<compile_context>
chip_gen: v7x
topology: tpu7x:2x2x1
jax: 0.10.0
libtpu: 0.0.40
codegen_flags: <defaults>
</compile_context>

<pallas_src>
import math

import jax
import jax.numpy as jnp
from jax.experimental import pallas as pl
from jax.experimental.pallas import tpu as pltpu

LN_EPS = 1e-5


# ----------------------------- in-kernel helpers -----------------------------

def _gelu(x):
    c = math.sqrt(2.0 / math.pi)
    return 0.5 * x * (1.0 + jnp.tanh(c * (x + 0.044715 * x * x * x)))


def _silu(x):
    return x * jax.nn.sigmoid(x)


def _softplus(x):
    # torch.nn.functional.softplus with threshold=20
    return jnp.where(x > 20.0, x, jnp.log(1.0 + jnp.exp(jnp.minimum(x, 20.0))))


def _layer_norm(x, g, b):
    mu = jnp.mean(x, axis=-1, keepdims=True)
    var = jnp.mean((x - mu) ** 2, axis=-1, keepdims=True)
    return (x - mu) * jax.lax.rsqrt(var + LN_EPS) * g + b


# ------------------------------- fused kernel --------------------------------

def gmb_kernel(dist_ref, feat_ref,
               m1g_ref, m1b_ref, m1w1_ref, m1b1_ref, m1w2_ref, m1b2_ref,
               lng_ref, lnb_ref,
               winxz_ref, convw_ref, convb_ref,
               wdbc_ref, bdt_ref, asm_ref, dskip_ref, wout_ref,
               m2w12_ref, m2b12_ref,
               out_ref):
    f32, bf16 = jnp.float32, jnp.bfloat16
    K, tn, N = dist_ref.shape                   # dist block: [K (flipped), tile_n, N]
    F = feat_ref.shape[1]
    Di = convb_ref.shape[1]                     # d_inner (= F, expand=1)
    DS = asm_ref.shape[1]                       # Di * d_state (flattened state width)
    ds = DS // Di                               # d_state
    d_conv = convw_ref.shape[0]
    R = K * tn                                  # time-major row count
    last = (K - 1) * tn                         # row offset of last flipped timestep (= original k=0)

    # ---- sumNodeFeatures, already flipped & time-major via the BlockSpec -------------
    # row t*tn + n  ==  sum_m dist_masks[node, K-1-t, m] * feats[m]
    dist2d = dist_ref[...].reshape(R, N)        # collapse leading dims (minor dim unchanged)
    agg_tm = jnp.dot(dist2d, feat_ref[...], preferred_element_type=f32)      # [R, F]

    # ---- MLP1 on the original k==0 slice (flipped t = K-1); only x_skip3[0] is used ---
    x0 = agg_tm[last:, :]                                                    # [tn, F]
    h = _layer_norm(x0, m1g_ref[...], m1b_ref[...])
    h = jnp.dot(h.astype(bf16), m1w1_ref[...], preferred_element_type=f32) + m1b1_ref[...]
    h = _gelu(h)
    h = jnp.dot(h.astype(bf16), m1w2_ref[...], preferred_element_type=f32) + m1b2_ref[...]
    skip1 = h + x0                                                           # x_skip3[0]

    # ---- pre-Mamba LayerNorm (per-row over F; flip order irrelevant) -----------------
    ln_tm = _layer_norm(agg_tm, lng_ref[...], lnb_ref[...])                  # [R, F]

    # ---- Mamba in_proj, x|z fused into one matmul -------------------------------------
    xz = jnp.dot(ln_tm.astype(bf16), winxz_ref[...], preferred_element_type=f32)  # [R, 2*Di]
    xin = xz[:, :Di]                                                         # [R, Di]
    z_last = xz[last:, Di:]                                                  # [tn, Di]

    # ---- depthwise causal conv (in flipped time) + SiLU, whole block at once ----------
    pad = jnp.zeros(((d_conv - 1) * tn, Di), f32)
    xin_pad = jnp.concatenate([pad, xin], axis=0)                            # [(K+dc-1)*tn, Di]
    cw = convw_ref[...]                                                      # [d_conv, Di]
    acc = xin_pad[0:R, :] * cw[0:1, :]
    for j in range(1, d_conv):
        acc = acc + xin_pad[j * tn:j * tn + R, :] * cw[j:j + 1, :]
    u_all = _silu(acc + convb_ref[...])                                      # [R, Di]
    u_bf = u_all.astype(bf16)

    # ---- x_proj (dt|B|C fused; dt_proj folded into the dt block) ----------------------
    dbc = jnp.dot(u_bf, wdbc_ref[...], preferred_element_type=f32)           # [R, Di+2*ds]
    delta = _softplus(dbc[:, :Di] + bdt_ref[...])                            # [R, Di]
    Bp = dbc[:, Di:Di + ds]                                                  # [R, ds]
    C_last = dbc[last:, Di + ds:]                                            # [tn, ds]

    # ---- expand to the flattened, lane-dense state layout (index = s*Di + c) ----------
    # delta/u replicate across s -> simple lane concatenation of ds copies.
    delta_rep = jnp.concatenate([delta] * ds, axis=1)                        # [R, DS]
    du_rep = jnp.concatenate([delta * u_all] * ds, axis=1)                   # [R, DS]
    # B replicates across channels -> ds single-lane broadcasts + one concat (no weights,
    # no MXU, exact f32).
    B_rep = jnp.concatenate(
        [jnp.broadcast_to(Bp[:, s:s + 1], (R, Di)) for s in range(ds)], axis=1)   # [R, DS]

    dA_all = jnp.exp(delta_rep * asm_ref[...])                               # [R, DS]
    dBu_all = du_rep * B_rep                                                 # [R, DS]

    # ---- selective-scan recurrence: only full-lane elementwise work in the loop -------
    state = jnp.zeros((tn, DS), f32)
    for t in range(K):
        lo = t * tn
        state = dA_all[lo:lo + tn, :] * state + dBu_all[lo:lo + tn, :]

    # ---- Mamba output at the last flipped timestep only -------------------------------
    C_rep = jnp.concatenate(
        [jnp.broadcast_to(C_last[:, s:s + 1], (tn, Di)) for s in range(ds)], axis=1)  # [tn, DS]
    g = state * C_rep
    y = g[:, 0:Di]
    for s in range(1, ds):                      # segment-sum over the d_state axis
        y = y + g[:, s * Di:(s + 1) * Di]                                    # [tn, Di]
    u_last = u_all[last:, :]
    y = y + u_last * dskip_ref[...]                                          # D skip
    y = y * _silu(z_last)                                                    # gate
    mamba_out = jnp.dot(y.astype(bf16), wout_ref[...], preferred_element_type=f32)  # [tn, F]

    # ---- MLP2 (full-glu, lin1|lin2 fused) + x_skip3[0] residual ------------------------
    gact = _gelu(mamba_out).astype(bf16)
    ab = jnp.dot(gact, m2w12_ref[...], preferred_element_type=f32) + m2b12_ref[...]  # [tn, 2F]
    out_ref[...] = ab[:, :F] * jax.nn.sigmoid(ab[:, F:]) + skip1


# ------------------------------ pallas_call glue ------------------------------

def gmb_layer_forward(node_x, dist_masks, graph_labels, params, *, tile_n=None):
    """local_model_type == 'None' branch of GMBLayer.forward (single graph)."""
    del graph_labels  # TODO(synk): multi-graph to_dense_batch not implemented.
    N, K, _ = dist_masks.shape
    F = node_x.shape[1]
    if tile_n is None:
        tile_n = N                      # grid=1: best on single-TC v5e/v6e and at toy sizes.
    assert N % tile_n == 0
    # For tile_n < N (v7x 2-core split at production sizes) keep tile_n a multiple of 16
    # so the in-kernel (K, tn, N) -> (K*tn, N) collapse stays a pure layout no-op for bf16.

    # One-time XLA transpose + flip of the mask (amortized over the whole kernel):
    # dist_flip[t, n, m] = dist_masks[n, K-1-t, m];  0/1 mask is lossless in bf16.
    dist_flip = jnp.flip(jnp.transpose(dist_masks, (1, 0, 2)), axis=0).astype(jnp.bfloat16)
    feats = node_x.astype(jnp.bfloat16)

    q = params
    weights = [q['m1_ln_g'], q['m1_ln_b'], q['m1_w1'], q['m1_b1'], q['m1_w2'], q['m1_b2'],
               q['ln_g'], q['ln_b'],
               q['w_in_xz'], q['conv_w'], q['conv_b'],
               q['w_dbc'], q['b_dt'], q['a_sm'], q['d_skip'], q['w_out'],
               q['m2_w12'], q['m2_b12']]

    in_specs = [pl.BlockSpec((K, tile_n, N), lambda i: (0, i, 0)),   # flipped masks, node tile
                pl.BlockSpec((N, F), lambda i: (0, 0))]              # all node features
    in_specs += [pl.BlockSpec(w.shape, lambda i: (0, 0)) for w in weights]

    return pl.pallas_call(
        gmb_kernel,
        out_shape=jax.ShapeDtypeStruct((N, F), jnp.float32),
        grid=(N // tile_n,),
        in_specs=in_specs,
        out_specs=pl.BlockSpec((tile_n, F), lambda i: (i, 0)),
        compiler_params=pltpu.CompilerParams(
            dimension_semantics=("parallel",),
            vmem_limit_bytes=32 * 1024 * 1024),
    )(dist_flip, feats, *weights)


# ------------------------------ parameter init --------------------------------

def init_params(key, F, Di, d_state, d_conv, dt_rank):
    """PyTorch-equivalent (f32) parameters."""
    ks = jax.random.split(key, 20)

    def lin(k, fan_in, shape):
        bound = 1.0 / math.sqrt(fan_in)
        return jax.random.uniform(k, shape, jnp.float32, -bound, bound)

    p = {}
    # MLP1 (LayerNorm + Linear(F,F) + Linear(F,F))
    p['mlp1_ln_g'] = jnp.ones((1, F), jnp.float32)
    p['mlp1_ln_b'] = jnp.zeros((1, F), jnp.float32)
    p['mlp1_w1'] = lin(ks[0], F, (F, F)); p['mlp1_b1'] = lin(ks[1], F, (1, F))
    p['mlp1_w2'] = lin(ks[2], F, (F, F)); p['mlp1_b2'] = lin(ks[3], F, (1, F))
    # GMBLayer.layer_norm (pre-Mamba)
    p['ln_g'] = jnp.ones((1, F), jnp.float32)
    p['ln_b'] = jnp.zeros((1, F), jnp.float32)
    # Mamba (d_model=F, d_inner=Di=F, d_state, d_conv, dt_rank)
    p['w_in_x'] = lin(ks[4], F, (F, Di))            # in_proj x half, stored [in, out]
    p['w_in_z'] = lin(ks[5], F, (F, Di))            # in_proj z half
    p['conv_w'] = lin(ks[6], d_conv, (d_conv, Di))  # depthwise conv, stored [tap, channel]
    p['conv_b'] = lin(ks[7], d_conv, (1, Di))
    p['w_x_dt'] = lin(ks[8], Di, (Di, dt_rank))
    p['w_x_B'] = lin(ks[9], Di, (Di, d_state))
    p['w_x_C'] = lin(ks[10], Di, (Di, d_state))
    dt_init_std = dt_rank ** -0.5
    p['w_dt'] = jax.random.uniform(ks[11], (dt_rank, Di), jnp.float32,
                                   -dt_init_std, dt_init_std)
    dt = jnp.exp(jax.random.uniform(ks[12], (1, Di), jnp.float32)
                 * (math.log(0.1) - math.log(0.001)) + math.log(0.001))
    dt = jnp.maximum(dt, 1e-4)
    p['b_dt'] = dt + jnp.log(-jnp.expm1(-dt))       # inverse softplus (Mamba dt_proj.bias init)
    p['A_log'] = jnp.log(jnp.tile(jnp.arange(1, d_state + 1, dtype=jnp.float32)[None, :],
                                  (Di, 1)))
    p['D'] = jnp.ones((1, Di), jnp.float32)
    p['w_out'] = lin(ks[13], Di, (Di, F))
    # MLP2 (full-glu: two Linear(F,F))
    p['mlp2_w1'] = lin(ks[14], F, (F, F)); p['mlp2_b1'] = lin(ks[15], F, (1, F))
    p['mlp2_w2'] = lin(ks[16], F, (F, F)); p['mlp2_b2'] = lin(ks[17], F, (1, F))
    return p


def prepare_params(p, *, d_state):
    """Exact linear rewrites + dtype casts for the fused kernel (done once, XLA side)."""
    bf = lambda a: a.astype(jnp.bfloat16)
    Di = p['w_in_x'].shape[1]
    q = {}
    q['m1_ln_g'], q['m1_ln_b'] = p['mlp1_ln_g'], p['mlp1_ln_b']
    q['m1_w1'], q['m1_b1'] = bf(p['mlp1_w1']), p['mlp1_b1']
    q['m1_w2'], q['m1_b2'] = bf(p['mlp1_w2']), p['mlp1_b2']
    q['ln_g'], q['ln_b'] = p['ln_g'], p['ln_b']
    # in_proj x|z fused along the output (lane) axis
    q['w_in_xz'] = bf(jnp.concatenate([p['w_in_x'], p['w_in_z']], axis=1))
    q['conv_w'], q['conv_b'] = p['conv_w'], p['conv_b']
    # x_proj dt|B|C fused; x_proj(dt) folded with dt_proj (rounding noted in tolerance budget)
    q['w_dbc'] = bf(jnp.concatenate(
        [p['w_x_dt'] @ p['w_dt'], p['w_x_B'], p['w_x_C']], axis=1))          # [Di, Di+2*ds]
    q['b_dt'] = p['b_dt']
    # A in the state-major flattened layout: a_sm[0, s*Di + c] = -exp(A_log)[c, s]
    q['a_sm'] = (-jnp.exp(p['A_log'])).T.reshape(1, d_state * Di)
    q['d_skip'] = p['D']
    q['w_out'] = bf(p['w_out'])
    # MLP2 lin1|lin2 fused along the output (lane) axis
    q['m2_w12'] = bf(jnp.concatenate([p['mlp2_w1'], p['mlp2_w2']], axis=1))
    q['m2_b12'] = jnp.concatenate([p['mlp2_b1'], p['mlp2_b2']], axis=1)
    return q


# ------------------------------------ main -------------------------------------

if __name__ == "__main__":
    N, F, K = 16, 32, 8          # nodes, dim_hidden, num distance masks (seq len)
    d_state, d_conv = 16, 4
    dt_rank = math.ceil(F / 16)  # Mamba default dt_rank
    Di = F                       # expand = 1

    key = jax.random.PRNGKey(0)
    kx, kd, kp = jax.random.split(key, 3)
    node_x = jax.random.normal(kx, (N, F), jnp.float32)                         # batch.x
    dist_masks = (jax.random.uniform(kd, (N, K, N)) < 0.3).astype(jnp.float32)  # dist_masks
    graph_labels = jnp.zeros((N,), jnp.int32)                                   # batch.batch (1 graph)

    raw = init_params(kp, F, Di, d_state, d_conv, dt_rank)
    params = prepare_params(raw, d_state=d_state)

    # grid = 1 (tile_n = N): single step, whole output slab written once.
    out = gmb_layer_forward(node_x, dist_masks, graph_labels, params)
    out = jax.block_until_ready(out)
    assert out.shape == (N, F) and out.dtype == jnp.float32
    assert bool(jnp.all(jnp.isfinite(out)))
    print("KERNEL_OK")
</pallas_src>

<mosaic_0001>
module attributes {stable_mosaic.version = 11 : i64} {
  func.func @gmb_kernel(%arg0: i32, %arg1: memref<8x16x16xbf16, #tpu.memory_space<vmem>>, %arg2: memref<16x32xbf16, #tpu.memory_space<vmem>>, %arg3: memref<1x32xf32, #tpu.memory_space<vmem>>, %arg4: memref<1x32xf32, #tpu.memory_space<vmem>>, %arg5: memref<32x32xbf16, #tpu.memory_space<vmem>>, %arg6: memref<1x32xf32, #tpu.memory_space<vmem>>, %arg7: memref<32x32xbf16, #tpu.memory_space<vmem>>, %arg8: memref<1x32xf32, #tpu.memory_space<vmem>>, %arg9: memref<1x32xf32, #tpu.memory_space<vmem>>, %arg10: memref<1x32xf32, #tpu.memory_space<vmem>>, %arg11: memref<32x64xbf16, #tpu.memory_space<vmem>>, %arg12: memref<4x32xf32, #tpu.memory_space<vmem>>, %arg13: memref<1x32xf32, #tpu.memory_space<vmem>>, %arg14: memref<32x64xbf16, #tpu.memory_space<vmem>>, %arg15: memref<1x32xf32, #tpu.memory_space<vmem>>, %arg16: memref<1x512xf32, #tpu.memory_space<vmem>>, %arg17: memref<1x32xf32, #tpu.memory_space<vmem>>, %arg18: memref<32x32xbf16, #tpu.memory_space<vmem>>, %arg19: memref<32x64xbf16, #tpu.memory_space<vmem>>, %arg20: memref<1x64xf32, #tpu.memory_space<vmem>>, %arg21: memref<16x32xf32, #tpu.memory_space<vmem>>) attributes {dimension_semantics = [#tpu.dimension_semantics<parallel>], iteration_bounds = array<i64: 1>, scalar_prefetch = 0 : i64, scratch_operands = 0 : i64, tpu.core_type = #tpu.core_type<tc>, window_params = [{transform_indices = @transform_0, window_bounds = array<i64: 8, 16, 16>}, {pipeline_mode = #tpu.pipeline_mode<synchronous>, transform_indices = @transform_1, window_bounds = array<i64: 16, 32>}, {pipeline_mode = #tpu.pipeline_mode<synchronous>, transform_indices = @transform_2, window_bounds = array<i64: 1, 32>}, {pipeline_mode = #tpu.pipeline_mode<synchronous>, transform_indices = @transform_3, window_bounds = array<i64: 1, 32>}, {pipeline_mode = #tpu.pipeline_mode<synchronous>, transform_indices = @transform_4, window_bounds = array<i64: 32, 32>}, {pipeline_mode = #tpu.pipeline_mode<synchronous>, transform_indices = @transform_5, window_bounds = array<i64: 1, 32>}, {pipeline_mode = #tpu.pipeline_mode<synchronous>, transform_indices = @transform_6, window_bounds = array<i64: 32, 32>}, {pipeline_mode = #tpu.pipeline_mode<synchronous>, transform_indices = @transform_7, window_bounds = array<i64: 1, 32>}, {pipeline_mode = #tpu.pipeline_mode<synchronous>, transform_indices = @transform_8, window_bounds = array<i64: 1, 32>}, {pipeline_mode = #tpu.pipeline_mode<synchronous>, transform_indices = @transform_9, window_bounds = array<i64: 1, 32>}, {pipeline_mode = #tpu.pipeline_mode<synchronous>, transform_indices = @transform_10, window_bounds = array<i64: 32, 64>}, {pipeline_mode = #tpu.pipeline_mode<synchronous>, transform_indices = @transform_11, window_bounds = array<i64: 4, 32>}, {pipeline_mode = #tpu.pipeline_mode<synchronous>, transform_indices = @transform_12, window_bounds = array<i64: 1, 32>}, {pipeline_mode = #tpu.pipeline_mode<synchronous>, transform_indices = @transform_13, window_bounds = array<i64: 32, 64>}, {pipeline_mode = #tpu.pipeline_mode<synchronous>, transform_indices = @transform_14, window_bounds = array<i64: 1, 32>}, {pipeline_mode = #tpu.pipeline_mode<synchronous>, transform_indices = @transform_15, window_bounds = array<i64: 1, 512>}, {pipeline_mode = #tpu.pipeline_mode<synchronous>, transform_indices = @transform_16, window_bounds = array<i64: 1, 32>}, {pipeline_mode = #tpu.pipeline_mode<synchronous>, transform_indices = @transform_17, window_bounds = array<i64: 32, 32>}, {pipeline_mode = #tpu.pipeline_mode<synchronous>, transform_indices = @transform_18, window_bounds = array<i64: 32, 64>}, {pipeline_mode = #tpu.pipeline_mode<synchronous>, transform_indices = @transform_19, window_bounds = array<i64: 1, 64>}, {transform_indices = @transform_20, window_bounds = array<i64: 16, 32>}]} {
    %c0 = arith.constant 0 : index
    %c0_0 = arith.constant 0 : index
    %c0_1 = arith.constant 0 : index
    %0 = vector.load %arg1[%c0, %c0_0, %c0_1] : memref<8x16x16xbf16, #tpu.memory_space<vmem>>, vector<8x16x16xbf16>
    %1 = vector.shape_cast %0 : vector<8x16x16xbf16> to vector<128x16xbf16>
    %c0_2 = arith.constant 0 : index
    %c0_3 = arith.constant 0 : index
    %2 = vector.load %arg2[%c0_2, %c0_3] : memref<16x32xbf16, #tpu.memory_space<vmem>>, vector<16x32xbf16>
    %cst = arith.constant dense<0.000000e+00> : vector<128x32xf32>
    %3 = tpu.matmul %1, %2, %cst {dimension_numbers = #tpu.dot_dimension_numbers<[1], [0], [0], [1], [0, 0, 1, 1], [], []>} : vector<128x16xbf16>, vector<16x32xbf16>, vector<128x32xf32> -> vector<128x32xf32>
    %4 = vector.extract_strided_slice %3 {offsets = [112, 0], sizes = [16, 32], strides = [1, 1]} : vector<128x32xf32> to vector<16x32xf32>
    %c0_4 = arith.constant 0 : index
    %c0_5 = arith.constant 0 : index
    %5 = vector.load %arg3[%c0_4, %c0_5] : memref<1x32xf32, #tpu.memory_space<vmem>>, vector<1x32xf32>
    %c0_6 = arith.constant 0 : index
    %c0_7 = arith.constant 0 : index
    %6 = vector.load %arg4[%c0_6, %c0_7] : memref<1x32xf32, #tpu.memory_space<vmem>>, vector<1x32xf32>
    %cst_8 = arith.constant dense<0.000000e+00> : vector<16xf32>
    %7 = vector.multi_reduction <add>, %4, %cst_8 [1] : vector<16x32xf32> to vector<16xf32>
    %8 = vector.shape_cast %7 : vector<16xf32> to vector<16x1xf32>
    %cst_9 = arith.constant 3.200000e+01 : f32
    %9 = vector.broadcast %cst_9 : f32 to vector<16x1xf32>
    %10 = arith.divf %8, %9 : vector<16x1xf32>
    %11 = vector.broadcast %10 : vector<16x1xf32> to vector<16x32xf32>
    %12 = arith.subf %4, %11 : vector<16x32xf32>
    %13 = arith.mulf %12, %12 : vector<16x32xf32>
    %cst_10 = arith.constant dense<0.000000e+00> : vector<16xf32>
    %14 = vector.multi_reduction <add>, %13, %cst_10 [1] : vector<16x32xf32> to vector<16xf32>
    %15 = vector.shape_cast %14 : vector<16xf32> to vector<16x1xf32>
    %cst_11 = arith.constant 3.200000e+01 : f32
    %16 = vector.broadcast %cst_11 : f32 to vector<16x1xf32>
    %17 = arith.divf %15, %16 : vector<16x1xf32>
    %18 = vector.broadcast %10 : vector<16x1xf32> to vector<16x32xf32>
    %19 = arith.subf %4, %18 : vector<16x32xf32>
    %cst_12 = arith.constant 9.99999974E-6 : f32
    %20 = vector.broadcast %cst_12 : f32 to vector<16x1xf32>
    %21 = arith.addf %17, %20 : vector<16x1xf32>
    %22 = math.rsqrt %21 : vector<16x1xf32>
    %23 = vector.broadcast %22 : vector<16x1xf32> to vector<16x32xf32>
    %24 = arith.mulf %19, %23 : vector<16x32xf32>
    %25 = vector.broadcast %5 : vector<1x32xf32> to vector<16x32xf32>
    %26 = arith.mulf %24, %25 : vector<16x32xf32>
    %27 = vector.broadcast %6 : vector<1x32xf32> to vector<16x32xf32>
    %28 = arith.addf %26, %27 : vector<16x32xf32>
    %29 = arith.truncf %28 : vector<16x32xf32> to vector<16x32xbf16>
    %c0_13 = arith.constant 0 : index
    %c0_14 = arith.constant 0 : index
    %30 = vector.load %arg5[%c0_13, %c0_14] : memref<32x32xbf16, #tpu.memory_space<vmem>>, vector<32x32xbf16>
    %cst_15 = arith.constant dense<0.000000e+00> : vector<16x32xf32>
    %31 = tpu.matmul %29, %30, %cst_15 {dimension_numbers = #tpu.dot_dimension_numbers<[1], [0], [0], [1], [0, 0, 1, 1], [], []>} : vector<16x32xbf16>, vector<32x32xbf16>, vector<16x32xf32> -> vector<16x32xf32>
    %c0_16 = arith.constant 0 : index
    %c0_17 = arith.constant 0 : index
    %32 = vector.load %arg6[%c0_16, %c0_17] : memref<1x32xf32, #tpu.memory_space<vmem>>, vector<1x32xf32>
    %33 = vector.broadcast %32 : vector<1x32xf32> to vector<16x32xf32>
    %34 = arith.addf %31, %33 : vector<16x32xf32>
    %cst_18 = arith.constant 5.000000e-01 : f32
    %35 = vector.broadcast %cst_18 : f32 to vector<16x32xf32>
    %36 = arith.mulf %35, %34 : vector<16x32xf32>
    %cst_19 = arith.constant 4.471500e-02 : f32
    %37 = vector.broadcast %cst_19 : f32 to vector<16x32xf32>
    %38 = arith.mulf %37, %34 : vector<16x32xf32>
    %39 = arith.mulf %38, %34 : vector<16x32xf32>
    %40 = arith.mulf %39, %34 : vector<16x32xf32>
    %41 = arith.addf %34, %40 : vector<16x32xf32>
    %cst_20 = arith.constant 0.797884583 : f32
    %42 = vector.broadcast %cst_20 : f32 to vector<16x32xf32>
    %43 = arith.mulf %42, %41 : vector<16x32xf32>
    %44 = math.tanh %43 : vector<16x32xf32>
    %cst_21 = arith.constant 1.000000e+00 : f32
    %45 = vector.broadcast %cst_21 : f32 to vector<16x32xf32>
    %46 = arith.addf %45, %44 : vector<16x32xf32>
    %47 = arith.mulf %36, %46 : vector<16x32xf32>
    %48 = arith.truncf %47 : vector<16x32xf32> to vector<16x32xbf16>
    %c0_22 = arith.constant 0 : index
    %c0_23 = arith.constant 0 : index
    %49 = vector.load %arg7[%c0_22, %c0_23] : memref<32x32xbf16, #tpu.memory_space<vmem>>, vector<32x32xbf16>
    %cst_24 = arith.constant dense<0.000000e+00> : vector<16x32xf32>
    %50 = tpu.matmul %48, %49, %cst_24 {dimension_numbers = #tpu.dot_dimension_numbers<[1], [0], [0], [1], [0, 0, 1, 1], [], []>} : vector<16x32xbf16>, vector<32x32xbf16>, vector<16x32xf32> -> vector<16x32xf32>
    %c0_25 = arith.constant 0 : index
    %c0_26 = arith.constant 0 : index
    %51 = vector.load %arg8[%c0_25, %c0_26] : memref<1x32xf32, #tpu.memory_space<vmem>>, vector<1x32xf32>
    %52 = vector.broadcast %51 : vector<1x32xf32> to vector<16x32xf32>
    %53 = arith.addf %50, %52 : vector<16x32xf32>
    %54 = arith.addf %53, %4 : vector<16x32xf32>
    %c0_27 = arith.constant 0 : index
    %c0_28 = arith.constant 0 : index
    %55 = vector.load %arg9[%c0_27, %c0_28] : memref<1x32xf32, #tpu.memory_space<vmem>>, vector<1x32xf32>
    %c0_29 = arith.constant 0 : index
    %c0_30 = arith.constant 0 : index
    %56 = vector.load %arg10[%c0_29, %c0_30] : memref<1x32xf32, #tpu.memory_space<vmem>>, vector<1x32xf32>
    %cst_31 = arith.constant dense<0.000000e+00> : vector<128xf32>
    %57 = vector.multi_reduction <add>, %3, %cst_31 [1] : vector<128x32xf32> to vector<128xf32>
    %58 = vector.shape_cast %57 : vector<128xf32> to vector<128x1xf32>
    %cst_32 = arith.constant 3.200000e+01 : f32
    %59 = vector.broadcast %cst_32 : f32 to vector<128x1xf32>
    %60 = arith.divf %58, %59 : vector<128x1xf32>
    %61 = vector.broadcast %60 : vector<128x1xf32> to vector<128x32xf32>
    %62 = arith.subf %3, %61 : vector<128x32xf32>
    %63 = arith.mulf %62, %62 : vector<128x32xf32>
    %cst_33 = arith.constant dense<0.000000e+00> : vector<128xf32>
    %64 = vector.multi_reduction <add>, %63, %cst_33 [1] : vector<128x32xf32> to vector<128xf32>
    %65 = vector.shape_cast %64 : vector<128xf32> to vector<128x1xf32>
    %cst_34 = arith.constant 3.200000e+01 : f32
    %66 = vector.broadcast %cst_34 : f32 to vector<128x1xf32>
    %67 = arith.divf %65, %66 : vector<128x1xf32>
    %68 = vector.broadcast %60 : vector<128x1xf32> to vector<128x32xf32>
    %69 = arith.subf %3, %68 : vector<128x32xf32>
    %cst_35 = arith.constant 9.99999974E-6 : f32
    %70 = vector.broadcast %cst_35 : f32 to vector<128x1xf32>
    %71 = arith.addf %67, %70 : vector<128x1xf32>
    %72 = math.rsqrt %71 : vector<128x1xf32>
    %73 = vector.broadcast %72 : vector<128x1xf32> to vector<128x32xf32>
    %74 = arith.mulf %69, %73 : vector<128x32xf32>
    %75 = vector.broadcast %55 : vector<1x32xf32> to vector<128x32xf32>
    %76 = arith.mulf %74, %75 : vector<128x32xf32>
    %77 = vector.broadcast %56 : vector<1x32xf32> to vector<128x32xf32>
    %78 = arith.addf %76, %77 : vector<128x32xf32>
    %79 = arith.truncf %78 : vector<128x32xf32> to vector<128x32xbf16>
    %c0_36 = arith.constant 0 : index
    %c0_37 = arith.constant 0 : index
    %80 = vector.load %arg11[%c0_36, %c0_37] : memref<32x64xbf16, #tpu.memory_space<vmem>>, vector<32x64xbf16>
    %cst_38 = arith.constant dense<0.000000e+00> : vector<128x64xf32>
    %81 = tpu.matmul %79, %80, %cst_38 {dimension_numbers = #tpu.dot_dimension_numbers<[1], [0], [0], [1], [0, 0, 1, 1], [], []>} : vector<128x32xbf16>, vector<32x64xbf16>, vector<128x64xf32> -> vector<128x64xf32>
    %82 = vector.extract_strided_slice %81 {offsets = [0, 0], sizes = [128, 32], strides = [1, 1]} : vector<128x64xf32> to vector<128x32xf32>
    %83 = vector.extract_strided_slice %81 {offsets = [112, 32], sizes = [16, 32], strides = [1, 1]} : vector<128x64xf32> to vector<16x32xf32>
    %cst_39 = arith.constant 0.000000e+00 : f32
    %84 = vector.broadcast %cst_39 : f32 to vector<48x32xf32>
    %85 = tpu.concatenate %84, %82 in 0 : vector<48x32xf32>, vector<128x32xf32> -> vector<176x32xf32>
    %c0_40 = arith.constant 0 : index
    %c0_41 = arith.constant 0 : index
    %86 = vector.load %arg12[%c0_40, %c0_41] : memref<4x32xf32, #tpu.memory_space<vmem>>, vector<4x32xf32>
    %87 = vector.extract_strided_slice %85 {offsets = [0, 0], sizes = [128, 32], strides = [1, 1]} : vector<176x32xf32> to vector<128x32xf32>
    %88 = vector.extract_strided_slice %86 {offsets = [0, 0], sizes = [1, 32], strides = [1, 1]} : vector<4x32xf32> to vector<1x32xf32>
    %89 = vector.broadcast %88 : vector<1x32xf32> to vector<128x32xf32>
    %90 = arith.mulf %87, %89 : vector<128x32xf32>
    %91 = vector.extract_strided_slice %85 {offsets = [16, 0], sizes = [128, 32], strides = [1, 1]} : vector<176x32xf32> to vector<128x32xf32>
    %92 = vector.extract_strided_slice %86 {offsets = [1, 0], sizes = [1, 32], strides = [1, 1]} : vector<4x32xf32> to vector<1x32xf32>
    %93 = vector.broadcast %92 : vector<1x32xf32> to vector<128x32xf32>
    %94 = arith.mulf %91, %93 : vector<128x32xf32>
    %95 = arith.addf %90, %94 : vector<128x32xf32>
    %96 = vector.extract_strided_slice %85 {offsets = [32, 0], sizes = [128, 32], strides = [1, 1]} : vector<176x32xf32> to vector<128x32xf32>
    %97 = vector.extract_strided_slice %86 {offsets = [2, 0], sizes = [1, 32], strides = [1, 1]} : vector<4x32xf32> to vector<1x32xf32>
    %98 = vector.broadcast %97 : vector<1x32xf32> to vector<128x32xf32>
    %99 = arith.mulf %96, %98 : vector<128x32xf32>
    %100 = arith.addf %95, %99 : vector<128x32xf32>
    %101 = vector.extract_strided_slice %85 {offsets = [48, 0], sizes = [128, 32], strides = [1, 1]} : vector<176x32xf32> to vector<128x32xf32>
    %102 = vector.extract_strided_slice %86 {offsets = [3, 0], sizes = [1, 32], strides = [1, 1]} : vector<4x32xf32> to vector<1x32xf32>
    %103 = vector.broadcast %102 : vector<1x32xf32> to vector<128x32xf32>
    %104 = arith.mulf %101, %103 : vector<128x32xf32>
    %105 = arith.addf %100, %104 : vector<128x32xf32>
    %c0_42 = arith.constant 0 : index
    %c0_43 = arith.constant 0 : index
    %106 = vector.load %arg13[%c0_42, %c0_43] : memref<1x32xf32, #tpu.memory_space<vmem>>, vector<1x32xf32>
    %107 = vector.broadcast %106 : vector<1x32xf32> to vector<128x32xf32>
    %108 = arith.addf %105, %107 : vector<128x32xf32>
    %109 = arith.negf %108 : vector<128x32xf32>
    %110 = math.exp %109 : vector<128x32xf32>
    %cst_44 = arith.constant 1.000000e+00 : f32
    %111 = vector.broadcast %cst_44 : f32 to vector<128x32xf32>
    %112 = arith.addf %111, %110 : vector<128x32xf32>
    %113 = arith.divf %111, %112 : vector<128x32xf32>
    %114 = arith.mulf %108, %113 : vector<128x32xf32>
    %115 = arith.truncf %114 : vector<128x32xf32> to vector<128x32xbf16>
    %c0_45 = arith.constant 0 : index
    %c0_46 = arith.constant 0 : index
    %116 = vector.load %arg14[%c0_45, %c0_46] : memref<32x64xbf16, #tpu.memory_space<vmem>>, vector<32x64xbf16>
    %cst_47 = arith.constant dense<0.000000e+00> : vector<128x64xf32>
    %117 = tpu.matmul %115, %116, %cst_47 {dimension_numbers = #tpu.dot_dimension_numbers<[1], [0], [0], [1], [0, 0, 1, 1], [], []>} : vector<128x32xbf16>, vector<32x64xbf16>, vector<128x64xf32> -> vector<128x64xf32>
    %118 = vector.extract_strided_slice %117 {offsets = [0, 0], sizes = [128, 32], strides = [1, 1]} : vector<128x64xf32> to vector<128x32xf32>
    %c0_48 = arith.constant 0 : index
    %c0_49 = arith.constant 0 : index
    %119 = vector.load %arg15[%c0_48, %c0_49] : memref<1x32xf32, #tpu.memory_space<vmem>>, vector<1x32xf32>
    %120 = vector.broadcast %119 : vector<1x32xf32> to vector<128x32xf32>
    %121 = arith.addf %118, %120 : vector<128x32xf32>
    %cst_50 = arith.constant 2.000000e+01 : f32
    %122 = vector.broadcast %cst_50 : f32 to vector<128x32xf32>
    %123 = arith.cmpf ogt, %121, %122 : vector<128x32xf32>
    %cst_51 = arith.constant 2.000000e+01 : f32
    %124 = vector.broadcast %cst_51 : f32 to vector<128x32xf32>
    %125 = arith.minimumf %121, %124 : vector<128x32xf32>
    %126 = math.exp %125 : vector<128x32xf32>
    %cst_52 = arith.constant 1.000000e+00 : f32
    %127 = vector.broadcast %cst_52 : f32 to vector<128x32xf32>
    %128 = arith.addf %127, %126 : vector<128x32xf32>
    %129 = math.log %128 : vector<128x32xf32>
    %130 = arith.select %123, %121, %129 : vector<128x32xi1>, vector<128x32xf32>
    %131 = vector.extract_strided_slice %117 {offsets = [0, 32], sizes = [128, 16], strides = [1, 1]} : vector<128x64xf32> to vector<128x16xf32>
    %132 = vector.extract_strided_slice %117 {offsets = [112, 48], sizes = [16, 16], strides = [1, 1]} : vector<128x64xf32> to vector<16x16xf32>
    %133 = tpu.concatenate %130, %130, %130, %130, %130, %130, %130, %130, %130, %130, %130, %130, %130, %130, %130, %130 in 1 : vector<128x32xf32>, vector<128x32xf32>, vector<128x32xf32>, vector<128x32xf32>, vector<128x32xf32>, vector<128x32xf32>, vector<128x32xf32>, vector<128x32xf32>, vector<128x32xf32>, vector<128x32xf32>, vector<128x32xf32>, vector<128x32xf32>, vector<128x32xf32>, vector<128x32xf32>, vector<128x32xf32>, vector<128x32xf32> -> vector<128x512xf32>
    %134 = arith.mulf %130, %114 : vector<128x32xf32>
    %135 = tpu.concatenate %134, %134, %134, %134, %134, %134, %134, %134, %134, %134, %134, %134, %134, %134, %134, %134 in 1 : vector<128x32xf32>, vector<128x32xf32>, vector<128x32xf32>, vector<128x32xf32>, vector<128x32xf32>, vector<128x32xf32>, vector<128x32xf32>, vector<128x32xf32>, vector<128x32xf32>, vector<128x32xf32>, vector<128x32xf32>, vector<128x32xf32>, vector<128x32xf32>, vector<128x32xf32>, vector<128x32xf32>, vector<128x32xf32> -> vector<128x512xf32>
    %136 = vector.extract_strided_slice %131 {offsets = [0, 0], sizes = [128, 1], strides = [1, 1]} : vector<128x16xf32> to vector<128x1xf32>
    %137 = vector.shape_cast %136 : vector<128x1xf32> to vector<128x1xf32>
    %138 = vector.broadcast %137 : vector<128x1xf32> to vector<128x32xf32>
    %139 = vector.extract_strided_slice %131 {offsets = [0, 1], sizes = [128, 1], strides = [1, 1]} : vector<128x16xf32> to vector<128x1xf32>
    %140 = vector.shape_cast %139 : vector<128x1xf32> to vector<128x1xf32>
    %141 = vector.broadcast %140 : vector<128x1xf32> to vector<128x32xf32>
    %142 = vector.extract_strided_slice %131 {offsets = [0, 2], sizes = [128, 1], strides = [1, 1]} : vector<128x16xf32> to vector<128x1xf32>
    %143 = vector.shape_cast %142 : vector<128x1xf32> to vector<128x1xf32>
    %144 = vector.broadcast %143 : vector<128x1xf32> to vector<128x32xf32>
    %145 = vector.extract_strided_slice %131 {offsets = [0, 3], sizes = [128, 1], strides = [1, 1]} : vector<128x16xf32> to vector<128x1xf32>
    %146 = vector.shape_cast %145 : vector<128x1xf32> to vector<128x1xf32>
    %147 = vector.broadcast %146 : vector<128x1xf32> to vector<128x32xf32>
    %148 = vector.extract_strided_slice %131 {offsets = [0, 4], sizes = [128, 1], strides = [1, 1]} : vector<128x16xf32> to vector<128x1xf32>
    %149 = vector.shape_cast %148 : vector<128x1xf32> to vector<128x1xf32>
    %150 = vector.broadcast %149 : vector<128x1xf32> to vector<128x32xf32>
    %151 = vector.extract_strided_slice %131 {offsets = [0, 5], sizes = [128, 1], strides = [1, 1]} : vector<128x16xf32> to vector<128x1xf32>
    %152 = vector.shape_cast %151 : vector<128x1xf32> to vector<128x1xf32>
    %153 = vector.broadcast %152 : vector<128x1xf32> to vector<128x32xf32>
    %154 = vector.extract_strided_slice %131 {offsets = [0, 6], sizes = [128, 1], strides = [1, 1]} : vector<128x16xf32> to vector<128x1xf32>
    %155 = vector.shape_cast %154 : vector<128x1xf32> to vector<128x1xf32>
    %156 = vector.broadcast %155 : vector<128x1xf32> to vector<128x32xf32>
    %157 = vector.extract_strided_slice %131 {offsets = [0, 7], sizes = [128, 1], strides = [1, 1]} : vector<128x16xf32> to vector<128x1xf32>
    %158 = vector.shape_cast %157 : vector<128x1xf32> to vector<128x1xf32>
    %159 = vector.broadcast %158 : vector<128x1xf32> to vector<128x32xf32>
    %160 = vector.extract_strided_slice %131 {offsets = [0, 8], sizes = [128, 1], strides = [1, 1]} : vector<128x16xf32> to vector<128x1xf32>
    %161 = vector.shape_cast %160 : vector<128x1xf32> to vector<128x1xf32>
    %162 = vector.broadcast %161 : vector<128x1xf32> to vector<128x32xf32>
    %163 = vector.extract_strided_slice %131 {offsets = [0, 9], sizes = [128, 1], strides = [1, 1]} : vector<128x16xf32> to vector<128x1xf32>
    %164 = vector.shape_cast %163 : vector<128x1xf32> to vector<128x1xf32>
    %165 = vector.broadcast %164 : vector<128x1xf32> to vector<128x32xf32>
    %166 = vector.extract_strided_slice %131 {offsets = [0, 10], sizes = [128, 1], strides = [1, 1]} : vector<128x16xf32> to vector<128x1xf32>
    %167 = vector.shape_cast %166 : vector<128x1xf32> to vector<128x1xf32>
    %168 = vector.broadcast %167 : vector<128x1xf32> to vector<128x32xf32>
    %169 = vector.extract_strided_slice %131 {offsets = [0, 11], sizes = [128, 1], strides = [1, 1]} : vector<128x16xf32> to vector<128x1xf32>
    %170 = vector.shape_cast %169 : vector<128x1xf32> to vector<128x1xf32>
    %171 = vector.broadcast %170 : vector<128x1xf32> to vector<128x32xf32>
    %172 = vector.extract_strided_slice %131 {offsets = [0, 12], sizes = [128, 1], strides = [1, 1]} : vector<128x16xf32> to vector<128x1xf32>
    %173 = vector.shape_cast %172 : vector<128x1xf32> to vector<128x1xf32>
    %174 = vector.broadcast %173 : vector<128x1xf32> to vector<128x32xf32>
    %175 = vector.extract_strided_slice %131 {offsets = [0, 13], sizes = [128, 1], strides = [1, 1]} : vector<128x16xf32> to vector<128x1xf32>
    %176 = vector.shape_cast %175 : vector<128x1xf32> to vector<128x1xf32>
    %177 = vector.broadcast %176 : vector<128x1xf32> to vector<128x32xf32>
    %178 = vector.extract_strided_slice %131 {offsets = [0, 14], sizes = [128, 1], strides = [1, 1]} : vector<128x16xf32> to vector<128x1xf32>
    %179 = vector.shape_cast %178 : vector<128x1xf32> to vector<128x1xf32>
    %180 = vector.broadcast %179 : vector<128x1xf32> to vector<128x32xf32>
    %181 = vector.extract_strided_slice %131 {offsets = [0, 15], sizes = [128, 1], strides = [1, 1]} : vector<128x16xf32> to vector<128x1xf32>
    %182 = vector.shape_cast %181 : vector<128x1xf32> to vector<128x1xf32>
    %183 = vector.broadcast %182 : vector<128x1xf32> to vector<128x32xf32>
    %184 = tpu.concatenate %138, %141, %144, %147, %150, %153, %156, %159, %162, %165, %168, %171, %174, %177, %180, %183 in 1 : vector<128x32xf32>, vector<128x32xf32>, vector<128x32xf32>, vector<128x32xf32>, vector<128x32xf32>, vector<128x32xf32>, vector<128x32xf32>, vector<128x32xf32>, vector<128x32xf32>, vector<128x32xf32>, vector<128x32xf32>, vector<128x32xf32>, vector<128x32xf32>, vector<128x32xf32>, vector<128x32xf32>, vector<128x32xf32> -> vector<128x512xf32>
    %c0_53 = arith.constant 0 : index
    %c0_54 = arith.constant 0 : index
    %185 = vector.load %arg16[%c0_53, %c0_54] : memref<1x512xf32, #tpu.memory_space<vmem>>, vector<1x512xf32>
    %186 = vector.broadcast %185 : vector<1x512xf32> to vector<128x512xf32>
    %187 = arith.mulf %133, %186 : vector<128x512xf32>
    %188 = math.exp %187 : vector<128x512xf32>
    %189 = arith.mulf %135, %184 : vector<128x512xf32>
    %cst_55 = arith.constant 0.000000e+00 : f32
    %190 = vector.broadcast %cst_55 : f32 to vector<16x512xf32>
    %191 = vector.extract_strided_slice %188 {offsets = [0, 0], sizes = [16, 512], strides = [1, 1]} : vector<128x512xf32> to vector<16x512xf32>
    %192 = arith.mulf %191, %190 : vector<16x512xf32>
    %193 = vector.extract_strided_slice %189 {offsets = [0, 0], sizes = [16, 512], strides = [1, 1]} : vector<128x512xf32> to vector<16x512xf32>
    %194 = arith.addf %192, %193 : vector<16x512xf32>
    %195 = vector.extract_strided_slice %188 {offsets = [16, 0], sizes = [16, 512], strides = [1, 1]} : vector<128x512xf32> to vector<16x512xf32>
    %196 = arith.mulf %195, %194 : vector<16x512xf32>
    %197 = vector.extract_strided_slice %189 {offsets = [16, 0], sizes = [16, 512], strides = [1, 1]} : vector<128x512xf32> to vector<16x512xf32>
    %198 = arith.addf %196, %197 : vector<16x512xf32>
    %199 = vector.extract_strided_slice %188 {offsets = [32, 0], sizes = [16, 512], strides = [1, 1]} : vector<128x512xf32> to vector<16x512xf32>
    %200 = arith.mulf %199, %198 : vector<16x512xf32>
    %201 = vector.extract_strided_slice %189 {offsets = [32, 0], sizes = [16, 512], strides = [1, 1]} : vector<128x512xf32> to vector<16x512xf32>
    %202 = arith.addf %200, %201 : vector<16x512xf32>
    %203 = vector.extract_strided_slice %188 {offsets = [48, 0], sizes = [16, 512], strides = [1, 1]} : vector<128x512xf32> to vector<16x512xf32>
    %204 = arith.mulf %203, %202 : vector<16x512xf32>
    %205 = vector.extract_strided_slice %189 {offsets = [48, 0], sizes = [16, 512], strides = [1, 1]} : vector<128x512xf32> to vector<16x512xf32>
    %206 = arith.addf %204, %205 : vector<16x512xf32>
    %207 = vector.extract_strided_slice %188 {offsets = [64, 0], sizes = [16, 512], strides = [1, 1]} : vector<128x512xf32> to vector<16x512xf32>
    %208 = arith.mulf %207, %206 : vector<16x512xf32>
    %209 = vector.extract_strided_slice %189 {offsets = [64, 0], sizes = [16, 512], strides = [1, 1]} : vector<128x512xf32> to vector<16x512xf32>
    %210 = arith.addf %208, %209 : vector<16x512xf32>
    %211 = vector.extract_strided_slice %188 {offsets = [80, 0], sizes = [16, 512], strides = [1, 1]} : vector<128x512xf32> to vector<16x512xf32>
    %212 = arith.mulf %211, %210 : vector<16x512xf32>
    %213 = vector.extract_strided_slice %189 {offsets = [80, 0], sizes = [16, 512], strides = [1, 1]} : vector<128x512xf32> to vector<16x512xf32>
    %214 = arith.addf %212, %213 : vector<16x512xf32>
    %215 = vector.extract_strided_slice %188 {offsets = [96, 0], sizes = [16, 512], strides = [1, 1]} : vector<128x512xf32> to vector<16x512xf32>
    %216 = arith.mulf %215, %214 : vector<16x512xf32>
    %217 = vector.extract_strided_slice %189 {offsets = [96, 0], sizes = [16, 512], strides = [1, 1]} : vector<128x512xf32> to vector<16x512xf32>
    %218 = arith.addf %216, %217 : vector<16x512xf32>
    %219 = vector.extract_strided_slice %188 {offsets = [112, 0], sizes = [16, 512], strides = [1, 1]} : vector<128x512xf32> to vector<16x512xf32>
    %220 = arith.mulf %219, %218 : vector<16x512xf32>
    %221 = vector.extract_strided_slice %189 {offsets = [112, 0], sizes = [16, 512], strides = [1, 1]} : vector<128x512xf32> to vector<16x512xf32>
    %222 = arith.addf %220, %221 : vector<16x512xf32>
    %223 = vector.extract_strided_slice %132 {offsets = [0, 0], sizes = [16, 1], strides = [1, 1]} : vector<16x16xf32> to vector<16x1xf32>
    %224 = vector.shape_cast %223 : vector<16x1xf32> to vector<16x1xf32>
    %225 = vector.broadcast %224 : vector<16x1xf32> to vector<16x32xf32>
    %226 = vector.extract_strided_slice %132 {offsets = [0, 1], sizes = [16, 1], strides = [1, 1]} : vector<16x16xf32> to vector<16x1xf32>
    %227 = vector.shape_cast %226 : vector<16x1xf32> to vector<16x1xf32>
    %228 = vector.broadcast %227 : vector<16x1xf32> to vector<16x32xf32>
    %229 = vector.extract_strided_slice %132 {offsets = [0, 2], sizes = [16, 1], strides = [1, 1]} : vector<16x16xf32> to vector<16x1xf32>
    %230 = vector.shape_cast %229 : vector<16x1xf32> to vector<16x1xf32>
    %231 = vector.broadcast %230 : vector<16x1xf32> to vector<16x32xf32>
    %232 = vector.extract_strided_slice %132 {offsets = [0, 3], sizes = [16, 1], strides = [1, 1]} : vector<16x16xf32> to vector<16x1xf32>
    %233 = vector.shape_cast %232 : vector<16x1xf32> to vector<16x1xf32>
    %234 = vector.broadcast %233 : vector<16x1xf32> to vector<16x32xf32>
    %235 = vector.extract_strided_slice %132 {offsets = [0, 4], sizes = [16, 1], strides = [1, 1]} : vector<16x16xf32> to vector<16x1xf32>
    %236 = vector.shape_cast %235 : vector<16x1xf32> to vector<16x1xf32>
    %237 = vector.broadcast %236 : vector<16x1xf32> to vector<16x32xf32>
    %238 = vector.extract_strided_slice %132 {offsets = [0, 5], sizes = [16, 1], strides = [1, 1]} : vector<16x16xf32> to vector<16x1xf32>
    %239 = vector.shape_cast %238 : vector<16x1xf32> to vector<16x1xf32>
    %240 = vector.broadcast %239 : vector<16x1xf32> to vector<16x32xf32>
    %241 = vector.extract_strided_slice %132 {offsets = [0, 6], sizes = [16, 1], strides = [1, 1]} : vector<16x16xf32> to vector<16x1xf32>
    %242 = vector.shape_cast %241 : vector<16x1xf32> to vector<16x1xf32>
    %243 = vector.broadcast %242 : vector<16x1xf32> to vector<16x32xf32>
    %244 = vector.extract_strided_slice %132 {offsets = [0, 7], sizes = [16, 1], strides = [1, 1]} : vector<16x16xf32> to vector<16x1xf32>
    %245 = vector.shape_cast %244 : vector<16x1xf32> to vector<16x1xf32>
    %246 = vector.broadcast %245 : vector<16x1xf32> to vector<16x32xf32>
    %247 = vector.extract_strided_slice %132 {offsets = [0, 8], sizes = [16, 1], strides = [1, 1]} : vector<16x16xf32> to vector<16x1xf32>
    %248 = vector.shape_cast %247 : vector<16x1xf32> to vector<16x1xf32>
    %249 = vector.broadcast %248 : vector<16x1xf32> to vector<16x32xf32>
    %250 = vector.extract_strided_slice %132 {offsets = [0, 9], sizes = [16, 1], strides = [1, 1]} : vector<16x16xf32> to vector<16x1xf32>
    %251 = vector.shape_cast %250 : vector<16x1xf32> to vector<16x1xf32>
    %252 = vector.broadcast %251 : vector<16x1xf32> to vector<16x32xf32>
    %253 = vector.extract_strided_slice %132 {offsets = [0, 10], sizes = [16, 1], strides = [1, 1]} : vector<16x16xf32> to vector<16x1xf32>
    %254 = vector.shape_cast %253 : vector<16x1xf32> to vector<16x1xf32>
    %255 = vector.broadcast %254 : vector<16x1xf32> to vector<16x32xf32>
    %256 = vector.extract_strided_slice %132 {offsets = [0, 11], sizes = [16, 1], strides = [1, 1]} : vector<16x16xf32> to vector<16x1xf32>
    %257 = vector.shape_cast %256 : vector<16x1xf32> to vector<16x1xf32>
    %258 = vector.broadcast %257 : vector<16x1xf32> to vector<16x32xf32>
    %259 = vector.extract_strided_slice %132 {offsets = [0, 12], sizes = [16, 1], strides = [1, 1]} : vector<16x16xf32> to vector<16x1xf32>
    %260 = vector.shape_cast %259 : vector<16x1xf32> to vector<16x1xf32>
    %261 = vector.broadcast %260 : vector<16x1xf32> to vector<16x32xf32>
    %262 = vector.extract_strided_slice %132 {offsets = [0, 13], sizes = [16, 1], strides = [1, 1]} : vector<16x16xf32> to vector<16x1xf32>
    %263 = vector.shape_cast %262 : vector<16x1xf32> to vector<16x1xf32>
    %264 = vector.broadcast %263 : vector<16x1xf32> to vector<16x32xf32>
    %265 = vector.extract_strided_slice %132 {offsets = [0, 14], sizes = [16, 1], strides = [1, 1]} : vector<16x16xf32> to vector<16x1xf32>
    %266 = vector.shape_cast %265 : vector<16x1xf32> to vector<16x1xf32>
    %267 = vector.broadcast %266 : vector<16x1xf32> to vector<16x32xf32>
    %268 = vector.extract_strided_slice %132 {offsets = [0, 15], sizes = [16, 1], strides = [1, 1]} : vector<16x16xf32> to vector<16x1xf32>
    %269 = vector.shape_cast %268 : vector<16x1xf32> to vector<16x1xf32>
    %270 = vector.broadcast %269 : vector<16x1xf32> to vector<16x32xf32>
    %271 = tpu.concatenate %225, %228, %231, %234, %237, %240, %243, %246, %249, %252, %255, %258, %261, %264, %267, %270 in 1 : vector<16x32xf32>, vector<16x32xf32>, vector<16x32xf32>, vector<16x32xf32>, vector<16x32xf32>, vector<16x32xf32>, vector<16x32xf32>, vector<16x32xf32>, vector<16x32xf32>, vector<16x32xf32>, vector<16x32xf32>, vector<16x32xf32>, vector<16x32xf32>, vector<16x32xf32>, vector<16x32xf32>, vector<16x32xf32> -> vector<16x512xf32>
    %272 = arith.mulf %222, %271 : vector<16x512xf32>
    %273 = vector.extract_strided_slice %272 {offsets = [0, 0], sizes = [16, 32], strides = [1, 1]} : vector<16x512xf32> to vector<16x32xf32>
    %274 = vector.extract_strided_slice %272 {offsets = [0, 32], sizes = [16, 32], strides = [1, 1]} : vector<16x512xf32> to vector<16x32xf32>
    %275 = arith.addf %273, %274 : vector<16x32xf32>
    %276 = vector.extract_strided_slice %272 {offsets = [0, 64], sizes = [16, 32], strides = [1, 1]} : vector<16x512xf32> to vector<16x32xf32>
    %277 = arith.addf %275, %276 : vector<16x32xf32>
    %278 = vector.extract_strided_slice %272 {offsets = [0, 96], sizes = [16, 32], strides = [1, 1]} : vector<16x512xf32> to vector<16x32xf32>
    %279 = arith.addf %277, %278 : vector<16x32xf32>
    %280 = vector.extract_strided_slice %272 {offsets = [0, 128], sizes = [16, 32], strides = [1, 1]} : vector<16x512xf32> to vector<16x32xf32>
    %281 = arith.addf %279, %280 : vector<16x32xf32>
    %282 = vector.extract_strided_slice %272 {offsets = [0, 160], sizes = [16, 32], strides = [1, 1]} : vector<16x512xf32> to vector<16x32xf32>
    %283 = arith.addf %281, %282 : vector<16x32xf32>
    %284 = vector.extract_strided_slice %272 {offsets = [0, 192], sizes = [16, 32], strides = [1, 1]} : vector<16x512xf32> to vector<16x32xf32>
    %285 = arith.addf %283, %284 : vector<16x32xf32>
    %286 = vector.extract_strided_slice %272 {offsets = [0, 224], sizes = [16, 32], strides = [1, 1]} : vector<16x512xf32> to vector<16x32xf32>
    %287 = arith.addf %285, %286 : vector<16x32xf32>
    %288 = vector.extract_strided_slice %272 {offsets = [0, 256], sizes = [16, 32], strides = [1, 1]} : vector<16x512xf32> to vector<16x32xf32>
    %289 = arith.addf %287, %288 : vector<16x32xf32>
    %290 = vector.extract_strided_slice %272 {offsets = [0, 288], sizes = [16, 32], strides = [1, 1]} : vector<16x512xf32> to vector<16x32xf32>
    %291 = arith.addf %289, %290 : vector<16x32xf32>
    %292 = vector.extract_strided_slice %272 {offsets = [0, 320], sizes = [16, 32], strides = [1, 1]} : vector<16x512xf32> to vector<16x32xf32>
    %293 = arith.addf %291, %292 : vector<16x32xf32>
    %294 = vector.extract_strided_slice %272 {offsets = [0, 352], sizes = [16, 32], strides = [1, 1]} : vector<16x512xf32> to vector<16x32xf32>
    %295 = arith.addf %293, %294 : vector<16x32xf32>
    %296 = vector.extract_strided_slice %272 {offsets = [0, 384], sizes = [16, 32], strides = [1, 1]} : vector<16x512xf32> to vector<16x32xf32>
    %297 = arith.addf %295, %296 : vector<16x32xf32>
    %298 = vector.extract_strided_slice %272 {offsets = [0, 416], sizes = [16, 32], strides = [1, 1]} : vector<16x512xf32> to vector<16x32xf32>
    %299 = arith.addf %297, %298 : vector<16x32xf32>
    %300 = vector.extract_strided_slice %272 {offsets = [0, 448], sizes = [16, 32], strides = [1, 1]} : vector<16x512xf32> to vector<16x32xf32>
    %301 = arith.addf %299, %300 : vector<16x32xf32>
    %302 = vector.extract_strided_slice %272 {offsets = [0, 480], sizes = [16, 32], strides = [1, 1]} : vector<16x512xf32> to vector<16x32xf32>
    %303 = arith.addf %301, %302 : vector<16x32xf32>
    %304 = vector.extract_strided_slice %114 {offsets = [112, 0], sizes = [16, 32], strides = [1, 1]} : vector<128x32xf32> to vector<16x32xf32>
    %c0_56 = arith.constant 0 : index
    %c0_57 = arith.constant 0 : index
    %305 = vector.load %arg17[%c0_56, %c0_57] : memref<1x32xf32, #tpu.memory_space<vmem>>, vector<1x32xf32>
    %306 = vector.broadcast %305 : vector<1x32xf32> to vector<16x32xf32>
    %307 = arith.mulf %304, %306 : vector<16x32xf32>
    %308 = arith.addf %303, %307 : vector<16x32xf32>
    %309 = arith.negf %83 : vector<16x32xf32>
    %310 = math.exp %309 : vector<16x32xf32>
    %cst_58 = arith.constant 1.000000e+00 : f32
    %311 = vector.broadcast %cst_58 : f32 to vector<16x32xf32>
    %312 = arith.addf %311, %310 : vector<16x32xf32>
    %313 = arith.divf %311, %312 : vector<16x32xf32>
    %314 = arith.mulf %83, %313 : vector<16x32xf32>
    %315 = arith.mulf %308, %314 : vector<16x32xf32>
    %316 = arith.truncf %315 : vector<16x32xf32> to vector<16x32xbf16>
    %c0_59 = arith.constant 0 : index
    %c0_60 = arith.constant 0 : index
    %317 = vector.load %arg18[%c0_59, %c0_60] : memref<32x32xbf16, #tpu.memory_space<vmem>>, vector<32x32xbf16>
    %cst_61 = arith.constant dense<0.000000e+00> : vector<16x32xf32>
    %318 = tpu.matmul %316, %317, %cst_61 {dimension_numbers = #tpu.dot_dimension_numbers<[1], [0], [0], [1], [0, 0, 1, 1], [], []>} : vector<16x32xbf16>, vector<32x32xbf16>, vector<16x32xf32> -> vector<16x32xf32>
    %cst_62 = arith.constant 5.000000e-01 : f32
    %319 = vector.broadcast %cst_62 : f32 to vector<16x32xf32>
    %320 = arith.mulf %319, %318 : vector<16x32xf32>
    %cst_63 = arith.constant 4.471500e-02 : f32
    %321 = vector.broadcast %cst_63 : f32 to vector<16x32xf32>
    %322 = arith.mulf %321, %318 : vector<16x32xf32>
    %323 = arith.mulf %322, %318 : vector<16x32xf32>
    %324 = arith.mulf %323, %318 : vector<16x32xf32>
    %325 = arith.addf %318, %324 : vector<16x32xf32>
    %cst_64 = arith.constant 0.797884583 : f32
    %326 = vector.broadcast %cst_64 : f32 to vector<16x32xf32>
    %327 = arith.mulf %326, %325 : vector<16x32xf32>
    %328 = math.tanh %327 : vector<16x32xf32>
    %cst_65 = arith.constant 1.000000e+00 : f32
    %329 = vector.broadcast %cst_65 : f32 to vector<16x32xf32>
    %330 = arith.addf %329, %328 : vector<16x32xf32>
    %331 = arith.mulf %320, %330 : vector<16x32xf32>
    %332 = arith.truncf %331 : vector<16x32xf32> to vector<16x32xbf16>
    %c0_66 = arith.constant 0 : index
    %c0_67 = arith.constant 0 : index
    %333 = vector.load %arg19[%c0_66, %c0_67] : memref<32x64xbf16, #tpu.memory_space<vmem>>, vector<32x64xbf16>
    %cst_68 = arith.constant dense<0.000000e+00> : vector<16x64xf32>
    %334 = tpu.matmul %332, %333, %cst_68 {dimension_numbers = #tpu.dot_dimension_numbers<[1], [0], [0], [1], [0, 0, 1, 1], [], []>} : vector<16x32xbf16>, vector<32x64xbf16>, vector<16x64xf32> -> vector<16x64xf32>
    %c0_69 = arith.constant 0 : index
    %c0_70 = arith.constant 0 : index
    %335 = vector.load %arg20[%c0_69, %c0_70] : memref<1x64xf32, #tpu.memory_space<vmem>>, vector<1x64xf32>
    %336 = vector.broadcast %335 : vector<1x64xf32> to vector<16x64xf32>
    %337 = arith.addf %334, %336 : vector<16x64xf32>
    %338 = vector.extract_strided_slice %337 {offsets = [0, 0], sizes = [16, 32], strides = [1, 1]} : vector<16x64xf32> to vector<16x32xf32>
    %339 = vector.extract_strided_slice %337 {offsets = [0, 32], sizes = [16, 32], strides = [1, 1]} : vector<16x64xf32> to vector<16x32xf32>
    %340 = arith.negf %339 : vector<16x32xf32>
    %341 = math.exp %340 : vector<16x32xf32>
    %cst_71 = arith.constant 1.000000e+00 : f32
    %342 = vector.broadcast %cst_71 : f32 to vector<16x32xf32>
    %343 = arith.addf %342, %341 : vector<16x32xf32>
    %344 = arith.divf %342, %343 : vector<16x32xf32>
    %345 = arith.mulf %338, %344 : vector<16x32xf32>
    %346 = arith.addf %345, %54 : vector<16x32xf32>
    %c0_72 = arith.constant 0 : index
    %c0_73 = arith.constant 0 : index
    %347 = vector.load %arg21[%c0_72, %c0_73] : memref<16x32xf32, #tpu.memory_space<vmem>>, vector<16x32xf32>
    tpu.vector_store %arg21[%c0_72, %c0_73], %346 {strides = array<i32>} : memref<16x32xf32, #tpu.memory_space<vmem>>, vector<16x32xf32>,
    return
  }
  func.func @transform_0(%arg0: i32) -> (i32, i32, i32) {
    %c0_i32 = arith.constant 0 : i32
    %c0_i32_0 = arith.constant 0 : i32
    %c0_i32_1 = arith.constant 0 : i32
    return %c0_i32, %arg0, %c0_i32_0 : i32, i32, i32
  }
  func.func @transform_1(%arg0: i32) -> (i32, i32) {
    %c0_i32 = arith.constant 0 : i32
    %c0_i32_0 = arith.constant 0 : i32
    %c0_i32_1 = arith.constant 0 : i32
    return %c0_i32, %c0_i32_0 : i32, i32
  }
  func.func @transform_2(%arg0: i32) -> (i32, i32) {
    %c0_i32 = arith.constant 0 : i32
    %c0_i32_0 = arith.constant 0 : i32
    %c0_i32_1 = arith.constant 0 : i32
    return %c0_i32, %c0_i32_0 : i32, i32
  }
  func.func @transform_3(%arg0: i32) -> (i32, i32) {
    %c0_i32 = arith.constant 0 : i32
    %c0_i32_0 = arith.constant 0 : i32
    %c0_i32_1 = arith.constant 0 : i32
    return %c0_i32, %c0_i32_0 : i32, i32
  }
  func.func @transform_4(%arg0: i32) -> (i32, i32) {
    %c0_i32 = arith.constant 0 : i32
    %c0_i32_0 = arith.constant 0 : i32
    %c0_i32_1 = arith.constant 0 : i32
    return %c0_i32, %c0_i32_0 : i32, i32
  }
  func.func @transform_5(%arg0: i32) -> (i32, i32) {
    %c0_i32 = arith.constant 0 : i32
    %c0_i32_0 = arith.constant 0 : i32
    %c0_i32_1 = arith.constant 0 : i32
    return %c0_i32, %c0_i32_0 : i32, i32
  }
  func.func @transform_6(%arg0: i32) -> (i32, i32) {
    %c0_i32 = arith.constant 0 : i32
    %c0_i32_0 = arith.constant 0 : i32
    %c0_i32_1 = arith.constant 0 : i32
    return %c0_i32, %c0_i32_0 : i32, i32
  }
  func.func @transform_7(%arg0: i32) -> (i32, i32) {
    %c0_i32 = arith.constant 0 : i32
    %c0_i32_0 = arith.constant 0 : i32
    %c0_i32_1 = arith.constant 0 : i32
    return %c0_i32, %c0_i32_0 : i32, i32
  }
  func.func @transform_8(%arg0: i32) -> (i32, i32) {
    %c0_i32 = arith.constant 0 : i32
    %c0_i32_0 = arith.constant 0 : i32
    %c0_i32_1 = arith.constant 0 : i32
    return %c0_i32, %c0_i32_0 : i32, i32
  }
  func.func @transform_9(%arg0: i32) -> (i32, i32) {
    %c0_i32 = arith.constant 0 : i32
    %c0_i32_0 = arith.constant 0 : i32
    %c0_i32_1 = arith.constant 0 : i32
    return %c0_i32, %c0_i32_0 : i32, i32
  }
  func.func @transform_10(%arg0: i32) -> (i32, i32) {
    %c0_i32 = arith.constant 0 : i32
    %c0_i32_0 = arith.constant 0 : i32
    %c0_i32_1 = arith.constant 0 : i32
    return %c0_i32, %c0_i32_0 : i32, i32
  }
  func.func @transform_11(%arg0: i32) -> (i32, i32) {
    %c0_i32 = arith.constant 0 : i32
    %c0_i32_0 = arith.constant 0 : i32
    %c0_i32_1 = arith.constant 0 : i32
    return %c0_i32, %c0_i32_0 : i32, i32
  }
  func.func @transform_12(%arg0: i32) -> (i32, i32) {
    %c0_i32 = arith.constant 0 : i32
    %c0_i32_0 = arith.constant 0 : i32
    %c0_i32_1 = arith.constant 0 : i32
    return %c0_i32, %c0_i32_0 : i32, i32
  }
  func.func @transform_13(%arg0: i32) -> (i32, i32) {
    %c0_i32 = arith.constant 0 : i32
    %c0_i32_0 = arith.constant 0 : i32
    %c0_i32_1 = arith.constant 0 : i32
    return %c0_i32, %c0_i32_0 : i32, i32
  }
  func.func @transform_14(%arg0: i32) -> (i32, i32) {
    %c0_i32 = arith.constant 0 : i32
    %c0_i32_0 = arith.constant 0 : i32
    %c0_i32_1 = arith.constant 0 : i32
    return %c0_i32, %c0_i32_0 : i32, i32
  }
  func.func @transform_15(%arg0: i32) -> (i32, i32) {
    %c0_i32 = arith.constant 0 : i32
    %c0_i32_0 = arith.constant 0 : i32
    %c0_i32_1 = arith.constant 0 : i32
    return %c0_i32, %c0_i32_0 : i32, i32
  }
  func.func @transform_16(%arg0: i32) -> (i32, i32) {
    %c0_i32 = arith.constant 0 : i32
    %c0_i32_0 = arith.constant 0 : i32
    %c0_i32_1 = arith.constant 0 : i32
    return %c0_i32, %c0_i32_0 : i32, i32
  }
  func.func @transform_17(%arg0: i32) -> (i32, i32) {
    %c0_i32 = arith.constant 0 : i32
    %c0_i32_0 = arith.constant 0 : i32
    %c0_i32_1 = arith.constant 0 : i32
    return %c0_i32, %c0_i32_0 : i32, i32
  }
  func.func @transform_18(%arg0: i32) -> (i32, i32) {
    %c0_i32 = arith.constant 0 : i32
    %c0_i32_0 = arith.constant 0 : i32
    %c0_i32_1 = arith.constant 0 : i32
    return %c0_i32, %c0_i32_0 : i32, i32
  }
  func.func @transform_19(%arg0: i32) -> (i32, i32) {
    %c0_i32 = arith.constant 0 : i32
    %c0_i32_0 = arith.constant 0 : i32
    %c0_i32_1 = arith.constant 0 : i32
    return %c0_i32, %c0_i32_0 : i32, i32
  }
  func.func @transform_20(%arg0: i32) -> (i32, i32) {
    %c0_i32 = arith.constant 0 : i32
    %c0_i32_0 = arith.constant 0 : i32
    return %arg0, %c0_i32 : i32, i32
  }
}

</mosaic_0001>

<bundles_post_ra>
// kernel: tpu_custom_call.1
= control target key start
LH: loop header
LB: loop body
LE: loop exit
PB: predicated region body
PF: predicated region fallthrough
CT: control target
= control target key end

     0   :  { %s9096_s0 = inlined_call_operand.hbm [shape: bf16[8,16,16], index: 0, kind: input, shape index: {}]   ;;  %s9097_s1 = inlined_call_operand.hbm [shape: bf16[16,32], index: 1, kind: input, shape index: {}]   ;;  %s9098_s2 = inlined_call_operand.hbm [shape: f32[1,32], index: 2, kind: input, shape index: {}]   ;;  %s9099_s3 = inlined_call_operand.hbm [shape: f32[1,32], index: 3, kind: input, shape index: {}]   ;;  %s9100_s4 = inlined_call_operand.hbm [shape: bf16[32,32], index: 4, kind: input, shape index: {}]   ;;  %s9101_s5 = inlined_call_operand.hbm [shape: f32[1,32], index: 5, kind: input, shape index: {}]   ;;  %s9102_s6 = inlined_call_operand.vmem [shape: bf16[32,32], index: 6, kind: input, shape index: {}]   ;;  %s9103_s7 = inlined_call_operand.hbm [shape: f32[1,32], index: 7, kind: input, shape index: {}]   ;;  %s9104_s8 = inlined_call_operand.hbm [shape: f32[1,32], index: 8, kind: input, shape index: {}]   ;;  %s9105_s9 = inlined_call_operand.hbm [shape: f32[1,32], index: 9, kind: input, shape index: {}]   ;;  %s9106_s10 = inlined_call_operand.vmem [shape: bf16[32,64], index: 10, kind: input, shape index: {}]   ;;  %s9107_s11 = inlined_call_operand.hbm [shape: f32[4,32], index: 11, kind: input, shape index: {}]   ;;  %s9108_s12 = inlined_call_operand.hbm [shape: f32[1,32], index: 12, kind: input, shape index: {}]   ;;  %s9109_s13 = inlined_call_operand.vmem [shape: bf16[32,64], index: 13, kind: input, shape index: {}]   ;;  %s9110_s14 = inlined_call_operand.hbm [shape: f32[1,32], index: 14, kind: input, shape index: {}]   ;;  %s9111_s15 = inlined_call_operand.hbm [shape: f32[1,512], index: 15, kind: input, shape index: {}]   ;;  %s9112_s16 = inlined_call_operand.hbm [shape: f32[1,32], index: 16, kind: input, shape index: {}]   ;;  %s9113_s17 = inlined_call_operand.vmem [shape: bf16[32,32], index: 17, kind: input, shape index: {}]   ;;  %s9114_s18 = inlined_call_operand.hbm [shape: bf16[32,64], index: 18, kind: input, shape index: {}]   ;;  %s9115_s19 = inlined_call_operand.vmem [shape: f32[1,64], index: 19, kind: input, shape index: {}]   ;;  %s9116_s20 = inlined_call_operand.hbm [shape: f32[16,32], index: 20, kind: output, shape index: {}]  }
   0x1   :  { %9214 = sst [smem:[#allocation334_spill]] %s9096_s0 }
   0x2   :  { %9215 = sst [smem:[#allocation335_spill]] %s9097_s1 }
   0x3   :  { %9216 = sst [smem:[#allocation336_spill]] %s9098_s2 }
   0x4   :  { %9217 = sst [smem:[#allocation337_spill]] %s9099_s3 }
   0x5   :  { %9218 = sst [smem:[#allocation338_spill]] %s9100_s4 }
   0x6   :  { %25 = vsyncpa [#allocation3], 0 }
   0x7   :  { %26 = vsyncpa [#allocation6], 0 }
   0x8   :  { %27 = vsyncpa [#allocation9], 0 }
   0x9   :  { %28 = vsyncpa [#allocation12], 0 }
   0xa   :  { %29 = vsyncpa [#allocation15], 0 }
   0xb   :  { %30 = vsyncpa [#allocation18], 0 }
   0xc   :  { %31 = vsyncpa [#allocation21], 0 }
   0xd   :  { %32 = vsyncpa [#allocation24], 0 }
   0xe   :  { %33 = vsyncpa [#allocation4], 0  ;;  %s5385_s1 = smov [#allocation5]   ;;  %s5386_s23 = smov [#allocation8]  }
   0xf   :  { %s51_s22 = sshll.u32 %s5385_s1, 4  ;;  %s74_s24 = sshll.u32 %s5386_s23, 4  ;;  %s52_s22 = int_to_ptr.vmem [resolvable:$true] %s51_s22  ;;  %s5546_s24 = int_to_ptr.vmem [resolvable:$true] %s74_s24 }
  0x10   :  { %s9219_s3 = sld [smem:[#allocation335_spill]] }
  0x16   :  { %s5015_s26 = scalar_lea.hbm %s9219_s3, 128 }
  0x17   :  { %p5016_p0 = scmp.ne.s32.totalorder %s9219_s3, %s5015_s26  ;;  %p5019_p1 = scmp.lt.u32.totalorder %s5015_s26, %s9219_s3 }
  0x19   :  { %p5021_p2 = pnand %p5019_p1, %p5016_p0 }
  0x1b   :  { %5024 = shalt.err (!%p5021_p2)
}
  0x1c   :  { %s5025_s30 = scalar_lea.vmem %s52_s22, 128  ;;  %p5030_p4 = scmp.lt.s32.totalorder %s52_s22, %s52_s22 }
  0x1d   :  { %p5026_p3 = scmp.ne.s32.totalorder %s52_s22, %s5025_s30  ;;  %p5031_p5 = scmp.lt.s32.totalorder %s5025_s30, %s5025_s30 }
  0x1f   :  { %p5032_p6 = por %p5031_p5, %p5030_p4 }
  0x21   :  { %p5033_p7 = pnand %p5032_p6, %p5026_p3 }
  0x23   :  { %5036 = shalt.err (!%p5033_p7)
}
  0x24   :  { %s9122_s0 = smov 64   ;;  %s9124_s21 = smov 4  }
  0x25   :  { %57 = dma.hbm_to_vmem [thread:$0]  %s9219_s3, 128, %s52_s22, [#allocation6], %s9122_s0, %s9122_s0, %s9124_s21  }
  0x26   :  { %s9220_s26 = sld [smem:[#allocation337_spill]] }
  0x2c   :  { %s5037_s27 = scalar_lea.hbm %s9220_s26, 16 }
  0x2d   :  { %p5038_p8 = scmp.ne.s32.totalorder %s9220_s26, %s5037_s27  ;;  %p5041_p9 = scmp.lt.u32.totalorder %s5037_s27, %s9220_s26 }
  0x2f   :  { %p5043_p10 = pnand %p5041_p9, %p5038_p8 }
  0x31   :  { %5046 = shalt.err (!%p5043_p10)
}
  0x32   :  { %s5047_s1 = scalar_lea.vmem %s5546_s24, 16  ;;  %s5051_s22 = scalar_lea.vmem %s5546_s24, 32 }
  0x33   :  { %p5048_p11 = scmp.ne.s32.totalorder %s5546_s24, %s5047_s1  ;;  %p5052_p12 = scmp.lt.s32.totalorder %s5546_s24, %s5546_s24 }
  0x34   :  { %p5053_p13 = scmp.lt.s32.totalorder %s5051_s22, %s5047_s1 }
  0x36   :  { %p5054_p0 = por %p5053_p13, %p5052_p12 }
  0x38   :  { %p5055_p1 = pnand %p5054_p0, %p5048_p11 }
  0x3a   :  { %5058 = shalt.err (!%p5055_p1)
}
  0x3b   :  { %77 = dma.hbm_to_vmem [thread:$0]  %s9220_s26, 16, %s5546_s24, [#allocation9]  }
  0x3c   :  { %s5389_s2 = smov [#allocation11]   ;;  %s5390_s27 = smov [#allocation14]  }
  0x3d   :  { %s96_s25 = sshll.u32 %s5389_s2, 4  ;;  %s118_s28 = sshll.u32 %s5390_s27, 4  ;;  %s97_s25 = int_to_ptr.vmem [resolvable:$true] %s96_s25  ;;  %s119_s28 = int_to_ptr.vmem [resolvable:$true] %s118_s28 }
  0x3e   :  { %s5059_s30 = scalar_lea.hbm %s9101_s5, 16 }
  0x3f   :  { %p5060_p2 = scmp.ne.s32.totalorder %s9101_s5, %s5059_s30  ;;  %p5063_p3 = scmp.lt.u32.totalorder %s5059_s30, %s9101_s5 }
  0x41   :  { %p5065_p4 = pnand %p5063_p3, %p5060_p2 }
  0x43   :  { %5068 = shalt.err (!%p5065_p4)
}
  0x44   :  { %s5069_s24 = scalar_lea.vmem %s97_s25, 16  ;;  %s5073_s26 = scalar_lea.vmem %s97_s25, 32 }
  0x45   :  { %p5070_p5 = scmp.ne.s32.totalorder %s97_s25, %s5069_s24  ;;  %p5074_p6 = scmp.lt.s32.totalorder %s97_s25, %s97_s25 }
  0x46   :  { %p5075_p7 = scmp.lt.s32.totalorder %s5073_s26, %s5069_s24 }
  0x48   :  { %p5076_p8 = por %p5075_p7, %p5074_p6 }
  0x4a   :  { %p5077_p9 = pnand %p5076_p8, %p5070_p5 }
  0x4c   :  { %5080 = shalt.err (!%p5077_p9)
}
  0x4d   :  { %99 = dma.hbm_to_vmem [thread:$0]  %s9101_s5, 16, %s97_s25, [#allocation12]  }
  0x4e   :  { %s5081_s27 = scalar_lea.hbm %s9104_s8, 16 }
  0x4f   :  { %p5082_p10 = scmp.ne.s32.totalorder %s9104_s8, %s5081_s27  ;;  %p5085_p11 = scmp.lt.u32.totalorder %s5081_s27, %s9104_s8 }
  0x51   :  { %p5087_p12 = pnand %p5085_p11, %p5082_p10 }
  0x53   :  { %5090 = shalt.err (!%p5087_p12)
}
  0x54   :  { %s5091_s1 = scalar_lea.vmem %s119_s28, 16  ;;  %s5095_s22 = scalar_lea.vmem %s119_s28, 32 }
  0x55   :  { %p5092_p13 = scmp.ne.s32.totalorder %s119_s28, %s5091_s1  ;;  %p5096_p0 = scmp.lt.s32.totalorder %s119_s28, %s119_s28 }
  0x56   :  { %p5097_p1 = scmp.lt.s32.totalorder %s5095_s22, %s5091_s1 }
  0x58   :  { %p5098_p2 = por %p5097_p1, %p5096_p0 }
  0x5a   :  { %p5099_p3 = pnand %p5098_p2, %p5092_p13 }
  0x5c   :  { %5102 = shalt.err (!%p5099_p3)
}
  0x5d   :  { %121 = dma.hbm_to_vmem [thread:$0]  %s9104_s8, 16, %s119_s28, [#allocation15]  }
  0x5e   :  { %s5391_s24 = smov [#allocation17]   ;;  %s5392_s3 = smov [#allocation20]  }
  0x5f   :  { %s140_s26 = sshll.u32 %s5391_s24, 4  ;;  %s162_s23 = sshll.u32 %s5392_s3, 4  ;;  %s141_s26 = int_to_ptr.vmem [resolvable:$true] %s140_s26  ;;  %s163_s23 = int_to_ptr.vmem [resolvable:$true] %s162_s23 }
  0x60   :  { %s5103_s27 = scalar_lea.hbm %s9107_s11, 64 }
  0x61   :  { %p5104_p4 = scmp.ne.s32.totalorder %s9107_s11, %s5103_s27  ;;  %p5107_p5 = scmp.lt.u32.totalorder %s5103_s27, %s9107_s11 }
  0x63   :  { %p5109_p6 = pnand %p5107_p5, %p5104_p4 }
  0x65   :  { %5112 = shalt.err (!%p5109_p6)
}
  0x66   :  { %s5113_s8 = scalar_lea.vmem %s141_s26, 64  ;;  %p5118_p8 = scmp.lt.s32.totalorder %s141_s26, %s141_s26 }
  0x67   :  { %p5114_p7 = scmp.ne.s32.totalorder %s141_s26, %s5113_s8  ;;  %p5119_p9 = scmp.lt.s32.totalorder %s5113_s8, %s5113_s8 }
  0x69   :  { %p5120_p10 = por %p5119_p9, %p5118_p8 }
  0x6b   :  { %p5121_p11 = pnand %p5120_p10, %p5114_p7 }
  0x6d   :  { %5124 = shalt.err (!%p5121_p11)
}
  0x6e   :  { %143 = dma.hbm_to_vmem [thread:$0]  %s9107_s11, 64, %s141_s26, [#allocation18]  }
  0x6f   :  { %s5125_s25 = scalar_lea.hbm %s9110_s14, 16 }
  0x70   :  { %p5126_p12 = scmp.ne.s32.totalorder %s9110_s14, %s5125_s25  ;;  %p5129_p13 = scmp.lt.u32.totalorder %s5125_s25, %s9110_s14 }
  0x72   :  { %p5131_p0 = pnand %p5129_p13, %p5126_p12 }
  0x74   :  { %5134 = shalt.err (!%p5131_p0)
}
  0x75   :  { %s5135_s27 = scalar_lea.vmem %s163_s23, 16  ;;  %s5139_s21 = scalar_lea.vmem %s163_s23, 32 }
  0x76   :  { %p5136_p1 = scmp.ne.s32.totalorder %s163_s23, %s5135_s27  ;;  %p5140_p2 = scmp.lt.s32.totalorder %s163_s23, %s163_s23 }
  0x77   :  { %p5141_p3 = scmp.lt.s32.totalorder %s5139_s21, %s5135_s27 }
  0x79   :  { %p5142_p4 = por %p5141_p3, %p5140_p2 }
  0x7b   :  { %p5143_p5 = pnand %p5142_p4, %p5136_p1 }
  0x7d   :  { %5146 = shalt.err (!%p5143_p5)
}
  0x7e   :  { %165 = dma.hbm_to_vmem [thread:$0]  %s9110_s14, 16, %s163_s23, [#allocation21]  }
  0x7f   :  { %s5393_s4 = smov [#allocation23]   ;;  %s5394_s30 = smov [#allocation2]  }
  0x80   :  { %s182_s29 = sshll.u32 %s5393_s4, 4  ;;  %s39_s8 = sshll.u32 %s5394_s30, 4  ;;  %s183_s29 = int_to_ptr.vmem [resolvable:$true] %s182_s29  ;;  %s5629_s8 = int_to_ptr.vmem [resolvable:$true] %s39_s8 }
  0x81   :  { %s5147_s22 = scalar_lea.hbm %s9112_s16, 16 }
  0x82   :  { %p5148_p6 = scmp.ne.s32.totalorder %s9112_s16, %s5147_s22  ;;  %p5151_p7 = scmp.lt.u32.totalorder %s5147_s22, %s9112_s16 }
  0x84   :  { %p5153_p8 = pnand %p5151_p7, %p5148_p6 }
  0x86   :  { %5156 = shalt.err (!%p5153_p8)
}
  0x87   :  { %s5157_s14 = scalar_lea.vmem %s183_s29, 16  ;;  %s5161_s23 = scalar_lea.vmem %s183_s29, 32 }
  0x88   :  { %p5158_p9 = scmp.ne.s32.totalorder %s183_s29, %s5157_s14  ;;  %p5162_p10 = scmp.lt.s32.totalorder %s183_s29, %s183_s29 }
  0x89   :  { %p5163_p11 = scmp.lt.s32.totalorder %s5161_s23, %s5157_s14 }
  0x8b   :  { %p5164_p12 = por %p5163_p11, %p5162_p10 }
  0x8d   :  { %p5165_p13 = pnand %p5164_p12, %p5158_p9 }
  0x8f   :  { %5168 = shalt.err (!%p5165_p13)
}
  0x90   :  { %185 = dma.hbm_to_vmem [thread:$0]  %s9112_s16, 16, %s183_s29, [#allocation24]  }
  0x91   :  { %s9221_s11 = sld [smem:[#allocation334_spill]] }
  0x97   :  { %s5169_s26 = scalar_lea.hbm %s9221_s11, 1024 }
  0x98   :  { %p5170_p0 = scmp.ne.s32.totalorder %s9221_s11, %s5169_s26  ;;  %p5173_p1 = scmp.lt.u32.totalorder %s5169_s26, %s9221_s11 }
  0x9a   :  { %p5175_p2 = pnand %p5173_p1, %p5170_p0 }
  0x9c   :  { %5178 = shalt.err (!%p5175_p2)
}
  0x9d   :  { %s5179_s22 = scalar_lea.vmem %s5629_s8, 1024  ;;  %p5184_p4 = scmp.lt.s32.totalorder %s5629_s8, %s5629_s8 }
  0x9e   :  { %p5180_p3 = scmp.ne.s32.totalorder %s5629_s8, %s5179_s22  ;;  %p5185_p5 = scmp.lt.s32.totalorder %s5179_s22, %s5179_s22 }
  0xa0   :  { %p5186_p6 = por %p5185_p5, %p5184_p4 }
  0xa2   :  { %p5187_p7 = pnand %p5186_p6, %p5180_p3 }
  0xa4   :  { %5190 = shalt.err (!%p5187_p7)
}
  0xa5   :  { %s9222_s16 = smov 4   ;;  %s9223_s29 = smov 64  }
  0xa6   :  { %45 = dma.hbm_to_vmem [thread:$0]  %s9221_s11, 1024, %s5629_s8, [#allocation3], %s9223_s29, %s9223_s29, %s9222_s16  }
  0xa7   :  { %s5395_s24 = smov [#allocation7]   ;;  %s5396_s14 = smov [#allocation10]  }
  0xa8   :  { %s64_s3 = sshll.u32 %s5395_s24, 4  ;;  %s83_s23 = sshll.u32 %s5396_s14, 4  ;;  %s65_s3 = int_to_ptr.vmem [resolvable:$true] %s64_s3  ;;  %s5663_s23 = int_to_ptr.vmem [resolvable:$true] %s83_s23 }
  0xa9   :  { %s9224_s27 = sld [smem:[#allocation336_spill]] }
  0xaf   :  { %s5191_s21 = scalar_lea.hbm %s9224_s27, 16 }
  0xb0   :  { %p5192_p8 = scmp.ne.s32.totalorder %s9224_s27, %s5191_s21  ;;  %p5195_p9 = scmp.lt.u32.totalorder %s5191_s21, %s9224_s27 }
  0xb2   :  { %p5197_p10 = pnand %p5195_p9, %p5192_p8 }
  0xb4   :  { %5200 = shalt.err (!%p5197_p10)
}
  0xb5   :  { %s5201_s8 = scalar_lea.vmem %s65_s3, 16  ;;  %s5205_s11 = scalar_lea.vmem %s65_s3, 32 }
  0xb6   :  { %p5202_p11 = scmp.ne.s32.totalorder %s65_s3, %s5201_s8  ;;  %p5206_p12 = scmp.lt.s32.totalorder %s65_s3, %s65_s3 }
  0xb7   :  { %p5207_p13 = scmp.lt.s32.totalorder %s5205_s11, %s5201_s8 }
  0xb9   :  { %p5208_p0 = por %p5207_p13, %p5206_p12 }
  0xbb   :  { %p5209_p1 = pnand %p5208_p0, %p5202_p11 }
  0xbd   :  { %5212 = shalt.err (!%p5209_p1)
}
  0xbe   :  { %67 = dma.hbm_to_vmem [thread:$0]  %s9224_s27, 16, %s65_s3, [#allocation6]  }
  0xbf   :  { %s9225_s24 = sld [smem:[#allocation338_spill]] }
  0xc5   :  { %s5213_s14 = scalar_lea.hbm %s9225_s24, 256 }
  0xc6   :  { %p5214_p2 = scmp.ne.s32.totalorder %s9225_s24, %s5213_s14  ;;  %p5217_p3 = scmp.lt.u32.totalorder %s5213_s14, %s9225_s24 }
  0xc8   :  { %p5219_p4 = pnand %p5217_p3, %p5214_p2 }
  0xca   :  { %5222 = shalt.err (!%p5219_p4)
}
  0xcb   :  { %s5223_s4 = scalar_lea.vmem %s5663_s23, 256  ;;  %p5228_p6 = scmp.lt.s32.totalorder %s5663_s23, %s5663_s23 }
  0xcc   :  { %p5224_p5 = scmp.ne.s32.totalorder %s5663_s23, %s5223_s4  ;;  %p5229_p7 = scmp.lt.s32.totalorder %s5223_s4, %s5223_s4 }
  0xce   :  { %p5230_p8 = por %p5229_p7, %p5228_p6 }
  0xd0   :  { %p5231_p9 = pnand %p5230_p8, %p5224_p5 }
  0xd2   :  { %5234 = shalt.err (!%p5231_p9)
}
  0xd3   :  { %89 = dma.hbm_to_vmem [thread:$0]  %s9225_s24, 256, %s5663_s23, [#allocation9], %s9223_s29, %s9223_s29, %s9222_s16  }
  0xd4   :  { %s5397_s30 = smov [#allocation13]   ;;  %s5398_s8 = smov [#allocation16]  }
  0xd5   :  { %s108_s28 = sshll.u32 %s5397_s30, 4  ;;  %s128_s11 = sshll.u32 %s5398_s8, 4  ;;  %s109_s28 = int_to_ptr.vmem [resolvable:$true] %s108_s28  ;;  %s129_s11 = int_to_ptr.vmem [resolvable:$true] %s128_s11 }
  0xd6   :  { %s5235_s5 = scalar_lea.hbm %s9103_s7, 16 }
  0xd7   :  { %p5236_p10 = scmp.ne.s32.totalorder %s9103_s7, %s5235_s5  ;;  %p5239_p11 = scmp.lt.u32.totalorder %s5235_s5, %s9103_s7 }
  0xd9   :  { %p5241_p12 = pnand %p5239_p11, %p5236_p10 }
  0xdb   :  { %5244 = shalt.err (!%p5241_p12)
}
  0xdc   :  { %s5245_s23 = scalar_lea.vmem %s109_s28, 16  ;;  %s5249_s24 = scalar_lea.vmem %s109_s28, 32 }
  0xdd   :  { %p5246_p13 = scmp.ne.s32.totalorder %s109_s28, %s5245_s23  ;;  %p5250_p0 = scmp.lt.s32.totalorder %s109_s28, %s109_s28 }
  0xde   :  { %p5251_p1 = scmp.lt.s32.totalorder %s5249_s24, %s5245_s23 }
  0xe0   :  { %p5252_p2 = por %p5251_p1, %p5250_p0 }
  0xe2   :  { %p5253_p3 = pnand %p5252_p2, %p5246_p13 }
  0xe4   :  { %5256 = shalt.err (!%p5253_p3)
}
  0xe5   :  { %111 = dma.hbm_to_vmem [thread:$0]  %s9103_s7, 16, %s109_s28, [#allocation12]  }
  0xe6   :  { %s5257_s27 = scalar_lea.hbm %s9105_s9, 16 }
  0xe7   :  { %p5258_p4 = scmp.ne.s32.totalorder %s9105_s9, %s5257_s27  ;;  %p5261_p5 = scmp.lt.u32.totalorder %s5257_s27, %s9105_s9 }
  0xe9   :  { %p5263_p6 = pnand %p5261_p5, %p5258_p4 }
  0xeb   :  { %5266 = shalt.err (!%p5263_p6)
}
  0xec   :  { %s5267_s5 = scalar_lea.vmem %s129_s11, 16  ;;  %s5271_s25 = scalar_lea.vmem %s129_s11, 32 }
  0xed   :  { %p5268_p7 = scmp.ne.s32.totalorder %s129_s11, %s5267_s5  ;;  %p5272_p8 = scmp.lt.s32.totalorder %s129_s11, %s129_s11 }
  0xee   :  { %p5273_p9 = scmp.lt.s32.totalorder %s5271_s25, %s5267_s5 }
  0xf0   :  { %p5274_p10 = por %p5273_p9, %p5272_p8 }
  0xf2   :  { %p5275_p11 = pnand %p5274_p10, %p5268_p7 }
  0xf4   :  { %5278 = shalt.err (!%p5275_p11)
}
  0xf5   :  { %131 = dma.hbm_to_vmem [thread:$0]  %s9105_s9, 16, %s129_s11, [#allocation15]  }
  0xf6   :  { %s5399_s14 = smov [#allocation19]   ;;  %s5400_s2 = smov [#allocation22]  }
  0xf7   :  { %s150_s0 = sshll.u32 %s5399_s14, 4  ;;  %s172_s23 = sshll.u32 %s5400_s2, 4  ;;  %s151_s0 = int_to_ptr.vmem [resolvable:$true] %s150_s0  ;;  %s173_s23 = int_to_ptr.vmem [resolvable:$true] %s172_s23 }
  0xf8   :  { %s5279_s26 = scalar_lea.hbm %s9108_s12, 16 }
  0xf9   :  { %p5280_p12 = scmp.ne.s32.totalorder %s9108_s12, %s5279_s26  ;;  %p5283_p13 = scmp.lt.u32.totalorder %s5279_s26, %s9108_s12 }
  0xfb   :  { %p5285_p0 = pnand %p5283_p13, %p5280_p12 }
  0xfd   :  { %5288 = shalt.err (!%p5285_p0)
}
  0xfe   :  { %s5289_s9 = scalar_lea.vmem %s151_s0, 16  ;;  %s5293_s11 = scalar_lea.vmem %s151_s0, 32 }
  0xff   :  { %p5290_p1 = scmp.ne.s32.totalorder %s151_s0, %s5289_s9  ;;  %p5294_p2 = scmp.lt.s32.totalorder %s151_s0, %s151_s0 }
 0x100   :  { %p5295_p3 = scmp.lt.s32.totalorder %s5293_s11, %s5289_s9 }
 0x102   :  { %p5296_p4 = por %p5295_p3, %p5294_p2 }
 0x104   :  { %p5297_p5 = pnand %p5296_p4, %p5290_p1 }
 0x106   :  { %5300 = shalt.err (!%p5297_p5)
}
 0x107   :  { %153 = dma.hbm_to_vmem [thread:$0]  %s9108_s12, 16, %s151_s0, [#allocation18]  }
 0x108   :  { %s5301_s25 = scalar_lea.hbm %s9111_s15, 64 }
 0x109   :  { %p5302_p6 = scmp.ne.s32.totalorder %s9111_s15, %s5301_s25  ;;  %p5305_p7 = scmp.lt.u32.totalorder %s5301_s25, %s9111_s15 }
 0x10b   :  { %p5307_p8 = pnand %p5305_p7, %p5302_p6 }
 0x10d   :  { %5310 = shalt.err (!%p5307_p8)
}
 0x10e   :  { %s5311_s24 = scalar_lea.vmem %s173_s23, 64  ;;  %p5316_p10 = scmp.lt.s32.totalorder %s173_s23, %s173_s23 }
 0x10f   :  { %p5312_p9 = scmp.ne.s32.totalorder %s173_s23, %s5311_s24  ;;  %p5317_p11 = scmp.lt.s32.totalorder %s5311_s24, %s5311_s24 }
 0x111   :  { %p5318_p12 = por %p5317_p11, %p5316_p10 }
 0x113   :  { %p5319_p13 = pnand %p5318_p12, %p5312_p9 }
 0x115   :  { %5322 = shalt.err (!%p5319_p13)
}
 0x116   :  { %175 = dma.hbm_to_vmem [thread:$0]  %s9111_s15, 64, %s173_s23, [#allocation21]  }
 0x117   :  { %s5401_s21 = smov [#allocation25]   ;;  %s5323_s27 = scalar_lea.hbm %s9114_s18, 256 }
 0x118   :  { %s193_s26 = sshll.u32 %s5401_s21, 4  ;;  %p5324_p0 = scmp.ne.s32.totalorder %s9114_s18, %s5323_s27  ;;  %s194_s26 = int_to_ptr.vmem [resolvable:$true] %s193_s26 }
 0x119   :  { %p5327_p1 = scmp.lt.u32.totalorder %s5323_s27, %s9114_s18 }
 0x11b   :  { %p5329_p2 = pnand %p5327_p1, %p5324_p0 }
 0x11d   :  { %5332 = shalt.err (!%p5329_p2)
}
 0x11e   :  { %s5333_s1 = scalar_lea.vmem %s194_s26, 256  ;;  %p5338_p4 = scmp.lt.s32.totalorder %s194_s26, %s194_s26 }
 0x11f   :  { %p5334_p3 = scmp.ne.s32.totalorder %s194_s26, %s5333_s1  ;;  %p5339_p5 = scmp.lt.s32.totalorder %s5333_s1, %s5333_s1 }
 0x121   :  { %p5340_p6 = por %p5339_p5, %p5338_p4 }
 0x123   :  { %p5341_p7 = pnand %p5340_p6, %p5334_p3 }
 0x125   :  { %5344 = shalt.err (!%p5341_p7)
}
 0x126   :  { %199 = dma.hbm_to_vmem [thread:$0]  %s9114_s18, 256, %s194_s26, [#allocation24], %s9223_s29, %s9223_s29, %s9222_s16  }
 0x127   :  { %5367 = dma.done.wait [#allocation3], 1024  }
 0x128   :  { %5368 = vsyncadd [#allocation3], 4294966272 }
 0x129   :  { %5369 = dma.done.wait [#allocation6], 144  }
 0x12a   :  { %5370 = vsyncadd [#allocation6], 4294967152 }
 0x12b   :  { %5371 = dma.done.wait [#allocation9], 272  }
 0x12c   :  { %5372 = vsyncadd [#allocation9], 4294967024 }
 0x12d   :  { %5373 = dma.done.wait [#allocation12], 32  }
 0x12e   :  { %5374 = vsyncadd [#allocation12], 4294967264 }
 0x12f   :  { %5375 = dma.done.wait [#allocation15], 32  }
 0x130   :  { %5376 = vsyncadd [#allocation15], 4294967264 }
 0x131   :  { %5377 = dma.done.wait [#allocation18], 80  }
 0x132   :  { %5378 = vsyncadd [#allocation18], 4294967216 }
 0x133   :  { %5379 = dma.done.wait [#allocation21], 80  }
 0x134   :  { %5380 = vsyncadd [#allocation21], 4294967216 }
 0x135   :  { %5381 = dma.done.wait [#allocation24], 272  }
 0x136   :  { %5382 = vsyncadd [#allocation24], 4294967024  ;;  %v4681_v0 = vld [vmem:[#allocation5] sm:$0xff]   ;;  %vm312_vm0 = vcmask 130048   ;;  %v4683_v2 = vld [vmem:[#allocation2 + $0x8] sm:$0xff]   ;;  %vm436_vm1 = vcmask 261120  }
 0x137   :  { %v4682_v1 = vld [vmem:[#allocation2] sm:$0xff]   ;;  %4250 = vmatprep.subr.bf16.mxu0 %v4681_v0  ;;  %v4684_v3 = vld [vmem:[#allocation2 + $0x10] sm:$0xff]   ;;  %v4685_v4 = vld [vmem:[#allocation2 + $0x18] sm:$0xff]   ;;  %vm5403_vm2 = vmmov 0   ;;  %s5431_s12 = smov 32   ;;  %vm1732_vm10 = vcmask 523264  }
 0x138   :  { %4251 = vmatpush3.bf16.msra.mxu0 %v4681_v0  ;;  %4252 = vmatprep.mubr.msk.bf16.mxu0 %vm312_vm0, %v4682_v1  ;;  %v4686_v5 = vld [vmem:[#allocation2 + $0x20] sm:$0xff]   ;;  %v4687_v6 = vld [vmem:[#allocation2 + $0x28] sm:$0xff]   ;;  %v4688_v7 = vld [vmem:[#allocation2 + $0x30] sm:$0xff]   ;;  %vm1749_vm11 = vcmask 785408  }
 0x139   :  { %v4689_v8 = vld [vmem:[#allocation2 + $0x38] sm:$0xff]  }
 0x13b   :  { %4253 = vmatmul.mubr.msk.bf16.vlgmr.msra.gmra.mrb[0].mxu0 %vm312_vm0, %v4683_v2 }
 0x13c   :  { %4256 = vmatprep.mubr.msk.bf16.mxu0 %vm312_vm0, %v4684_v3 }
 0x143   :  { %4257 = vmatmul.mubr.msk.bf16.gmra.mrb[4].mxu0 %vm312_vm0, %v4685_v4 }
 0x144   :  { %4260 = vmatprep.mubr.msk.bf16.mxu0 %vm312_vm0, %v4686_v5 }
 0x14b   :  { %4261 = vmatmul.mubr.msk.bf16.gmra.mrb[8].mxu0 %vm312_vm0, %v4687_v6 }
 0x14c   :  { %4264 = vmatprep.mubr.msk.bf16.mxu0 %vm312_vm0, %v4688_v7 }
 0x153   :  { %4265 = vmatmul.mubr.msk.bf16.gmra.mrb[12].mxu0 %vm312_vm0, %v4689_v8 }
 0x20e   :  { %v4254_v9 = vpop.f32.mrb[0].mxu0 }
 0x20f   :  { %v371_v10 = vpop.f32.mrb[1].mxu0  ;;  %v644_v11 = vsel %vm436_vm1, %v4254_v9, 0.0 }
 0x210   :  { %645 = vadd.xlane.f32.xlu0 %v644_v11  ;;  %v4255_v12 = vpop.f32.mrb[2].mxu0  ;;  %v638_v15 = vsel %vm436_vm1, %v371_v10, 0.0 }
 0x211   :  { %v374_v13 = vpop.f32.mrb[3].mxu0  ;;  %v647_v14 = vsel %vm436_vm1, %v4255_v12, 0.0 }
 0x212   :  { %648 = vadd.xlane.f32.xlu1 %v647_v14  ;;  %v641_v16 = vsel %vm436_vm1, %v374_v13, 0.0 }
 0x214   :  { %639 = vadd.xlane.f32.xlu0 %v638_v15 }
 0x216   :  { %642 = vadd.xlane.f32.xlu1 %v641_v16  ;;  %v4258_v17 = vpop.f32.mrb[4].mxu0 }
 0x217   :  { %v5772_v18 = vpop.f32.mrb[5].mxu0  ;;  %v656_v19 = vsel %vm436_vm1, %v4258_v17, 0.0 }
 0x218   :  { %657 = vadd.xlane.f32.xlu0 %v656_v19  ;;  %v4259_v20 = vpop.f32.mrb[6].mxu0  ;;  %v650_v23 = vsel %vm436_vm1, %v5772_v18, 0.0 }
 0x219   :  { %v5775_v21 = vpop.f32.mrb[7].mxu0  ;;  %v659_v22 = vsel %vm436_vm1, %v4259_v20, 0.0 }
 0x21a   :  { %660 = vadd.xlane.f32.xlu1 %v659_v22  ;;  %v653_v24 = vsel %vm436_vm1, %v5775_v21, 0.0 }
 0x21c   :  { %651 = vadd.xlane.f32.xlu0 %v650_v23 }
 0x21e   :  { %654 = vadd.xlane.f32.xlu1 %v653_v24  ;;  %v5782_v25 = vpop.f32.mrb[8].mxu0 }
 0x21f   :  { %v5784_v26 = vpop.f32.mrb[9].mxu0  ;;  %v668_v27 = vsel %vm436_vm1, %v5782_v25, 0.0 }
 0x220   :  { %669 = vadd.xlane.f32.xlu0 %v668_v27  ;;  %v5788_v28 = vpop.f32.mrb[10].mxu0  ;;  %v662_v31 = vsel %vm436_vm1, %v5784_v26, 0.0 }
 0x221   :  { %v5790_v29 = vpop.f32.mrb[11].mxu0  ;;  %v671_v30 = vsel %vm436_vm1, %v5788_v28, 0.0 }
 0x222   :  { %672 = vadd.xlane.f32.xlu1 %v671_v30  ;;  %v665_v32 = vsel %vm436_vm1, %v5790_v29, 0.0 }
 0x224   :  { %663 = vadd.xlane.f32.xlu0 %v662_v31 }
 0x226   :  { %666 = vadd.xlane.f32.xlu1 %v665_v32  ;;  %v5798_v33 = vpop.f32.mrb[12].mxu0 }
 0x227   :  { %v5800_v34 = vpop.f32.mrb[13].mxu0  ;;  %v437_v35 = vsel %vm436_vm1, %v5798_v33, 0.0 }
 0x228   :  { %438 = vadd.xlane.f32.xlu0 %v437_v35  ;;  %v5804_v36 = vpop.f32.mrb[14].mxu0  ;;  %v674_v39 = vsel %vm436_vm1, %v5800_v34, 0.0 }
 0x229   :  { %v5806_v37 = vpop.f32.mrb[15].mxu0  ;;  %v440_v40 = vsel %vm436_vm1, %v5804_v36, 0.0 }
 0x22a   :  { %v677_v38 = vsel %vm436_vm1, %v5806_v37, 0.0 }
 0x22b   :  { %678 = vadd.xlane.f32.xlu1 %v677_v38 }
 0x22c   :  { %675 = vadd.xlane.f32.xlu0 %v674_v39 }
 0x230   :  { %441 = vadd.xlane.f32.xlu0 %v440_v40 }
 0x29d   :  { %v646_v41 = vpop.xlane.xlu0 %645 }
 0x29e   :  { %v682_v42 = vmul.f32 0.03125, %v646_v41 }
 0x29f   :  { %v649_v43 = vpop.xlane.xlu1 %648 }
 0x2a0   :  { %v5814_v44 = vsub.f32 %v4254_v9, %v682_v42  ;;  %v683_v45 = vmul.f32 0.03125, %v649_v43 }
 0x2a1   :  { %v640_v46 = vpop.xlane.xlu0 %639 }
 0x2a2   :  { %v5816_v47 = vsub.f32 %v4255_v12, %v683_v45  ;;  %v680_v48 = vmul.f32 0.03125, %v640_v46  ;;  %v710_v49 = vmul.f32 %v5814_v44, %v5814_v44 }
 0x2a3   :  { %v643_v50 = vpop.xlane.xlu1 %642 }
 0x2a4   :  { %v5820_v51 = vsub.f32 %v371_v10, %v680_v48  ;;  %v681_v52 = vmul.f32 0.03125, %v643_v50  ;;  %v728_v53 = vsel %vm436_vm1, %v710_v49, 0.0  ;;  %v711_v54 = vmul.f32 %v5816_v47, %v5816_v47 }
 0x2a5   :  { %v658_v55 = vpop.xlane.xlu0 %657  ;;  %729 = vadd.xlane.f32.xlu0 %v728_v53 }
 0x2a6   :  { %v5825_v56 = vsub.f32 %v374_v13, %v681_v52  ;;  %v686_v57 = vmul.f32 0.03125, %v658_v55  ;;  %v731_v58 = vsel %vm436_vm1, %v711_v54, 0.0  ;;  %v708_v59 = vmul.f32 %v5820_v51, %v5820_v51 }
 0x2a7   :  { %v661_v60 = vpop.xlane.xlu1 %660  ;;  %732 = vadd.xlane.f32.xlu1 %v731_v58 }
 0x2a8   :  { %v5830_v61 = vsub.f32 %v4258_v17, %v686_v57  ;;  %v687_v62 = vmul.f32 0.03125, %v661_v60  ;;  %v722_v63 = vsel %vm436_vm1, %v708_v59, 0.0  ;;  %v709_v0 = vmul.f32 %v5825_v56, %v5825_v56 }
 0x2a9   :  { %v652_v1 = vpop.xlane.xlu0 %651  ;;  %723 = vadd.xlane.f32.xlu0 %v722_v63 }
 0x2aa   :  { %v5835_v2 = vsub.f32 %v4259_v20, %v687_v62  ;;  %v684_v3 = vmul.f32 0.03125, %v652_v1  ;;  %v725_v4 = vsel %vm436_vm1, %v709_v0, 0.0  ;;  %v714_v5 = vmul.f32 %v5830_v61, %v5830_v61  ;;  %v4690_v1 = vld [vmem:[#allocation10] sm:$0xff]  }
 0x2ab   :  { %v655_v6 = vpop.xlane.xlu1 %654  ;;  %726 = vadd.xlane.f32.xlu1 %v725_v4 }
 0x2ac   :  { %v5841_v7 = vsub.f32 %v5772_v18, %v684_v3  ;;  %v685_v8 = vmul.f32 0.03125, %v655_v6  ;;  %v740_v9 = vsel %vm436_vm1, %v714_v5, 0.0  ;;  %v715_v10 = vmul.f32 %v5835_v2, %v5835_v2 }
 0x2ad   :  { %v670_v11 = vpop.xlane.xlu0 %669  ;;  %741 = vadd.xlane.f32.xlu0 %v740_v9  ;;  %v9126_v3 = vmov 0.0  }
 0x2ae   :  { %v5847_v12 = vsub.f32 %v5775_v21, %v685_v8  ;;  %v690_v13 = vmul.f32 0.03125, %v670_v11  ;;  %v743_v14 = vsel %vm436_vm1, %v715_v10, 0.0  ;;  %v712_v15 = vmul.f32 %v5841_v7, %v5841_v7  ;;  %4268 = vmatprep.subr.bf16.mxu1 %v9126_v3  ;;  %4272 = vmatprep.mubr.msk.bf16.mxu1 %vm5403_vm2, %v9126_v3 }
 0x2af   :  { %v673_v16 = vpop.xlane.xlu1 %672  ;;  %744 = vadd.xlane.f32.xlu1 %v743_v14  ;;  %4269 = vmatpush3.bf16.msra.mxu1 %v4690_v1 }
 0x2b0   :  { %v5853_v17 = vsub.f32 %v5782_v25, %v690_v13  ;;  %v691_v18 = vmul.f32 0.03125, %v673_v16  ;;  %v734_v19 = vsel %vm436_vm1, %v712_v15, 0.0  ;;  %v713_v20 = vmul.f32 %v5847_v12, %v5847_v12  ;;  %4270 = vmatprep.subr.bf16.mxu1 %v9126_v3 }
 0x2b1   :  { %v664_v22 = vpop.xlane.xlu0 %663  ;;  %735 = vadd.xlane.f32.xlu0 %v734_v19 }
 0x2b2   :  { %v5859_v21 = vsub.f32 %v5788_v28, %v691_v18  ;;  %v688_v23 = vmul.f32 0.03125, %v664_v22  ;;  %v737_v24 = vsel %vm436_vm1, %v713_v20, 0.0  ;;  %v718_v27 = vmul.f32 %v5853_v17, %v5853_v17  ;;  %v4147_v22 = vld [vmem:[#allocation7] ss:$0 sm:$0xff] }
 0x2b3   :  { %v667_v30 = vpop.xlane.xlu1 %666  ;;  %738 = vadd.xlane.f32.xlu1 %v737_v24  ;;  %v5907_v24 = vld [vmem:[#allocation14] ss:$0 sm:$0xff] }
 0x2b4   :  { %v5865_v25 = vsub.f32 %v5784_v26, %v688_v23  ;;  %v689_v31 = vmul.f32 0.03125, %v667_v30  ;;  %v752_v32 = vsel %vm436_vm1, %v718_v27, 0.0  ;;  %v719_v35 = vmul.f32 %v5859_v21, %v5859_v21 }
 0x2b5   :  { %v439_v38 = vpop.xlane.xlu0 %438  ;;  %753 = vadd.xlane.f32.xlu0 %v752_v32  ;;  %v4148_v32 = vld [vmem:[#allocation8] ss:$0 sm:$0xff] }
 0x2b6   :  { %v5871_v28 = vsub.f32 %v5790_v29, %v689_v31  ;;  %v444_v39 = vmul.f32 0.03125, %v439_v38  ;;  %v755_v40 = vsel %vm436_vm1, %v719_v35, 0.0  ;;  %v716_v41 = vmul.f32 %v5865_v25, %v5865_v25 }
 0x2b7   :  { %756 = vadd.xlane.f32.xlu1 %v755_v40 }
 0x2b8   :  { %v446_v26 = vsub.f32 %v5798_v33, %v444_v39  ;;  %v746_v42 = vsel %vm436_vm1, %v716_v41, 0.0  ;;  %v717_v43 = vmul.f32 %v5871_v28, %v5871_v28  ;;  %v679_v45 = vpop.xlane.xlu1 %678  ;;  %v5911_v39 = vld [vmem:[#allocation16] ss:$0 sm:$0xff] }
 0x2b9   :  { %v676_v46 = vpop.xlane.xlu0 %675  ;;  %747 = vadd.xlane.f32.xlu0 %v746_v42  ;;  %v693_v50 = vmul.f32 0.03125, %v679_v45 }
 0x2ba   :  { %v692_v48 = vmul.f32 0.03125, %v676_v46  ;;  %v749_v29 = vsel %vm436_vm1, %v717_v43, 0.0  ;;  %v448_v49 = vmul.f32 %v446_v26, %v446_v26  ;;  %v4692_v46 = vld [vmem:[%s9102_s6] sm:$0xff]  }
 0x2bb   :  { %750 = vadd.xlane.f32.xlu1 %v749_v29  ;;  %v5888_v58 = vsub.f32 %v5806_v37, %v693_v50  ;;  %v4691_v37 = vld [vmem:[#allocation10 + $0x8] sm:$0xff]   ;;  %v5934_v29 = vld [vmem:[%s9106_s10] sm:$0xff]  }
 0x2bc   :  { %v5882_v52 = vsub.f32 %v5800_v34, %v692_v48  ;;  %v450_v55 = vsel %vm436_vm1, %v448_v49, 0.0  ;;  %4271 = vmatpush3.bf16.msra.mxu1 %v4691_v37  ;;  %v4693_v48 = vld [vmem:[%s9102_s6 + $0x8] sm:$0xff]  }
 0x2bd   :  { %v442_v53 = vpop.xlane.xlu0 %441  ;;  %v721_v63 = vmul.f32 %v5888_v58, %v5888_v58  ;;  %4276 = vmatprep.subr.bf16.mxu1 %v9126_v3 }
 0x2be   :  { %v445_v54 = vmul.f32 0.03125, %v442_v53  ;;  %v720_v57 = vmul.f32 %v5882_v52, %v5882_v52 }
 0x2bf   :  { %451 = vadd.xlane.f32.xlu1 %v450_v55  ;;  %v761_v0 = vsel %vm436_vm1, %v721_v63, 0.0  ;;  %v4149_v55 = vld [vmem:[#allocation11] ss:$0 sm:$0xff] }
 0x2c0   :  { %v447_v59 = vsub.f32 %v5804_v36, %v445_v54  ;;  %v758_v60 = vsel %vm436_vm1, %v720_v57, 0.0 }
 0x2c1   :  { %759 = vadd.xlane.f32.xlu0 %v758_v60 }
 0x2c2   :  { %v449_v62 = vmul.f32 %v447_v59, %v447_v59 }
 0x2c4   :  { %v453_v34 = vsel %vm436_vm1, %v449_v62, 0.0 }
 0x2c5   :  { %454 = vadd.xlane.f32.xlu1 %v453_v34 }
 0x2c9   :  { %762 = vadd.xlane.f32.xlu1 %v761_v0 }
 0x332   :  { %v730_v49 = vpop.xlane.xlu0 %729 }
 0x333   :  { %v766_v1 = vmul.f32 0.03125, %v730_v49 }
 0x334   :  { %v733_v4 = vpop.xlane.xlu1 %732 }
 0x336   :  { %v724_v50 = vpop.xlane.xlu0 %723 }
 0x337   :  { %v764_v57 = vmul.f32 0.03125, %v724_v50 }
 0x338   :  { %v727_v5 = vpop.xlane.xlu1 %726 }
 0x339   :  { %v765_v54 = vmul.f32 0.03125, %v727_v5 }
 0x33a   :  { %v742_v53 = vpop.xlane.xlu0 %741 }
 0x33b   :  { %v779_v63 = vadd.f32 1e-05, %v765_v54 }
 0x33c   :  { %v5901_v6 = vpop.xlane.xlu1 %744 }
 0x33e   :  { %v736_v60 = vpop.xlane.xlu0 %735 }
 0x340   :  { %v739_v8 = vpop.xlane.xlu1 %738 }
 0x344   :  { %v5903_v9 = vpop.xlane.xlu1 %756 }
 0x348   :  { %v5905_v10 = vpop.xlane.xlu1 %750 }
 0x34c   :  { %v452_v11 = vpop.xlane.xlu1 %451 }
 0x34d   :  { %v456_v13 = vmul.f32 0.03125, %v452_v11 }
 0x34f   :  { %v458_v14 = vadd.f32 1e-05, %v456_v13 }
 0x351   :  { %4702 = vrsqrt.f32 %v458_v14  ;;  %v767_v14 = vmul.f32 0.03125, %v733_v4 }
 0x352   :  { %v455_v15 = vpop.xlane.xlu1 %454 }
 0x353   :  { %v457_v16 = vmul.f32 0.03125, %v455_v15  ;;  %v778_v15 = vadd.f32 1e-05, %v764_v57 }
 0x355   :  { %v459_v18 = vadd.f32 1e-05, %v457_v16 }
 0x357   :  { %4704 = vrsqrt.f32 %v459_v18  ;;  %v769_v18 = vmul.f32 0.03125, %v739_v8 }
 0x358   :  { %4706 = vrsqrt.f32 %v779_v63 }
 0x359   :  { %4708 = vrsqrt.f32 %v778_v15 }
 0x35b   :  { %v4703_v19 = vpop.eup %4702 }
 0x35c   :  { %v462_v20 = vmul.f32 %v4703_v19, %v446_v26  ;;  %v780_v19 = vadd.f32 1e-05, %v766_v1 }
 0x35e   :  { %v470_v30 = vmul.f32 %v4147_v22, %v462_v20  ;;  %v840_v31 = vmul.f32 %v5907_v24, %v462_v20  ;;  %v754_v20 = vpop.xlane.xlu0 %753  ;;  %4710 = vrsqrt.f32 %v780_v19 }
 0x360   :  { %v478_v40 = vadd.f32 %v4148_v32, %v470_v30  ;;  %v5914_v42 = vadd.f32 %v5911_v39, %v840_v31  ;;  %v768_v30 = vmul.f32 0.03125, %v736_v60  ;;  %v763_v60 = vpop.xlane.xlu1 %762 }
 0x361   :  { %v4705_v23 = vpop.eup %4704 }
 0x362   :  { %v463_v27 = vmul.f32 %v4705_v23, %v447_v59  ;;  %v782_v8 = vadd.f32 1e-05, %v768_v30  ;;  %v4707_v49 = vpop.eup %4706 }
 0x364   :  { %v471_v35 = vmul.f32 %v4147_v22, %v463_v27  ;;  %v841_v38 = vmul.f32 %v5907_v24, %v463_v27  ;;  %v781_v27 = vadd.f32 1e-05, %v767_v14  ;;  %v774_v14 = vmul.f32 0.03125, %v754_v20 }
 0x366   :  { %v479_v41 = vadd.f32 %v4148_v32, %v471_v35  ;;  %v5917_v26 = vadd.f32 %v5911_v39, %v841_v38  ;;  %v783_v32 = vadd.f32 1e-05, %v769_v18  ;;  %4712 = vrsqrt.f32 %v781_v27 }
 0x367   :  { %v788_v20 = vadd.f32 1e-05, %v774_v14 }
 0x368   :  { %v480_v43 = vpack.c.bf16 %v479_v41, %v478_v40  ;;  %v871_v45 = vpack.c.bf16 %v5917_v26, %v5914_v42  ;;  %v771_v40 = vmul.f32 0.03125, %v5901_v6  ;;  %v748_v41 = vpop.xlane.xlu0 %747  ;;  %v9150_v42 = vmov 32  }
 0x369   :  { %v772_v50 = vmul.f32 0.03125, %v748_v41  ;;  %4396 = vset.pattern.permute.xlu1 %v9150_v42  ;;  %v1010_v26 = vlaneseq }
 0x36a   :  { %4273 = vmatmul.mubr.msk.bf16.vlgmr.msra.gmra.mrb[0].mxu1 %vm436_vm1, %v480_v43  ;;  %v785_v54 = vadd.f32 1e-05, %v771_v40 }
 0x36b   :  { %4280 = vmatprep.mubr.msk.bf16.mxu1 %vm5403_vm2, %v9126_v3  ;;  %4277 = vmatpush3.bf16.msra.mxu1 %v4692_v46  ;;  %v773_v46 = vmul.f32 0.03125, %v5905_v10  ;;  %v786_v63 = vadd.f32 1e-05, %v772_v50 }
 0x36c   :  { %4278 = vmatprep.subr.bf16.mxu1 %v9126_v3  ;;  %v760_v1 = vpop.xlane.xlu0 %759 }
 0x36d   :  { %v787_v57 = vadd.f32 1e-05, %v773_v46 }
 0x36f   :  { %4279 = vmatpush3.bf16.msra.mxu1 %v4693_v48  ;;  %v770_v48 = vmul.f32 0.03125, %v742_v53 }
 0x370   :  { %4284 = vmatprep.subr.bf16.mxu1 %v5934_v29 }
 0x43d   :  { %v541_v59 = vpop.f32.mrb[0].mxu1 }
 0x43e   :  { %v5937_v62 = vadd.f32 %v4149_v55, %v541_v59  ;;  %v4274_v34 = vpop.f32.mrb[1].mxu1  ;;  %v784_v59 = vadd.f32 1e-05, %v770_v48 }
 0x43f   :  { %v544_v0 = vpop.f32.mrb[2].mxu1  ;;  %v807_v34 = vmul.f32 %v4707_v49, %v5825_v56 }
 0x440   :  { %v550_v37 = vmul.f32 0.044715, %v5937_v62  ;;  %v5940_v11 = vadd.f32 %v4149_v55, %v544_v0  ;;  %v4275_v13 = vpop.f32.mrb[3].mxu1  ;;  %v4709_v55 = vpop.eup %4708  ;;  %v775_v0 = vmul.f32 0.03125, %v5903_v9  ;;  %v548_v27 = vmul.f32 0.5, %v5937_v62 }
 0x441   :  { %v4711_v6 = vpop.eup %4710  ;;  %v806_v10 = vmul.f32 %v4709_v55, %v5820_v51  ;;  %v827_v15 = vmul.f32 %v5907_v24, %v807_v34 }
 0x442   :  { %v552_v16 = vmul.f32 %v550_v37, %v5937_v62  ;;  %v551_v5 = vmul.f32 0.044715, %v5940_v11  ;;  %v4713_v53 = vpop.eup %4712  ;;  %v777_v37 = vmul.f32 0.03125, %v763_v60  ;;  %v549_v30 = vmul.f32 0.5, %v5940_v11 }
 0x443   :  { %v809_v19 = vmul.f32 %v4713_v53, %v5816_v47  ;;  %v826_v9 = vmul.f32 %v5907_v24, %v806_v10 }
 0x444   :  { %v554_v22 = vmul.f32 %v552_v16, %v5937_v62  ;;  %v553_v23 = vmul.f32 %v551_v5, %v5940_v11  ;;  %v776_v5 = vmul.f32 0.03125, %v760_v1  ;;  %v791_v51 = vadd.f32 1e-05, %v777_v37 }
 0x445   :  { %v848_v40 = vadd.f32 %v5911_v39, %v826_v9 }
 0x446   :  { %v556_v31 = vadd.f32 %v554_v22, %v5937_v62  ;;  %v555_v4 = vmul.f32 %v553_v23, %v5940_v11  ;;  %v789_v22 = vadd.f32 1e-05, %v775_v0  ;;  %v829_v62 = vmul.f32 %v5907_v24, %v809_v19 }
 0x448   :  { %v558_v35 = vmul.f32 0.7978846, %v556_v31  ;;  %v557_v38 = vadd.f32 %v555_v4, %v5940_v11  ;;  %v849_v4 = vadd.f32 %v5911_v39, %v827_v15  ;;  %v851_v55 = vadd.f32 %v5911_v39, %v829_v62  ;;  %v4153_v62 = vld [vmem:[#allocation13] ss:$0 sm:$0xff] }
 0x44a   :  { %4714 = vtanh.f32 %v558_v35  ;;  %v559_v43 = vmul.f32 0.7978846, %v557_v38  ;;  %v808_v35 = vmul.f32 %v4711_v6, %v5814_v44  ;;  %v790_v38 = vadd.f32 1e-05, %v776_v5 }
 0x44b   :  { %4716 = vrsqrt.f32 %v783_v32 }
 0x44c   :  { %4718 = vtanh.f32 %v559_v43  ;;  %v4695_v43 = vld [vmem:[%s9106_s10 + $0x8] sm:$0xff]   ;;  %v828_v49 = vmul.f32 %v5907_v24, %v808_v35 }
 0x44d   :  { %4720 = vrsqrt.f32 %v782_v8 }
 0x44e   :  { %4722 = vrsqrt.f32 %v785_v54  ;;  %v850_v34 = vadd.f32 %v5911_v39, %v828_v49 }
 0x44f   :  { %4724 = vrsqrt.f32 %v787_v57 }
 0x450   :  { %4726 = vrsqrt.f32 %v784_v59  ;;  %v865_v0 = vpack.c.bf16 %v851_v55, %v850_v34 }
 0x451   :  { %4728 = vrsqrt.f32 %v786_v63 }
 0x452   :  { %4730 = vrsqrt.f32 %v789_v22 }
 0x453   :  { %4732 = vrsqrt.f32 %v791_v51 }
 0x454   :  { %v4715_v13 = vpop.eup %4714  ;;  %4734 = vrsqrt.f32 %v788_v20 }
 0x455   :  { %v4717_v16 = vpop.eup %4716  ;;  %v562_v56 = vadd.f32 1.0, %v4715_v13  ;;  %4736 = vrsqrt.f32 %v790_v38 }
 0x456   :  { %v4719_v18 = vpop.eup %4718  ;;  %v811_v32 = vmul.f32 %v4717_v16, %v5847_v12  ;;  %v864_v12 = vpack.c.bf16 %v849_v4, %v848_v40 }
 0x457   :  { %v4721_v23 = vpop.eup %4720  ;;  %v563_v31 = vadd.f32 1.0, %v4719_v18  ;;  %v564_v8 = vmul.f32 %v562_v56, %v548_v27 }
 0x458   :  { %v810_v41 = vmul.f32 %v4721_v23, %v5841_v7  ;;  %v4723_v46 = vpop.eup %4722  ;;  %v831_v44 = vmul.f32 %v5907_v24, %v811_v32  ;;  %v9148_v32 = vmov 41  }
 0x459   :  { %v565_v47 = vmul.f32 %v563_v31, %v549_v30  ;;  %v4725_v48 = vpop.eup %4724  ;;  %v813_v57 = vmul.f32 %v4723_v46, %v5835_v2  ;;  %4405 = vset.pattern.permute.xlu0 %v9148_v32 }
 0x45a   :  { %v4727_v7 = vpop.eup %4726  ;;  %v830_v50 = vmul.f32 %v5907_v24, %v810_v41  ;;  %v853_v59 = vadd.f32 %v5911_v39, %v831_v44  ;;  %v815_v60 = vmul.f32 %v4725_v48, %v5871_v28 }
 0x45b   :  { %v566_v11 = vpack.c.bf16 %v565_v47, %v564_v8  ;;  %v4729_v54 = vpop.eup %4728  ;;  %v812_v63 = vmul.f32 %v4727_v7, %v5830_v61  ;;  %v833_v1 = vmul.f32 %v5907_v24, %v813_v57  ;;  %v1009_v8 = vld [vmem:[#allocation17] sm:$0xf] }
 0x45c   :  { %v814_v6 = vmul.f32 %v4729_v54, %v5865_v25  ;;  %v4731_v10 = vpop.eup %4730  ;;  %v835_v53 = vmul.f32 %v5907_v24, %v815_v60 }
 0x45d   :  { %4281 = vmatmul.mubr.msk.bf16.vlgmr.msra.gmra.mrb[4].mxu1 %vm436_vm1, %v566_v11  ;;  %v4733_v37 = vpop.eup %4732  ;;  %v832_v28 = vmul.f32 %v5907_v24, %v812_v63  ;;  %v855_v14 = vadd.f32 %v5911_v39, %v833_v1  ;;  %v817_v15 = vmul.f32 %v4731_v10, %v5859_v21 }
 0x45e   :  { %4285 = vmatpush3.bf16.msra.mxu1 %v5934_v29  ;;  %4288 = vmatprep.mubr.msk.bf16.mxu1 %vm436_vm1, %v864_v12  ;;  %v852_v29 = vadd.f32 %v5911_v39, %v830_v50  ;;  %v4735_v61 = vpop.eup %4734  ;;  %v834_v13 = vmul.f32 %v5907_v24, %v814_v6  ;;  %v857_v16 = vadd.f32 %v5911_v39, %v835_v53 }
 0x45f   :  { %4286 = vmatprep.subr.bf16.mxu1 %v4695_v43  ;;  %v4737_v25 = vpop.eup %4736  ;;  %v819_v5 = vmul.f32 %v4733_v37, %v5888_v58  ;;  %v854_v56 = vadd.f32 %v5911_v39, %v832_v28  ;;  %v816_v18 = vmul.f32 %v4735_v61, %v5853_v17  ;;  %v837_v23 = vmul.f32 %v5907_v24, %v817_v15  ;;  %v6061_v28 = vld [vmem:[#allocation19] ss:$0 sm:$0xff] }
 0x460   :  { %v866_v2 = vpack.c.bf16 %v853_v59, %v852_v29  ;;  %v856_v19 = vadd.f32 %v5911_v39, %v834_v13  ;;  %v818_v22 = vmul.f32 %v4737_v25, %v5882_v52 }
 0x461   :  { %v867_v9 = vpack.c.bf16 %v855_v14, %v854_v56  ;;  %v839_v27 = vmul.f32 %v5907_v24, %v819_v5  ;;  %v836_v21 = vmul.f32 %v5907_v24, %v816_v18  ;;  %v859_v17 = vadd.f32 %v5911_v39, %v837_v23 }
 0x462   :  { %4287 = vmatpush3.bf16.msra.mxu1 %v4695_v43  ;;  %v868_v51 = vpack.c.bf16 %v857_v16, %v856_v19  ;;  %v838_v58 = vmul.f32 %v5907_v24, %v818_v22  ;;  %v4696_v24 = vld [vmem:[%s9109_s13] sm:$0xff]  }
 0x463   :  { %4324 = vmatprep.subr.bf16.mxu1 %v9126_v3  ;;  %v861_v30 = vadd.f32 %v5911_v39, %v839_v27  ;;  %v858_v52 = vadd.f32 %v5911_v39, %v836_v21  ;;  %4304 = vmatprep.subr.bf16.mxu0 %v4696_v24 }
 0x464   :  { %v860_v31 = vadd.f32 %v5911_v39, %v838_v58  ;;  %4305 = vmatpush3.bf16.msra.mxu0 %v4696_v24  ;;  %v4697_v39 = vld [vmem:[%s9109_s13 + $0x8] sm:$0xff]   ;;  %s5430_s13 = smov 96  }
 0x465   :  { %4289 = vmatmul.mubr.msk.bf16.vlgmr.msra.gmra.mrb[8].mxu1 %vm436_vm1, %v865_v0  ;;  %v869_v20 = vpack.c.bf16 %v859_v17, %v858_v52  ;;  %4306 = vmatprep.subr.bf16.mxu0 %v4697_v39 }
 0x466   :  { %4292 = vmatprep.mubr.msk.bf16.mxu1 %vm436_vm1, %v866_v2  ;;  %v870_v4 = vpack.c.bf16 %v861_v30, %v860_v31 }
 0x468   :  { %4307 = vmatpush3.bf16.msra.mxu0 %v4697_v39 }
 0x46d   :  { %4293 = vmatmul.mubr.msk.bf16.gmra.mrb[12].mxu1 %vm436_vm1, %v867_v9 }
 0x46e   :  { %4296 = vmatprep.mubr.msk.bf16.mxu1 %vm436_vm1, %v868_v51 }
 0x475   :  { %4297 = vmatmul.mubr.msk.bf16.gmra.mrb[16].mxu1 %vm436_vm1, %v869_v20 }
 0x476   :  { %4300 = vmatprep.mubr.msk.bf16.mxu1 %vm436_vm1, %v870_v4 }
 0x47d   :  { %4301 = vmatmul.mubr.msk.bf16.gmra.mrb[20].mxu1 %vm436_vm1, %v871_v45  ;;  %v6023_v45 = vshrl.u32 %v1010_v26, 7 }
 0x47e   :  { %4328 = vmatprep.mubr.msk.bf16.mxu1 %vm5403_vm2, %v9126_v3 }
 0x47f   :  { %v9130_v35 = vsub.s32 0, %v6023_v45  ;;  %v9129_v38 = vsub.s32 1, %v6023_v45  ;;  %v9128_v41 = vsub.s32 2, %v6023_v45  ;;  %v9131_v7 = vsub.s32 3, %v6023_v45 }
 0x481   :  { %v6029_v47 = vrot.slane %v1009_v8, %v9130_v35  ;;  %v6033_v40 = vrot.slane %v1009_v8, %v9129_v38  ;;  %v6038_v43 = vrot.slane %v1009_v8, %v9128_v41  ;;  %v6052_v34 = vrot.slane %v1009_v8, %v9131_v7 }
 0x482   :  { %v9152_v7 = vmov 43  }
 0x483   :  { %v1014_v46 = vmul.f32 0.0, %v6029_v47  ;;  %v1029_v12 = vmul.f32 0.0, %v6033_v40  ;;  %v1059_v59 = vmul.f32 0.0, %v6038_v43 }
 0x485   :  { %v1042_v57 = vadd.f32 %v1029_v12, %v1014_v46 }
 0x487   :  { %v1074_v29 = vadd.f32 %v1059_v59, %v1042_v57 }
 0x530   :  { %v627_v11 = vpop.f32.mrb[4].mxu1 }
 0x531   :  { %v628_v44 = vadd.f32 %v4153_v62, %v627_v11  ;;  %v4282_v48 = vpop.f32.mrb[5].mxu1 }
 0x532   :  { %v630_v49 = vpop.f32.mrb[6].mxu1 }
 0x533   :  { %v6044_v50 = vadd.f32 %v5798_v33, %v628_v44  ;;  %v631_v54 = vadd.f32 %v4153_v62, %v630_v49  ;;  %v4283_v55 = vpop.f32.mrb[7].mxu1 }
 0x535   :  { %9226 = vst [vmem:[#allocation36_spill] sm:$0xff] %v6044_v50  ;;  %v6048_v60 = vadd.f32 %v5804_v36, %v631_v54 }
 0x537   :  { %9227 = vst [vmem:[#allocation37_spill] sm:$0xff] %v6048_v60 }
 0x538   :  { %v4290_v63 = vpop.f32.mrb[8].mxu1 }
 0x539   :  { %v1032_v6 = vmul.f32 %v4290_v63, %v6033_v40  ;;  %v946_v0 = vpop.f32.mrb[9].mxu1  ;;  %v1062_v36 = vmul.f32 %v4290_v63, %v6038_v43  ;;  %v1095_v37 = vmul.f32 %v4290_v63, %v6052_v34  ;;  %v1017_v39 = vmul.f32 %v4290_v63, %v6029_v47 }
 0x53a   :  { %v1015_v33 = vmul.f32 %v6029_v47, %v946_v0  ;;  %v1030_v1 = vmul.f32 %v6033_v40, %v946_v0  ;;  %v1060_v10 = vmul.f32 %v6038_v43, %v946_v0  ;;  %v1093_v2 = vmul.f32 %v6052_v34, %v946_v0  ;;  %v4291_v53 = vpop.f32.mrb[10].mxu1 }
 0x53b   :  { %v1033_v61 = vmul.f32 %v4291_v53, %v6033_v40  ;;  %v949_v13 = vpop.f32.mrb[11].mxu1  ;;  %v1096_v23 = vmul.f32 %v4291_v53, %v6052_v34  ;;  %v1063_v8 = vmul.f32 %v4291_v53, %v6038_v43 }
 0x53c   :  { %v1043_v25 = vadd.f32 %v1030_v1, %v1014_v46  ;;  %v1045_v14 = vadd.f32 %v1032_v6, %v1015_v33  ;;  %v1075_v15 = vadd.f32 %v1060_v10, %v1042_v57  ;;  %v1109_v16 = vadd.f32 %v1093_v2, %v1074_v29 }
 0x53d   :  { %v1016_v5 = vmul.f32 %v6029_v47, %v949_v13  ;;  %v1061_v56 = vmul.f32 %v6038_v43, %v949_v13  ;;  %v1094_v18 = vmul.f32 %v6052_v34, %v949_v13  ;;  %v1031_v30 = vmul.f32 %v6033_v40, %v949_v13 }
 0x53e   :  { %v1111_v19 = vadd.f32 %v1095_v37, %v1075_v15  ;;  %v6068_v22 = vadd.f32 %v6061_v28, %v1109_v16  ;;  %v1077_v9 = vadd.f32 %v1062_v36, %v1043_v25  ;;  %v1018_v10 = vmul.f32 %v4291_v53, %v6029_v47 }
 0x53f   :  { %v1046_v51 = vadd.f32 %v1033_v61, %v1016_v5  ;;  %v1076_v27 = vadd.f32 %v1061_v56, %v1042_v57  ;;  %v1110_v21 = vadd.f32 %v1094_v18, %v1074_v29  ;;  %v1044_v54 = vadd.f32 %v1031_v30, %v1014_v46 }
 0x540   :  { %v6072_v58 = vadd.f32 %v6061_v28, %v1111_v19  ;;  %v4170_v17 = vmul.f32 -1.442695, %v6068_v22  ;;  %v4294_v52 = vpop.f32.mrb[12].mxu1 }
 0x541   :  { %v1112_v31 = vadd.f32 %v1096_v23, %v1076_v27  ;;  %v6077_v20 = vadd.f32 %v6061_v28, %v1110_v21  ;;  %v1036_v4 = vmul.f32 %v4294_v52, %v6033_v40  ;;  %v962_v24 = vpop.f32.mrb[13].mxu1  ;;  %v1099_v6 = vmul.f32 %v4294_v52, %v6052_v34 }
 0x542   :  { %4738 = vpow2.f32 %v4170_v17  ;;  %v4172_v26 = vmul.f32 -1.442695, %v6072_v58  ;;  %v6083_v62 = vpop.f32.mrb[14].mxu1  ;;  %v1019_v44 = vmul.f32 %v6029_v47, %v962_v24  ;;  %v1034_v48 = vmul.f32 %v6033_v40, %v962_v24 }
 0x543   :  { %v6086_v11 = vadd.f32 %v6061_v28, %v1112_v31  ;;  %v4171_v12 = vmul.f32 -1.442695, %v6077_v20  ;;  %v965_v49 = vpop.f32.mrb[15].mxu1  ;;  %v1064_v55 = vmul.f32 %v6038_v43, %v962_v24  ;;  %v1097_v57 = vmul.f32 %v6052_v34, %v962_v24 }
 0x544   :  { %4740 = vpow2.f32 %v4172_v26  ;;  %v1047_v63 = vadd.f32 %v1034_v48, %v1017_v39  ;;  %v1049_v29 = vadd.f32 %v1036_v4, %v1019_v44  ;;  %v1037_v1 = vmul.f32 %v6083_v62, %v6033_v40 }
 0x545   :  { %4742 = vpow2.f32 %v4171_v12  ;;  %v4173_v59 = vmul.f32 -1.442695, %v6086_v11  ;;  %v1079_v0 = vadd.f32 %v1064_v55, %v1045_v14  ;;  %v1113_v33 = vadd.f32 %v1097_v57, %v1077_v9 }
 0x546   :  { %v1020_v46 = vmul.f32 %v6029_v47, %v965_v49  ;;  %v1035_v2 = vmul.f32 %v6033_v40, %v965_v49  ;;  %v1065_v61 = vmul.f32 %v6038_v43, %v965_v49  ;;  %v1078_v13 = vadd.f32 %v1063_v8, %v1044_v54 }
 0x547   :  { %4744 = vpow2.f32 %v4173_v59  ;;  %v6100_v36 = vadd.f32 %v1099_v6, %v1079_v0  ;;  %v6103_v37 = vadd.f32 %v6061_v28, %v1113_v33  ;;  %v1021_v14 = vmul.f32 %v4294_v52, %v6029_v47 }
 0x548   :  { %v4298_v25 = vpop.f32.mrb[16].mxu1  ;;  %v1048_v15 = vadd.f32 %v1035_v2, %v1018_v10  ;;  %v1050_v16 = vadd.f32 %v1037_v1, %v1020_v46  ;;  %v1098_v53 = vmul.f32 %v6052_v34, %v965_v49  ;;  %v1066_v56 = vmul.f32 %v4294_v52, %v6038_v43 }
 0x549   :  { %v978_v5 = vpop.f32.mrb[17].mxu1  ;;  %v4174_v18 = vmul.f32 -1.442695, %v6103_v37  ;;  %v1100_v19 = vmul.f32 %v6083_v62, %v6052_v34  ;;  %v1080_v9 = vadd.f32 %v1065_v61, %v1046_v51  ;;  %v1067_v27 = vmul.f32 %v6083_v62, %v6038_v43 }
 0x54a   :  { %v4299_v23 = vpop.f32.mrb[18].mxu1  ;;  %v1114_v21 = vadd.f32 %v1098_v53, %v1078_v13  ;;  %v1040_v17 = vmul.f32 %v4298_v25, %v6033_v40  ;;  %v1068_v30 = vmul.f32 %v6038_v43, %v978_v5  ;;  %v1103_v52 = vmul.f32 %v4298_v25, %v6052_v34 }
 0x54b   :  { %v981_v31 = vpop.f32.mrb[19].mxu1  ;;  %v6116_v24 = vadd.f32 %v1100_v19, %v1080_v9  ;;  %v1081_v39 = vadd.f32 %v1066_v56, %v1047_v63  ;;  %v1101_v26 = vmul.f32 %v6052_v34, %v978_v5  ;;  %4746 = vpow2.f32 %v4174_v18 }
 0x54c   :  { %v4739_v4 = vpop.eup %4738  ;;  %v6121_v51 = vadd.f32 %v6061_v28, %v1114_v21  ;;  %v1083_v12 = vadd.f32 %v1068_v30, %v1049_v29  ;;  %v1070_v48 = vmul.f32 %v4298_v25, %v6038_v43  ;;  %v1023_v49 = vmul.f32 %v6029_v47, %v978_v5 }
 0x54d   :  { %v1196_v8 = vadd.f32 1.0, %v4739_v4  ;;  %v1038_v54 = vmul.f32 %v6033_v40, %v978_v5  ;;  %v1117_v55 = vadd.f32 %v1101_v26, %v1081_v39  ;;  %v1041_v0 = vmul.f32 %v4299_v23, %v6033_v40 }
 0x54e   :  { %v4741_v44 = vpop.eup %4740  ;;  %v4175_v63 = vmul.f32 -1.442695, %v6121_v51  ;;  %v6127_v6 = vadd.f32 %v1103_v52, %v1083_v12  ;;  %v1104_v29 = vmul.f32 %v4299_v23, %v6052_v34  ;;  %v1069_v1 = vmul.f32 %v6038_v43, %v981_v31 }
 0x54f   :  { %v4743_v57 = vpop.eup %4742  ;;  %v1198_v59 = vadd.f32 1.0, %v4741_v44  ;;  %4748 = vrcp.f32 %v1196_v8  ;;  %v1024_v2 = vmul.f32 %v6029_v47, %v981_v31  ;;  %v1082_v61 = vadd.f32 %v1067_v27, %v1048_v15 }
 0x550   :  { %v1197_v33 = vadd.f32 1.0, %v4743_v57  ;;  %v6132_v10 = vpop.f32.mrb[20].mxu1  ;;  %v1102_v13 = vmul.f32 %v6052_v34, %v981_v31  ;;  %v6137_v5 = vadd.f32 %v6061_v28, %v1117_v55  ;;  %v1084_v56 = vadd.f32 %v1069_v1, %v1050_v16 }
 0x551   :  { %9228 = vst [vmem:[#allocation38_spill] sm:$0xff] %v6132_v10  ;;  %v4745_v46 = vpop.eup %4744  ;;  %4750 = vrcp.f32 %v1198_v59  ;;  %v994_v25 = vpop.f32.mrb[21].mxu1  ;;  %v1039_v19 = vmul.f32 %v6033_v40, %v981_v31  ;;  %v1051_v21 = vadd.f32 %v1038_v54, %v1021_v14  ;;  %v1053_v15 = vadd.f32 %v1040_v17, %v1023_v49 }
 0x552   :  { %v1199_v53 = vadd.f32 1.0, %v4745_v46  ;;  %4752 = vrcp.f32 %v1197_v33  ;;  %v6139_v18 = vpop.f32.mrb[22].mxu1  ;;  %v1118_v9 = vadd.f32 %v1102_v13, %v1082_v61  ;;  %v1120_v4 = vadd.f32 %v1104_v29, %v1084_v56 }
 0x553   :  { %9229 = vst [vmem:[#allocation39_spill] sm:$0xff] %v6139_v18  ;;  %4754 = vpow2.f32 %v4175_v63  ;;  %v997_v30 = vpop.f32.mrb[23].mxu1  ;;  %v1072_v27 = vmul.f32 %v6038_v43, %v994_v25  ;;  %v1022_v52 = vmul.f32 %v6083_v62, %v6029_v47  ;;  %v1085_v16 = vadd.f32 %v1070_v48, %v1051_v21 }
 0x554   :  { %4756 = vrcp.f32 %v1199_v53  ;;  %v6146_v39 = vadd.f32 %v6061_v28, %v1118_v9  ;;  %v1105_v26 = vmul.f32 %v6052_v34, %v994_v25  ;;  %v1107_v40 = vmul.f32 %v6132_v10, %v6052_v34 }
 0x555   :  { %v1087_v31 = vadd.f32 %v1072_v27, %v1053_v15  ;;  %v4747_v14 = vpop.eup %4746  ;;  %v4178_v8 = vmul.f32 -1.442695, %v6137_v5  ;;  %v1071_v17 = vmul.f32 %v4299_v23, %v6038_v43  ;;  %v1052_v44 = vadd.f32 %v1039_v19, %v1022_v52 }
 0x556   :  { %v1121_v12 = vadd.f32 %v1105_v26, %v1085_v16  ;;  %v4179_v49 = vmul.f32 -1.442695, %v6146_v39  ;;  %v1054_v62 = vadd.f32 %v1041_v0, %v1024_v2  ;;  %v1073_v54 = vmul.f32 %v6038_v43, %v997_v30 }
 0x557   :  { %v1123_v47 = vadd.f32 %v1107_v40, %v1087_v31  ;;  %v1086_v48 = vadd.f32 %v1071_v17, %v1052_v44  ;;  %v1106_v55 = vmul.f32 %v6052_v34, %v997_v30  ;;  %v1200_v59 = vadd.f32 1.0, %v4747_v14 }
 0x558   :  { %v1108_v63 = vmul.f32 %v6139_v18, %v6052_v34  ;;  %v1088_v33 = vadd.f32 %v1073_v54, %v1054_v62  ;;  %4758 = vpow2.f32 %v4178_v8  ;;  %v6160_v1 = vadd.f32 %v6061_v28, %v6100_v36 }
 0x559   :  { %v4749_v57 = vpop.eup %4748  ;;  %v1122_v23 = vadd.f32 %v1106_v55, %v1086_v48  ;;  %4760 = vpow2.f32 %v4179_v49  ;;  %v6173_v36 = vadd.f32 %v6061_v28, %v1121_v12  ;;  %v6177_v56 = vadd.f32 %v6061_v28, %v6116_v24 }
 0x55a   :  { %v1124_v0 = vadd.f32 %v1108_v63, %v1088_v33  ;;  %v6166_v61 = vmul.f32 %v4749_v57, %v6068_v22  ;;  %v4176_v13 = vmul.f32 -1.442695, %v6160_v1  ;;  %4762 = vrcp.f32 %v1200_v59 }
 0x55b   :  { %v4751_v29 = vpop.eup %4750  ;;  %v6163_v2 = vadd.f32 %v6061_v28, %v1122_v23  ;;  %v6190_v21 = vadd.f32 %v6061_v28, %v6127_v6  ;;  %v4182_v30 = vmul.f32 -1.442695, %v6173_v36  ;;  %v6206_v52 = vadd.f32 %v6061_v28, %v1123_v47 }
 0x55c   :  { %v4753_v46 = vpop.eup %4752  ;;  %v6180_v19 = vmul.f32 %v4751_v29, %v6072_v58  ;;  %4764 = vpow2.f32 %v4176_v13  ;;  %v6196_v58 = vadd.f32 %v6061_v28, %v1120_v4  ;;  %v6202_v15 = vadd.f32 %v6061_v28, %v1124_v0 }
 0x55d   :  { %v4755_v43 = vpop.eup %4754  ;;  %v6169_v34 = vmul.f32 %v4753_v46, %v6077_v20  ;;  %v4183_v9 = vmul.f32 -1.442695, %v6163_v2  ;;  %v4180_v6 = vmul.f32 -1.442695, %v6190_v21  ;;  %v4184_v14 = vmul.f32 -1.442695, %v6206_v52 }
 0x55e   :  { %v4757_v25 = vpop.eup %4756  ;;  %v1201_v53 = vadd.f32 1.0, %v4755_v43  ;;  %v4181_v16 = vmul.f32 -1.442695, %v6196_v58  ;;  %v4185_v40 = vmul.f32 -1.442695, %v6202_v15  ;;  %v9252_v18 = vmov 40  }
 0x55f   :  { %v6183_v22 = vmul.f32 %v4757_v25, %v6086_v11  ;;  %v1260_v20 = vpack.c.bf16 %v6169_v34, %v6166_v61  ;;  %v4177_v11 = vmul.f32 -1.442695, %v6177_v56 }
 0x560   :  { %4766 = vrcp.f32 %v1201_v53 }
 0x561   :  { %v1261_v24 = vpack.c.bf16 %v6183_v22, %v6180_v19  ;;  %4308 = vmatprep.mubr.msk.bf16.mxu0 %vm436_vm1, %v1260_v20  ;;  %4768 = vpow2.f32 %v4183_v9 }
 0x562   :  { %v4759_v27 = vpop.eup %4758  ;;  %4770 = vpow2.f32 %v4177_v11 }
 0x563   :  { %4309 = vmatmul.mubr.msk.bf16.vlgmr.msra.gmra.mrb[16].mxu0 %vm436_vm1, %v1261_v24  ;;  %v4761_v4 = vpop.eup %4760  ;;  %4772 = vpow2.f32 %v4182_v30  ;;  %v1204_v44 = vadd.f32 1.0, %v4759_v27 }
 0x564   :  { %v4763_v26 = vpop.eup %4762  ;;  %4774 = vpow2.f32 %v4180_v6  ;;  %v1205_v17 = vadd.f32 1.0, %v4761_v4 }
 0x565   :  { %4776 = vpow2.f32 %v4181_v16  ;;  %v6212_v12 = vmul.f32 %v4763_v26, %v6103_v37 }
 0x566   :  { %v4765_v31 = vpop.eup %4764  ;;  %4778 = vpow2.f32 %v4185_v40 }
 0x567   :  { %4780 = vpow2.f32 %v4184_v14  ;;  %v1202_v47 = vadd.f32 1.0, %v4765_v31 }
 0x568   :  { %4782 = vrcp.f32 %v1205_v17 }
 0x569   :  { %4784 = vrcp.f32 %v1204_v44  ;;  %v6273_v44 = vld [vmem:[#allocation20] ss:$0 sm:$0xff] }
 0x56a   :  { %v4767_v8 = vpop.eup %4766  ;;  %4786 = vrcp.f32 %v1202_v47 }
 0x56b   :  { %v6215_v28 = vmul.f32 %v4767_v8, %v6121_v51  ;;  %v4769_v62 = vpop.eup %4768 }
 0x56c   :  { %v4771_v54 = vpop.eup %4770  ;;  %v1209_v55 = vadd.f32 1.0, %v4769_v62  ;;  %v9134_v62 = vmov 44  }
 0x56d   :  { %v1262_v49 = vpack.c.bf16 %v6215_v28, %v6212_v12  ;;  %v4773_v48 = vpop.eup %4772  ;;  %v1203_v37 = vadd.f32 1.0, %v4771_v54  ;;  %v9154_v54 = vmov 33  }
 0x56e   :  { %v4775_v57 = vpop.eup %4774  ;;  %v1208_v63 = vadd.f32 1.0, %v4773_v48  ;;  %v9132_v48 = vmov 46  }
 0x56f   :  { %4312 = vmatprep.mubr.msk.bf16.mxu0 %vm436_vm1, %v1262_v49  ;;  %v4777_v51 = vpop.eup %4776  ;;  %4788 = vrcp.f32 %v1203_v37  ;;  %v1206_v59 = vadd.f32 1.0, %v4775_v57  ;;  %v9166_v37 = vmov 47   ;;  %v9158_v57 = vmov 35  }
 0x570   :  { %v1207_v33 = vadd.f32 1.0, %v4777_v51  ;;  %4790 = vrcp.f32 %v1209_v55  ;;  %v4779_v29 = vpop.eup %4778  ;;  %v9144_v55 = vmov 34   ;;  %v9142_v51 = vmov 36  }
 0x571   :  { %v4781_v23 = vpop.eup %4780  ;;  %v1211_v0 = vadd.f32 1.0, %v4779_v29 }
 0x572   :  { %4792 = vrcp.f32 %v1207_v33  ;;  %v4783_v46 = vpop.eup %4782  ;;  %v1210_v25 = vadd.f32 1.0, %v4781_v23 }
 0x573   :  { %4794 = vrcp.f32 %v1206_v59  ;;  %v4785_v43 = vpop.eup %4784  ;;  %v6221_v53 = vmul.f32 %v4783_v46, %v6146_v39  ;;  %v9160_v59 = vmov 37  }
 0x574   :  { %4796 = vrcp.f32 %v1208_v63  ;;  %v4787_v13 = vpop.eup %4786  ;;  %v6224_v9 = vmul.f32 %v4785_v43, %v6137_v5  ;;  %v9140_v63 = vmov 38  }
 0x575   :  { %9230 = vst [vmem:[#allocation40_spill] sm:$0xff] %v6221_v53  ;;  %4798 = vrcp.f32 %v1211_v0  ;;  %v6227_v24 = vmul.f32 %v4787_v13, %v6160_v1  ;;  %v9156_v0 = vmov 39  }
 0x576   :  { %4800 = vrcp.f32 %v1210_v25  ;;  %v1264_v6 = vpack.c.bf16 %v6221_v53, %v6224_v9 }
 0x579   :  { %v4789_v20 = vpop.eup %4788 }
 0x57a   :  { %v6230_v11 = vmul.f32 %v4789_v20, %v6177_v56  ;;  %v4791_v30 = vpop.eup %4790 }
 0x57b   :  { %v6241_v1 = vmul.f32 %v4791_v30, %v6163_v2  ;;  %v9146_v30 = vmov 40  }
 0x57c   :  { %v4793_v27 = vpop.eup %4792  ;;  %v1263_v39 = vpack.c.bf16 %v6230_v11, %v6227_v24 }
 0x57d   :  { %v4795_v16 = vpop.eup %4794  ;;  %v6238_v5 = vmul.f32 %v4793_v27, %v6196_v58  ;;  %9232 = vst [vmem:[#allocation42_spill] sm:$0xff] %v6241_v1 }
 0x57e   :  { %v4797_v4 = vpop.eup %4796  ;;  %4313 = vmatmul.mubr.msk.bf16.gmra.mrb[20].mxu0 %vm436_vm1, %v1263_v39  ;;  %v6245_v56 = vmul.f32 %v4795_v16, %v6190_v21 }
 0x57f   :  { %9231 = vst [vmem:[#allocation41_spill] sm:$0xff] %v6238_v5  ;;  %4316 = vmatprep.mubr.msk.bf16.mxu0 %vm436_vm1, %v1264_v6  ;;  %v6248_v26 = vmul.f32 %v4797_v4, %v6173_v36  ;;  %v4799_v31 = vpop.eup %4798  ;;  %v9138_v6 = vmov 42  }
 0x580   :  { %v1265_v40 = vpack.c.bf16 %v6238_v5, %v6245_v56  ;;  %v4801_v58 = vpop.eup %4800  ;;  %v6255_v8 = vmul.f32 %v4799_v31, %v6202_v15  ;;  %v9271_v5 = vmov 45  }
 0x581   :  { %v1266_v14 = vpack.c.bf16 %v6241_v1, %v6248_v26  ;;  %v6260_v2 = vmul.f32 %v4801_v58, %v6206_v52  ;;  %v9255_v1 = vmov 34  }
 0x582   :  { %9233 = vst [vmem:[#allocation43_spill] sm:$0xff] %v6255_v8 }
 0x583   :  { %9234 = vst [vmem:[#allocation44_spill] sm:$0xff] %v6260_v2  ;;  %v1267_v36 = vpack.c.bf16 %v6255_v8, %v6260_v2  ;;  %v9264_v8 = vmov 41  }
 0x586   :  { %4317 = vmatmul.mubr.msk.bf16.gmra.mrb[24].mxu0 %vm436_vm1, %v1265_v40 }
 0x587   :  { %4320 = vmatprep.mubr.msk.bf16.mxu0 %vm436_vm1, %v1266_v14  ;;  %v9136_v14 = vmov 45  }
 0x58e   :  { %4321 = vmatmul.mubr.msk.bf16.gmra.mrb[28].mxu0 %vm436_vm1, %v1267_v36 }
 0x636   :  { %v6265_v21 = vpop.f32.mrb[16].mxu0 }
 0x637   :  { %2591 = vperm.xlu0 %4405, %v6265_v21   ;;  %2002 = vperm.xlu1 %4396, %v6265_v21   ;;  %v6269_v15 = vpop.f32.mrb[17].mxu0 }
 0x638   :  { %v6271_v17 = vpop.f32.mrb[18].mxu0 }
 0x639   :  { %v6275_v49 = vpop.f32.mrb[19].mxu0  ;;  %v6279_v52 = vadd.f32 %v6271_v17, %v6273_v44 }
 0x63a   :  { %v6283_v47 = vadd.f32 %v6273_v44, %v6275_v49 }
 0x63b   :  { %4408 = vset.pattern.permute.xlu0 %v9134_v62  ;;  %4397 = vset.pattern.permute.xlu1 %v9154_v54  ;;  %vm1431_vm13 = vcmp.gt.f32.partialorder %v6279_v52, 20.0 }
 0x63c   :  { %2783 = vperm.xlu0 %4408, %v6265_v21   ;;  %2079 = vperm.xlu1 %4397, %v6265_v21   ;;  %vm1429_vm14 = vcmp.gt.f32.partialorder %v6283_v47, 20.0 }
 0x640   :  { %4410 = vset.pattern.permute.xlu0 %v9132_v48  ;;  %4398 = vset.pattern.permute.xlu1 %v9144_v55 }
 0x641   :  { %2911 = vperm.xlu0 %4410, %v6265_v21   ;;  %2143 = vperm.xlu1 %4398, %v6265_v21  }
 0x645   :  { %4411 = vset.pattern.permute.xlu0 %v9166_v37  ;;  %4399 = vset.pattern.permute.xlu1 %v9158_v57 }
 0x646   :  { %2975 = vperm.xlu0 %4411, %v6265_v21   ;;  %2207 = vperm.xlu1 %4399, %v6265_v21  }
 0x64a   :  { %4412 = vset.pattern.permute.xlu0 %v9150_v42  ;;  %4400 = vset.pattern.permute.xlu1 %v9142_v51 }
 0x64b   :  { %2271 = vperm.xlu1 %4400, %v6265_v21   ;;  %1992 = vperm.xlu0 %4412, %v6269_v15  }
 0x64f   :  { %4401 = vset.pattern.permute.xlu1 %v9160_v59  ;;  %4414 = vset.pattern.permute.xlu0 %v9144_v55 }
 0x650   :  { %2335 = vperm.xlu1 %4401, %v6265_v21   ;;  %2135 = vperm.xlu0 %4414, %v6269_v15  }
 0x651   :  { %v6307_v33 = vpop.f32.mrb[20].mxu0 }
 0x652   :  { %v6311_v29 = vpop.f32.mrb[21].mxu0 }
 0x653   :  { %v6313_v23 = vpop.f32.mrb[22].mxu0 }
 0x654   :  { %4402 = vset.pattern.permute.xlu1 %v9140_v63  ;;  %4416 = vset.pattern.permute.xlu0 %v9142_v51  ;;  %v6315_v46 = vpop.f32.mrb[23].mxu0  ;;  %v6323_v43 = vadd.f32 %v6313_v23, %v6273_v44 }
 0x655   :  { %2399 = vperm.xlu1 %4402, %v6265_v21   ;;  %2263 = vperm.xlu0 %4416, %v6269_v15   ;;  %v6327_v13 = vadd.f32 %v6273_v44, %v6315_v46 }
 0x656   :  { %vm1435_vm15 = vcmp.gt.f32.partialorder %v6323_v43, 20.0 }
 0x657   :  { %vm1433_vm0 = vcmp.gt.f32.partialorder %v6327_v13, 20.0 }
 0x659   :  { %4403 = vset.pattern.permute.xlu1 %v9156_v0  ;;  %4418 = vset.pattern.permute.xlu0 %v9140_v63  ;;  %v6329_v25 = vpop.f32.mrb[24].mxu0 }
 0x65a   :  { %2463 = vperm.xlu1 %4403, %v6265_v21   ;;  %2391 = vperm.xlu0 %4418, %v6269_v15   ;;  %v6331_v20 = vpop.f32.mrb[25].mxu0  ;;  %v6337_v27 = vadd.f32 %v6329_v25, %v6273_v44 }
 0x65b   :  { %v6339_v39 = vpop.f32.mrb[26].mxu0  ;;  %v6345_v16 = vadd.f32 %v6273_v44, %v6331_v20 }
 0x65c   :  { %v6347_v4 = vpop.f32.mrb[27].mxu0  ;;  %v6351_v40 = vadd.f32 %v6339_v39, %v6273_v44  ;;  %vm1438_vm7 = vcmp.gt.f32.partialorder %v6337_v27, 20.0 }
 0x65d   :  { %v6355_v31 = vadd.f32 %v6273_v44, %v6347_v4  ;;  %vm1436_vm8 = vcmp.gt.f32.partialorder %v6345_v16, 20.0 }
 0x65e   :  { %4404 = vset.pattern.permute.xlu1 %v9146_v30  ;;  %4422 = vset.pattern.permute.xlu0 %v9138_v6 }
 0x65f   :  { %2527 = vperm.xlu1 %4404, %v6265_v21   ;;  %2647 = vperm.xlu0 %4422, %v6269_v15  }
 0x661   :  { %v6361_v58 = vpop.f32.mrb[28].mxu0 }
 0x662   :  { %9235 = vst [vmem:[#allocation45_spill] sm:$0xff] %v6361_v58  ;;  %v6363_v36 = vpop.f32.mrb[29].mxu0  ;;  %v6367_v3 = vadd.f32 %v6361_v58, %v6273_v44 }
 0x663   :  { %4406 = vset.pattern.permute.xlu1 %v9138_v6  ;;  %4425 = vset.pattern.permute.xlu0 %v9136_v14  ;;  %v6369_v41 = vpop.f32.mrb[30].mxu0  ;;  %v6373_v38 = vadd.f32 %v6273_v44, %v6363_v36 }
 0x664   :  { %2655 = vperm.xlu1 %4406, %v6265_v21   ;;  %2839 = vperm.xlu0 %4425, %v6269_v15   ;;  %9236 = vst [vmem:[#allocation46_spill] sm:$0xff] %v6369_v41  ;;  %v6375_v35 = vpop.f32.mrb[31].mxu0  ;;  %v6381_v48 = vadd.f32 %v6369_v41, %v6273_v44  ;;  %vm1442_vm9 = vcmp.gt.f32.partialorder %v6367_v3, 20.0 }
 0x665   :  { %v6387_v62 = vadd.f32 %v6273_v44, %v6375_v35  ;;  %v9237_v44 = vmov 44   ;;  %vm1440_vm12 = vcmp.gt.f32.partialorder %v6373_v38, 20.0 }
 0x668   :  { %4407 = vset.pattern.permute.xlu1 %v9152_v7  ;;  %4427 = vset.pattern.permute.xlu0 %v9166_v37 }
 0x669   :  { %2719 = vperm.xlu1 %4407, %v6265_v21   ;;  %2967 = vperm.xlu0 %4427, %v6269_v15  }
 0x66d   :  { %4409 = vset.pattern.permute.xlu1 %v9136_v14  ;;  %4428 = vset.pattern.permute.xlu0 %v9150_v42 }
 0x66e   :  { %2847 = vperm.xlu1 %4409, %v6265_v21   ;;  %2007 = vperm.xlu0 %4428, %v6271_v17  }
 0x672   :  { %4413 = vset.pattern.permute.xlu1 %v9154_v54  ;;  %4430 = vset.pattern.permute.xlu0 %v9144_v55 }
 0x673   :  { %2071 = vperm.xlu1 %4413, %v6269_v15   ;;  %2147 = vperm.xlu0 %4430, %v6271_v17  }
 0x677   :  { %4415 = vset.pattern.permute.xlu1 %v9158_v57  ;;  %4432 = vset.pattern.permute.xlu0 %v9142_v51 }
 0x678   :  { %2199 = vperm.xlu1 %4415, %v6269_v15   ;;  %2275 = vperm.xlu0 %4432, %v6271_v17  }
 0x67c   :  { %4417 = vset.pattern.permute.xlu1 %v9160_v59  ;;  %4434 = vset.pattern.permute.xlu0 %v9140_v63 }
 0x67d   :  { %2327 = vperm.xlu1 %4417, %v6269_v15   ;;  %2403 = vperm.xlu0 %4434, %v6271_v17  }
 0x681   :  { %4419 = vset.pattern.permute.xlu1 %v9156_v0  ;;  %4438 = vset.pattern.permute.xlu0 %v9138_v6 }
 0x682   :  { %2455 = vperm.xlu1 %4419, %v6269_v15   ;;  %2659 = vperm.xlu0 %4438, %v6271_v17  }
 0x686   :  { %4420 = vset.pattern.permute.xlu1 %v9146_v30  ;;  %4441 = vset.pattern.permute.xlu0 %v9136_v14  ;;  %v9238_v14 = vmov 46  }
 0x687   :  { %2519 = vperm.xlu1 %4420, %v6269_v15   ;;  %2851 = vperm.xlu0 %4441, %v6271_v17  }
 0x68b   :  { %4421 = vset.pattern.permute.xlu1 %v9148_v32  ;;  %4445 = vset.pattern.permute.xlu0 %v9154_v54 }
 0x68c   :  { %2583 = vperm.xlu1 %4421, %v6269_v15   ;;  %2075 = vperm.xlu0 %4445, %v6275_v49  }
 0x690   :  { %4423 = vset.pattern.permute.xlu1 %v9152_v7  ;;  %4447 = vset.pattern.permute.xlu0 %v9158_v57 }
 0x691   :  { %2711 = vperm.xlu1 %4423, %v6269_v15   ;;  %2203 = vperm.xlu0 %4447, %v6275_v49  }
 0x695   :  { %4424 = vset.pattern.permute.xlu1 %v9237_v44  ;;  %4449 = vset.pattern.permute.xlu0 %v9160_v59 }
 0x696   :  { %2775 = vperm.xlu1 %4424, %v6269_v15   ;;  %2331 = vperm.xlu0 %4449, %v6275_v49  }
 0x69a   :  { %4426 = vset.pattern.permute.xlu1 %v9238_v14  ;;  %4451 = vset.pattern.permute.xlu0 %v9156_v0 }
 0x69b   :  { %2903 = vperm.xlu1 %4426, %v6269_v15   ;;  %2459 = vperm.xlu0 %4451, %v6275_v49  }
 0x69f   :  { %4429 = vset.pattern.permute.xlu1 %v9154_v54  ;;  %4452 = vset.pattern.permute.xlu0 %v9146_v30 }
 0x6a0   :  { %2083 = vperm.xlu1 %4429, %v6271_v17   ;;  %2523 = vperm.xlu0 %4452, %v6275_v49  }
 0x6a4   :  { %4431 = vset.pattern.permute.xlu1 %v9158_v57  ;;  %4455 = vset.pattern.permute.xlu0 %v9152_v7 }
 0x6a5   :  { %2211 = vperm.xlu1 %4431, %v6271_v17   ;;  %2715 = vperm.xlu0 %4455, %v6275_v49  }
 0x6a9   :  { %4433 = vset.pattern.permute.xlu1 %v9160_v59  ;;  %4461 = vset.pattern.permute.xlu0 %v9154_v54 }
 0x6aa   :  { %2339 = vperm.xlu1 %4433, %v6271_v17   ;;  %2095 = vperm.xlu0 %4461, %v6307_v33  }
 0x6ae   :  { %4435 = vset.pattern.permute.xlu1 %v9156_v0  ;;  %4463 = vset.pattern.permute.xlu0 %v9158_v57 }
 0x6af   :  { %2467 = vperm.xlu1 %4435, %v6271_v17   ;;  %2223 = vperm.xlu0 %4463, %v6307_v33  }
 0x6b3   :  { %4436 = vset.pattern.permute.xlu1 %v9146_v30  ;;  %4465 = vset.pattern.permute.xlu0 %v9160_v59 }
 0x6b4   :  { %2531 = vperm.xlu1 %4436, %v6271_v17   ;;  %2351 = vperm.xlu0 %4465, %v6307_v33  }
 0x6b6   :  { %v6449_v6 = vpop.permute.xlu0 %2591  ;;  %v6451_v63 = vpop.permute.xlu1 %2002 }
 0x6b7   :  { %9239 = vst [vmem:[#allocation47_spill] sm:$0xff] %v6449_v6  ;;  %9240 = vst [vmem:[#allocation48_spill] sm:$0xff] %v6451_v63  ;;  %v9262_v6 = vmov 38   ;;  %v9299_v63 = vmov 37  }
 0x6b8   :  { %4437 = vset.pattern.permute.xlu1 %v9148_v32  ;;  %4467 = vset.pattern.permute.xlu0 %v9156_v0 }
 0x6b9   :  { %2595 = vperm.xlu1 %4437, %v6271_v17   ;;  %2479 = vperm.xlu0 %4467, %v6307_v33  }
 0x6bb   :  { %v6457_v51 = vpop.permute.xlu0 %2783  ;;  %v6459_v55 = vpop.permute.xlu1 %2079 }
 0x6bc   :  { %9241 = vst [vmem:[#allocation49_spill] sm:$0xff] %v6457_v51  ;;  %v9293_v51 = vmov 33  }
 0x6bd   :  { %4439 = vset.pattern.permute.xlu1 %v9152_v7  ;;  %4477 = vset.pattern.permute.xlu0 %v9154_v54 }
 0x6be   :  { %2723 = vperm.xlu1 %4439, %v6271_v17   ;;  %2087 = vperm.xlu0 %4477, %v6311_v29  }
 0x6c0   :  { %v6465_v30 = vpop.permute.xlu0 %2911  ;;  %v6467_v32 = vpop.permute.xlu1 %2143 }
 0x6c1   :  { %9242 = vst [vmem:[#allocation50_spill] sm:$0xff] %v6465_v30  ;;  %9243 = vst [vmem:[#allocation51_spill] sm:$0xff] %v6467_v32  ;;  %v9290_v32 = vmov 43  }
 0x6c2   :  { %4440 = vset.pattern.permute.xlu1 %v9237_v44  ;;  %4479 = vset.pattern.permute.xlu0 %v9158_v57  ;;  %v9248_v57 = vmov 39  }
 0x6c3   :  { %2787 = vperm.xlu1 %4440, %v6271_v17   ;;  %2215 = vperm.xlu0 %4479, %v6311_v29  }
 0x6c5   :  { %v6473_v42 = vpop.permute.xlu0 %2975  ;;  %v6475_v7 = vpop.permute.xlu1 %2207 }
 0x6c6   :  { %9244 = vst [vmem:[#allocation52_spill] sm:$0xff] %v6473_v42  ;;  %9245 = vst [vmem:[#allocation53_spill] sm:$0xff] %v6475_v7 }
 0x6c7   :  { %4442 = vset.pattern.permute.xlu1 %v9238_v14  ;;  %4481 = vset.pattern.permute.xlu0 %v9160_v59  ;;  %v9251_v59 = vmov 32  }
 0x6c8   :  { %2915 = vperm.xlu1 %4442, %v6271_v17   ;;  %2343 = vperm.xlu0 %4481, %v6311_v29  }
 0x6ca   :  { %v6481_v54 = vpop.permute.xlu0 %1992  ;;  %v6483_v0 = vpop.permute.xlu1 %2271 }
 0x6cb   :  { %9246 = vst [vmem:[#allocation54_spill] sm:$0xff] %v6481_v54  ;;  %9247 = vst [vmem:[#allocation55_spill] sm:$0xff] %v6483_v0  ;;  %v9259_v54 = vmov 47  }
 0x6cc   :  { %4443 = vset.pattern.permute.xlu1 %v9166_v37  ;;  %4483 = vset.pattern.permute.xlu0 %v9248_v57 }
 0x6cd   :  { %2979 = vperm.xlu1 %4443, %v6271_v17   ;;  %2471 = vperm.xlu0 %4483, %v6311_v29  }
 0x6cf   :  { %v6489_v60 = vpop.permute.xlu0 %2135  ;;  %v6491_v50 = vpop.permute.xlu1 %2335 }
 0x6d0   :  { %9249 = vst [vmem:[#allocation56_spill] sm:$0xff] %v6489_v60  ;;  %9250 = vst [vmem:[#allocation57_spill] sm:$0xff] %v6491_v50  ;;  %v9258_v60 = vmov 36  }
 0x6d1   :  { %4444 = vset.pattern.permute.xlu1 %v9251_v59  ;;  %4484 = vset.pattern.permute.xlu0 %v9252_v18 }
 0x6d2   :  { %1997 = vperm.xlu1 %4444, %v6275_v49   ;;  %2535 = vperm.xlu0 %4484, %v6311_v29  }
 0x6d4   :  { %v6497_v10 = vpop.permute.xlu0 %2263  ;;  %v6499_v37 = vpop.permute.xlu1 %2399 }
 0x6d5   :  { %9253 = vst [vmem:[#allocation58_spill] sm:$0xff] %v6497_v10  ;;  %9254 = vst [vmem:[#allocation59_spill] sm:$0xff] %v6499_v37  ;;  %v9266_v37 = vmov 42  }
 0x6d6   :  { %4446 = vset.pattern.permute.xlu1 %v9255_v1  ;;  %4488 = vset.pattern.permute.xlu0 %v9237_v44 }
 0x6d7   :  { %2139 = vperm.xlu1 %4446, %v6275_v49   ;;  %2791 = vperm.xlu0 %4488, %v6311_v29  }
 0x6d9   :  { %v6505_v17 = vpop.permute.xlu0 %2391  ;;  %v6507_v42 = vpop.permute.xlu1 %2463 }
 0x6da   :  { %9256 = vst [vmem:[#allocation60_spill] sm:$0xff] %v6505_v17  ;;  %9257 = vst [vmem:[#allocation61_spill] sm:$0xff] %v6507_v42 }
 0x6db   :  { %4448 = vset.pattern.permute.xlu1 %v9258_v60  ;;  %4491 = vset.pattern.permute.xlu0 %v9259_v54 }
 0x6dc   :  { %2267 = vperm.xlu1 %4448, %v6275_v49   ;;  %2983 = vperm.xlu0 %4491, %v6311_v29  }
 0x6de   :  { %v6513_v10 = vpop.permute.xlu0 %2647  ;;  %v6515_v30 = vpop.permute.xlu1 %2527 }
 0x6df   :  { %9260 = vst [vmem:[#allocation62_spill] sm:$0xff] %v6513_v10  ;;  %9261 = vst [vmem:[#allocation63_spill] sm:$0xff] %v6515_v30 }
 0x6e0   :  { %4450 = vset.pattern.permute.xlu1 %v9262_v6  ;;  %4492 = vset.pattern.permute.xlu0 %v9251_v59 }
 0x6e1   :  { %2395 = vperm.xlu1 %4450, %v6275_v49   ;;  %2027 = vperm.xlu0 %4492, %v6313_v23  }
 0x6e3   :  { %v6521_v17 = vpop.permute.xlu0 %2839  ;;  %v6523_v42 = vpop.permute.xlu1 %2655 }
 0x6e4   :  { %9263 = vst [vmem:[#allocation64_spill] sm:$0xff] %v6523_v42 }
 0x6e5   :  { %4453 = vset.pattern.permute.xlu1 %v9264_v8  ;;  %4494 = vset.pattern.permute.xlu0 %v9255_v1 }
 0x6e6   :  { %2587 = vperm.xlu1 %4453, %v6275_v49   ;;  %2163 = vperm.xlu0 %4494, %v6313_v23  }
 0x6e8   :  { %v6529_v10 = vpop.permute.xlu0 %2967  ;;  %v6531_v30 = vpop.permute.xlu1 %2719 }
 0x6e9   :  { %9265 = vst [vmem:[#allocation65_spill] sm:$0xff] %v6531_v30 }
 0x6ea   :  { %4454 = vset.pattern.permute.xlu1 %v9266_v37  ;;  %4496 = vset.pattern.permute.xlu0 %v9258_v60 }
 0x6eb   :  { %2651 = vperm.xlu1 %4454, %v6275_v49   ;;  %2291 = vperm.xlu0 %4496, %v6313_v23  }
 0x6ed   :  { %v6537_v42 = vpop.permute.xlu0 %2007  ;;  %v6539_v7 = vpop.permute.xlu1 %2847 }
 0x6ee   :  { %9267 = vst [vmem:[#allocation66_spill] sm:$0xff] %v6537_v42  ;;  %9268 = vst [vmem:[#allocation67_spill] sm:$0xff] %v6539_v7  ;;  %v9296_v7 = vmov 35  }
 0x6ef   :  { %4456 = vset.pattern.permute.xlu1 %v9237_v44  ;;  %4498 = vset.pattern.permute.xlu0 %v9262_v6 }
 0x6f0   :  { %2779 = vperm.xlu1 %4456, %v6275_v49   ;;  %2419 = vperm.xlu0 %4498, %v6313_v23  }
 0x6f2   :  { %v6545_v30 = vpop.permute.xlu0 %2147  ;;  %v6547_v53 = vpop.permute.xlu1 %2071 }
 0x6f3   :  { %9269 = vst [vmem:[#allocation68_spill] sm:$0xff] %v6545_v30  ;;  %9270 = vst [vmem:[#allocation69_spill] sm:$0xff] %v6547_v53 }
 0x6f4   :  { %4457 = vset.pattern.permute.xlu1 %v9271_v5  ;;  %4500 = vset.pattern.permute.xlu0 %v9252_v18 }
 0x6f5   :  { %2843 = vperm.xlu1 %4457, %v6275_v49   ;;  %2547 = vperm.xlu0 %4500, %v6313_v23  }
 0x6f7   :  { %v6553_v42 = vpop.permute.xlu0 %2275  ;;  %v6555_v0 = vpop.permute.xlu1 %2199 }
 0x6f8   :  { %9272 = vst [vmem:[#allocation70_spill] sm:$0xff] %v6553_v42  ;;  %9273 = vst [vmem:[#allocation71_spill] sm:$0xff] %v6555_v0 }
 0x6f9   :  { %4458 = vset.pattern.permute.xlu1 %v9238_v14  ;;  %4504 = vset.pattern.permute.xlu0 %v9237_v44 }
 0x6fa   :  { %2907 = vperm.xlu1 %4458, %v6275_v49   ;;  %2803 = vperm.xlu0 %4504, %v6313_v23  }
 0x6fc   :  { %v6561_v30 = vpop.permute.xlu0 %2403  ;;  %v6563_v53 = vpop.permute.xlu1 %2327 }
 0x6fd   :  { %9274 = vst [vmem:[#allocation72_spill] sm:$0xff] %v6561_v30  ;;  %9275 = vst [vmem:[#allocation73_spill] sm:$0xff] %v6563_v53 }
 0x6fe   :  { %4459 = vset.pattern.permute.xlu1 %v9259_v54  ;;  %4506 = vset.pattern.permute.xlu0 %v9238_v14 }
 0x6ff   :  { %2971 = vperm.xlu1 %4459, %v6275_v49   ;;  %2931 = vperm.xlu0 %4506, %v6313_v23  }
 0x701   :  { %v6569_v42 = vpop.permute.xlu0 %2659  ;;  %v6571_v0 = vpop.permute.xlu1 %2455 }
 0x702   :  { %9276 = vst [vmem:[#allocation74_spill] sm:$0xff] %v6569_v42  ;;  %9277 = vst [vmem:[#allocation75_spill] sm:$0xff] %v6571_v0 }
 0x703   :  { %4460 = vset.pattern.permute.xlu1 %v9251_v59  ;;  %4507 = vset.pattern.permute.xlu0 %v9259_v54 }
 0x704   :  { %2022 = vperm.xlu1 %4460, %v6307_v33   ;;  %2995 = vperm.xlu0 %4507, %v6313_v23  }
 0x706   :  { %v6577_v30 = vpop.permute.xlu0 %2851  ;;  %v6579_v53 = vpop.permute.xlu1 %2519 }
 0x707   :  { %9278 = vst [vmem:[#allocation76_spill] sm:$0xff] %v6577_v30  ;;  %9279 = vst [vmem:[#allocation77_spill] sm:$0xff] %v6579_v53 }
 0x708   :  { %4462 = vset.pattern.permute.xlu1 %v9255_v1  ;;  %4508 = vset.pattern.permute.xlu0 %v9251_v59 }
 0x709   :  { %2159 = vperm.xlu1 %4462, %v6307_v33   ;;  %2017 = vperm.xlu0 %4508, %v6315_v46  }
 0x70b   :  { %v6585_v49 = vpop.permute.xlu0 %2075  ;;  %v6587_v42 = vpop.permute.xlu1 %2583 }
 0x70c   :  { %9280 = vst [vmem:[#allocation78_spill] sm:$0xff] %v6585_v49  ;;  %9281 = vst [vmem:[#allocation79_spill] sm:$0xff] %v6587_v42 }
 0x70d   :  { %4464 = vset.pattern.permute.xlu1 %v9258_v60  ;;  %4510 = vset.pattern.permute.xlu0 %v9255_v1 }
 0x70e   :  { %2287 = vperm.xlu1 %4464, %v6307_v33   ;;  %2155 = vperm.xlu0 %4510, %v6315_v46  }
 0x710   :  { %v6593_v30 = vpop.permute.xlu0 %2203  ;;  %v6595_v0 = vpop.permute.xlu1 %2711 }
 0x711   :  { %9282 = vst [vmem:[#allocation80_spill] sm:$0xff] %v6593_v30  ;;  %9283 = vst [vmem:[#allocation81_spill] sm:$0xff] %v6595_v0 }
 0x712   :  { %4466 = vset.pattern.permute.xlu1 %v9262_v6  ;;  %4512 = vset.pattern.permute.xlu0 %v9258_v60 }
 0x713   :  { %2415 = vperm.xlu1 %4466, %v6307_v33   ;;  %2283 = vperm.xlu0 %4512, %v6315_v46  }
 0x715   :  { %v6601_v49 = vpop.permute.xlu0 %2331  ;;  %v6603_v53 = vpop.permute.xlu1 %2775 }
 0x716   :  { %9284 = vst [vmem:[#allocation82_spill] sm:$0xff] %v6601_v49 }
 0x717   :  { %4468 = vset.pattern.permute.xlu1 %v9252_v18  ;;  %4514 = vset.pattern.permute.xlu0 %v9262_v6 }
 0x718   :  { %2543 = vperm.xlu1 %4468, %v6307_v33   ;;  %2411 = vperm.xlu0 %4514, %v6315_v46  }
 0x71a   :  { %v6609_v30 = vpop.permute.xlu0 %2459  ;;  %v6611_v0 = vpop.permute.xlu1 %2903 }
 0x71b   :  { %9285 = vst [vmem:[#allocation83_spill] sm:$0xff] %v6609_v30 }
 0x71c   :  { %4469 = vset.pattern.permute.xlu1 %v9264_v8  ;;  %4517 = vset.pattern.permute.xlu0 %v9264_v8 }
 0x71d   :  { %2607 = vperm.xlu1 %4469, %v6307_v33   ;;  %2603 = vperm.xlu0 %4517, %v6315_v46  }
 0x71f   :  { %v6617_v49 = vpop.permute.xlu0 %2523  ;;  %v6619_v42 = vpop.permute.xlu1 %2083 }
 0x720   :  { %9286 = vst [vmem:[#allocation84_spill] sm:$0xff] %v6617_v49  ;;  %9287 = vst [vmem:[#allocation85_spill] sm:$0xff] %v6619_v42 }
 0x721   :  { %4470 = vset.pattern.permute.xlu1 %v9266_v37  ;;  %4518 = vset.pattern.permute.xlu0 %v9266_v37 }
 0x722   :  { %2671 = vperm.xlu1 %4470, %v6307_v33   ;;  %2667 = vperm.xlu0 %4518, %v6315_v46  }
 0x724   :  { %v6625_v30 = vpop.permute.xlu0 %2715  ;;  %v6627_v50 = vpop.permute.xlu1 %2211 }
 0x725   :  { %9288 = vst [vmem:[#allocation86_spill] sm:$0xff] %v6625_v30  ;;  %9289 = vst [vmem:[#allocation87_spill] sm:$0xff] %v6627_v50 }
 0x726   :  { %4471 = vset.pattern.permute.xlu1 %v9290_v32  ;;  %4521 = vset.pattern.permute.xlu0 %v9271_v5 }
 0x727   :  { %2859 = vperm.xlu0 %4521, %v6315_v46   ;;  %2735 = vperm.xlu1 %4471, %v6307_v33  }
 0x729   :  { %v6633_v49 = vpop.permute.xlu0 %2095  ;;  %v6635_v42 = vpop.permute.xlu1 %2339 }
 0x72a   :  { %9291 = vst [vmem:[#allocation88_spill] sm:$0xff] %v6633_v49  ;;  %9292 = vst [vmem:[#allocation89_spill] sm:$0xff] %v6635_v42 }
 0x72b   :  { %4525 = vset.pattern.permute.xlu0 %v9293_v51  ;;  %4472 = vset.pattern.permute.xlu1 %v9237_v44 }
 0x72c   :  { %2111 = vperm.xlu0 %4525, %v6329_v25   ;;  %2799 = vperm.xlu1 %4472, %v6307_v33  }
 0x72e   :  { %v6641_v30 = vpop.permute.xlu0 %2223  ;;  %v6643_v50 = vpop.permute.xlu1 %2467 }
 0x72f   :  { %9294 = vst [vmem:[#allocation90_spill] sm:$0xff] %v6641_v30  ;;  %9295 = vst [vmem:[#allocation91_spill] sm:$0xff] %v6643_v50 }
 0x730   :  { %4527 = vset.pattern.permute.xlu0 %v9296_v7  ;;  %4473 = vset.pattern.permute.xlu1 %v9271_v5 }
 0x731   :  { %2239 = vperm.xlu0 %4527, %v6329_v25   ;;  %2863 = vperm.xlu1 %4473, %v6307_v33  }
 0x733   :  { %v6649_v42 = vpop.permute.xlu0 %2351  ;;  %v6651_v49 = vpop.permute.xlu1 %2531 }
 0x734   :  { %9297 = vst [vmem:[#allocation92_spill] sm:$0xff] %v6649_v42  ;;  %9298 = vst [vmem:[#allocation93_spill] sm:$0xff] %v6651_v49 }
 0x735   :  { %4529 = vset.pattern.permute.xlu0 %v9299_v63  ;;  %4474 = vset.pattern.permute.xlu1 %v9238_v14 }
 0x736   :  { %2367 = vperm.xlu0 %4529, %v6329_v25   ;;  %2927 = vperm.xlu1 %4474, %v6307_v33  }
 0x738   :  { %v6657_v50 = vpop.permute.xlu0 %2479  ;;  %v6659_v30 = vpop.permute.xlu1 %2595 }
 0x739   :  { %9300 = vst [vmem:[#allocation94_spill] sm:$0xff] %v6657_v50  ;;  %9301 = vst [vmem:[#allocation95_spill] sm:$0xff] %v6659_v30 }
 0x73a   :  { %4533 = vset.pattern.permute.xlu0 %v9264_v8  ;;  %4475 = vset.pattern.permute.xlu1 %v9259_v54 }
 0x73b   :  { %2623 = vperm.xlu0 %4533, %v6329_v25   ;;  %2991 = vperm.xlu1 %4475, %v6307_v33  }
 0x73d   :  { %v6665_v49 = vpop.permute.xlu0 %2087  ;;  %v6667_v42 = vpop.permute.xlu1 %2723 }
 0x73e   :  { %9302 = vst [vmem:[#allocation96_spill] sm:$0xff] %v6665_v49  ;;  %9303 = vst [vmem:[#allocation97_spill] sm:$0xff] %v6667_v42 }
 0x73f   :  { %4534 = vset.pattern.permute.xlu0 %v9266_v37  ;;  %4476 = vset.pattern.permute.xlu1 %v9251_v59 }
 0x740   :  { %2687 = vperm.xlu0 %4534, %v6329_v25   ;;  %2012 = vperm.xlu1 %4476, %v6311_v29  }
 0x742   :  { %v6673_v30 = vpop.permute.xlu0 %2215  ;;  %v6675_v50 = vpop.permute.xlu1 %2787 }
 0x743   :  { %9304 = vst [vmem:[#allocation98_spill] sm:$0xff] %v6673_v30  ;;  %9305 = vst [vmem:[#allocation99_spill] sm:$0xff] %v6675_v50 }
 0x744   :  { %4535 = vset.pattern.permute.xlu0 %v9290_v32  ;;  %4478 = vset.pattern.permute.xlu1 %v9255_v1 }
 0x745   :  { %2751 = vperm.xlu0 %4535, %v6329_v25   ;;  %2151 = vperm.xlu1 %4478, %v6311_v29  }
 0x747   :  { %v6681_v42 = vpop.permute.xlu0 %2343  ;;  %v6683_v49 = vpop.permute.xlu1 %2915 }
 0x748   :  { %9306 = vst [vmem:[#allocation100_spill] sm:$0xff] %v6681_v42  ;;  %9307 = vst [vmem:[#allocation101_spill] sm:$0xff] %v6683_v49 }
 0x749   :  { %4539 = vset.pattern.permute.xlu0 %v9259_v54  ;;  %4480 = vset.pattern.permute.xlu1 %v9258_v60 }
 0x74a   :  { %3007 = vperm.xlu0 %4539, %v6329_v25   ;;  %2279 = vperm.xlu1 %4480, %v6311_v29  }
 0x74c   :  { %v6689_v50 = vpop.permute.xlu0 %2471  ;;  %v6691_v30 = vpop.permute.xlu1 %2979 }
 0x74d   :  { %9308 = vst [vmem:[#allocation102_spill] sm:$0xff] %v6689_v50  ;;  %9309 = vst [vmem:[#allocation103_spill] sm:$0xff] %v6691_v30 }
 0x74e   :  { %4541 = vset.pattern.permute.xlu0 %v9293_v51  ;;  %4482 = vset.pattern.permute.xlu1 %v9262_v6 }
 0x74f   :  { %2103 = vperm.xlu0 %4541, %v6331_v20   ;;  %2407 = vperm.xlu1 %4482, %v6311_v29  }
 0x751   :  { %v6697_v49 = vpop.permute.xlu0 %2535  ;;  %v6699_v42 = vpop.permute.xlu1 %1997 }
 0x752   :  { %9310 = vst [vmem:[#allocation104_spill] sm:$0xff] %v6697_v49  ;;  %9311 = vst [vmem:[#allocation105_spill] sm:$0xff] %v6699_v42 }
 0x753   :  { %4543 = vset.pattern.permute.xlu0 %v9296_v7  ;;  %4485 = vset.pattern.permute.xlu1 %v9264_v8 }
 0x754   :  { %2231 = vperm.xlu0 %4543, %v6331_v20   ;;  %2599 = vperm.xlu1 %4485, %v6311_v29  }
 0x756   :  { %v6705_v30 = vpop.permute.xlu0 %2791  ;;  %v6707_v50 = vpop.permute.xlu1 %2139 }
 0x757   :  { %9312 = vst [vmem:[#allocation106_spill] sm:$0xff] %v6705_v30  ;;  %9313 = vst [vmem:[#allocation107_spill] sm:$0xff] %v6707_v50 }
 0x758   :  { %4545 = vset.pattern.permute.xlu0 %v9299_v63  ;;  %4486 = vset.pattern.permute.xlu1 %v9266_v37 }
 0x759   :  { %2359 = vperm.xlu0 %4545, %v6331_v20   ;;  %2663 = vperm.xlu1 %4486, %v6311_v29  }
 0x75b   :  { %v6713_v42 = vpop.permute.xlu0 %2983  ;;  %v6715_v49 = vpop.permute.xlu1 %2267 }
 0x75c   :  { %9314 = vst [vmem:[#allocation108_spill] sm:$0xff] %v6713_v42  ;;  %9315 = vst [vmem:[#allocation109_spill] sm:$0xff] %v6715_v49 }
 0x75d   :  { %4547 = vset.pattern.permute.xlu0 %v9248_v57  ;;  %4487 = vset.pattern.permute.xlu1 %v9290_v32 }
 0x75e   :  { %2487 = vperm.xlu0 %4547, %v6331_v20   ;;  %2727 = vperm.xlu1 %4487, %v6311_v29  }
 0x760   :  { %v6721_v50 = vpop.permute.xlu0 %2027  ;;  %v6723_v30 = vpop.permute.xlu1 %2395 }
 0x761   :  { %9316 = vst [vmem:[#allocation110_spill] sm:$0xff] %v6721_v50  ;;  %9317 = vst [vmem:[#allocation111_spill] sm:$0xff] %v6723_v30 }
 0x762   :  { %4554 = vset.pattern.permute.xlu0 %v9238_v14  ;;  %4489 = vset.pattern.permute.xlu1 %v9271_v5 }
 0x763   :  { %2935 = vperm.xlu0 %4554, %v6331_v20   ;;  %2855 = vperm.xlu1 %4489, %v6311_v29  }
 0x765   :  { %v6729_v49 = vpop.permute.xlu0 %2163  ;;  %v6731_v42 = vpop.permute.xlu1 %2587 }
 0x766   :  { %9318 = vst [vmem:[#allocation112_spill] sm:$0xff] %v6729_v49  ;;  %9319 = vst [vmem:[#allocation113_spill] sm:$0xff] %v6731_v42 }
 0x767   :  { %4555 = vset.pattern.permute.xlu0 %v9259_v54  ;;  %4490 = vset.pattern.permute.xlu1 %v9238_v14 }
 0x768   :  { %2999 = vperm.xlu0 %4555, %v6331_v20   ;;  %2919 = vperm.xlu1 %4490, %v6311_v29  }
 0x76a   :  { %v6737_v50 = vpop.permute.xlu0 %2291  ;;  %v6739_v30 = vpop.permute.xlu1 %2651 }
 0x76b   :  { %9320 = vst [vmem:[#allocation114_spill] sm:$0xff] %v6737_v50  ;;  %9321 = vst [vmem:[#allocation115_spill] sm:$0xff] %v6739_v30 }
 0x76c   :  { %4556 = vset.pattern.permute.xlu0 %v9251_v59  ;;  %4493 = vset.pattern.permute.xlu1 %v9293_v51 }
 0x76d   :  { %2047 = vperm.xlu0 %4556, %v6339_v39   ;;  %2099 = vperm.xlu1 %4493, %v6313_v23  }
 0x76f   :  { %v6745_v49 = vpop.permute.xlu0 %2419  ;;  %v6747_v42 = vpop.permute.xlu1 %2779 }
 0x770   :  { %9322 = vst [vmem:[#allocation116_spill] sm:$0xff] %v6745_v49  ;;  %9323 = vst [vmem:[#allocation117_spill] sm:$0xff] %v6747_v42 }
 0x771   :  { %4558 = vset.pattern.permute.xlu0 %v9255_v1  ;;  %4495 = vset.pattern.permute.xlu1 %v9296_v7 }
 0x772   :  { %2179 = vperm.xlu0 %4558, %v6339_v39   ;;  %2227 = vperm.xlu1 %4495, %v6313_v23  }
 0x774   :  { %v6753_v50 = vpop.permute.xlu0 %2547  ;;  %v6755_v30 = vpop.permute.xlu1 %2843 }
 0x775   :  { %9324 = vst [vmem:[#allocation118_spill] sm:$0xff] %v6753_v50  ;;  %9325 = vst [vmem:[#allocation119_spill] sm:$0xff] %v6755_v30 }
 0x776   :  { %4560 = vset.pattern.permute.xlu0 %v9258_v60  ;;  %4497 = vset.pattern.permute.xlu1 %v9299_v63 }
 0x777   :  { %2307 = vperm.xlu0 %4560, %v6339_v39   ;;  %2355 = vperm.xlu1 %4497, %v6313_v23  }
 0x779   :  { %v6761_v49 = vpop.permute.xlu0 %2803  ;;  %v6763_v42 = vpop.permute.xlu1 %2907 }
 0x77a   :  { %9326 = vst [vmem:[#allocation120_spill] sm:$0xff] %v6761_v49  ;;  %9327 = vst [vmem:[#allocation121_spill] sm:$0xff] %v6763_v42 }
 0x77b   :  { %4562 = vset.pattern.permute.xlu0 %v9262_v6  ;;  %4499 = vset.pattern.permute.xlu1 %v9248_v57 }
 0x77c   :  { %2435 = vperm.xlu0 %4562, %v6339_v39   ;;  %2483 = vperm.xlu1 %4499, %v6313_v23  }
 0x77e   :  { %v6769_v50 = vpop.permute.xlu0 %2931  ;;  %v6771_v30 = vpop.permute.xlu1 %2971 }
 0x77f   :  { %9328 = vst [vmem:[#allocation122_spill] sm:$0xff] %v6769_v50  ;;  %9329 = vst [vmem:[#allocation123_spill] sm:$0xff] %v6771_v30 }
 0x780   :  { %4563 = vset.pattern.permute.xlu0 %v9248_v57  ;;  %4501 = vset.pattern.permute.xlu1 %v9264_v8 }
 0x781   :  { %2499 = vperm.xlu0 %4563, %v6339_v39   ;;  %2611 = vperm.xlu1 %4501, %v6313_v23  }
 0x783   :  { %v6777_v49 = vpop.permute.xlu0 %2995  ;;  %v6779_v42 = vpop.permute.xlu1 %2022 }
 0x784   :  { %9330 = vst [vmem:[#allocation124_spill] sm:$0xff] %v6777_v49  ;;  %9331 = vst [vmem:[#allocation125_spill] sm:$0xff] %v6779_v42 }
 0x785   :  { %4568 = vset.pattern.permute.xlu0 %v9237_v44  ;;  %4502 = vset.pattern.permute.xlu1 %v9266_v37 }
 0x786   :  { %2819 = vperm.xlu0 %4568, %v6339_v39   ;;  %2675 = vperm.xlu1 %4502, %v6313_v23  }
 0x788   :  { %v6785_v50 = vpop.permute.xlu0 %2017  ;;  %v6787_v30 = vpop.permute.xlu1 %2159 }
 0x789   :  { %9332 = vst [vmem:[#allocation126_spill] sm:$0xff] %v6785_v50  ;;  %9333 = vst [vmem:[#allocation127_spill] sm:$0xff] %v6787_v30 }
 0x78a   :  { %4570 = vset.pattern.permute.xlu0 %v9238_v14  ;;  %4503 = vset.pattern.permute.xlu1 %v9290_v32 }
 0x78b   :  { %2947 = vperm.xlu0 %4570, %v6339_v39   ;;  %2739 = vperm.xlu1 %4503, %v6313_v23  }
 0x78d   :  { %v6793_v49 = vpop.permute.xlu0 %2155  ;;  %v6795_v42 = vpop.permute.xlu1 %2287 }
 0x78e   :  { %9334 = vst [vmem:[#allocation128_spill] sm:$0xff] %v6793_v49  ;;  %9335 = vst [vmem:[#allocation129_spill] sm:$0xff] %v6795_v42 }
 0x78f   :  { %4572 = vset.pattern.permute.xlu0 %v9251_v59  ;;  %4505 = vset.pattern.permute.xlu1 %v9271_v5 }
 0x790   :  { %2037 = vperm.xlu0 %4572, %v6347_v4   ;;  %2867 = vperm.xlu1 %4505, %v6313_v23  }
 0x792   :  { %v6801_v50 = vpop.permute.xlu0 %2283  ;;  %v6803_v30 = vpop.permute.xlu1 %2415 }
 0x793   :  { %9336 = vst [vmem:[#allocation130_spill] sm:$0xff] %v6801_v50  ;;  %9337 = vst [vmem:[#allocation131_spill] sm:$0xff] %v6803_v30  ;;  %v9173_v30 = vmov 49  }
 0x794   :  { %4574 = vset.pattern.permute.xlu0 %v9255_v1  ;;  %4509 = vset.pattern.permute.xlu1 %v9293_v51 }
 0x795   :  { %2171 = vperm.xlu0 %4574, %v6347_v4   ;;  %2091 = vperm.xlu1 %4509, %v6315_v46  }
 0x797   :  { %v6809_v49 = vpop.permute.xlu0 %2411  ;;  %v6811_v42 = vpop.permute.xlu1 %2543 }
 0x798   :  { %9338 = vst [vmem:[#allocation132_spill] sm:$0xff] %v6809_v49  ;;  %9339 = vst [vmem:[#allocation133_spill] sm:$0xff] %v6811_v42 }
 0x799   :  { %4576 = vset.pattern.permute.xlu0 %v9258_v60  ;;  %4511 = vset.pattern.permute.xlu1 %v9296_v7 }
 0x79a   :  { %2299 = vperm.xlu0 %4576, %v6347_v4   ;;  %2219 = vperm.xlu1 %4511, %v6315_v46  }
 0x79c   :  { %v6817_v23 = vpop.permute.xlu0 %2603  ;;  %v6819_v50 = vpop.permute.xlu1 %2607 }
 0x79d   :  { %9340 = vst [vmem:[#allocation134_spill] sm:$0xff] %v6817_v23  ;;  %9341 = vst [vmem:[#allocation135_spill] sm:$0xff] %v6819_v50 }
 0x79e   :  { %4578 = vset.pattern.permute.xlu0 %v9262_v6  ;;  %4513 = vset.pattern.permute.xlu1 %v9299_v63 }
 0x79f   :  { %2427 = vperm.xlu0 %4578, %v6347_v4   ;;  %2347 = vperm.xlu1 %4513, %v6315_v46  }
 0x7a1   :  { %v6825_v49 = vpop.permute.xlu0 %2667  ;;  %v6827_v42 = vpop.permute.xlu1 %2671 }
 0x7a2   :  { %9342 = vst [vmem:[#allocation136_spill] sm:$0xff] %v6825_v49  ;;  %9343 = vst [vmem:[#allocation137_spill] sm:$0xff] %v6827_v42 }
 0x7a3   :  { %4579 = vset.pattern.permute.xlu0 %v9248_v57  ;;  %4515 = vset.pattern.permute.xlu1 %v9248_v57 }
 0x7a4   :  { %2491 = vperm.xlu0 %4579, %v6347_v4   ;;  %2475 = vperm.xlu1 %4515, %v6315_v46  }
 0x7a6   :  { %v6833_v23 = vpop.permute.xlu0 %2859  ;;  %v6835_v50 = vpop.permute.xlu1 %2735 }
 0x7a7   :  { %9344 = vst [vmem:[#allocation138_spill] sm:$0xff] %v6833_v23  ;;  %9345 = vst [vmem:[#allocation139_spill] sm:$0xff] %v6835_v50 }
 0x7a8   :  { %4580 = vset.pattern.permute.xlu0 %v9252_v18  ;;  %4516 = vset.pattern.permute.xlu1 %v9252_v18 }
 0x7a9   :  { %2555 = vperm.xlu0 %4580, %v6347_v4   ;;  %2539 = vperm.xlu1 %4516, %v6315_v46  }
 0x7ab   :  { %v6841_v49 = vpop.permute.xlu0 %2111  ;;  %v6843_v42 = vpop.permute.xlu1 %2799 }
 0x7ac   :  { %9346 = vst [vmem:[#allocation140_spill] sm:$0xff] %v6841_v49  ;;  %9347 = vst [vmem:[#allocation141_spill] sm:$0xff] %v6843_v42 }
 0x7ad   :  { %4582 = vset.pattern.permute.xlu0 %v9266_v37  ;;  %4519 = vset.pattern.permute.xlu1 %v9290_v32 }
 0x7ae   :  { %2683 = vperm.xlu0 %4582, %v6347_v4   ;;  %2731 = vperm.xlu1 %4519, %v6315_v46  }
 0x7b0   :  { %v6849_v23 = vpop.permute.xlu0 %2239  ;;  %v6851_v50 = vpop.permute.xlu1 %2863 }
 0x7b1   :  { %9348 = vst [vmem:[#allocation142_spill] sm:$0xff] %v6849_v23  ;;  %9349 = vst [vmem:[#allocation143_spill] sm:$0xff] %v6851_v50 }
 0x7b2   :  { %4584 = vset.pattern.permute.xlu0 %v9237_v44  ;;  %4520 = vset.pattern.permute.xlu1 %v9237_v44 }
 0x7b3   :  { %2811 = vperm.xlu0 %4584, %v6347_v4   ;;  %2795 = vperm.xlu1 %4520, %v6315_v46  }
 0x7b5   :  { %v6857_v49 = vpop.permute.xlu0 %2367  ;;  %v6859_v42 = vpop.permute.xlu1 %2927 }
 0x7b6   :  { %9350 = vst [vmem:[#allocation144_spill] sm:$0xff] %v6857_v49  ;;  %9351 = vst [vmem:[#allocation145_spill] sm:$0xff] %v6859_v42 }
 0x7b7   :  { %4589 = vset.pattern.permute.xlu0 %v9293_v51  ;;  %4522 = vset.pattern.permute.xlu1 %v9238_v14 }
 0x7b8   :  { %2127 = vperm.xlu0 %4589, %v6361_v58   ;;  %2923 = vperm.xlu1 %4522, %v6315_v46  }
 0x7ba   :  { %v6865_v23 = vpop.permute.xlu0 %2623  ;;  %v6867_v50 = vpop.permute.xlu1 %2991 }
 0x7bb   :  { %9352 = vst [vmem:[#allocation146_spill] sm:$0xff] %v6865_v23  ;;  %9353 = vst [vmem:[#allocation147_spill] sm:$0xff] %v6867_v50 }
 0x7bc   :  { %4591 = vset.pattern.permute.xlu0 %v9296_v7  ;;  %4523 = vset.pattern.permute.xlu1 %v9259_v54 }
 0x7bd   :  { %2255 = vperm.xlu0 %4591, %v6361_v58   ;;  %2987 = vperm.xlu1 %4523, %v6315_v46  }
 0x7bf   :  { %v6873_v49 = vpop.permute.xlu0 %2687  ;;  %v6875_v42 = vpop.permute.xlu1 %2012 }
 0x7c0   :  { %9354 = vst [vmem:[#allocation148_spill] sm:$0xff] %v6873_v49  ;;  %9355 = vst [vmem:[#allocation149_spill] sm:$0xff] %v6875_v42  ;;  %v9174_v42 = vmov 50  }
 0x7c1   :  { %4593 = vset.pattern.permute.xlu0 %v9299_v63  ;;  %4524 = vset.pattern.permute.xlu1 %v9251_v59 }
 0x7c2   :  { %2383 = vperm.xlu0 %4593, %v6361_v58   ;;  %2042 = vperm.xlu1 %4524, %v6329_v25  }
 0x7c4   :  { %v6881_v23 = vpop.permute.xlu0 %2751  ;;  %v6883_v50 = vpop.permute.xlu1 %2151 }
 0x7c5   :  { %9356 = vst [vmem:[#allocation150_spill] sm:$0xff] %v6881_v23  ;;  %9357 = vst [vmem:[#allocation151_spill] sm:$0xff] %v6883_v50  ;;  %v9175_v50 = vmov 52  }
 0x7c6   :  { %4596 = vset.pattern.permute.xlu0 %v9173_v30  ;;  %4526 = vset.pattern.permute.xlu1 %v9255_v1 }
 0x7c7   :  { %3637 = vperm.xlu0 %4596, %v6361_v58   ;;  %2175 = vperm.xlu1 %4526, %v6329_v25  }
 0x7c9   :  { %v6889_v46 = vpop.permute.xlu0 %3007  ;;  %v6891_v49 = vpop.permute.xlu1 %2279 }
 0x7ca   :  { %9358 = vst [vmem:[#allocation152_spill] sm:$0xff] %v6889_v46  ;;  %9359 = vst [vmem:[#allocation153_spill] sm:$0xff] %v6891_v49  ;;  %v9177_v49 = vmov 58  }
 0x7cb   :  { %4597 = vset.pattern.permute.xlu0 %v9174_v42  ;;  %4528 = vset.pattern.permute.xlu1 %v9258_v60 }
 0x7cc   :  { %3645 = vperm.xlu0 %4597, %v6361_v58   ;;  %2303 = vperm.xlu1 %4528, %v6329_v25  }
 0x7ce   :  { %v6897_v30 = vpop.permute.xlu0 %2103  ;;  %v6899_v23 = vpop.permute.xlu1 %2407 }
 0x7cf   :  { %9360 = vst [vmem:[#allocation154_spill] sm:$0xff] %v6897_v30  ;;  %9361 = vst [vmem:[#allocation155_spill] sm:$0xff] %v6899_v23  ;;  %v9176_v23 = vmov 56  }
 0x7d0   :  { %4600 = vset.pattern.permute.xlu0 %v9175_v50  ;;  %4530 = vset.pattern.permute.xlu1 %v9262_v6 }
 0x7d1   :  { %3661 = vperm.xlu0 %4600, %v6361_v58   ;;  %2431 = vperm.xlu1 %4530, %v6329_v25  }
 0x7d3   :  { %v6905_v42 = vpop.permute.xlu0 %2231  ;;  %v6907_v46 = vpop.permute.xlu1 %2599 }
 0x7d4   :  { %9362 = vst [vmem:[#allocation156_spill] sm:$0xff] %v6905_v42  ;;  %9363 = vst [vmem:[#allocation157_spill] sm:$0xff] %v6907_v46 }
 0x7d5   :  { %4605 = vset.pattern.permute.xlu0 %v9264_v8  ;;  %4531 = vset.pattern.permute.xlu1 %v9248_v57 }
 0x7d6   :  { %2639 = vperm.xlu0 %4605, %v6361_v58   ;;  %2495 = vperm.xlu1 %4531, %v6329_v25  }
 0x7d8   :  { %v6913_v30 = vpop.permute.xlu0 %2359  ;;  %v6915_v50 = vpop.permute.xlu1 %2663 }
 0x7d9   :  { %9364 = vst [vmem:[#allocation158_spill] sm:$0xff] %v6913_v30  ;;  %9365 = vst [vmem:[#allocation159_spill] sm:$0xff] %v6915_v50 }
 0x7da   :  { %4606 = vset.pattern.permute.xlu0 %v9266_v37  ;;  %4532 = vset.pattern.permute.xlu1 %v9252_v18 }
 0x7db   :  { %2703 = vperm.xlu0 %4606, %v6361_v58   ;;  %2559 = vperm.xlu1 %4532, %v6329_v25  }
 0x7dd   :  { %v6921_v42 = vpop.permute.xlu0 %2487  ;;  %v6923_v46 = vpop.permute.xlu1 %2727 }
 0x7de   :  { %9366 = vst [vmem:[#allocation160_spill] sm:$0xff] %v6921_v42  ;;  %9367 = vst [vmem:[#allocation161_spill] sm:$0xff] %v6923_v46 }
 0x7df   :  { %4608 = vset.pattern.permute.xlu0 %v9176_v23  ;;  %4536 = vset.pattern.permute.xlu1 %v9237_v44 }
 0x7e0   :  { %3693 = vperm.xlu0 %4608, %v6361_v58   ;;  %2815 = vperm.xlu1 %4536, %v6329_v25  }
 0x7e2   :  { %v6929_v30 = vpop.permute.xlu0 %2935  ;;  %v6931_v50 = vpop.permute.xlu1 %2855 }
 0x7e3   :  { %9368 = vst [vmem:[#allocation162_spill] sm:$0xff] %v6929_v30  ;;  %9369 = vst [vmem:[#allocation163_spill] sm:$0xff] %v6931_v50 }
 0x7e4   :  { %4610 = vset.pattern.permute.xlu0 %v9177_v49  ;;  %4537 = vset.pattern.permute.xlu1 %v9271_v5 }
 0x7e5   :  { %3709 = vperm.xlu0 %4610, %v6361_v58   ;;  %2879 = vperm.xlu1 %4537, %v6329_v25  }
 0x7e7   :  { %v6937_v23 = vpop.permute.xlu0 %2999  ;;  %v6939_v42 = vpop.permute.xlu1 %2919 }
 0x7e8   :  { %9370 = vst [vmem:[#allocation164_spill] sm:$0xff] %v6937_v23  ;;  %9371 = vst [vmem:[#allocation165_spill] sm:$0xff] %v6939_v42  ;;  %v9179_v42 = vmov 53  }
 0x7e9   :  { %4612 = vset.pattern.permute.xlu0 %v9237_v44  ;;  %4538 = vset.pattern.permute.xlu1 %v9238_v14 }
 0x7ea   :  { %2831 = vperm.xlu0 %4612, %v6361_v58   ;;  %2943 = vperm.xlu1 %4538, %v6329_v25  }
 0x7ec   :  { %v6945_v30 = vpop.permute.xlu0 %2047  ;;  %v6947_v49 = vpop.permute.xlu1 %2099 }
 0x7ed   :  { %9372 = vst [vmem:[#allocation166_spill] sm:$0xff] %v6945_v30  ;;  %9373 = vst [vmem:[#allocation167_spill] sm:$0xff] %v6947_v49  ;;  %v9178_v49 = vmov 51  }
 0x7ee   :  { %4616 = vset.pattern.permute.xlu0 %v9293_v51  ;;  %4540 = vset.pattern.permute.xlu1 %v9251_v59 }
 0x7ef   :  { %2119 = vperm.xlu0 %4616, %v6363_v36   ;;  %2032 = vperm.xlu1 %4540, %v6331_v20  }
 0x7f1   :  { %v6953_v23 = vpop.permute.xlu0 %2179  ;;  %v6955_v46 = vpop.permute.xlu1 %2227 }
 0x7f2   :  { %9374 = vst [vmem:[#allocation168_spill] sm:$0xff] %v6953_v23  ;;  %9375 = vst [vmem:[#allocation169_spill] sm:$0xff] %v6955_v46 }
 0x7f3   :  { %4618 = vset.pattern.permute.xlu0 %v9296_v7  ;;  %4542 = vset.pattern.permute.xlu1 %v9255_v1 }
 0x7f4   :  { %2247 = vperm.xlu0 %4618, %v6363_v36   ;;  %2167 = vperm.xlu1 %4542, %v6331_v20  }
 0x7f6   :  { %v6961_v25 = vpop.permute.xlu0 %2307  ;;  %v6963_v30 = vpop.permute.xlu1 %2355 }
 0x7f7   :  { %9376 = vst [vmem:[#allocation170_spill] sm:$0xff] %v6961_v25  ;;  %9377 = vst [vmem:[#allocation171_spill] sm:$0xff] %v6963_v30 }
 0x7f8   :  { %4620 = vset.pattern.permute.xlu0 %v9299_v63  ;;  %4544 = vset.pattern.permute.xlu1 %v9258_v60 }
 0x7f9   :  { %2375 = vperm.xlu0 %4620, %v6363_v36   ;;  %2295 = vperm.xlu1 %4544, %v6331_v20  }
 0x7fb   :  { %v6969_v23 = vpop.permute.xlu0 %2435  ;;  %v6971_v46 = vpop.permute.xlu1 %2483 }
 0x7fc   :  { %9378 = vst [vmem:[#allocation172_spill] sm:$0xff] %v6969_v23  ;;  %9379 = vst [vmem:[#allocation173_spill] sm:$0xff] %v6971_v46 }
 0x7fd   :  { %4624 = vset.pattern.permute.xlu0 %v9264_v8  ;;  %4546 = vset.pattern.permute.xlu1 %v9262_v6 }
 0x7fe   :  { %2631 = vperm.xlu0 %4624, %v6363_v36   ;;  %2423 = vperm.xlu1 %4546, %v6331_v20  }
 0x800   :  { %v6977_v25 = vpop.permute.xlu0 %2499  ;;  %v6979_v30 = vpop.permute.xlu1 %2611 }
 0x801   :  { %9380 = vst [vmem:[#allocation174_spill] sm:$0xff] %v6977_v25  ;;  %9381 = vst [vmem:[#allocation175_spill] sm:$0xff] %v6979_v30 }
 0x802   :  { %4631 = vset.pattern.permute.xlu0 %v9251_v59  ;;  %4548 = vset.pattern.permute.xlu1 %v9252_v18 }
 0x803   :  { %2067 = vperm.xlu0 %4631, %v6369_v41   ;;  %2551 = vperm.xlu1 %4548, %v6331_v20  }
 0x805   :  { %v6985_v23 = vpop.permute.xlu0 %2819  ;;  %v6987_v46 = vpop.permute.xlu1 %2675 }
 0x806   :  { %9382 = vst [vmem:[#allocation176_spill] sm:$0xff] %v6985_v23  ;;  %9383 = vst [vmem:[#allocation177_spill] sm:$0xff] %v6987_v46 }
 0x807   :  { %4633 = vset.pattern.permute.xlu0 %v9255_v1  ;;  %4549 = vset.pattern.permute.xlu1 %v9264_v8 }
 0x808   :  { %2195 = vperm.xlu0 %4633, %v6369_v41   ;;  %2615 = vperm.xlu1 %4549, %v6331_v20  }
 0x80a   :  { %v6993_v25 = vpop.permute.xlu0 %2947  ;;  %v6995_v30 = vpop.permute.xlu1 %2739 }
 0x80b   :  { %9384 = vst [vmem:[#allocation178_spill] sm:$0xff] %v6993_v25  ;;  %9385 = vst [vmem:[#allocation179_spill] sm:$0xff] %v6995_v30 }
 0x80c   :  { %4635 = vset.pattern.permute.xlu0 %v9258_v60  ;;  %4550 = vset.pattern.permute.xlu1 %v9266_v37 }
 0x80d   :  { %2323 = vperm.xlu0 %4635, %v6369_v41   ;;  %2679 = vperm.xlu1 %4550, %v6331_v20  }
 0x80f   :  { %v7001_v23 = vpop.permute.xlu0 %2037  ;;  %v7003_v46 = vpop.permute.xlu1 %2867 }
 0x810   :  { %9386 = vst [vmem:[#allocation180_spill] sm:$0xff] %v7001_v23  ;;  %9387 = vst [vmem:[#allocation181_spill] sm:$0xff] %v7003_v46 }
 0x811   :  { %4637 = vset.pattern.permute.xlu0 %v9262_v6  ;;  %4551 = vset.pattern.permute.xlu1 %v9290_v32 }
 0x812   :  { %2451 = vperm.xlu0 %4637, %v6369_v41   ;;  %2743 = vperm.xlu1 %4551, %v6331_v20  }
 0x814   :  { %v7009_v25 = vpop.permute.xlu0 %2171  ;;  %v7011_v30 = vpop.permute.xlu1 %2091 }
 0x815   :  { %9388 = vst [vmem:[#allocation182_spill] sm:$0xff] %v7009_v25  ;;  %9389 = vst [vmem:[#allocation183_spill] sm:$0xff] %v7011_v30  ;;  %v9180_v30 = vmov 54  }
 0x816   :  { %4641 = vset.pattern.permute.xlu0 %v9178_v49  ;;  %4552 = vset.pattern.permute.xlu1 %v9237_v44 }
 0x817   :  { %3657 = vperm.xlu0 %4641, %v6369_v41   ;;  %2807 = vperm.xlu1 %4552, %v6331_v20  }
 0x819   :  { %v7017_v23 = vpop.permute.xlu0 %2299  ;;  %v7019_v46 = vpop.permute.xlu1 %2219 }
 0x81a   :  { %9390 = vst [vmem:[#allocation184_spill] sm:$0xff] %v7017_v23  ;;  %9391 = vst [vmem:[#allocation185_spill] sm:$0xff] %v7019_v46  ;;  %v9181_v46 = vmov 55  }
 0x81b   :  { %4644 = vset.pattern.permute.xlu0 %v9179_v42  ;;  %4553 = vset.pattern.permute.xlu1 %v9271_v5 }
 0x81c   :  { %3673 = vperm.xlu0 %4644, %v6369_v41   ;;  %2871 = vperm.xlu1 %4553, %v6331_v20  }
 0x81e   :  { %v7025_v49 = vpop.permute.xlu0 %2427  ;;  %v7027_v25 = vpop.permute.xlu1 %2347 }
 0x81f   :  { %9392 = vst [vmem:[#allocation186_spill] sm:$0xff] %v7025_v49  ;;  %9393 = vst [vmem:[#allocation187_spill] sm:$0xff] %v7027_v25  ;;  %v7045_v49 = vld [vmem:[#allocation20] ss:$0 sm:$0xff] }
 0x820   :  { %4645 = vset.pattern.permute.xlu0 %v9180_v30  ;;  %4557 = vset.pattern.permute.xlu1 %v9293_v51 }
 0x821   :  { %3681 = vperm.xlu0 %4645, %v6369_v41   ;;  %2115 = vperm.xlu1 %4557, %v6339_v39  }
 0x823   :  { %v7033_v42 = vpop.permute.xlu0 %2491  ;;  %v7035_v23 = vpop.permute.xlu1 %2475 }
 0x824   :  { %9394 = vst [vmem:[#allocation188_spill] sm:$0xff] %v7033_v42  ;;  %9395 = vst [vmem:[#allocation189_spill] sm:$0xff] %v7035_v23  ;;  %v7049_v42 = vadd.f32 %v7045_v49, %v6265_v21  ;;  %v9182_v23 = vmov 57  }
 0x825   :  { %4646 = vset.pattern.permute.xlu0 %v9181_v46  ;;  %4559 = vset.pattern.permute.xlu1 %v9296_v7 }
 0x826   :  { %3689 = vperm.xlu0 %4646, %v6369_v41   ;;  %2243 = vperm.xlu1 %4559, %v6339_v39   ;;  %v1446_v46 = vmin.f32 %v7049_v42, 20.0  ;;  %vm1430_vm3 = vcmp.gt.f32.partialorder %v7049_v42, 20.0 }
 0x828   :  { %v7041_v20 = vpop.permute.xlu0 %2555  ;;  %v7043_v30 = vpop.permute.xlu1 %2539  ;;  %v1464_v21 = vmul.f32 1.442695, %v1446_v46 }
 0x829   :  { %9396 = vst [vmem:[#allocation190_spill] sm:$0xff] %v7041_v20  ;;  %9397 = vst [vmem:[#allocation191_spill] sm:$0xff] %v7043_v30 }
 0x82a   :  { %4652 = vset.pattern.permute.xlu0 %v9182_v23  ;;  %4561 = vset.pattern.permute.xlu1 %v9299_v63  ;;  %v7066_v23 = vadd.f32 %v7045_v49, %v6269_v15  ;;  %4802 = vpow2.f32 %v1464_v21 }
 0x82b   :  { %3705 = vperm.xlu0 %4652, %v6369_v41   ;;  %2371 = vperm.xlu1 %4561, %v6339_v39  }
 0x82c   :  { %vm1428_vm4 = vcmp.gt.f32.partialorder %v7066_v23, 20.0 }
 0x82d   :  { %v7056_v20 = vpop.permute.xlu0 %2683  ;;  %v7058_v30 = vpop.permute.xlu1 %2731 }
 0x82e   :  { %9398 = vst [vmem:[#allocation192_spill] sm:$0xff] %v7056_v20  ;;  %9399 = vst [vmem:[#allocation193_spill] sm:$0xff] %v7058_v30  ;;  %v1444_v20 = vmin.f32 %v7066_v23, 20.0 }
 0x82f   :  { %4656 = vset.pattern.permute.xlu0 %v9271_v5  ;;  %4564 = vset.pattern.permute.xlu1 %v9252_v18 }
 0x830   :  { %2899 = vperm.xlu0 %4656, %v6369_v41   ;;  %2563 = vperm.xlu1 %4564, %v6339_v39   ;;  %v1460_v15 = vmul.f32 1.442695, %v1444_v20 }
 0x832   :  { %v7068_v25 = vpop.permute.xlu0 %2811  ;;  %v7070_v50 = vpop.permute.xlu1 %2795  ;;  %4804 = vpow2.f32 %v1460_v15 }
 0x833   :  { %9400 = vst [vmem:[#allocation194_spill] sm:$0xff] %v7068_v25  ;;  %9401 = vst [vmem:[#allocation195_spill] sm:$0xff] %v7070_v50 }
 0x834   :  { %4657 = vset.pattern.permute.xlu0 %v9251_v59  ;;  %4565 = vset.pattern.permute.xlu1 %v9264_v8  ;;  %v4803_v50 = vpop.eup %4802 }
 0x835   :  { %2057 = vperm.xlu0 %4657, %v6375_v35   ;;  %2627 = vperm.xlu1 %4565, %v6339_v39  }
 0x837   :  { %v7077_v46 = vpop.permute.xlu0 %2127  ;;  %v7079_v30 = vpop.permute.xlu1 %2923 }
 0x838   :  { %9402 = vst [vmem:[#allocation196_spill] sm:$0xff] %v7077_v46  ;;  %9403 = vst [vmem:[#allocation197_spill] sm:$0xff] %v7079_v30  ;;  %v1494_v46 = vadd.f32 1.0, %v4803_v50 }
 0x839   :  { %4659 = vset.pattern.permute.xlu0 %v9255_v1  ;;  %4566 = vset.pattern.permute.xlu1 %v9266_v37 }
 0x83a   :  { %2187 = vperm.xlu0 %4659, %v6375_v35   ;;  %2691 = vperm.xlu1 %4566, %v6339_v39   ;;  %4806 = vlog2.f32 %v1494_v46 }
 0x83c   :  { %v7085_v21 = vpop.permute.xlu0 %2255  ;;  %v7087_v25 = vpop.permute.xlu1 %2987 }
 0x83d   :  { %9404 = vst [vmem:[#allocation198_spill] sm:$0xff] %v7085_v21  ;;  %9405 = vst [vmem:[#allocation199_spill] sm:$0xff] %v7087_v25  ;;  %v4805_v15 = vpop.eup %4804 }
 0x83e   :  { %4661 = vset.pattern.permute.xlu0 %v9258_v60  ;;  %4567 = vset.pattern.permute.xlu1 %v9290_v32  ;;  %v1492_v50 = vadd.f32 1.0, %v4805_v15  ;;  %v7127_v15 = vadd.f32 %v7045_v49, %v6307_v33 }
 0x83f   :  { %2315 = vperm.xlu0 %4661, %v6375_v35   ;;  %2755 = vperm.xlu1 %4567, %v6339_v39  }
 0x840   :  { %4808 = vlog2.f32 %v1492_v50  ;;  %v1450_v33 = vmin.f32 %v7127_v15, 20.0  ;;  %vm1434_vm5 = vcmp.gt.f32.partialorder %v7127_v15, 20.0 }
 0x841   :  { %v7093_v20 = vpop.permute.xlu0 %2383  ;;  %v7095_v30 = vpop.permute.xlu1 %2042 }
 0x842   :  { %9406 = vst [vmem:[#allocation200_spill] sm:$0xff] %v7093_v20  ;;  %9407 = vst [vmem:[#allocation201_spill] sm:$0xff] %v7095_v30 }
 0x843   :  { %4663 = vset.pattern.permute.xlu0 %v9262_v6  ;;  %4569 = vset.pattern.permute.xlu1 %v9271_v5 }
 0x844   :  { %2443 = vperm.xlu0 %4663, %v6375_v35   ;;  %2883 = vperm.xlu1 %4569, %v6339_v39   ;;  %v4807_v46 = vpop.eup %4806 }
 0x846   :  { %v7101_v25 = vpop.permute.xlu0 %3637  ;;  %v7103_v21 = vpop.permute.xlu1 %2175 }
 0x847   :  { %9408 = vst [vmem:[#allocation202_spill] sm:$0xff] %v7101_v25  ;;  %9409 = vst [vmem:[#allocation203_spill] sm:$0xff] %v7103_v21 }
 0x848   :  { %4664 = vset.pattern.permute.xlu0 %v9248_v57  ;;  %4571 = vset.pattern.permute.xlu1 %v9259_v54 }
 0x849   :  { %2507 = vperm.xlu0 %4664, %v6375_v35   ;;  %3011 = vperm.xlu1 %4571, %v6339_v39   ;;  %v1513_v39 = vmul.f32 0.6931472, %v4807_v46 }
 0x84b   :  { %v7109_v20 = vpop.permute.xlu0 %3645  ;;  %v7111_v30 = vpop.permute.xlu1 %2303 }
 0x84c   :  { %9410 = vst [vmem:[#allocation204_spill] sm:$0xff] %v7109_v20  ;;  %9411 = vst [vmem:[#allocation205_spill] sm:$0xff] %v7111_v30 }
 0x84d   :  { %4669 = vset.pattern.permute.xlu0 %v9237_v44  ;;  %4573 = vset.pattern.permute.xlu1 %v9293_v51 }
 0x84e   :  { %2827 = vperm.xlu0 %4669, %v6375_v35   ;;  %2107 = vperm.xlu1 %4573, %v6347_v4  }
 0x850   :  { %v7117_v25 = vpop.permute.xlu0 %3661  ;;  %v7119_v21 = vpop.permute.xlu1 %2431 }
 0x851   :  { %9412 = vst [vmem:[#allocation206_spill] sm:$0xff] %v7117_v25  ;;  %9413 = vst [vmem:[#allocation207_spill] sm:$0xff] %v7119_v21  ;;  %v7135_v25 = vsel %vm1430_vm3, %v7049_v42, %v1513_v39  ;;  %v4809_v21 = vpop.eup %4808  ;;  %v1472_v42 = vmul.f32 1.442695, %v1450_v33  ;;  %vm1439_vm3 = vcmp.gt.f32.partialorder %v6351_v40, 20.0 }
 0x852   :  { %4672 = vset.pattern.permute.xlu0 %v9259_v54  ;;  %4575 = vset.pattern.permute.xlu1 %v9296_v7 }
 0x853   :  { %3019 = vperm.xlu0 %4672, %v6375_v35   ;;  %2235 = vperm.xlu1 %4575, %v6347_v4   ;;  %4810 = vpow2.f32 %v1472_v42 }
 0x855   :  { %v7129_v50 = vpop.permute.xlu0 %2639  ;;  %v7131_v20 = vpop.permute.xlu1 %2495 }
 0x856   :  { %9414 = vst [vmem:[#allocation208_spill] sm:$0xff] %v7129_v50  ;;  %9415 = vst [vmem:[#allocation209_spill] sm:$0xff] %v7131_v20  ;;  %v1509_v20 = vmul.f32 0.6931472, %v4809_v21 }
 0x857   :  { %1624 = vrot.lane.b32.xlu0 %v7135_v25, %s9223_s29  ;;  %4577 = vset.pattern.permute.xlu1 %v9299_v63 }
 0x858   :  { %2363 = vperm.xlu1 %4577, %v6347_v4   ;;  %v7152_v39 = vsel %vm1428_vm4, %v7066_v23, %v1509_v20  ;;  %vm1437_vm4 = vcmp.gt.f32.partialorder %v6355_v31, 20.0 }
 0x85a   :  { %v7142_v46 = vpop.permute.xlu0 %2703  ;;  %v7144_v50 = vpop.permute.xlu1 %2559 }
 0x85b   :  { %9416 = vst [vmem:[#allocation210_spill] sm:$0xff] %v7142_v46  ;;  %1672 = vrot.lane.b32.xlu0 %v7135_v25, %s5430_s13  ;;  %v7162_v46 = vadd.f32 %v7045_v49, %v6311_v29 }
 0x85c   :  { %4581 = vset.pattern.permute.xlu1 %v9264_v8 }
 0x85d   :  { %2619 = vperm.xlu1 %4581, %v6347_v4   ;;  %v1448_v33 = vmin.f32 %v7162_v46, 20.0  ;;  %vm1432_vm6 = vcmp.gt.f32.partialorder %v7162_v46, 20.0 }
 0x85f   :  { %v7154_v30 = vpop.permute.xlu0 %3693  ;;  %1572 = vrot.lane.b32.xlu0 %v7152_v39, %s5431_s12  ;;  %v7158_v21 = vpop.permute.xlu1 %2815  ;;  %v1468_v29 = vmul.f32 1.442695, %v1448_v33 }
 0x860   :  { %9417 = vst [vmem:[#allocation211_spill] sm:$0xff] %v7154_v30  ;;  %9418 = vst [vmem:[#allocation212_spill] sm:$0xff] %v7158_v21  ;;  %v7183_v30 = vmul.f32 %v7135_v25, %v6180_v19 }
 0x861   :  { %4583 = vset.pattern.permute.xlu1 %v9290_v32  ;;  %4812 = vpow2.f32 %v1468_v29 }
 0x862   :  { %2747 = vperm.xlu1 %4583, %v6347_v4   ;;  %9422 = vst [vmem:[#allocation216_spill] sm:$0xff] %v7183_v30 }
 0x863   :  { %1620 = vrot.lane.b32.xlu0 %v7152_v39, %s9223_s29 }
 0x864   :  { %v7168_v23 = vpop.permute.xlu0 %3709  ;;  %v7170_v20 = vpop.permute.xlu1 %2879 }
 0x865   :  { %9419 = vst [vmem:[#allocation213_spill] sm:$0xff] %v7168_v23  ;;  %9420 = vst [vmem:[#allocation214_spill] sm:$0xff] %v7170_v20  ;;  %v4811_v23 = vpop.eup %4810 }
 0x866   :  { %4585 = vset.pattern.permute.xlu1 %v9271_v5  ;;  %v1498_v21 = vadd.f32 1.0, %v4811_v23  ;;  %v7206_v23 = vmul.f32 %v7152_v39, %v6166_v61 }
 0x867   :  { %1668 = vrot.lane.b32.xlu0 %v7152_v39, %s5430_s13  ;;  %2875 = vperm.xlu1 %4585, %v6347_v4  }
 0x868   :  { %4814 = vlog2.f32 %v1498_v21 }
 0x869   :  { %v7177_v49 = vpop.permute.xlu0 %2831  ;;  %v7179_v42 = vpop.permute.xlu1 %2943 }
 0x86a   :  { %9421 = vst [vmem:[#allocation215_spill] sm:$0xff] %v7177_v49 }
 0x86b   :  { %1802 = vrot.lane.b32.xlu0 %v7183_v30, %s5431_s12  ;;  %4586 = vset.pattern.permute.xlu1 %v9238_v14  ;;  %v4813_v29 = vpop.eup %4812 }
 0x86c   :  { %2939 = vperm.xlu1 %4586, %v6347_v4  }
 0x86e   :  { %v7189_v20 = vpop.permute.xlu0 %2119  ;;  %v7191_v33 = vpop.permute.xlu1 %2032 }
 0x86f   :  { %9423 = vst [vmem:[#allocation217_spill] sm:$0xff] %v7189_v20  ;;  %9424 = vst [vmem:[#allocation218_spill] sm:$0xff] %v7191_v33  ;;  %1850 = vrot.lane.b32.xlu0 %v7183_v30, %s9223_s29  ;;  %v9437_v33 = vmov 51  }
 0x870   :  { %4587 = vset.pattern.permute.xlu1 %v9259_v54 }
 0x871   :  { %3003 = vperm.xlu1 %4587, %v6347_v4  }
 0x872   :  { %v4815_v20 = vpop.eup %4814 }
 0x873   :  { %v7197_v19 = vpop.permute.xlu0 %2247  ;;  %1898 = vrot.lane.b32.xlu0 %v7183_v30, %s5430_s13  ;;  %v7201_v49 = vpop.permute.xlu1 %2167  ;;  %v1521_v30 = vmul.f32 0.6931472, %v4815_v20 }
 0x874   :  { %9425 = vst [vmem:[#allocation219_spill] sm:$0xff] %v7197_v19  ;;  %9426 = vst [vmem:[#allocation220_spill] sm:$0xff] %v7201_v49  ;;  %v1496_v19 = vadd.f32 1.0, %v4813_v29 }
 0x875   :  { %4588 = vset.pattern.permute.xlu1 %v9251_v59 }
 0x876   :  { %2062 = vperm.xlu1 %4588, %v6361_v58   ;;  %4816 = vlog2.f32 %v1496_v19 }
 0x877   :  { %1798 = vrot.lane.b32.xlu0 %v7206_v23, %s5431_s12 }
 0x878   :  { %v7211_v4 = vpop.permute.xlu0 %2375  ;;  %v7213_v21 = vpop.permute.xlu1 %2295 }
 0x879   :  { %9427 = vst [vmem:[#allocation221_spill] sm:$0xff] %v7211_v4  ;;  %9428 = vst [vmem:[#allocation222_spill] sm:$0xff] %v7213_v21  ;;  %v7233_v21 = vsel %vm1434_vm5, %v7127_v15, %v1521_v30  ;;  %vm1443_vm5 = vcmp.gt.f32.partialorder %v6381_v48, 20.0 }
 0x87a   :  { %4590 = vset.pattern.permute.xlu1 %v9255_v1 }
 0x87b   :  { %1846 = vrot.lane.b32.xlu0 %v7206_v23, %s9223_s29  ;;  %2191 = vperm.xlu1 %4590, %v6361_v58  }
 0x87d   :  { %v7219_v61 = vpop.permute.xlu0 %2631  ;;  %v7221_v49 = vpop.permute.xlu1 %2423 }
 0x87e   :  { %9429 = vst [vmem:[#allocation223_spill] sm:$0xff] %v7219_v61  ;;  %9430 = vst [vmem:[#allocation224_spill] sm:$0xff] %v7221_v49 }
 0x87f   :  { %1894 = vrot.lane.b32.xlu0 %v7206_v23, %s5430_s13  ;;  %4592 = vset.pattern.permute.xlu1 %v9258_v60 }
 0x880   :  { %2319 = vperm.xlu1 %4592, %v6361_v58   ;;  %v4817_v20 = vpop.eup %4816 }
 0x881   :  { %v1517_v30 = vmul.f32 0.6931472, %v4817_v20 }
 0x882   :  { %v7228_v29 = vpop.permute.xlu0 %2067  ;;  %v7230_v4 = vpop.permute.xlu1 %2551 }
 0x883   :  { %9431 = vst [vmem:[#allocation225_spill] sm:$0xff] %v7228_v29  ;;  %9432 = vst [vmem:[#allocation226_spill] sm:$0xff] %v7230_v4  ;;  %1584 = vrot.lane.b32.xlu0 %v7233_v21, %s5431_s12  ;;  %v1454_v29 = vmin.f32 %v6337_v27, 20.0  ;;  %v9184_v4 = vmov 48  }
 0x884   :  { %4594 = vset.pattern.permute.xlu1 %v9262_v6 }
 0x885   :  { %2447 = vperm.xlu1 %4594, %v6361_v58  }
 0x887   :  { %v7239_v19 = vpop.permute.xlu0 %2195  ;;  %1632 = vrot.lane.b32.xlu0 %v7233_v21, %s9223_s29  ;;  %v7243_v61 = vpop.permute.xlu1 %2615 }
 0x888   :  { %9433 = vst [vmem:[#allocation227_spill] sm:$0xff] %v7239_v19  ;;  %9434 = vst [vmem:[#allocation228_spill] sm:$0xff] %v7243_v61  ;;  %v1480_v19 = vmul.f32 1.442695, %v1454_v29  ;;  %v7257_v61 = vsel %vm1432_vm6, %v7162_v46, %v1517_v30  ;;  %v1452_v46 = vmin.f32 %v6345_v16, 20.0  ;;  %vm1441_vm6 = vcmp.gt.f32.partialorder %v6387_v62, 20.0 }
 0x889   :  { %4595 = vset.pattern.permute.xlu1 %v9184_v4 }
 0x88a   :  { %3629 = vperm.xlu1 %4595, %v6361_v58   ;;  %4818 = vpow2.f32 %v1480_v19  ;;  %v9442_v19 = vmov 53   ;;  %v1476_v30 = vmul.f32 1.442695, %v1452_v46 }
 0x88b   :  { %1680 = vrot.lane.b32.xlu0 %v7233_v21, %s5430_s13 }
 0x88c   :  { %v7250_v15 = vpop.permute.xlu0 %2323  ;;  %v7252_v49 = vpop.permute.xlu1 %2679  ;;  %4820 = vpow2.f32 %v1476_v30 }
 0x88d   :  { %9435 = vst [vmem:[#allocation229_spill] sm:$0xff] %v7250_v15  ;;  %9436 = vst [vmem:[#allocation230_spill] sm:$0xff] %v7252_v49  ;;  %v9445_v49 = vmov 54  }
 0x88e   :  { %4598 = vset.pattern.permute.xlu1 %v9437_v33 }
 0x88f   :  { %1580 = vrot.lane.b32.xlu0 %v7257_v61, %s5431_s12  ;;  %3653 = vperm.xlu1 %4598, %v6361_v58  }
 0x891   :  { %v7262_v20 = vpop.permute.xlu0 %2451  ;;  %v7264_v4 = vpop.permute.xlu1 %2743 }
 0x892   :  { %9438 = vst [vmem:[#allocation231_spill] sm:$0xff] %v7262_v20  ;;  %9439 = vst [vmem:[#allocation232_spill] sm:$0xff] %v7264_v4  ;;  %v7281_v20 = vmul.f32 %v7233_v21, %v6227_v24 }
 0x893   :  { %1628 = vrot.lane.b32.xlu0 %v7257_v61, %s9223_s29  ;;  %4599 = vset.pattern.permute.xlu1 %v9248_v57 }
 0x894   :  { %2511 = vperm.xlu1 %4599, %v6361_v58   ;;  %v4819_v15 = vpop.eup %4818 }
 0x896   :  { %v7271_v33 = vpop.permute.xlu0 %3657  ;;  %v7273_v29 = vpop.permute.xlu1 %2807 }
 0x897   :  { %9440 = vst [vmem:[#allocation233_spill] sm:$0xff] %v7271_v33  ;;  %9441 = vst [vmem:[#allocation234_spill] sm:$0xff] %v7273_v29  ;;  %1676 = vrot.lane.b32.xlu0 %v7257_v61, %s5430_s13  ;;  %v1502_v29 = vadd.f32 1.0, %v4819_v15  ;;  %v7307_v15 = vmul.f32 %v7257_v61, %v6212_v12 }
 0x898   :  { %4601 = vset.pattern.permute.xlu1 %v9442_v19  ;;  %v9448_v19 = vmov 55  }
 0x899   :  { %3669 = vperm.xlu1 %4601, %v6361_v58   ;;  %4822 = vlog2.f32 %v1502_v29 }
 0x89b   :  { %v7283_v4 = vpop.permute.xlu0 %3673  ;;  %1810 = vrot.lane.b32.xlu0 %v7281_v20, %s5431_s12  ;;  %v7287_v33 = vpop.permute.xlu1 %2871 }
 0x89c   :  { %9443 = vst [vmem:[#allocation235_spill] sm:$0xff] %v7283_v4  ;;  %9444 = vst [vmem:[#allocation236_spill] sm:$0xff] %v7287_v33  ;;  %v4821_v4 = vpop.eup %4820 }
 0x89d   :  { %4602 = vset.pattern.permute.xlu1 %v9445_v49  ;;  %v1500_v29 = vadd.f32 1.0, %v4821_v4 }
 0x89e   :  { %3677 = vperm.xlu1 %4602, %v6361_v58  }
 0x89f   :  { %1858 = vrot.lane.b32.xlu0 %v7281_v20, %s9223_s29  ;;  %4824 = vlog2.f32 %v1500_v29 }
 0x8a0   :  { %v7293_v46 = vpop.permute.xlu0 %3681  ;;  %v7295_v24 = vpop.permute.xlu1 %2115 }
 0x8a1   :  { %9446 = vst [vmem:[#allocation237_spill] sm:$0xff] %v7293_v46  ;;  %9447 = vst [vmem:[#allocation238_spill] sm:$0xff] %v7295_v24 }
 0x8a2   :  { %4603 = vset.pattern.permute.xlu1 %v9448_v19 }
 0x8a3   :  { %1906 = vrot.lane.b32.xlu0 %v7281_v20, %s5430_s13  ;;  %3685 = vperm.xlu1 %4603, %v6361_v58  }
 0x8a5   :  { %v7301_v30 = vpop.permute.xlu0 %3689  ;;  %v7303_v49 = vpop.permute.xlu1 %2243 }
 0x8a6   :  { %9449 = vst [vmem:[#allocation239_spill] sm:$0xff] %v7301_v30  ;;  %9450 = vst [vmem:[#allocation240_spill] sm:$0xff] %v7303_v49  ;;  %v4823_v30 = vpop.eup %4822 }
 0x8a7   :  { %1806 = vrot.lane.b32.xlu0 %v7307_v15, %s5431_s12  ;;  %4604 = vset.pattern.permute.xlu1 %v9252_v18  ;;  %v1529_v12 = vmul.f32 0.6931472, %v4823_v30 }
 0x8a8   :  { %2575 = vperm.xlu1 %4604, %v6361_v58  }
 0x8aa   :  { %v7313_v19 = vpop.permute.xlu0 %3705  ;;  %v7315_v46 = vpop.permute.xlu1 %2371 }
 0x8ab   :  { %9451 = vst [vmem:[#allocation241_spill] sm:$0xff] %v7313_v19  ;;  %9452 = vst [vmem:[#allocation242_spill] sm:$0xff] %v7315_v46  ;;  %1854 = vrot.lane.b32.xlu0 %v7307_v15, %s9223_s29  ;;  %v9455_v19 = vmov 57   ;;  %v7331_v46 = vsel %vm1438_vm7, %v6337_v27, %v1529_v12 }
 0x8ac   :  { %4607 = vset.pattern.permute.xlu1 %v9290_v32 }
 0x8ad   :  { %2767 = vperm.xlu1 %4607, %v6361_v58  }
 0x8af   :  { %v7321_v49 = vpop.permute.xlu0 %2899  ;;  %1902 = vrot.lane.b32.xlu0 %v7307_v15, %s5430_s13  ;;  %v7325_v4 = vpop.permute.xlu1 %2563 }
 0x8b0   :  { %9453 = vst [vmem:[#allocation243_spill] sm:$0xff] %v7321_v49  ;;  %9454 = vst [vmem:[#allocation244_spill] sm:$0xff] %v7325_v4  ;;  %v9185_v49 = vmov 59   ;;  %v4825_v4 = vpop.eup %4824 }
 0x8b1   :  { %4609 = vset.pattern.permute.xlu1 %v9455_v19  ;;  %v1458_v19 = vmin.f32 %v6367_v3, 20.0  ;;  %v1525_v24 = vmul.f32 0.6931472, %v4825_v4 }
 0x8b2   :  { %3701 = vperm.xlu1 %4609, %v6361_v58  }
 0x8b3   :  { %1592 = vrot.lane.b32.xlu0 %v7331_v46, %s5431_s12  ;;  %v7358_v33 = vsel %vm1436_vm8, %v6345_v16, %v1525_v24 }
 0x8b4   :  { %v7335_v30 = vpop.permute.xlu0 %2057  ;;  %v7337_v29 = vpop.permute.xlu1 %2627 }
 0x8b5   :  { %9456 = vst [vmem:[#allocation245_spill] sm:$0xff] %v7335_v30  ;;  %9457 = vst [vmem:[#allocation246_spill] sm:$0xff] %v7337_v29 }
 0x8b6   :  { %4611 = vset.pattern.permute.xlu1 %v9185_v49  ;;  %v1488_v49 = vmul.f32 1.442695, %v1458_v19 }
 0x8b7   :  { %1640 = vrot.lane.b32.xlu0 %v7331_v46, %s9223_s29  ;;  %3717 = vperm.xlu1 %4611, %v6361_v58  }
 0x8b8   :  { %4826 = vpow2.f32 %v1488_v49 }
 0x8b9   :  { %v7344_v27 = vpop.permute.xlu0 %2187  ;;  %v7346_v12 = vpop.permute.xlu1 %2691 }
 0x8ba   :  { %9458 = vst [vmem:[#allocation247_spill] sm:$0xff] %v7344_v27  ;;  %9459 = vst [vmem:[#allocation248_spill] sm:$0xff] %v7346_v12  ;;  %v7381_v12 = vmul.f32 %v7331_v46, %v6245_v56 }
 0x8bb   :  { %1688 = vrot.lane.b32.xlu0 %v7331_v46, %s5430_s13  ;;  %4613 = vset.pattern.permute.xlu1 %v9271_v5 }
 0x8bc   :  { %2895 = vperm.xlu1 %4613, %v6361_v58   ;;  %9466 = vst [vmem:[#allocation255_spill] sm:$0xff] %v7381_v12 }
 0x8be   :  { %v7353_v29 = vpop.permute.xlu0 %2315  ;;  %v7355_v30 = vpop.permute.xlu1 %2755 }
 0x8bf   :  { %9460 = vst [vmem:[#allocation249_spill] sm:$0xff] %v7353_v29  ;;  %9461 = vst [vmem:[#allocation250_spill] sm:$0xff] %v7355_v30  ;;  %1588 = vrot.lane.b32.xlu0 %v7358_v33, %s5431_s12  ;;  %v1456_v30 = vmin.f32 %v6373_v38, 20.0 }
 0x8c0   :  { %4614 = vset.pattern.permute.xlu1 %v9238_v14 }
 0x8c1   :  { %2959 = vperm.xlu1 %4614, %v6361_v58   ;;  %v1484_v49 = vmul.f32 1.442695, %v1456_v30  ;;  %v7405_v30 = vmul.f32 %v7358_v33, %v6224_v9 }
 0x8c3   :  { %1636 = vrot.lane.b32.xlu0 %v7358_v33, %s9223_s29  ;;  %v7366_v4 = vpop.permute.xlu0 %2443  ;;  %v7368_v19 = vpop.permute.xlu1 %2883  ;;  %4828 = vpow2.f32 %v1484_v49  ;;  %9471 = vst [vmem:[#allocation260_spill] sm:$0xff] %v7405_v30 }
 0x8c4   :  { %9462 = vst [vmem:[#allocation251_spill] sm:$0xff] %v7366_v4  ;;  %9463 = vst [vmem:[#allocation252_spill] sm:$0xff] %v7368_v19  ;;  %v4827_v4 = vpop.eup %4826 }
 0x8c5   :  { %4615 = vset.pattern.permute.xlu1 %v9251_v59 }
 0x8c6   :  { %2052 = vperm.xlu1 %4615, %v6363_v36  }
 0x8c7   :  { %1684 = vrot.lane.b32.xlu0 %v7358_v33, %s5430_s13 }
 0x8c8   :  { %v7375_v16 = vpop.permute.xlu0 %2507  ;;  %v7377_v24 = vpop.permute.xlu1 %3011 }
 0x8c9   :  { %9464 = vst [vmem:[#allocation253_spill] sm:$0xff] %v7375_v16  ;;  %9465 = vst [vmem:[#allocation254_spill] sm:$0xff] %v7377_v24  ;;  %v1506_v16 = vadd.f32 1.0, %v4827_v4 }
 0x8ca   :  { %4617 = vset.pattern.permute.xlu1 %v9255_v1 }
 0x8cb   :  { %1818 = vrot.lane.b32.xlu0 %v7381_v12, %s5431_s12  ;;  %2183 = vperm.xlu1 %4617, %v6363_v36   ;;  %4830 = vlog2.f32 %v1506_v16 }
 0x8cd   :  { %v7387_v59 = vpop.permute.xlu0 %2827  ;;  %v7389_v19 = vpop.permute.xlu1 %2107 }
 0x8ce   :  { %9467 = vst [vmem:[#allocation256_spill] sm:$0xff] %v7387_v59  ;;  %9468 = vst [vmem:[#allocation257_spill] sm:$0xff] %v7389_v19  ;;  %v4829_v4 = vpop.eup %4828 }
 0x8cf   :  { %1866 = vrot.lane.b32.xlu0 %v7381_v12, %s9223_s29  ;;  %4619 = vset.pattern.permute.xlu1 %v9258_v60  ;;  %v1504_v49 = vadd.f32 1.0, %v4829_v4 }
 0x8d0   :  { %2311 = vperm.xlu1 %4619, %v6363_v36  }
 0x8d1   :  { %4832 = vlog2.f32 %v1504_v49  ;;  %v7434_v49 = vld [vmem:[#allocation22] sm:$0xf] }
 0x8d2   :  { %v7395_v1 = vpop.permute.xlu0 %3019  ;;  %v7397_v56 = vpop.permute.xlu1 %2235 }
 0x8d3   :  { %9469 = vst [vmem:[#allocation258_spill] sm:$0xff] %v7395_v1  ;;  %9470 = vst [vmem:[#allocation259_spill] sm:$0xff] %v7397_v56  ;;  %1914 = vrot.lane.b32.xlu0 %v7381_v12, %s5430_s13 }
 0x8d4   :  { %4621 = vset.pattern.permute.xlu1 %v9262_v6 }
 0x8d5   :  { %2439 = vperm.xlu1 %4621, %v6363_v36   ;;  %v4831_v6 = vpop.eup %4830 }
 0x8d6   :  { %v7407_v60 = vpop.permute.xlu0 %1624  ;;  %v1537_v59 = vmul.f32 0.6931472, %v4831_v6 }
 0x8d7   :  { %1814 = vrot.lane.b32.xlu0 %v7405_v30, %s5431_s12  ;;  %v7411_v16 = vpop.permute.xlu1 %2363 }
 0x8d8   :  { %9472 = vst [vmem:[#allocation261_spill] sm:$0xff] %v7411_v16  ;;  %v7429_v29 = vsel %vm1442_vm9, %v6367_v3, %v1537_v59  ;;  %v9477_v59 = vsub.s32 3, %v6023_v45 }
 0x8d9   :  { %4622 = vset.pattern.permute.xlu1 %v9248_v57  ;;  %9475 = vst [vmem:[#allocation264_spill] sm:$0xff] %v7429_v29 }
 0x8da   :  { %v7414_v1 = vpop.permute.xlu0 %1672  ;;  %2503 = vperm.xlu1 %4622, %v6363_v36   ;;  %v7445_v16 = vrot.slane %v7434_v49, %v9477_v59 }
 0x8db   :  { %1862 = vrot.lane.b32.xlu0 %v7405_v30, %s9223_s29 }
 0x8dc   :  { %v7419_v9 = vpop.permute.xlu1 %2619 }
 0x8dd   :  { %9473 = vst [vmem:[#allocation262_spill] sm:$0xff] %v7419_v9  ;;  %v4833_v9 = vpop.eup %4832 }
 0x8de   :  { %v1573_v24 = vpop.permute.xlu0 %1572  ;;  %4623 = vset.pattern.permute.xlu1 %v9252_v18 }
 0x8df   :  { %1910 = vrot.lane.b32.xlu0 %v7405_v30, %s5430_s13  ;;  %2567 = vperm.xlu1 %4623, %v6363_v36   ;;  %v1716_v6 = vsel %vm436_vm1, %v7152_v39, %v1573_v24  ;;  %v1533_v24 = vmul.f32 0.6931472, %v4833_v9 }
 0x8e1   :  { %v7425_v4 = vpop.permute.xlu1 %2747 }
 0x8e2   :  { %9474 = vst [vmem:[#allocation263_spill] sm:$0xff] %v7425_v4  ;;  %v1621_v27 = vpop.permute.xlu0 %1620 }
 0x8e3   :  { %1600 = vrot.lane.b32.xlu0 %v7429_v29, %s5431_s12  ;;  %4625 = vset.pattern.permute.xlu1 %v9266_v37  ;;  %v1733_v3 = vsel %vm1732_vm10, %v1716_v6, %v1621_v27 }
 0x8e4   :  { %2695 = vperm.xlu1 %4625, %v6363_v36  }
 0x8e6   :  { %v1669_v4 = vpop.permute.xlu0 %1668  ;;  %v7439_v56 = vpop.permute.xlu1 %2875 }
 0x8e7   :  { %9476 = vst [vmem:[#allocation265_spill] sm:$0xff] %v7439_v56  ;;  %1648 = vrot.lane.b32.xlu0 %v7429_v29, %s9223_s29  ;;  %v7450_v19 = vsel %vm1749_vm11, %v1733_v3, %v1669_v4  ;;  %v7468_v3 = vsel %vm1440_vm12, %v6373_v38, %v1533_v24  ;;  %v7488_v24 = vmul.f32 %v7429_v29, %v6260_v2 }
 0x8e8   :  { %4626 = vset.pattern.permute.xlu1 %v9290_v32  ;;  %v3247_v27 = vmul.f32 %v7445_v16, %v7450_v19 }
 0x8e9   :  { %2759 = vperm.xlu1 %4626, %v6363_v36   ;;  %9480 = vst [vmem:[#allocation268_spill] sm:$0xff] %v7488_v24 }
 0x8ea   :  { %v7454_v39 = vpop.permute.xlu0 %1802  ;;  %v3314_v9 = vmul.f32 1.442695, %v3247_v27 }
 0x8eb   :  { %1696 = vrot.lane.b32.xlu0 %v7429_v29, %s5430_s13  ;;  %v7460_v6 = vpop.permute.xlu1 %2939 }
 0x8ec   :  { %9478 = vst [vmem:[#allocation266_spill] sm:$0xff] %v7460_v6  ;;  %4834 = vpow2.f32 %v3314_v9 }
 0x8ed   :  { %4627 = vset.pattern.permute.xlu1 %v9237_v44 }
 0x8ee   :  { %v7464_v4 = vpop.permute.xlu0 %1850  ;;  %2823 = vperm.xlu1 %4627, %v6363_v36  }
 0x8ef   :  { %1596 = vrot.lane.b32.xlu0 %v7468_v3, %s5431_s12 }
 0x8f0   :  { %v7472_v59 = vpop.permute.xlu1 %3003 }
 0x8f1   :  { %9479 = vst [vmem:[#allocation267_spill] sm:$0xff] %v7472_v59  ;;  %v3174_v59 = vsel %vm436_vm1, %v6603_v53, %v6521_v17 }
 0x8f2   :  { %v7474_v56 = vpop.permute.xlu0 %1898  ;;  %4628 = vset.pattern.permute.xlu1 %v9271_v5  ;;  %v3190_v30 = vsel %vm1732_vm10, %v3174_v59, %v6611_v0 }
 0x8f3   :  { %1644 = vrot.lane.b32.xlu0 %v7468_v3, %s9223_s29  ;;  %2887 = vperm.xlu1 %4628, %v6363_v36   ;;  %v3206_v53 = vsel %vm1749_vm11, %v3190_v30, %v6529_v10 }
 0x8f5   :  { %v7480_v6 = vpop.permute.xlu1 %2062 }
 0x8f6   :  { %v1799_v38 = vpop.permute.xlu0 %1798  ;;  %v4835_v12 = vpop.eup %4834 }
 0x8f7   :  { %1692 = vrot.lane.b32.xlu0 %v7468_v3, %s5430_s13  ;;  %4629 = vset.pattern.permute.xlu1 %v9238_v14  ;;  %v1942_v2 = vsel %vm436_vm1, %v7206_v23, %v1799_v38  ;;  %v3503_v59 = vmul.f32 0.0, %v4835_v12  ;;  %v7526_v23 = vmul.f32 %v7468_v3, %v6248_v26  ;;  %v9488_v38 = vmov 48  }
 0x8f8   :  { %2951 = vperm.xlu1 %4629, %v6363_v36  }
 0x8f9   :  { %9485 = vst [vmem:[#allocation273_spill] sm:$0xff] %v7526_v23 }
 0x8fa   :  { %v1847_v27 = vpop.permute.xlu0 %1846  ;;  %v7490_v9 = vpop.permute.xlu1 %2191 }
 0x8fb   :  { %9481 = vst [vmem:[#allocation269_spill] sm:$0xff] %v7490_v9  ;;  %1826 = vrot.lane.b32.xlu0 %v7488_v24, %s5431_s12  ;;  %v1958_v29 = vsel %vm1732_vm10, %v1942_v2, %v1847_v27 }
 0x8fc   :  { %4630 = vset.pattern.permute.xlu1 %v9259_v54 }
 0x8fd   :  { %3015 = vperm.xlu1 %4630, %v6363_v36  }
 0x8fe   :  { %v1895_v9 = vpop.permute.xlu0 %1894 }
 0x8ff   :  { %v7507_v17 = vsel %vm1749_vm11, %v1958_v29, %v1895_v9  ;;  %1874 = vrot.lane.b32.xlu0 %v7488_v24, %s9223_s29  ;;  %v7511_v0 = vpop.permute.xlu1 %2319 }
 0x900   :  { %9482 = vst [vmem:[#allocation270_spill] sm:$0xff] %v7511_v0  ;;  %v3439_v54 = vmul.f32 %v3206_v53, %v7507_v17 }
 0x901   :  { %4632 = vset.pattern.permute.xlu1 %v9293_v51 }
 0x902   :  { %v7515_v36 = vadd.f32 %v3503_v59, %v3439_v54  ;;  %v7517_v2 = vpop.permute.xlu0 %1584  ;;  %2131 = vperm.xlu1 %4632, %v6369_v41   ;;  %v9490_v59 = vmov 49  }
 0x903   :  { %1922 = vrot.lane.b32.xlu0 %v7488_v24, %s5430_s13  ;;  %v9492_v24 = vmov 50  }
 0x904   :  { %9483 = vst [vmem:[#allocation271_spill] sm:$0xff] %v7515_v36  ;;  %v7522_v10 = vpop.permute.xlu1 %2447 }
 0x905   :  { %9484 = vst [vmem:[#allocation272_spill] sm:$0xff] %v7522_v10 }
 0x906   :  { %v7528_v29 = vpop.permute.xlu0 %1632  ;;  %4634 = vset.pattern.permute.xlu1 %v9296_v7 }
 0x907   :  { %1822 = vrot.lane.b32.xlu0 %v7526_v23, %s5431_s12  ;;  %2259 = vperm.xlu1 %4634, %v6369_v41  }
 0x909   :  { %v7534_v54 = vpop.permute.xlu1 %3629 }
 0x90a   :  { %9486 = vst [vmem:[#allocation274_spill] sm:$0xff] %v7534_v54  ;;  %v7536_v12 = vpop.permute.xlu0 %1680 }
 0x90b   :  { %1870 = vrot.lane.b32.xlu0 %v7526_v23, %s9223_s29  ;;  %4636 = vset.pattern.permute.xlu1 %v9299_v63 }
 0x90c   :  { %2387 = vperm.xlu1 %4636, %v6369_v41  }
 0x90e   :  { %v1581_v26 = vpop.permute.xlu0 %1580  ;;  %v7542_v30 = vpop.permute.xlu1 %3653 }
 0x90f   :  { %9487 = vst [vmem:[#allocation275_spill] sm:$0xff] %v7542_v30  ;;  %1918 = vrot.lane.b32.xlu0 %v7526_v23, %s5430_s13  ;;  %v1720_v53 = vsel %vm436_vm1, %v7257_v61, %v1581_v26  ;;  %v9192_v61 = vmov 62   ;;  %v9580_v23 = vld [vmem:[#allocation88_spill] sm:$0xff] }
 0x910   :  { %4638 = vset.pattern.permute.xlu1 %v9488_v38  ;;  %v9193_v38 = vmov 60  }
 0x911   :  { %3633 = vperm.xlu1 %4638, %v6369_v41  }
 0x912   :  { %v1629_v27 = vpop.permute.xlu0 %1628 }
 0x913   :  { %3023 = vperm.xlu0 %4672, %v6361_v58   ;;  %v7549_v9 = vpop.permute.xlu1 %2511  ;;  %v1737_v10 = vsel %vm1732_vm10, %v1720_v53, %v1629_v27 }
 0x914   :  { %9489 = vst [vmem:[#allocation276_spill] sm:$0xff] %v7549_v9 }
 0x915   :  { %4639 = vset.pattern.permute.xlu1 %v9490_v59 }
 0x916   :  { %v1677_v30 = vpop.permute.xlu0 %1676  ;;  %3641 = vperm.xlu1 %4639, %v6369_v41  }
 0x917   :  { %v7557_v0 = vsel %vm1749_vm11, %v1737_v10, %v1677_v30  ;;  %4675 = vset.pattern.permute.xlu0 %v9193_v38  ;;  %v9495_v38 = vmov 52  }
 0x918   :  { %3729 = vperm.xlu0 %4675, %v6369_v41   ;;  %v7561_v54 = vpop.permute.xlu1 %3669 }
 0x919   :  { %9491 = vst [vmem:[#allocation277_spill] sm:$0xff] %v7561_v54 }
 0x91a   :  { %v1811_v9 = vpop.permute.xlu0 %1810  ;;  %4640 = vset.pattern.permute.xlu1 %v9492_v24  ;;  %v9194_v24 = vmov 63  }
 0x91b   :  { %3649 = vperm.xlu1 %4640, %v6369_v41   ;;  %v1948_v10 = vsel %vm436_vm1, %v7281_v20, %v1811_v9 }
 0x91c   :  { %4677 = vset.pattern.permute.xlu0 %v9192_v61 }
 0x91d   :  { %3741 = vperm.xlu0 %4677, %v6361_v58   ;;  %v7567_v26 = vpop.permute.xlu1 %3677 }
 0x91e   :  { %9493 = vst [vmem:[#allocation278_spill] sm:$0xff] %v7567_v26  ;;  %v1859_v30 = vpop.permute.xlu0 %1858 }
 0x91f   :  { %v1964_v27 = vsel %vm1732_vm10, %v1948_v10, %v1859_v30  ;;  %4642 = vset.pattern.permute.xlu1 %v9248_v57 }
 0x920   :  { %2515 = vperm.xlu1 %4642, %v6369_v41  }
 0x921   :  { %4680 = vset.pattern.permute.xlu0 %v9194_v24 }
 0x922   :  { %3753 = vperm.xlu0 %4680, %v6369_v41   ;;  %v1907_v53 = vpop.permute.xlu0 %1906  ;;  %v7576_v59 = vpop.permute.xlu1 %3685 }
 0x923   :  { %9494 = vst [vmem:[#allocation279_spill] sm:$0xff] %v7576_v59  ;;  %v7579_v61 = vsel %vm1749_vm11, %v1964_v27, %v1907_v53  ;;  %v1457_v59 = vmin.f32 %v6387_v62, 20.0 }
 0x924   :  { %4643 = vset.pattern.permute.xlu1 %v9495_v38 }
 0x925   :  { %3665 = vperm.xlu1 %4643, %v6369_v41  }
 0x926   :  { %v1807_v20 = vpop.permute.xlu0 %1806 }
 0x927   :  { %v7583_v9 = vpop.permute.xlu1 %2575  ;;  %v1946_v57 = vsel %vm436_vm1, %v7307_v15, %v1807_v20 }
 0x928   :  { %9496 = vst [vmem:[#allocation280_spill] sm:$0xff] %v7583_v9 }
 0x929   :  { %4647 = vset.pattern.permute.xlu1 %v9252_v18 }
 0x92a   :  { %v1855_v10 = vpop.permute.xlu0 %1854  ;;  %2579 = vperm.xlu1 %4647, %v6369_v41  }
 0x92b   :  { %v1962_v30 = vsel %vm1732_vm10, %v1946_v57, %v1855_v10 }
 0x92c   :  { %v7590_v24 = vpop.permute.xlu1 %2767 }
 0x92d   :  { %9497 = vst [vmem:[#allocation281_spill] sm:$0xff] %v7590_v24  ;;  %v9501_v24 = vmov 56  }
 0x92e   :  { %v1903_v27 = vpop.permute.xlu0 %1902  ;;  %4648 = vset.pattern.permute.xlu1 %v9264_v8 }
 0x92f   :  { %v7594_v38 = vsel %vm1749_vm11, %v1962_v30, %v1903_v27  ;;  %2643 = vperm.xlu1 %4648, %v6369_v41  }
 0x931   :  { %v7597_v53 = vpop.permute.xlu1 %3701 }
 0x932   :  { %9498 = vst [vmem:[#allocation282_spill] sm:$0xff] %v7597_v53  ;;  %v1593_v58 = vpop.permute.xlu0 %1592 }
 0x933   :  { %4649 = vset.pattern.permute.xlu1 %v9266_v37  ;;  %v1726_v15 = vsel %vm436_vm1, %v7331_v46, %v1593_v58  ;;  %v9503_v46 = vmov 58  }
 0x934   :  { %2707 = vperm.xlu1 %4649, %v6369_v41  }
 0x936   :  { %v1641_v20 = vpop.permute.xlu0 %1640  ;;  %v7603_v57 = vpop.permute.xlu1 %3717 }
 0x937   :  { %9499 = vst [vmem:[#allocation283_spill] sm:$0xff] %v7603_v57  ;;  %v1743_v10 = vsel %vm1732_vm10, %v1726_v15, %v1641_v20  ;;  %v9504_v20 = vmov 59  }
 0x938   :  { %4650 = vset.pattern.permute.xlu1 %v9290_v32 }
 0x939   :  { %2771 = vperm.xlu1 %4650, %v6369_v41  }
 0x93a   :  { %v1689_v30 = vpop.permute.xlu0 %1688 }
 0x93b   :  { %v7609_v27 = vsel %vm1749_vm11, %v1743_v10, %v1689_v30  ;;  %v7611_v53 = vpop.permute.xlu1 %2895 }
 0x93c   :  { %9500 = vst [vmem:[#allocation284_spill] sm:$0xff] %v7611_v53 }
 0x93d   :  { %4651 = vset.pattern.permute.xlu1 %v9501_v24 }
 0x93e   :  { %3697 = vperm.xlu1 %4651, %v6369_v41  }
 0x940   :  { %v7615_v58 = vpop.permute.xlu1 %2959 }
 0x941   :  { %9502 = vst [vmem:[#allocation285_spill] sm:$0xff] %v7615_v58  ;;  %v9558_v58 = vld [vmem:[#allocation49_spill] sm:$0xff] }
 0x942   :  { %4653 = vset.pattern.permute.xlu1 %v9503_v46  ;;  %v1447_v46 = vmin.f32 %v6279_v52, 20.0 }
 0x943   :  { %3713 = vperm.xlu1 %4653, %v6369_v41  }
 0x945   :  { %v7619_v15 = vpop.permute.xlu1 %2052 }
 0x947   :  { %4654 = vset.pattern.permute.xlu1 %v9504_v20 }
 0x948   :  { %3721 = vperm.xlu1 %4654, %v6369_v41  }
 0x94a   :  { %v7623_v10 = vpop.permute.xlu1 %2183 }
 0x94c   :  { %4655 = vset.pattern.permute.xlu1 %v9237_v44  ;;  %v1466_v44 = vmul.f32 1.442695, %v1447_v46 }
 0x94d   :  { %2835 = vperm.xlu1 %4655, %v6369_v41  }
 0x94e   :  { %4836 = vpow2.f32 %v1466_v44 }
 0x94f   :  { %v7627_v24 = vpop.permute.xlu1 %2311 }
 0x950   :  { %9505 = vst [vmem:[#allocation286_spill] sm:$0xff] %v7627_v24  ;;  %v9588_v24 = vld [vmem:[#allocation56_spill] sm:$0xff] }
 0x951   :  { %4658 = vset.pattern.permute.xlu1 %v9293_v51 }
 0x952   :  { %2123 = vperm.xlu1 %4658, %v6375_v35  }
 0x954   :  { %v7631_v30 = vpop.permute.xlu1 %2439 }
 0x955   :  { %9506 = vst [vmem:[#allocation287_spill] sm:$0xff] %v7631_v30  ;;  %v9573_v30 = vld [vmem:[#allocation69_spill] sm:$0xff] }
 0x956   :  { %4660 = vset.pattern.permute.xlu1 %v9296_v7  ;;  %v1445_v7 = vmin.f32 %v6283_v47, 20.0 }
 0x957   :  { %2251 = vperm.xlu1 %4660, %v6375_v35  }
 0x958   :  { %v1462_v57 = vmul.f32 1.442695, %v1445_v7  ;;  %v4837_v46 = vpop.eup %4836 }
 0x959   :  { %v7636_v20 = vpop.permute.xlu1 %2503 }
 0x95a   :  { %9507 = vst [vmem:[#allocation288_spill] sm:$0xff] %v7636_v20  ;;  %4838 = vpow2.f32 %v1462_v57 }
 0x95b   :  { %4662 = vset.pattern.permute.xlu1 %v9299_v63 }
 0x95c   :  { %2379 = vperm.xlu1 %4662, %v6375_v35  }
 0x95e   :  { %v7640_v41 = vpop.permute.xlu1 %2567 }
 0x95f   :  { %9508 = vst [vmem:[#allocation289_spill] sm:$0xff] %v7640_v41 }
 0x960   :  { %4665 = vset.pattern.permute.xlu1 %v9252_v18  ;;  %v1495_v18 = vadd.f32 1.0, %v4837_v46 }
 0x961   :  { %2571 = vperm.xlu1 %4665, %v6375_v35  }
 0x962   :  { %4840 = vlog2.f32 %v1495_v18 }
 0x963   :  { %v7644_v51 = vpop.permute.xlu1 %2695 }
 0x964   :  { %9509 = vst [vmem:[#allocation290_spill] sm:$0xff] %v7644_v51  ;;  %v4839_v7 = vpop.eup %4838 }
 0x965   :  { %4666 = vset.pattern.permute.xlu1 %v9264_v8 }
 0x966   :  { %2635 = vperm.xlu1 %4666, %v6375_v35  }
 0x968   :  { %v7649_v63 = vpop.permute.xlu1 %2759 }
 0x969   :  { %9510 = vst [vmem:[#allocation291_spill] sm:$0xff] %v7649_v63 }
 0x96a   :  { %4667 = vset.pattern.permute.xlu1 %v9266_v37  ;;  %v1493_v37 = vadd.f32 1.0, %v4839_v7  ;;  %v1451_v7 = vmin.f32 %v6323_v43, 20.0 }
 0x96b   :  { %2699 = vperm.xlu1 %4667, %v6375_v35  }
 0x96c   :  { %v4841_v57 = vpop.eup %4840  ;;  %4842 = vlog2.f32 %v1493_v37 }
 0x96d   :  { %v7653_v44 = vpop.permute.xlu1 %2823 }
 0x96e   :  { %9511 = vst [vmem:[#allocation292_spill] sm:$0xff] %v7653_v44 }
 0x96f   :  { %4668 = vset.pattern.permute.xlu1 %v9290_v32  ;;  %v1515_v32 = vmul.f32 0.6931472, %v4841_v57 }
 0x970   :  { %2763 = vperm.xlu1 %4668, %v6375_v35  }
 0x971   :  { %v7673_v18 = vsel %vm1431_vm13, %v6279_v52, %v1515_v32 }
 0x972   :  { %v7657_v8 = vpop.permute.xlu1 %2887  ;;  %9516 = vst [vmem:[#allocation297_spill] sm:$0xff] %v7673_v18 }
 0x973   :  { %9512 = vst [vmem:[#allocation293_spill] sm:$0xff] %v7657_v8  ;;  %v9571_v8 = vld [vmem:[#allocation63_spill] sm:$0xff] }
 0x974   :  { %4670 = vset.pattern.permute.xlu1 %v9271_v5 }
 0x975   :  { %2891 = vperm.xlu1 %4670, %v6375_v35  }
 0x977   :  { %v7661_v9 = vpop.permute.xlu1 %2951 }
 0x978   :  { %9513 = vst [vmem:[#allocation294_spill] sm:$0xff] %v7661_v9  ;;  %v9565_v9 = vld [vmem:[#allocation59_spill] sm:$0xff] }
 0x979   :  { %4671 = vset.pattern.permute.xlu1 %v9238_v14  ;;  %v4843_v14 = vpop.eup %4842 }
 0x97a   :  { %2955 = vperm.xlu1 %4671, %v6375_v35   ;;  %v1511_v37 = vmul.f32 0.6931472, %v4843_v14  ;;  %v1449_v14 = vmin.f32 %v6327_v13, 20.0 }
 0x97c   :  { %v7665_v46 = vpop.permute.xlu1 %3015  ;;  %v7688_v52 = vsel %vm1429_vm14, %v6283_v47, %v1511_v37  ;;  %v7703_v47 = vmul.f32 %v7673_v18, %v6183_v22 }
 0x97d   :  { %9514 = vst [vmem:[#allocation295_spill] sm:$0xff] %v7665_v46  ;;  %9519 = vst [vmem:[#allocation300_spill] sm:$0xff] %v7688_v52  ;;  %v7719_v22 = vmul.f32 %v7688_v52, %v6169_v34 }
 0x97e   :  { %1576 = vrot.lane.b32.xlu1 %v7135_v25, %s5431_s12  ;;  %9522 = vst [vmem:[#allocation303_spill] sm:$0xff] %v7703_v47 }
 0x97f   :  { %9526 = vst [vmem:[#allocation307_spill] sm:$0xff] %v7719_v22 }
 0x981   :  { %v7670_v5 = vpop.permute.xlu1 %2131 }
 0x982   :  { %9515 = vst [vmem:[#allocation296_spill] sm:$0xff] %v7670_v5  ;;  %1578 = vrot.lane.b32.xlu1 %v7673_v18, %s5431_s12  ;;  %v1474_v5 = vmul.f32 1.442695, %v1451_v7  ;;  %v1470_v7 = vmul.f32 1.442695, %v1449_v14 }
 0x984   :  { %4844 = vpow2.f32 %v1474_v5 }
 0x985   :  { %4846 = vpow2.f32 %v1470_v7 }
 0x986   :  { %1626 = vrot.lane.b32.xlu1 %v7673_v18, %s9223_s29  ;;  %v7679_v35 = vpop.permute.xlu1 %2259 }
 0x987   :  { %9517 = vst [vmem:[#allocation298_spill] sm:$0xff] %v7679_v35 }
 0x98a   :  { %1674 = vrot.lane.b32.xlu1 %v7673_v18, %s5430_s13  ;;  %v7721_v18 = vpop.permute.xlu0 %1588 }
 0x98b   :  { %v7684_v57 = vpop.permute.xlu1 %2387 }
 0x98c   :  { %9518 = vst [vmem:[#allocation299_spill] sm:$0xff] %v7684_v57 }
 0x98e   :  { %1574 = vrot.lane.b32.xlu1 %v7688_v52, %s5431_s12  ;;  %v4845_v37 = vpop.eup %4844 }
 0x98f   :  { %v1499_v57 = vadd.f32 1.0, %v4845_v37 }
 0x990   :  { %v7692_v32 = vpop.permute.xlu1 %3633 }
 0x991   :  { %9520 = vst [vmem:[#allocation301_spill] sm:$0xff] %v7692_v32  ;;  %4848 = vlog2.f32 %v1499_v57  ;;  %v7729_v57 = vpop.permute.xlu0 %1636 }
 0x992   :  { %1622 = vrot.lane.b32.xlu1 %v7688_v52, %s9223_s29 }
 0x995   :  { %v7697_v35 = vpop.permute.xlu1 %3641 }
 0x996   :  { %9521 = vst [vmem:[#allocation302_spill] sm:$0xff] %v7697_v35  ;;  %1670 = vrot.lane.b32.xlu1 %v7688_v52, %s5430_s13  ;;  %v4847_v35 = vpop.eup %4846 }
 0x997   :  { %v1497_v7 = vadd.f32 1.0, %v4847_v35 }
 0x999   :  { %4850 = vlog2.f32 %v1497_v7  ;;  %v1455_v7 = vmin.f32 %v6351_v40, 20.0 }
 0x99a   :  { %1804 = vrot.lane.b32.xlu1 %v7703_v47, %s5431_s12  ;;  %v7707_v5 = vpop.permute.xlu1 %3649 }
 0x99b   :  { %9523 = vst [vmem:[#allocation304_spill] sm:$0xff] %v7707_v5  ;;  %v7736_v5 = vpop.permute.xlu0 %1684 }
 0x99e   :  { %1852 = vrot.lane.b32.xlu1 %v7703_v47, %s9223_s29 }
 0x99f   :  { %v7711_v32 = vpop.permute.xlu1 %2515 }
 0x9a0   :  { %9524 = vst [vmem:[#allocation305_spill] sm:$0xff] %v7711_v32  ;;  %v4849_v32 = vpop.eup %4848 }
 0x9a2   :  { %1900 = vrot.lane.b32.xlu1 %v7703_v47, %s5430_s13  ;;  %v7749_v47 = vpop.permute.xlu0 %1818 }
 0x9a4   :  { %v7715_v14 = vpop.permute.xlu1 %3665 }
 0x9a5   :  { %9525 = vst [vmem:[#allocation306_spill] sm:$0xff] %v7715_v14  ;;  %v1523_v14 = vmul.f32 0.6931472, %v4849_v32  ;;  %v4851_v32 = vpop.eup %4850 }
 0x9a6   :  { %1800 = vrot.lane.b32.xlu1 %v7719_v22, %s5431_s12  ;;  %v7758_v63 = vpop.permute.xlu0 %1866 }
 0x9a7   :  { %v7739_v35 = vsel %vm1435_vm15, %v6323_v43, %v1523_v14  ;;  %v1519_v43 = vmul.f32 0.6931472, %v4851_v32  ;;  %v1482_v14 = vmul.f32 1.442695, %v1455_v7  ;;  %9532 = vst [vmem:[#allocation313_spill] sm:$0xff] %v7758_v63  ;;  %v9607_v63 = vld [vmem:[#allocation139_spill] sm:$0xff] }
 0x9a8   :  { %9529 = vst [vmem:[#allocation310_spill] sm:$0xff] %v7739_v35  ;;  %v1486_v7 = vmul.f32 1.442695, %v1457_v59 }
 0x9a9   :  { %v7725_v37 = vpop.permute.xlu1 %2579  ;;  %v7763_v51 = vsel %vm1433_vm0, %v6327_v13, %v1519_v43  ;;  %4852 = vpow2.f32 %v1482_v14 }
 0x9aa   :  { %9527 = vst [vmem:[#allocation308_spill] sm:$0xff] %v7725_v37  ;;  %1848 = vrot.lane.b32.xlu1 %v7719_v22, %s9223_s29  ;;  %9534 = vst [vmem:[#allocation315_spill] sm:$0xff] %v7763_v51 }
 0x9ae   :  { %1896 = vrot.lane.b32.xlu1 %v7719_v22, %s5430_s13  ;;  %v7733_v34 = vpop.permute.xlu1 %2643  ;;  %v1459_v22 = vmin.f32 %v6381_v48, 20.0 }
 0x9af   :  { %9528 = vst [vmem:[#allocation309_spill] sm:$0xff] %v7733_v34  ;;  %v1453_v34 = vmin.f32 %v6355_v31, 20.0 }
 0x9b0   :  { %v1490_v26 = vmul.f32 1.442695, %v1459_v22 }
 0x9b2   :  { %1586 = vrot.lane.b32.xlu1 %v7739_v35, %s5431_s12 }
 0x9b3   :  { %v7743_v37 = vpop.permute.xlu1 %2707  ;;  %v4853_v13 = vpop.eup %4852 }
 0x9b4   :  { %9530 = vst [vmem:[#allocation311_spill] sm:$0xff] %v7743_v37  ;;  %v1478_v37 = vmul.f32 1.442695, %v1453_v34  ;;  %v7771_v34 = vpop.permute.xlu0 %1914  ;;  %v1503_v14 = vadd.f32 1.0, %v4853_v13  ;;  %v7797_v13 = vmul.f32 %v7763_v51, %v6215_v28 }
 0x9b5   :  { %9536 = vst [vmem:[#allocation317_spill] sm:$0xff] %v7771_v34  ;;  %v9581_v34 = vld [vmem:[#allocation125_spill] sm:$0xff] }
 0x9b6   :  { %1634 = vrot.lane.b32.xlu1 %v7739_v35, %s9223_s29  ;;  %4854 = vpow2.f32 %v1478_v37  ;;  %v7779_v37 = vmul.f32 %v7739_v35, %v6230_v11  ;;  %9543 = vst [vmem:[#allocation324_spill] sm:$0xff] %v7797_v13 }
 0x9b7   :  { %4856 = vpow2.f32 %v1490_v26 }
 0x9b8   :  { %v7752_v52 = vpop.permute.xlu1 %2771  ;;  %4858 = vpow2.f32 %v1486_v7  ;;  %9538 = vst [vmem:[#allocation319_spill] sm:$0xff] %v7779_v37  ;;  %v7781_v59 = vpop.permute.xlu0 %1814 }
 0x9b9   :  { %9531 = vst [vmem:[#allocation312_spill] sm:$0xff] %v7752_v52  ;;  %9539 = vst [vmem:[#allocation320_spill] sm:$0xff] %v7781_v59  ;;  %4860 = vlog2.f32 %v1503_v14  ;;  %v9606_v59 = vld [vmem:[#allocation149_spill] sm:$0xff] }
 0x9ba   :  { %1682 = vrot.lane.b32.xlu1 %v7739_v35, %s5430_s13 }
 0x9bd   :  { %v7760_v54 = vpop.permute.xlu1 %3697 }
 0x9be   :  { %9533 = vst [vmem:[#allocation314_spill] sm:$0xff] %v7760_v54  ;;  %1582 = vrot.lane.b32.xlu1 %v7763_v51, %s5431_s12 }
 0x9c0   :  { %v4855_v43 = vpop.eup %4854 }
 0x9c1   :  { %v4857_v26 = vpop.eup %4856  ;;  %v1501_v7 = vadd.f32 1.0, %v4855_v43 }
 0x9c2   :  { %1630 = vrot.lane.b32.xlu1 %v7763_v51, %s9223_s29  ;;  %v7769_v22 = vpop.permute.xlu1 %3713  ;;  %v1507_v52 = vadd.f32 1.0, %v4857_v26 }
 0x9c3   :  { %9535 = vst [vmem:[#allocation316_spill] sm:$0xff] %v7769_v22  ;;  %v4859_v22 = vpop.eup %4858  ;;  %4862 = vlog2.f32 %v1501_v7 }
 0x9c4   :  { %v1505_v11 = vadd.f32 1.0, %v4859_v22  ;;  %4864 = vlog2.f32 %v1507_v52  ;;  %v4861_v14 = vpop.eup %4860 }
 0x9c6   :  { %1678 = vrot.lane.b32.xlu1 %v7763_v51, %s5430_s13  ;;  %4866 = vlog2.f32 %v1505_v11 }
 0x9c7   :  { %v7775_v32 = vpop.permute.xlu1 %3721 }
 0x9c8   :  { %9537 = vst [vmem:[#allocation318_spill] sm:$0xff] %v7775_v32  ;;  %v7789_v32 = vpop.permute.xlu0 %1862 }
 0x9c9   :  { %9541 = vst [vmem:[#allocation322_spill] sm:$0xff] %v7789_v32  ;;  %v9592_v32 = vld [vmem:[#allocation60_spill] sm:$0xff] }
 0x9ca   :  { %1812 = vrot.lane.b32.xlu1 %v7779_v37, %s5431_s12 }
 0x9cc   :  { %v7785_v54 = vpop.permute.xlu1 %2835  ;;  %v7799_v43 = vpop.permute.xlu0 %1910 }
 0x9cd   :  { %9540 = vst [vmem:[#allocation321_spill] sm:$0xff] %v7785_v54  ;;  %9544 = vst [vmem:[#allocation325_spill] sm:$0xff] %v7799_v43  ;;  %v4863_v22 = vpop.eup %4862  ;;  %v1531_v54 = vmul.f32 0.6931472, %v4861_v14 }
 0x9ce   :  { %1860 = vrot.lane.b32.xlu1 %v7779_v37, %s9223_s29  ;;  %v4865_v52 = vpop.eup %4864  ;;  %v1527_v28 = vmul.f32 0.6931472, %v4863_v22  ;;  %v9551_v22 = vsub.s32 0, %v6023_v45 }
 0x9cf   :  { %v7818_v51 = vsel %vm1439_vm3, %v6351_v40, %v1531_v54 }
 0x9d0   :  { %v7807_v7 = vpop.permute.xlu0 %1600  ;;  %9549 = vst [vmem:[#allocation330_spill] sm:$0xff] %v7818_v51  ;;  %v7821_v41 = vsel %vm1437_vm4, %v6355_v31, %v1527_v28  ;;  %v9555_v31 = vsub.s32 2, %v6023_v45 }
 0x9d1   :  { %v7791_v35 = vpop.permute.xlu1 %2123  ;;  %9546 = vst [vmem:[#allocation327_spill] sm:$0xff] %v7807_v7  ;;  %9550 = vst [vmem:[#allocation331_spill] sm:$0xff] %v7821_v41  ;;  %v9656_v7 = vld [vmem:[#allocation156_spill] sm:$0xff] }
 0x9d2   :  { %9542 = vst [vmem:[#allocation323_spill] sm:$0xff] %v7791_v35  ;;  %1908 = vrot.lane.b32.xlu1 %v7779_v37, %s5430_s13  ;;  %v4867_v35 = vpop.eup %4866  ;;  %v1539_v37 = vmul.f32 0.6931472, %v4865_v52  ;;  %v7827_v52 = vrot.slane %v7434_v49, %v9551_v22  ;;  %v7842_v54 = vrot.slane %v7434_v49, %v9555_v31  ;;  %v9557_v22 = vld [vmem:[#allocation67_spill] sm:$0xff]  ;;  %v9562_v31 = vld [vmem:[#allocation41_spill] sm:$0xff] }
 0x9d3   :  { %v1535_v14 = vmul.f32 0.6931472, %v4867_v35  ;;  %v9556_v35 = vld [vmem:[#allocation48_spill] sm:$0xff]  ;;  %v3176_v53 = vsel %vm436_vm1, %v9558_v58, %v9557_v22  ;;  %v7860_v46 = vmul.f32 %v7818_v51, %v9562_v31  ;;  %v9564_v58 = vld [vmem:[#allocation53_spill] sm:$0xff] }
 0x9d4   :  { %v7837_v40 = vsel %vm1443_vm5, %v6381_v48, %v1539_v37  ;;  %v3032_v28 = vsel %vm436_vm1, %v9556_v35, %v6459_v55  ;;  %v9559_v48 = vld [vmem:[#allocation51_spill] sm:$0xff]  ;;  %v9563_v55 = vld [vmem:[#allocation40_spill] sm:$0xff] }
 0x9d5   :  { %9554 = vst [vmem:[#allocation333_spill] sm:$0xff] %v7837_v40  ;;  %v3048_v37 = vsel %vm1732_vm10, %v3032_v28, %v9559_v48  ;;  %v7864_v35 = vmul.f32 %v7821_v41, %v9563_v55  ;;  %v7873_v28 = vsel %vm1441_vm6, %v6387_v62, %v1535_v14  ;;  %v9567_v48 = vld [vmem:[#allocation43_spill] sm:$0xff] }
 0x9d6   :  { %1808 = vrot.lane.b32.xlu1 %v7797_v13, %s5431_s12  ;;  %v7803_v26 = vpop.permute.xlu1 %2251  ;;  %v7868_v22 = vsel %vm1749_vm11, %v3048_v37, %v9564_v58  ;;  %9566 = vst [vmem:[#allocation48_spill] sm:$0xff] %v7873_v28  ;;  %v9570_v55 = vld [vmem:[#allocation47_spill] sm:$0xff]  ;;  %v9572_v37 = vld [vmem:[#allocation50_spill] sm:$0xff] }
 0x9d7   :  { %9545 = vst [vmem:[#allocation326_spill] sm:$0xff] %v7803_v26  ;;  %v3128_v20 = vsel %vm436_vm1, %v9571_v8, %v9570_v55  ;;  %v3192_v58 = vsel %vm1732_vm10, %v3176_v53, %v9572_v37  ;;  %v9578_v28 = vld [vmem:[#allocation79_spill] sm:$0xff]  ;;  %v3036_v8 = vsel %vm436_vm1, %v9581_v34, %v9580_v23  ;;  %v3244_v53 = vmul.f32 %v7827_v52, %v7450_v19  ;;  %v9587_v34 = vld [vmem:[#allocation65_spill] sm:$0xff] }
 0x9d8   :  { %v9583_v37 = vld [vmem:[#allocation127_spill] sm:$0xff] }
 0x9da   :  { %1856 = vrot.lane.b32.xlu1 %v7797_v13, %s9223_s29 }
 0x9db   :  { %v7809_v11 = vpop.permute.xlu1 %2379 }
 0x9dc   :  { %9547 = vst [vmem:[#allocation328_spill] sm:$0xff] %v7809_v11  ;;  %v9552_v11 = vsub.s32 1, %v6023_v45  ;;  %v9560_v45 = vld [vmem:[#allocation57_spill] sm:$0xff] }
 0x9de   :  { %1904 = vrot.lane.b32.xlu1 %v7797_v13, %s5430_s13  ;;  %v7832_v13 = vrot.slane %v7434_v49, %v9552_v11  ;;  %v9561_v11 = vld [vmem:[#allocation55_spill] sm:$0xff] }
 0x9df   :  { %v3080_v49 = vsel %vm436_vm1, %v9561_v11, %v9560_v45  ;;  %v7877_v45 = vmul.f32 %v7837_v40, %v9567_v48  ;;  %v9569_v11 = vld [vmem:[#allocation61_spill] sm:$0xff]  ;;  %v9577_v48 = vld [vmem:[#allocation58_spill] sm:$0xff] }
 0x9e0   :  { %v7815_v26 = vpop.permute.xlu1 %2571  ;;  %v3096_v44 = vsel %vm1732_vm10, %v3080_v49, %v9565_v9  ;;  %v9574_v9 = vld [vmem:[#allocation54_spill] sm:$0xff]  ;;  %v9576_v49 = vld [vmem:[#allocation73_spill] sm:$0xff] }
 0x9e1   :  { %9548 = vst [vmem:[#allocation329_spill] sm:$0xff] %v7815_v26  ;;  %v7834_v26 = vpop.permute.xlu0 %1648  ;;  %9568 = vst [vmem:[#allocation67_spill] sm:$0xff] %v7877_v45  ;;  %v7881_v31 = vsel %vm1749_vm11, %v3096_v44, %v9569_v11  ;;  %v3030_v62 = vsel %vm436_vm1, %v9574_v9, %v9573_v30  ;;  %v3078_v45 = vsel %vm436_vm1, %v9577_v48, %v9576_v49  ;;  %v9579_v44 = vld [vmem:[#allocation77_spill] sm:$0xff]  ;;  %v9582_v30 = vld [vmem:[#allocation64_spill] sm:$0xff] }
 0x9e2   :  { %9553 = vst [vmem:[#allocation332_spill] sm:$0xff] %v7834_v26  ;;  %1594 = vrot.lane.b32.xlu1 %v7818_v51, %s5431_s12  ;;  %v3126_v11 = vsel %vm436_vm1, %v9579_v44, %v9578_v28  ;;  %v3144_v55 = vsel %vm1732_vm10, %v3128_v20, %v9582_v30  ;;  %v3052_v48 = vsel %vm1732_vm10, %v3036_v8, %v9583_v37  ;;  %v9584_v9 = vld [vmem:[#allocation92_spill] sm:$0xff]  ;;  %v9585_v49 = vld [vmem:[#allocation129_spill] sm:$0xff]  ;;  %v9589_v20 = vld [vmem:[#allocation131_spill] sm:$0xff] }
 0x9e3   :  { %v3084_v28 = vsel %vm436_vm1, %v9585_v49, %v9584_v9  ;;  %v3245_v44 = vmul.f32 %v7832_v13, %v7450_v19  ;;  %v3046_v43 = vsel %vm1732_vm10, %v3030_v62, %v9588_v24  ;;  %v3246_v8 = vmul.f32 %v7842_v54, %v7450_v19  ;;  %v9590_v37 = vld [vmem:[#allocation52_spill] sm:$0xff]  ;;  %v9591_v49 = vld [vmem:[#allocation71_spill] sm:$0xff]  ;;  %v9604_v40 = vld [vmem:[#allocation145_spill] sm:$0xff] }
 0x9e4   :  { %v3100_v30 = vsel %vm1732_vm10, %v3084_v28, %v9589_v20  ;;  %v7929_v9 = vsel %vm1749_vm11, %v3192_v58, %v9590_v37  ;;  %v7933_v36 = vsel %vm1749_vm11, %v3046_v43, %v9591_v49  ;;  %v9594_v62 = vld [vmem:[#allocation75_spill] sm:$0xff]  ;;  %v9595_v20 = vld [vmem:[#allocation81_spill] sm:$0xff]  ;;  %v9596_v58 = vld [vmem:[#allocation90_spill] sm:$0xff]  ;;  %v3308_v43 = vmul.f32 1.442695, %v3244_v53 }
 0x9e5   :  { %v7891_v14 = vpop.permute.xlu1 %2635  ;;  %v7915_v23 = vpop.permute.xlu0 %1696  ;;  %v7949_v37 = vsel %vm1749_vm11, %v3052_v48, %v9596_v58  ;;  %v9599_v49 = vld [vmem:[#allocation135_spill] sm:$0xff]  ;;  %v3310_v48 = vmul.f32 1.442695, %v3245_v44  ;;  %v9603_v58 = vld [vmem:[#allocation137_spill] sm:$0xff] }
 0x9e6   :  { %9575 = vst [vmem:[#allocation49_spill] sm:$0xff] %v7891_v14  ;;  %1642 = vrot.lane.b32.xlu1 %v7818_v51, %s9223_s29  ;;  %9586 = vst [vmem:[#allocation51_spill] sm:$0xff] %v7915_v23  ;;  %v7919_v14 = vsel %vm1749_vm11, %v3144_v55, %v9587_v34  ;;  %v3094_v55 = vsel %vm1732_vm10, %v3078_v45, %v9592_v32  ;;  %v9593_v34 = vld [vmem:[#allocation62_spill] sm:$0xff]  ;;  %v9609_v44 = vld [vmem:[#allocation151_spill] sm:$0xff]  ;;  %4868 = vpow2.f32 %v3308_v43 }
 0x9e7   :  { %v3142_v24 = vsel %vm1732_vm10, %v3126_v11, %v9593_v34  ;;  %v7941_v28 = vsel %vm1749_vm11, %v3094_v55, %v9594_v62  ;;  %v9598_v45 = vld [vmem:[#allocation94_spill] sm:$0xff]  ;;  %v9600_v55 = vld [vmem:[#allocation133_spill] sm:$0xff]  ;;  %4870 = vpow2.f32 %v3310_v48  ;;  %v9624_v48 = vld [vmem:[#allocation144_spill] sm:$0xff] }
 0x9e8   :  { %v7945_v19 = vsel %vm1749_vm11, %v3142_v24, %v9595_v20  ;;  %v7957_v11 = vsel %vm1749_vm11, %v3100_v30, %v9598_v45  ;;  %v3132_v34 = vsel %vm436_vm1, %v9600_v55, %v9599_v49  ;;  %v9601_v24 = vld [vmem:[#allocation143_spill] sm:$0xff]  ;;  %v9602_v62 = vld [vmem:[#allocation141_spill] sm:$0xff]  ;;  %v3312_v45 = vmul.f32 1.442695, %v3246_v8 }
 0x9e9   :  { %v3180_v20 = vsel %vm436_vm1, %v9602_v62, %v9601_v24  ;;  %v3148_v53 = vsel %vm1732_vm10, %v3132_v34, %v9603_v58  ;;  %v9608_v49 = vld [vmem:[#allocation147_spill] sm:$0xff]  ;;  %v9610_v34 = vld [vmem:[#allocation100_spill] sm:$0xff]  ;;  %v9611_v62 = vld [vmem:[#allocation153_spill] sm:$0xff] }
 0x9ea   :  { %1690 = vrot.lane.b32.xlu1 %v7818_v51, %s5430_s13  ;;  %v7953_v32 = vpop.permute.xlu1 %2699  ;;  %v3196_v51 = vsel %vm1732_vm10, %v3180_v20, %v9604_v40  ;;  %v7974_v23 = vsel %vm1749_vm11, %v3148_v53, %v9607_v63  ;;  %v3082_v40 = vsel %vm436_vm1, %v9611_v62, %v9610_v34  ;;  %v7985_v20 = vpop.permute.xlu0 %1596  ;;  %v9612_v58 = vld [vmem:[#allocation155_spill] sm:$0xff]  ;;  %v9613_v8 = vld [vmem:[#allocation157_spill] sm:$0xff]  ;;  %v9615_v53 = vld [vmem:[#allocation146_spill] sm:$0xff]  ;;  %4872 = vpow2.f32 %v3312_v45 }
 0x9eb   :  { %9597 = vst [vmem:[#allocation57_spill] sm:$0xff] %v7953_v32  ;;  %v9605_v32 = vld [vmem:[#allocation96_spill] sm:$0xff]  ;;  %v7978_v55 = vsel %vm1749_vm11, %v3196_v51, %v9608_v49  ;;  %v3136_v51 = vsel %vm436_vm1, %v7144_v50, %v9615_v53  ;;  %v9617_v49 = vld [vmem:[#allocation106_spill] sm:$0xff]  ;;  %v9619_v62 = vld [vmem:[#allocation201_spill] sm:$0xff] }
 0x9ec   :  { %v3034_v30 = vsel %vm436_vm1, %v9606_v59, %v9605_v32  ;;  %v3098_v59 = vsel %vm1732_vm10, %v3082_v40, %v9612_v58  ;;  %v9614_v32 = vld [vmem:[#allocation104_spill] sm:$0xff]  ;;  %v1722_v58 = vsel %vm436_vm1, %v7233_v21, %v7517_v2  ;;  %v9621_v50 = vld [vmem:[#allocation165_spill] sm:$0xff]  ;;  %v9628_v45 = vld [vmem:[#allocation102_spill] sm:$0xff] }
 0x9ed   :  { %v3050_v24 = vsel %vm1732_vm10, %v3034_v30, %v9609_v44  ;;  %v3130_v63 = vsel %vm436_vm1, %v9614_v32, %v9613_v8  ;;  %v9616_v30 = vld [vmem:[#allocation163_spill] sm:$0xff]  ;;  %v9618_v34 = vld [vmem:[#allocation140_spill] sm:$0xff] }
 0x9ee   :  { %1590 = vrot.lane.b32.xlu1 %v7821_v41, %s5431_s12  ;;  %v3178_v44 = vsel %vm436_vm1, %v9617_v49, %v9616_v30  ;;  %v3040_v40 = vsel %vm436_vm1, %v9619_v62, %v9618_v34  ;;  %v9622_v32 = vld [vmem:[#allocation203_spill] sm:$0xff]  ;;  %v1739_v30 = vsel %vm1732_vm10, %v1722_v58, %v7528_v29  ;;  %v9625_v62 = vld [vmem:[#allocation205_spill] sm:$0xff]  ;;  %v9626_v21 = vld [vmem:[#allocation148_spill] sm:$0xff]  ;;  %v8029_v29 = vsel %vm1749_vm11, %v3098_v59, %v9628_v45 }
 0x9ef   :  { %v8006_v8 = vpop.permute.xlu1 %2763  ;;  %v3194_v43 = vsel %vm1732_vm10, %v3178_v44, %v9621_v50  ;;  %v3056_v53 = vsel %vm1732_vm10, %v3040_v40, %v9622_v32  ;;  %v9623_v49 = vld [vmem:[#allocation159_spill] sm:$0xff]  ;;  %v3088_v26 = vsel %vm436_vm1, %v9625_v62, %v9624_v48  ;;  %v3152_v2 = vsel %vm1732_vm10, %v3136_v51, %v9626_v21  ;;  %v9627_v50 = vld [vmem:[#allocation98_spill] sm:$0xff]  ;;  %v9629_v58 = vld [vmem:[#allocation161_spill] sm:$0xff] }
 0x9f0   :  { %9620 = vst [vmem:[#allocation55_spill] sm:$0xff] %v8006_v8  ;;  %v3146_v34 = vsel %vm1732_vm10, %v3130_v63, %v9623_v49  ;;  %v1756_v44 = vsel %vm1749_vm11, %v1739_v30, %v7536_v12  ;;  %v8025_v40 = vsel %vm1749_vm11, %v3050_v24, %v9627_v50  ;;  %v9630_v32 = vld [vmem:[#allocation207_spill] sm:$0xff]  ;;  %v9631_v51 = vld [vmem:[#allocation108_spill] sm:$0xff]  ;;  %v9632_v24 = vld [vmem:[#allocation142_spill] sm:$0xff] }
 0x9f1   :  { %v8033_v63 = vsel %vm1749_vm11, %v3146_v34, %v9629_v58  ;;  %v3104_v49 = vsel %vm1732_vm10, %v3088_v26, %v9630_v32  ;;  %v8041_v12 = vsel %vm1749_vm11, %v3194_v43, %v9631_v51  ;;  %v8045_v30 = vsel %vm1749_vm11, %v3056_v53, %v9632_v24  ;;  %v9634_v59 = vld [vmem:[#allocation209_spill] sm:$0xff]  ;;  %v9636_v34 = vld [vmem:[#allocation214_spill] sm:$0xff]  ;;  %v9637_v62 = vld [vmem:[#allocation212_spill] sm:$0xff]  ;;  %v8054_v26 = vpop.permute.xlu0 %1644 }
 0x9f2   :  { %1638 = vrot.lane.b32.xlu1 %v7821_v41, %s9223_s29  ;;  %9633 = vst [vmem:[#allocation41_spill] sm:$0xff] %v8045_v30  ;;  %v8049_v48 = vsel %vm1749_vm11, %v3104_v49, %v9634_v59  ;;  %v3184_v21 = vsel %vm436_vm1, %v9637_v62, %v9636_v34  ;;  %v9638_v50 = vld [vmem:[#allocation150_spill] sm:$0xff]  ;;  %v9640_v58 = vld [vmem:[#allocation236_spill] sm:$0xff]  ;;  %v3268_v49 = vmul.f32 %v7827_v52, %v1756_v44 }
 0x9f3   :  { %9635 = vst [vmem:[#allocation40_spill] sm:$0xff] %v8049_v48  ;;  %v8058_v45 = vsel %vm1749_vm11, %v3152_v2, %v9638_v50  ;;  %v3200_v43 = vsel %vm1732_vm10, %v3184_v21, %v7179_v42  ;;  %v9641_v53 = vld [vmem:[#allocation234_spill] sm:$0xff]  ;;  %v9647_v50 = vld [vmem:[#allocation216_spill] sm:$0xff]  ;;  %v3269_v21 = vmul.f32 %v7832_v13, %v1756_v44 }
 0x9f4   :  { %9639 = vst [vmem:[#allocation53_spill] sm:$0xff] %v8058_v45  ;;  %v3182_v32 = vsel %vm436_vm1, %v9641_v53, %v9640_v58  ;;  %v8066_v51 = vpop.permute.xlu1 %2891  ;;  %v9643_v24 = vld [vmem:[#allocation154_spill] sm:$0xff]  ;;  %v1944_v42 = vsel %vm436_vm1, %v9647_v50, %v7454_v39  ;;  %v9648_v45 = vld [vmem:[#allocation220_spill] sm:$0xff]  ;;  %v3356_v30 = vmul.f32 1.442695, %v3268_v49 }
 0x9f5   :  { %9642 = vst [vmem:[#allocation59_spill] sm:$0xff] %v8066_v51  ;;  %v9644_v59 = vld [vmem:[#allocation218_spill] sm:$0xff]  ;;  %v9649_v53 = vld [vmem:[#allocation224_spill] sm:$0xff]  ;;  %v1960_v48 = vsel %vm1732_vm10, %v1944_v42, %v7464_v4 }
 0x9f6   :  { %v3038_v34 = vsel %vm436_vm1, %v9644_v59, %v9643_v24  ;;  %v9645_v62 = vld [vmem:[#allocation158_spill] sm:$0xff]  ;;  %v3270_v24 = vmul.f32 %v7842_v54, %v1756_v44  ;;  %1686 = vrot.lane.b32.xlu1 %v7821_v41, %s5430_s13  ;;  %4874 = vpow2.f32 %v3356_v30  ;;  %v3263_v30 = vmul.f32 %v7445_v16, %v7557_v0 }
 0x9f7   :  { %v9646_v8 = vld [vmem:[#allocation222_spill] sm:$0xff]  ;;  %v3054_v58 = vsel %vm1732_vm10, %v3038_v34, %v9648_v45  ;;  %v1976_v45 = vsel %vm1749_vm11, %v1960_v48, %v7474_v56  ;;  %v3271_v34 = vmul.f32 %v7445_v16, %v1756_v44  ;;  %v9657_v56 = vld [vmem:[#allocation160_spill] sm:$0xff] }
 0x9f8   :  { %v3086_v2 = vsel %vm436_vm1, %v9646_v8, %v9645_v62  ;;  %v9650_v8 = vld [vmem:[#allocation228_spill] sm:$0xff]  ;;  %v9651_v59 = vld [vmem:[#allocation226_spill] sm:$0xff] }
 0x9f9   :  { %v3102_v51 = vsel %vm1732_vm10, %v3086_v2, %v9649_v53  ;;  %v3134_v39 = vsel %vm436_vm1, %v9651_v59, %v9650_v8  ;;  %v9652_v62 = vld [vmem:[#allocation162_spill] sm:$0xff]  ;;  %v4869_v2 = vpop.eup %4868  ;;  %v9653_v53 = vld [vmem:[#allocation152_spill] sm:$0xff]  ;;  %v3260_v8 = vmul.f32 %v7827_v52, %v7557_v0  ;;  %v8117_v49 = vpop.permute.xlu1 %2955 }
 0x9fa   :  { %v3198_v50 = vsel %vm1732_vm10, %v3182_v32, %v9652_v62  ;;  %v8097_v4 = vsel %vm1749_vm11, %v3200_v43, %v9653_v53  ;;  %v9655_v42 = vld [vmem:[#allocation230_spill] sm:$0xff]  ;;  %v4871_v59 = vpop.eup %4870  ;;  %v8105_v32 = vsel %vm1749_vm11, %v3054_v58, %v9656_v7  ;;  %v8109_v44 = vsel %vm1749_vm11, %v3102_v51, %v9657_v56  ;;  %v9658_v48 = vld [vmem:[#allocation232_spill] sm:$0xff]  ;;  %v8115_v53 = vpop.permute.xlu0 %1692  ;;  %9660 = vst [vmem:[#allocation63_spill] sm:$0xff] %v8117_v49 }
 0x9fb   :  { %9654 = vst [vmem:[#allocation61_spill] sm:$0xff] %v8097_v4  ;;  %v3150_v41 = vsel %vm1732_vm10, %v3134_v39, %v9655_v42  ;;  %v3358_v62 = vmul.f32 1.442695, %v3269_v21  ;;  %v4873_v39 = vpop.eup %4872  ;;  %v9661_v42 = vld [vmem:[#allocation164_spill] sm:$0xff]  ;;  %v8124_v7 = vmul.f32 %v7868_v22, %v1976_v45  ;;  %v3360_v58 = vmul.f32 1.442695, %v3270_v24  ;;  %1820 = vrot.lane.b32.xlu1 %v7860_v46, %s5431_s12 }
 0x9fc   :  { %v8113_v43 = vsel %vm1749_vm11, %v3150_v41, %v9658_v48  ;;  %v8121_v4 = vsel %vm1749_vm11, %v3198_v50, %v9661_v42  ;;  %v3261_v51 = vmul.f32 %v7832_v13, %v7557_v0  ;;  %v8131_v41 = vmul.f32 %v7881_v31, %v1976_v45  ;;  %v9663_v48 = vld [vmem:[#allocation196_spill] sm:$0xff] }
 0x9fd   :  { %9659 = vst [vmem:[#allocation47_spill] sm:$0xff] %v8113_v43  ;;  %9662 = vst [vmem:[#allocation50_spill] sm:$0xff] %v8121_v4  ;;  %v8134_v21 = vmul.f32 %v7919_v14, %v1976_v45  ;;  %v8137_v56 = vmul.f32 %v7929_v9, %v1976_v45  ;;  %v3362_v50 = vmul.f32 1.442695, %v3271_v34  ;;  %v3044_v22 = vsel %vm436_vm1, %v7480_v6, %v9663_v48  ;;  %v1577_v43 = vpop.permute.xlu1 %1576 }
 0x9fe   :  { %v3262_v24 = vmul.f32 %v7842_v54, %v7557_v0  ;;  %v3340_v42 = vmul.f32 1.442695, %v3260_v8  ;;  %v3500_v49 = vmul.f32 0.0, %v4869_v2  ;;  %v3501_v4 = vmul.f32 0.0, %v4871_v59  ;;  %v8154_v34 = vpop.permute.xlu0 %1826 }
 0x9ff   :  { %v3502_v31 = vmul.f32 0.0, %v4873_v39  ;;  %4876 = vpow2.f32 %v3358_v62  ;;  %v3436_v14 = vmul.f32 %v7933_v36, %v7507_v17  ;;  %v3342_v9 = vmul.f32 1.442695, %v3261_v51  ;;  %1868 = vrot.lane.b32.xlu1 %v7860_v46, %s9223_s29 }
 0xa00   :  { %4878 = vpow2.f32 %v3360_v58  ;;  %v1718_v45 = vsel %vm436_vm1, %v7135_v25, %v1577_v43  ;;  %v3437_v6 = vmul.f32 %v7941_v28, %v7507_v17  ;;  %v3344_v2 = vmul.f32 1.442695, %v3262_v24 }
 0xa01   :  { %4880 = vpow2.f32 %v3362_v50  ;;  %v1735_v36 = vsel %vm1732_vm10, %v1718_v45, %v7407_v60  ;;  %v1724_v25 = vsel %vm436_vm1, %v7358_v33, %v7721_v18  ;;  %v8167_v62 = vpop.permute.xlu1 %1578  ;;  %v3284_v60 = vmul.f32 %v7827_v52, %v7609_v27 }
 0xa02   :  { %4882 = vpow2.f32 %v3340_v42  ;;  %v1752_v8 = vsel %vm1749_vm11, %v1735_v36, %v7414_v1  ;;  %v3285_v33 = vmul.f32 %v7832_v13, %v7609_v27  ;;  %v1741_v1 = vsel %vm1732_vm10, %v1724_v25, %v7729_v57  ;;  %v9664_v42 = vld [vmem:[#allocation269_spill] sm:$0xff]  ;;  %v8193_v25 = vpop.eup %4874 }
 0xa03   :  { %v3252_v28 = vmul.f32 %v7827_v52, %v1752_v8  ;;  %v3253_v59 = vmul.f32 %v7832_v13, %v1752_v8  ;;  %v3254_v0 = vmul.f32 %v7842_v54, %v1752_v8  ;;  %v3255_v43 = vmul.f32 %v7445_v16, %v1752_v8  ;;  %1916 = vrot.lane.b32.xlu1 %v7860_v46, %s5430_s13 }
 0xa04   :  { %4884 = vpow2.f32 %v3342_v9  ;;  %v1758_v18 = vsel %vm1749_vm11, %v1741_v1, %v7736_v5  ;;  %v3438_v50 = vmul.f32 %v7945_v19, %v7507_v17  ;;  %v3286_v48 = vmul.f32 %v7842_v54, %v7609_v27  ;;  %v8189_v5 = vpop.permute.xlu0 %1874 }
 0xa05   :  { %v3324_v39 = vmul.f32 1.442695, %v3252_v28  ;;  %v3326_v58 = vmul.f32 1.442695, %v3253_v59  ;;  %v3328_v51 = vmul.f32 1.442695, %v3254_v0  ;;  %4886 = vpow2.f32 %v3344_v2  ;;  %v8191_v36 = vpop.permute.xlu1 %1626 }
 0xa06   :  { %v3330_v24 = vmul.f32 1.442695, %v3255_v43  ;;  %v8185_v57 = vsel %vm1732_vm10, %v3044_v22, %v9664_v42  ;;  %v3346_v9 = vmul.f32 1.442695, %v3263_v30  ;;  %v3287_v45 = vmul.f32 %v7445_v16, %v7609_v27 }
 0xa07   :  { %4888 = vpow2.f32 %v3324_v39  ;;  %v3508_v17 = vadd.f32 %v3500_v49, %v3436_v14  ;;  %v3388_v19 = vmul.f32 1.442695, %v3284_v60  ;;  %v3276_v2 = vmul.f32 %v7827_v52, %v1758_v18  ;;  %1816 = vrot.lane.b32.xlu1 %v7864_v35, %s5431_s12 }
 0xa08   :  { %4890 = vpow2.f32 %v3326_v58  ;;  %v3509_v30 = vadd.f32 %v3501_v4, %v3437_v6  ;;  %v3390_v8 = vmul.f32 1.442695, %v3285_v33  ;;  %v3277_v27 = vmul.f32 %v7832_v13, %v1758_v18  ;;  %v8231_v58 = vpop.permute.xlu0 %1922 }
 0xa09   :  { %v8198_v22 = vpop.eup %4876  ;;  %4892 = vpow2.f32 %v3328_v51  ;;  %v3510_v59 = vadd.f32 %v3502_v31, %v3438_v50  ;;  %v3392_v0 = vmul.f32 1.442695, %v3286_v48  ;;  %v3278_v49 = vmul.f32 %v7842_v54, %v1758_v18  ;;  %v8211_v6 = vpop.permute.xlu1 %1674 }
 0xa0a   :  { %v8201_v28 = vpop.eup %4878  ;;  %4894 = vpow2.f32 %v3330_v24  ;;  %v8208_v43 = vmul.f32 %v7949_v37, %v7579_v61  ;;  %v3394_v60 = vmul.f32 1.442695, %v3287_v45  ;;  %v3279_v4 = vmul.f32 %v7445_v16, %v1758_v18 }
 0xa0b   :  { %v8204_v14 = vpop.eup %4880  ;;  %4896 = vpow2.f32 %v3346_v9  ;;  %v8215_v31 = vmul.f32 %v7957_v11, %v7579_v61  ;;  %v8219_v1 = vmul.f32 %v7974_v23, %v7579_v61  ;;  %v3372_v39 = vmul.f32 1.442695, %v3276_v2  ;;  %1864 = vrot.lane.b32.xlu1 %v7864_v35, %s9223_s29  ;;  %v9665_v23 = vld [vmem:[#allocation217_spill] sm:$0xff]  ;;  %v9668_v2 = vld [vmem:[#allocation264_spill] sm:$0xff] }
 0xa0c   :  { %v4883_v33 = vpop.eup %4882  ;;  %4898 = vpow2.f32 %v3388_v19  ;;  %v8225_v37 = vmul.f32 %v7978_v55, %v7579_v61  ;;  %v8229_v18 = vmul.f32 %v8025_v40, %v7594_v38  ;;  %v3374_v11 = vmul.f32 1.442695, %v3277_v27  ;;  %v9667_v19 = vld [vmem:[#allocation327_spill] sm:$0xff] }
 0xa0d   :  { %4900 = vpow2.f32 %v3390_v8  ;;  %v3042_v50 = vsel %vm436_vm1, %v7619_v15, %v9665_v23  ;;  %v3376_v48 = vmul.f32 1.442695, %v3278_v49  ;;  %v1728_v61 = vsel %vm436_vm1, %v7468_v3, %v7985_v20  ;;  %v8243_v42 = vpop.permute.xlu1 %1574 }
 0xa0e   :  { %v4885_v51 = vpop.eup %4884  ;;  %4902 = vpow2.f32 %v3392_v0  ;;  %v3378_v55 = vmul.f32 1.442695, %v3279_v4  ;;  %v3058_v40 = vsel %vm1732_vm10, %v3042_v50, %v7623_v10  ;;  %v1745_v24 = vsel %vm1732_vm10, %v1728_v61, %v8054_v26  ;;  %v9666_v26 = vld [vmem:[#allocation255_spill] sm:$0xff]  ;;  %v9670_v0 = vld [vmem:[#allocation332_spill] sm:$0xff] }
 0xa0f   :  { %4904 = vpow2.f32 %v3394_v60  ;;  %v4887_v9 = vpop.eup %4886  ;;  %v3453_v45 = vmul.f32 %v8029_v29, %v7594_v38  ;;  %v3454_v15 = vmul.f32 %v8033_v63, %v7594_v38  ;;  %v8251_v3 = vsel %vm1749_vm11, %v1745_v24, %v8115_v53  ;;  %1912 = vrot.lane.b32.xlu1 %v7864_v35, %s5430_s13  ;;  %v9669_v53 = vld [vmem:[#allocation219_spill] sm:$0xff] }
 0xa10   :  { %4906 = vpow2.f32 %v3372_v39  ;;  %v3455_v20 = vmul.f32 %v8041_v12, %v7594_v38  ;;  %v1952_v29 = vsel %vm436_vm1, %v9666_v26, %v7749_v47  ;;  %v1730_v63 = vsel %vm436_vm1, %v9668_v2, %v9667_v19  ;;  %v9671_v12 = vld [vmem:[#allocation51_spill] sm:$0xff]  ;;  %v8275_v39 = vpop.permute.xlu0 %1822  ;;  %v9675_v26 = vld [vmem:[#allocation333_spill] sm:$0xff]  ;;  %v9676_v2 = vld [vmem:[#allocation322_spill] sm:$0xff] }
 0xa11   :  { %v4889_v10 = vpop.eup %4888  ;;  %4908 = vpow2.f32 %v3374_v11  ;;  %v8265_v27 = vsel %vm1749_vm11, %v3058_v40, %v9669_v53  ;;  %v1747_v49 = vsel %vm1732_vm10, %v1730_v63, %v9670_v0  ;;  %v3292_v47 = vmul.f32 %v7827_v52, %v8251_v3  ;;  %v8277_v23 = vpop.permute.xlu1 %1622  ;;  %v9673_v40 = vld [vmem:[#allocation320_spill] sm:$0xff] }
 0xa12   :  { %v4891_v8 = vpop.eup %4890  ;;  %4910 = vpow2.f32 %v3376_v48  ;;  %v3516_v60 = vmul.f32 %v4889_v10, %v3508_v17  ;;  %v8271_v4 = vsel %vm1749_vm11, %v1747_v49, %v9671_v12  ;;  %v9672_v48 = vld [vmem:[#allocation313_spill] sm:$0xff]  ;;  %v9674_v17 = vld [vmem:[#allocation260_spill] sm:$0xff]  ;;  %v3293_v63 = vmul.f32 %v7832_v13, %v8251_v3 }
 0xa13   :  { %v4893_v38 = vpop.eup %4892  ;;  %4912 = vpow2.f32 %v3378_v55  ;;  %v3517_v11 = vmul.f32 %v4891_v8, %v3509_v30  ;;  %v1968_v61 = vsel %vm1732_vm10, %v1952_v29, %v9672_v48  ;;  %v1950_v55 = vsel %vm436_vm1, %v9674_v17, %v9673_v40  ;;  %1602 = vrot.lane.b32.xlu1 %v9675_v26, %s5431_s12  ;;  %v9677_v8 = vld [vmem:[#allocation271_spill] sm:$0xff]  ;;  %v9678_v49 = vld [vmem:[#allocation325_spill] sm:$0xff]  ;;  %v9680_v40 = vld [vmem:[#allocation286_spill] sm:$0xff] }
 0xa14   :  { %v4895_v50 = vpop.eup %4894  ;;  %v3518_v24 = vmul.f32 %v4893_v38, %v3510_v59  ;;  %v3524_v10 = vadd.f32 %v3516_v60, %v8124_v7  ;;  %v1966_v30 = vsel %vm1732_vm10, %v1950_v55, %v9676_v2  ;;  %v3300_v7 = vmul.f32 %v7827_v52, %v8271_v4  ;;  %v9679_v48 = vld [vmem:[#allocation221_spill] sm:$0xff] }
 0xa15   :  { %v4897_v19 = vpop.eup %4896  ;;  %v3519_v53 = vmul.f32 %v4895_v50, %v9677_v8  ;;  %v3525_v29 = vadd.f32 %v3517_v11, %v8131_v41  ;;  %v1982_v59 = vsel %vm1749_vm11, %v1966_v30, %v9678_v49  ;;  %v8305_v17 = vsel %vm436_vm1, %v9680_v40, %v9679_v48  ;;  %v8308_v55 = vpop.permute.xlu1 %1670  ;;  %v9681_v30 = vld [vmem:[#allocation317_spill] sm:$0xff] }
 0xa16   :  { %v8293_v0 = vpop.eup %4898  ;;  %v3526_v60 = vadd.f32 %v3518_v24, %v8134_v21  ;;  %v3532_v38 = vmul.f32 %v4883_v33, %v3524_v10  ;;  %v3404_v50 = vmul.f32 1.442695, %v3292_v47  ;;  %v8314_v8 = vsel %vm1749_vm11, %v1968_v61, %v9681_v30  ;;  %v1871_v10 = vpop.permute.xlu0 %1870 }
 0xa17   :  { %v8300_v12 = vpop.eup %4900  ;;  %v3527_v41 = vadd.f32 %v3519_v53, %v8137_v56  ;;  %v3533_v11 = vmul.f32 %v4885_v51, %v3525_v29  ;;  %v3295_v21 = vmul.f32 %v7445_v16, %v8251_v3  ;;  %1650 = vrot.lane.b32.xlu1 %v9675_v26, %s9223_s29  ;;  %v3468_v56 = vmul.f32 %v8105_v32, %v1982_v59 }
 0xa18   :  { %v8310_v2 = vpop.eup %4902  ;;  %v3534_v33 = vmul.f32 %v4887_v9, %v3526_v60  ;;  %v3540_v24 = vadd.f32 %v3532_v38, %v8229_v18  ;;  %v3406_v51 = vmul.f32 1.442695, %v3293_v63  ;;  %v3301_v61 = vmul.f32 %v7832_v13, %v8271_v4 }
 0xa19   :  { %v8321_v47 = vpop.eup %4904  ;;  %v3535_v53 = vmul.f32 %v4897_v19, %v3527_v41  ;;  %v3541_v29 = vadd.f32 %v3533_v11, %v3453_v45  ;;  %v3420_v48 = vmul.f32 1.442695, %v3300_v7  ;;  %v3469_v60 = vmul.f32 %v8109_v44, %v1982_v59  ;;  %v8328_v38 = vpop.permute.xlu1 %1804  ;;  %v9682_v19 = vld [vmem:[#allocation47_spill] sm:$0xff] }
 0xa1a   :  { %v4907_v49 = vpop.eup %4906  ;;  %v3542_v40 = vadd.f32 %v3534_v33, %v3454_v15  ;;  %v3548_v9 = vmul.f32 %v8193_v25, %v3540_v24  ;;  %4914 = vpow2.f32 %v3404_v50  ;;  %v3470_v45 = vmul.f32 %v9682_v19, %v1982_v59 }
 0xa1b   :  { %v4909_v18 = vpop.eup %4908  ;;  %v3549_v32 = vmul.f32 %v8198_v22, %v3541_v29  ;;  %v3543_v63 = vadd.f32 %v3535_v53, %v3455_v20  ;;  %v3303_v41 = vmul.f32 %v7445_v16, %v8271_v4  ;;  %v3410_v11 = vmul.f32 1.442695, %v3295_v21  ;;  %1698 = vrot.lane.b32.xlu1 %v9675_v26, %s5430_s13  ;;  %v9683_v20 = vld [vmem:[#allocation50_spill] sm:$0xff]  ;;  %v1919_v53 = vpop.permute.xlu0 %1918 }
 0xa1c   :  { %v4911_v30 = vpop.eup %4910  ;;  %v3556_v25 = vadd.f32 %v3548_v9, %v8208_v43  ;;  %4916 = vpow2.f32 %v3406_v51  ;;  %v3550_v7 = vmul.f32 %v8201_v28, %v3542_v40  ;;  %v3471_v50 = vmul.f32 %v9683_v20, %v1982_v59  ;;  %v9684_v28 = vld [vmem:[#allocation273_spill] sm:$0xff]  ;;  %v9685_v59 = vld [vmem:[#allocation48_spill] sm:$0xff] }
 0xa1d   :  { %v4913_v15 = vpop.eup %4912  ;;  %v3557_v44 = vadd.f32 %v3549_v32, %v8215_v31  ;;  %v3551_v22 = vmul.f32 %v8204_v14, %v3543_v63  ;;  %4918 = vpow2.f32 %v3420_v48  ;;  %v3422_v33 = vmul.f32 1.442695, %v3301_v61  ;;  %v8343_v29 = vpop.permute.xlu1 %1852 }
 0xa1e   :  { %v3564_v24 = vmul.f32 %v4907_v49, %v3556_v25  ;;  %v3294_v21 = vmul.f32 %v7842_v54, %v8251_v3  ;;  %v3558_v51 = vadd.f32 %v3550_v7, %v8219_v1  ;;  %v3426_v9 = vmul.f32 1.442695, %v3303_v41  ;;  %v9690_v7 = vld [vmem:[#allocation287_spill] sm:$0xff] }
 0xa1f   :  { %v3565_v43 = vmul.f32 %v4909_v18, %v3557_v44  ;;  %v3559_v31 = vadd.f32 %v3551_v22, %v8225_v37  ;;  %4920 = vpow2.f32 %v3410_v11  ;;  %v1954_v14 = vsel %vm436_vm1, %v9684_v28, %v8275_v39  ;;  %1598 = vrot.lane.b32.xlu1 %v9685_v59, %s5431_s12  ;;  %v9686_v18 = vld [vmem:[#allocation41_spill] sm:$0xff] }
 0xa20   :  { %v3572_v49 = vadd.f32 %v3564_v24, %v3468_v56  ;;  %v1970_v3 = vsel %vm1732_vm10, %v1954_v14, %v1871_v10  ;;  %v3566_v48 = vmul.f32 %v4911_v30, %v3558_v51  ;;  %v3476_v1 = vmul.f32 %v9686_v18, %v8314_v8  ;;  %v9687_v10 = vld [vmem:[#allocation40_spill] sm:$0xff]  ;;  %v9692_v51 = vld [vmem:[#allocation293_spill] sm:$0xff] }
 0xa21   :  { %v3573_v61 = vadd.f32 %v3565_v43, %v3469_v60  ;;  %v3567_v40 = vmul.f32 %v4913_v15, %v3559_v31  ;;  %4922 = vpow2.f32 %v3422_v33  ;;  %v8356_v37 = vsel %vm1749_vm11, %v1970_v3, %v1919_v53  ;;  %v8359_v39 = vpop.permute.xlu1 %1900  ;;  %v9688_v30 = vld [vmem:[#allocation268_spill] sm:$0xff]  ;;  %v9689_v15 = vld [vmem:[#allocation61_spill] sm:$0xff] }
 0xa22   :  { %v3580_v32 = vmul.f32 %v8293_v0, %v3572_v49  ;;  %v3408_v63 = vmul.f32 1.442695, %v3294_v21  ;;  %v3574_v56 = vadd.f32 %v3566_v48, %v3470_v45  ;;  %v3477_v60 = vmul.f32 %v9687_v10, %v8314_v8  ;;  %v9691_v21 = vld [vmem:[#allocation288_spill] sm:$0xff]  ;;  %v9696_v49 = vld [vmem:[#allocation274_spill] sm:$0xff] }
 0xa23   :  { %v3581_v19 = vmul.f32 %v8300_v12, %v3573_v61  ;;  %v3575_v41 = vadd.f32 %v3567_v40, %v3471_v50  ;;  %4924 = vpow2.f32 %v3426_v9  ;;  %v1956_v11 = vsel %vm436_vm1, %v9688_v30, %v8154_v34  ;;  %1646 = vrot.lane.b32.xlu1 %v9685_v59, %s9223_s29  ;;  %v9693_v31 = vld [vmem:[#allocation292_spill] sm:$0xff]  ;;  %v9697_v61 = vld [vmem:[#allocation294_spill] sm:$0xff] }
 0xa24   :  { %v3588_v25 = vadd.f32 %v3580_v32, %v3476_v1  ;;  %v4915_v0 = vpop.eup %4914  ;;  %v3479_v44 = vmul.f32 %v9689_v15, %v8314_v8  ;;  %v3106_v12 = vsel %vm1732_vm10, %v8305_v17, %v9690_v7  ;;  %v1972_v45 = vsel %vm1732_vm10, %v1956_v11, %v8189_v5  ;;  %v9698_v1 = vld [vmem:[#allocation295_spill] sm:$0xff]  ;;  %v9699_v10 = vld [vmem:[#allocation284_spill] sm:$0xff] }
 0xa25   :  { %v3484_v22 = vmul.f32 %v8265_v27, %v8356_v37  ;;  %v3589_v34 = vadd.f32 %v3581_v19, %v3477_v60  ;;  %v3582_v50 = vmul.f32 %v8310_v2, %v3574_v56  ;;  %v3583_v33 = vmul.f32 %v8321_v47, %v3575_v41  ;;  %v8388_v17 = vpop.permute.xlu1 %1800  ;;  %v3024_v19 = vpop.permute.xlu0 %3023  ;;  %v9700_v60 = vld [vmem:[#allocation215_spill] sm:$0xff] }
 0xa26   :  { %v3596_v20 = vmul.f32 %v4915_v0, %v3588_v25  ;;  %v4917_v24 = vpop.eup %4916  ;;  %v3122_v53 = vsel %vm1749_vm11, %v3106_v12, %v9691_v21  ;;  %v3302_v43 = vmul.f32 %v7842_v54, %v8271_v4  ;;  %4926 = vpow2.f32 %v3408_v63  ;;  %v9694_v4 = vld [vmem:[#allocation198_spill] sm:$0xff]  ;;  %v9702_v12 = vld [vmem:[#allocation285_spill] sm:$0xff] }
 0xa27   :  { %v8386_v5 = vsel %vm1749_vm11, %v1972_v45, %v8231_v58  ;;  %v4919_v27 = vpop.eup %4918  ;;  %v3186_v2 = vsel %vm436_vm1, %v9693_v31, %v9692_v51  ;;  %v3485_v47 = vmul.f32 %v3122_v53, %v8356_v37  ;;  %1694 = vrot.lane.b32.xlu1 %v9685_v59, %s5430_s13  ;;  %v3597_v28 = vmul.f32 %v4917_v24, %v3589_v34  ;;  %v9695_v58 = vld [vmem:[#allocation202_spill] sm:$0xff]  ;;  %v9704_v34 = vld [vmem:[#allocation67_spill] sm:$0xff]  ;;  %v9705_v24 = vld [vmem:[#allocation200_spill] sm:$0xff] }
 0xa28   :  { %v3604_v9 = vadd.f32 %v3596_v20, %v3484_v22  ;;  %v3076_v14 = vsel %vm1749_vm11, %v8185_v57, %v9694_v4  ;;  %v3756_v3 = vsel %vm436_vm1, %v9696_v49, %v9695_v58  ;;  %v3202_v48 = vsel %vm1732_vm10, %v3186_v2, %v9697_v61  ;;  %v9703_v22 = vld [vmem:[#allocation53_spill] sm:$0xff]  ;;  %v9706_v21 = vld [vmem:[#allocation270_spill] sm:$0xff] }
 0xa29   :  { %v3591_v40 = vadd.f32 %v3583_v33, %v3479_v44  ;;  %v4921_v18 = vpop.eup %4920  ;;  %v3218_v32 = vsel %vm1749_vm11, %v3202_v48, %v9698_v1  ;;  %v3492_v63 = vmul.f32 %v3076_v14, %v8386_v5  ;;  %v3605_v41 = vadd.f32 %v3597_v28, %v3485_v47  ;;  %v8411_v25 = vpop.permute.xlu1 %1848  ;;  %v9701_v44 = vld [vmem:[#allocation204_spill] sm:$0xff] }
 0xa2a   :  { %v3612_v56 = vmul.f32 %v4919_v27, %v3604_v9  ;;  %v3188_v57 = vsel %vm436_vm1, %v9700_v60, %v9699_v10  ;;  %v3424_v30 = vmul.f32 1.442695, %v3302_v43  ;;  %v3487_v11 = vmul.f32 %v3218_v32, %v8356_v37  ;;  %v9707_v43 = vld [vmem:[#allocation275_spill] sm:$0xff]  ;;  %v9708_v47 = vld [vmem:[#allocation272_spill] sm:$0xff]  ;;  %v9712_v32 = vld [vmem:[#allocation290_spill] sm:$0xff] }
 0xa2b   :  { %v3599_v0 = vmul.f32 %v4921_v18, %v3591_v40  ;;  %v4923_v15 = vpop.eup %4922  ;;  %v3758_v7 = vsel %vm1732_vm10, %v3756_v3, %v9701_v44  ;;  %v3204_v45 = vsel %vm1732_vm10, %v3188_v57, %v9702_v12  ;;  %v3478_v20 = vmul.f32 %v9703_v22, %v8314_v8  ;;  %1828 = vrot.lane.b32.xlu1 %v9704_v34, %s5431_s12  ;;  %v9709_v14 = vld [vmem:[#allocation276_spill] sm:$0xff]  ;;  %v9710_v18 = vld [vmem:[#allocation223_spill] sm:$0xff]  ;;  %v9713_v10 = vld [vmem:[#allocation277_spill] sm:$0xff] }
 0xa2c   :  { %v3620_v33 = vadd.f32 %v3612_v56, %v3492_v63  ;;  %v3092_v53 = vsel %vm436_vm1, %v9706_v21, %v9705_v24  ;;  %v3760_v27 = vsel %vm1749_vm11, %v3758_v7, %v9707_v43  ;;  %v3220_v51 = vsel %vm1749_vm11, %v3204_v45, %v3024_v19  ;;  %v9714_v60 = vld [vmem:[#allocation206_spill] sm:$0xff]  ;;  %v9717_v12 = vld [vmem:[#allocation279_spill] sm:$0xff]  ;;  %v9719_v21 = vld [vmem:[#allocation208_spill] sm:$0xff] }
 0xa2d   :  { %v3607_v31 = vadd.f32 %v3599_v0, %v3487_v11  ;;  %v4925_v2 = vpop.eup %4924  ;;  %v3108_v9 = vsel %vm1732_vm10, %v3092_v53, %v9708_v47  ;;  %v3613_v8 = vmul.f32 %v4923_v15, %v3605_v41  ;;  %v3590_v4 = vadd.f32 %v3582_v50, %v3478_v20  ;;  %v8433_v49 = vpop.permute.xlu1 %1896  ;;  %v9711_v50 = vld [vmem:[#allocation289_spill] sm:$0xff]  ;;  %v9716_v15 = vld [vmem:[#allocation278_spill] sm:$0xff]  ;;  %v9720_v53 = vld [vmem:[#allocation280_spill] sm:$0xff] }
 0xa2e   :  { %v8429_v28 = vmul.f32 %v3760_v27, %v3620_v33  ;;  %v3124_v58 = vsel %vm1749_vm11, %v3108_v9, %v9709_v14  ;;  %4928 = vpow2.f32 %v3424_v30  ;;  %v3495_v48 = vmul.f32 %v3220_v51, %v8386_v5  ;;  %v9715_v30 = vld [vmem:[#allocation291_spill] sm:$0xff]  ;;  %v9718_v22 = vld [vmem:[#allocation42_spill] sm:$0xff]  ;;  %v9722_v47 = vld [vmem:[#allocation281_spill] sm:$0xff] }
 0xa2f   :  { %v3615_v3 = vmul.f32 %v4925_v2, %v3607_v31  ;;  %v3493_v61 = vmul.f32 %v3124_v58, %v8386_v5  ;;  %1876 = vrot.lane.b32.xlu1 %v9704_v34, %s9223_s29  ;;  %v3138_v1 = vsel %vm436_vm1, %v9711_v50, %v9710_v18  ;;  %v3762_v57 = vsel %vm436_vm1, %v9714_v60, %v9713_v10  ;;  %v9721_v51 = vld [vmem:[#allocation210_spill] sm:$0xff]  ;;  %v9724_v58 = vld [vmem:[#allocation211_spill] sm:$0xff] }
 0xa30   :  { %3798 = vrot.lane.b32.xlu0 %v8429_v28, %s9223_s29  ;;  %v4927_v40 = vpop.eup %4926  ;;  %v3154_v63 = vsel %vm1732_vm10, %v3138_v1, %v9712_v32  ;;  %v3764_v44 = vsel %vm1732_vm10, %v3762_v57, %v9716_v15  ;;  %v8466_v20 = vmul.f32 %v9685_v59, %v9718_v22  ;;  %v9723_v14 = vld [vmem:[#allocation282_spill] sm:$0xff]  ;;  %v9729_v60 = vmov 60   ;;  %v9730_v57 = vld [vmem:[#allocation45_spill] sm:$0xff] }
 0xa31   :  { %v3621_v19 = vadd.f32 %v3613_v8, %v3493_v61  ;;  %v3598_v56 = vmul.f32 %v4927_v40, %v3590_v4  ;;  %v8446_v41 = vadd.f32 %v3615_v3, %v3495_v48  ;;  %v3170_v11 = vsel %vm1749_vm11, %v3154_v63, %v9715_v30  ;;  %v8453_v0 = vpop.permute.xlu1 %1586  ;;  %v9725_v40 = vld [vmem:[#allocation213_spill] sm:$0xff]  ;;  %v9727_v63 = vld [vmem:[#allocation46_spill] sm:$0xff] }
 0xa32   :  { %v3486_v7 = vmul.f32 %v3170_v11, %v8356_v37  ;;  %v3766_v45 = vsel %vm1749_vm11, %v3764_v44, %v9717_v12  ;;  %v3140_v37 = vsel %vm436_vm1, %v9720_v53, %v9719_v21  ;;  %v3768_v3 = vsel %vm436_vm1, %v9724_v58, %v9723_v14  ;;  %v9733_v22 = vld [vmem:[#allocation66_spill] sm:$0xff]  ;;  %v9734_v21 = vld [vmem:[#allocation89_spill] sm:$0xff]  ;;  %v9740_v58 = vld [vmem:[#allocation68_spill] sm:$0xff] }
 0xa33   :  { %1924 = vrot.lane.b32.xlu1 %v9704_v34, %s5430_s13  ;;  %v8468_v33 = vmul.f32 %v3766_v45, %v3621_v19  ;;  %v3156_v31 = vsel %vm1732_vm10, %v3140_v37, %v9721_v51  ;;  %v3770_v18 = vsel %vm1732_vm10, %v3768_v3, %v9725_v40  ;;  %v5437_v11 = vmov 61   ;;  %v9732_v45 = vld [vmem:[#allocation85_spill] sm:$0xff]  ;;  %v9735_v53 = vld [vmem:[#allocation70_spill] sm:$0xff] }
 0xa34   :  { %3806 = vrot.lane.b32.xlu0 %v8429_v28, %s5431_s12  ;;  %v3606_v24 = vadd.f32 %v3598_v56, %v3486_v7  ;;  %v3172_v9 = vsel %vm1749_vm11, %v3156_v31, %v9722_v47  ;;  %v9728_v56 = vmov 47   ;;  %v9731_v7 = vld [vmem:[#allocation300_spill] sm:$0xff]  ;;  %v3081_v37 = vsel %vm436_vm1, %v9735_v53, %v9734_v21  ;;  %v9736_v31 = vld [vmem:[#allocation95_spill] sm:$0xff]  ;;  %v9749_v21 = vld [vmem:[#allocation97_spill] sm:$0xff] }
 0xa35   :  { %v8473_v43 = vpop.permute.xlu1 %1634  ;;  %v3494_v4 = vmul.f32 %v3172_v9, %v8386_v5  ;;  %v9726_v5 = vld [vmem:[#allocation283_spill] sm:$0xff]  ;;  %v1717_v12 = vsel %vm436_vm1, %v9731_v7, %v8243_v42  ;;  %v9738_v9 = vld [vmem:[#allocation324_spill] sm:$0xff] }
 0xa36   :  { %v3772_v50 = vsel %vm1749_vm11, %v3770_v18, %v9726_v5  ;;  %v9743_v5 = vld [vmem:[#allocation91_spill] sm:$0xff] }
 0xa37   :  { %1824 = vrot.lane.b32.xlu1 %v8466_v20, %s5431_s12  ;;  %v9746_v7 = vld [vmem:[#allocation99_spill] sm:$0xff] }
 0xa38   :  { %3818 = vrot.lane.b32.xlu0 %v8468_v33, %s5430_s13  ;;  %v4929_v27 = vpop.eup %4928 }
 0xa39   :  { %v3614_v2 = vmul.f32 %v4929_v27, %v3606_v24  ;;  %v8483_v8 = vpop.permute.xlu1 %1682  ;;  %v3033_v24 = vsel %vm436_vm1, %v9733_v22, %v9732_v45  ;;  %v1734_v27 = vsel %vm1732_vm10, %v1717_v12, %v8277_v23  ;;  %v9747_v45 = vld [vmem:[#allocation78_spill] sm:$0xff]  ;;  %v9748_v22 = vld [vmem:[#allocation105_spill] sm:$0xff] }
 0xa3a   :  { %v1751_v51 = vsel %vm1749_vm11, %v1734_v27, %v8308_v55  ;;  %v3049_v3 = vsel %vm1732_vm10, %v3033_v24, %v9740_v58  ;;  %v9742_v55 = vld [vmem:[#allocation87_spill] sm:$0xff]  ;;  %v9754_v58 = vld [vmem:[#allocation113_spill] sm:$0xff] }
 0xa3b   :  { %1872 = vrot.lane.b32.xlu1 %v8466_v20, %s9223_s29  ;;  %v3622_v61 = vadd.f32 %v3614_v2, %v3494_v4  ;;  %v9737_v2 = vld [vmem:[#allocation93_spill] sm:$0xff]  ;;  %v9739_v4 = vmov 62   ;;  %v8555_v18 = vsel %vm1749_vm11, %v3049_v3, %v9742_v55  ;;  %v3249_v24 = vmul.f32 %v7832_v13, %v1751_v51  ;;  %v9755_v3 = vld [vmem:[#allocation84_spill] sm:$0xff] }
 0xa3c   :  { %3826 = vrot.lane.b32.xlu0 %v8468_v33, %s9223_s29  ;;  %v3129_v47 = vsel %vm436_vm1, %v9737_v2, %v9736_v31  ;;  %v9751_v31 = vld [vmem:[#allocation107_spill] sm:$0xff] }
 0xa3d   :  { %v8493_v48 = vpop.permute.xlu1 %1582  ;;  %v8503_v1 = vmul.f32 %v3772_v50, %v3622_v61  ;;  %v9741_v61 = vld [vmem:[#allocation72_spill] sm:$0xff] }
 0xa3e   :  { %v3097_v40 = vsel %vm1732_vm10, %v3081_v37, %v9741_v61  ;;  %v9750_v37 = vld [vmem:[#allocation101_spill] sm:$0xff]  ;;  %v3127_v61 = vsel %vm436_vm1, %v9755_v3, %v9754_v58  ;;  %v9766_v3 = vld [vmem:[#allocation83_spill] sm:$0xff] }
 0xa3f   :  { %1920 = vrot.lane.b32.xlu1 %v8466_v20, %s5430_s13  ;;  %v8559_v50 = vsel %vm1749_vm11, %v3097_v40, %v9743_v5  ;;  %v3251_v40 = vmul.f32 %v7445_v16, %v1751_v51  ;;  %v9756_v5 = vmov 63  }
 0xa40   :  { %3834 = vrot.lane.b32.xlu0 %v8468_v33, %s5431_s12 }
 0xa41   :  { %v8505_v32 = vpop.permute.xlu1 %1630 }
 0xa43   :  { %2963 = vperm.xlu1 %4671, %v9727_v63  }
 0xa44   :  { %3846 = vrot.lane.b32.xlu0 %v8503_v1, %s5430_s13 }
 0xa45   :  { %v8510_v19 = vpop.permute.xlu1 %1678 }
 0xa47   :  { %4673 = vset.pattern.permute.xlu1 %v9728_v56  ;;  %v3248_v56 = vmul.f32 %v7827_v52, %v1751_v51 }
 0xa48   :  { %3854 = vrot.lane.b32.xlu0 %v8503_v1, %s9223_s29  ;;  %3027 = vperm.xlu1 %4673, %v9727_v63  }
 0xa49   :  { %v8516_v10 = vpop.permute.xlu1 %1812 }
 0xa4c   :  { %3862 = vrot.lane.b32.xlu0 %v8503_v1, %s5431_s12  ;;  %4674 = vset.pattern.permute.xlu1 %v9729_v60  ;;  %v9744_v60 = vld [vmem:[#allocation74_spill] sm:$0xff] }
 0xa4d   :  { %3725 = vperm.xlu1 %4674, %v9730_v57   ;;  %v8522_v30 = vpop.permute.xlu1 %1860 }
 0xa51   :  { %4676 = vset.pattern.permute.xlu1 %v5437_v11  ;;  %v8525_v15 = vpop.permute.xlu1 %1908  ;;  %v3145_v11 = vsel %vm1732_vm10, %v3129_v47, %v9744_v60  ;;  %v3250_v47 = vmul.f32 %v7842_v54, %v1751_v51  ;;  %v9757_v60 = vld [vmem:[#allocation111_spill] sm:$0xff] }
 0xa52   :  { %3733 = vperm.xlu1 %4676, %v9730_v57   ;;  %v8573_v53 = vsel %vm1749_vm11, %v3145_v11, %v9749_v21  ;;  %v9762_v21 = vld [vmem:[#allocation110_spill] sm:$0xff] }
 0xa55   :  { %v1809_v44 = vpop.permute.xlu1 %1808 }
 0xa56   :  { %3737 = vperm.xlu1 %4676, %v9727_v63   ;;  %v1947_v42 = vsel %vm436_vm1, %v9738_v9, %v1809_v44  ;;  %v9745_v44 = vld [vmem:[#allocation76_spill] sm:$0xff] }
 0xa57   :  { %v3177_v12 = vsel %vm436_vm1, %v9746_v7, %v9745_v44  ;;  %v9758_v44 = vld [vmem:[#allocation115_spill] sm:$0xff] }
 0xa58   :  { %v3193_v27 = vsel %vm1732_vm10, %v3177_v12, %v9750_v37  ;;  %v3143_v7 = vsel %vm1732_vm10, %v3127_v61, %v9758_v44  ;;  %v9759_v12 = vld [vmem:[#allocation297_spill] sm:$0xff]  ;;  %v9769_v44 = vld [vmem:[#allocation123_spill] sm:$0xff] }
 0xa59   :  { %v1857_v14 = vpop.permute.xlu1 %1856 }
 0xa5a   :  { %4678 = vset.pattern.permute.xlu1 %v9739_v4  ;;  %v1963_v23 = vsel %vm1732_vm10, %v1947_v42, %v1857_v14  ;;  %v9752_v42 = vld [vmem:[#allocation82_spill] sm:$0xff]  ;;  %v9753_v4 = vld [vmem:[#allocation109_spill] sm:$0xff] }
 0xa5b   :  { %3745 = vperm.xlu1 %4678, %v9727_v63   ;;  %v3031_v63 = vsel %vm436_vm1, %v9748_v22, %v9747_v45  ;;  %v3079_v14 = vsel %vm436_vm1, %v9753_v4, %v9752_v42  ;;  %v1719_v45 = vsel %vm436_vm1, %v9759_v12, %v8167_v62  ;;  %v3316_v22 = vmul.f32 1.442695, %v3248_v56  ;;  %v9763_v42 = vld [vmem:[#allocation80_spill] sm:$0xff]  ;;  %v9764_v62 = vld [vmem:[#allocation119_spill] sm:$0xff]  ;;  %v9765_v56 = vld [vmem:[#allocation117_spill] sm:$0xff] }
 0xa5c   :  { %v3047_v2 = vsel %vm1732_vm10, %v3031_v63, %v9751_v31  ;;  %v3095_v11 = vsel %vm1732_vm10, %v3079_v14, %v9757_v60  ;;  %v9760_v63 = vld [vmem:[#allocation103_spill] sm:$0xff]  ;;  %v1736_v31 = vsel %vm1732_vm10, %v1719_v45, %v8191_v36  ;;  %v3320_v14 = vmul.f32 1.442695, %v3250_v47  ;;  %v9770_v45 = vld [vmem:[#allocation112_spill] sm:$0xff] }
 0xa5d   :  { %v1905_v9 = vpop.permute.xlu1 %1904  ;;  %v8601_v51 = vsel %vm1749_vm11, %v3193_v27, %v9760_v63  ;;  %v8610_v4 = vsel %vm1749_vm11, %v3047_v2, %v9763_v42  ;;  %v1753_v27 = vsel %vm1749_vm11, %v1736_v31, %v8211_v6  ;;  %v8619_v61 = vsel %vm1749_vm11, %v3095_v11, %v9766_v3  ;;  %v9771_v47 = vld [vmem:[#allocation171_spill] sm:$0xff]  ;;  %v9772_v63 = vld [vmem:[#allocation114_spill] sm:$0xff] }
 0xa5e   :  { %v8588_v55 = vsel %vm1749_vm11, %v1963_v23, %v1905_v9  ;;  %v9761_v23 = vld [vmem:[#allocation167_spill] sm:$0xff]  ;;  %v3318_v9 = vmul.f32 1.442695, %v3249_v24  ;;  %v9768_v24 = vld [vmem:[#allocation121_spill] sm:$0xff]  ;;  %v3322_v60 = vmul.f32 1.442695, %v3251_v40  ;;  %v3085_v11 = vsel %vm436_vm1, %v9772_v63, %v9771_v47 }
 0xa5f   :  { %4679 = vset.pattern.permute.xlu1 %v9756_v5  ;;  %v3037_v37 = vsel %vm436_vm1, %v9762_v21, %v9761_v23  ;;  %v9767_v5 = vld [vmem:[#allocation86_spill] sm:$0xff]  ;;  %4930 = vpow2.f32 %v3316_v22  ;;  %v9775_v40 = vld [vmem:[#allocation187_spill] sm:$0xff] }
 0xa60   :  { %3749 = vperm.xlu1 %4679, %v9730_v57   ;;  %v3175_v57 = vsel %vm436_vm1, %v9765_v56, %v9764_v62  ;;  %v8623_v36 = vsel %vm1749_vm11, %v3143_v7, %v9767_v5  ;;  %v3053_v6 = vsel %vm1732_vm10, %v3037_v37, %v9770_v45  ;;  %v9773_v7 = vld [vmem:[#allocation183_spill] sm:$0xff]  ;;  %v9774_v23 = vld [vmem:[#allocation126_spill] sm:$0xff]  ;;  %v3256_v62 = vmul.f32 %v7827_v52, %v1753_v27 }
 0xa61   :  { %v1595_v58 = vpop.permute.xlu1 %1594  ;;  %v3191_v2 = vsel %vm1732_vm10, %v3175_v57, %v9768_v24  ;;  %v3035_v21 = vsel %vm436_vm1, %v9774_v23, %v9773_v7  ;;  %v9776_v31 = vld [vmem:[#allocation130_spill] sm:$0xff]  ;;  %4932 = vpow2.f32 %v3318_v9  ;;  %v3257_v37 = vmul.f32 %v7832_v13, %v1753_v27  ;;  %v9777_v56 = vld [vmem:[#allocation315_spill] sm:$0xff]  ;;  %v9779_v9 = vld [vmem:[#allocation169_spill] sm:$0xff] }
 0xa62   :  { %v8629_v12 = vsel %vm1749_vm11, %v3191_v2, %v9769_v44  ;;  %v3083_v42 = vsel %vm436_vm1, %v9776_v31, %v9775_v40  ;;  %4934 = vpow2.f32 %v3320_v14  ;;  %v1721_v22 = vsel %vm436_vm1, %v9777_v56, %v8493_v48  ;;  %v9778_v57 = vld [vmem:[#allocation330_spill] sm:$0xff]  ;;  %v9780_v14 = vld [vmem:[#allocation116_spill] sm:$0xff]  ;;  %v9781_v63 = vld [vmem:[#allocation175_spill] sm:$0xff] }
 0xa63   :  { %v1727_v3 = vsel %vm436_vm1, %v9778_v57, %v1595_v58  ;;  %v3258_v24 = vmul.f32 %v7842_v54, %v1753_v27  ;;  %4936 = vpow2.f32 %v3322_v60  ;;  %v1738_v2 = vsel %vm1732_vm10, %v1721_v22, %v8505_v32  ;;  %v9782_v60 = vld [vmem:[#allocation118_spill] sm:$0xff]  ;;  %v9783_v32 = vld [vmem:[#allocation128_spill] sm:$0xff]  ;;  %v9788_v57 = vld [vmem:[#allocation185_spill] sm:$0xff] }
 0xa64   :  { %3790 = vrot.lane.b32.xlu1 %v8429_v28, %s5430_s13  ;;  %v8657_v45 = vsel %vm1749_vm11, %v3053_v6, %v9779_v9  ;;  %v8661_v47 = vsel %vm1732_vm10, %v3085_v11, %v9780_v14  ;;  %v3259_v48 = vmul.f32 %v7445_v16, %v1753_v27  ;;  %v1755_v58 = vsel %vm1749_vm11, %v1738_v2, %v8510_v19  ;;  %v9784_v40 = vld [vmem:[#allocation134_spill] sm:$0xff]  ;;  %v9785_v6 = vld [vmem:[#allocation191_spill] sm:$0xff]  ;;  %v9786_v11 = vld [vmem:[#allocation181_spill] sm:$0xff] }
 0xa65   :  { %v1643_v5 = vpop.permute.xlu1 %1642  ;;  %v8669_v7 = vsel %vm436_vm1, %v9782_v60, %v9781_v63  ;;  %v3051_v23 = vsel %vm1732_vm10, %v3035_v21, %v9783_v32  ;;  %v3131_v31 = vsel %vm436_vm1, %v9785_v6, %v9784_v40  ;;  %v3332_v56 = vmul.f32 1.442695, %v3256_v62  ;;  %v9787_v22 = vld [vmem:[#allocation120_spill] sm:$0xff]  ;;  %v9790_v21 = vld [vmem:[#allocation189_spill] sm:$0xff]  ;;  %v9792_v6 = vld [vmem:[#allocation307_spill] sm:$0xff] }
 0xa66   :  { %v1744_v44 = vsel %vm1732_vm10, %v1727_v3, %v1643_v5  ;;  %v8679_v27 = vsel %vm436_vm1, %v9787_v22, %v9786_v11  ;;  %v8683_v19 = vsel %vm1749_vm11, %v3051_v23, %v9788_v57  ;;  %v9789_v3 = vld [vmem:[#allocation132_spill] sm:$0xff]  ;;  %v3334_v2 = vmul.f32 1.442695, %v3257_v37  ;;  %v9793_v11 = vld [vmem:[#allocation193_spill] sm:$0xff] }
 0xa67   :  { %v3099_v5 = vsel %vm1732_vm10, %v3083_v42, %v9789_v3  ;;  %v3336_v63 = vmul.f32 1.442695, %v3258_v24  ;;  %v3264_v62 = vmul.f32 %v7827_v52, %v1755_v58  ;;  %v9791_v32 = vld [vmem:[#allocation136_spill] sm:$0xff]  ;;  %v3338_v23 = vmul.f32 1.442695, %v3259_v48 }
 0xa68   :  { %v8689_v14 = vsel %vm1749_vm11, %v3099_v5, %v9790_v21  ;;  %v3147_v40 = vsel %vm1732_vm10, %v3131_v31, %v9791_v32  ;;  %v1943_v42 = vsel %vm436_vm1, %v9792_v6, %v8388_v17  ;;  %v3265_v37 = vmul.f32 %v7832_v13, %v1755_v58  ;;  %v9794_v31 = vld [vmem:[#allocation310_spill] sm:$0xff] }
 0xa69   :  { %v1691_v9 = vpop.permute.xlu1 %1690  ;;  %v8703_v22 = vsel %vm1749_vm11, %v3147_v40, %v9793_v11  ;;  %4938 = vpow2.f32 %v3332_v56  ;;  %v1959_v24 = vsel %vm1732_vm10, %v1943_v42, %v8411_v25  ;;  %v4931_v57 = vpop.eup %4930  ;;  %v1723_v17 = vsel %vm436_vm1, %v9794_v31, %v8453_v0  ;;  %v9795_v56 = vld [vmem:[#allocation303_spill] sm:$0xff]  ;;  %v9796_v6 = vld [vmem:[#allocation138_spill] sm:$0xff] }
 0xa6a   :  { %v8693_v60 = vsel %vm1749_vm11, %v1744_v44, %v1691_v9  ;;  %v3266_v44 = vmul.f32 %v7842_v54, %v1755_v58  ;;  %4940 = vpow2.f32 %v3334_v2  ;;  %v1975_v48 = vsel %vm1749_vm11, %v1959_v24, %v8433_v49 }
 0xa6b   :  { %v3267_v3 = vmul.f32 %v7445_v16, %v1755_v58  ;;  %v4933_v9 = vpop.eup %4932  ;;  %4942 = vpow2.f32 %v3336_v63  ;;  %v1945_v25 = vsel %vm436_vm1, %v9795_v56, %v8328_v38  ;;  %v1740_v21 = vsel %vm1732_vm10, %v1723_v17, %v8473_v43  ;;  %v9797_v63 = vld [vmem:[#allocation195_spill] sm:$0xff] }
 0xa6c   :  { %v3348_v2 = vmul.f32 1.442695, %v3264_v62  ;;  %v4935_v32 = vpop.eup %4934  ;;  %4944 = vpow2.f32 %v3338_v23  ;;  %v1961_v49 = vsel %vm1732_vm10, %v1945_v25, %v8343_v29  ;;  %v1757_v0 = vsel %vm1749_vm11, %v1740_v21, %v8483_v8 }
 0xa6d   :  { %v1591_v5 = vpop.permute.xlu1 %1590  ;;  %v3350_v58 = vmul.f32 1.442695, %v3265_v37  ;;  %v4937_v40 = vpop.eup %4936  ;;  %v3179_v42 = vsel %vm436_vm1, %v9797_v63, %v9796_v6  ;;  %v1977_v38 = vsel %vm1749_vm11, %v1961_v49, %v8359_v39  ;;  %v3440_v43 = vmul.f32 %v8610_v4, %v1975_v48 }
 0xa6e   :  { %v3352_v62 = vmul.f32 1.442695, %v3266_v44  ;;  %v3504_v11 = vmul.f32 0.0, %v4931_v57  ;;  %v3505_v23 = vmul.f32 0.0, %v4933_v9  ;;  %v3441_v24 = vmul.f32 %v8619_v61, %v1975_v48  ;;  %v9798_v57 = vld [vmem:[#allocation331_spill] sm:$0xff] }
 0xa6f   :  { %v3354_v29 = vmul.f32 1.442695, %v3267_v3  ;;  %v3442_v8 = vmul.f32 %v8623_v36, %v1975_v48  ;;  %v3443_v37 = vmul.f32 %v8629_v12, %v1975_v48  ;;  %v3272_v17 = vmul.f32 %v7827_v52, %v1757_v0 }
 0xa70   :  { %4946 = vpow2.f32 %v3348_v2  ;;  %v3506_v56 = vmul.f32 0.0, %v4935_v32  ;;  %v3507_v25 = vmul.f32 0.0, %v4937_v40  ;;  %v3273_v39 = vmul.f32 %v7832_v13, %v1757_v0  ;;  %v9799_v40 = vld [vmem:[#allocation197_spill] sm:$0xff] }
 0xa71   :  { %v1639_v31 = vpop.permute.xlu1 %1638  ;;  %4948 = vpow2.f32 %v3350_v58  ;;  %v3512_v4 = vadd.f32 %v3504_v11, %v3440_v43  ;;  %v3274_v44 = vmul.f32 %v7842_v54, %v1757_v0  ;;  %v1725_v61 = vsel %vm436_vm1, %v9798_v57, %v1591_v5 }
 0xa72   :  { %4950 = vpow2.f32 %v3352_v62  ;;  %v3513_v3 = vadd.f32 %v3505_v23, %v3441_v24  ;;  %v3275_v36 = vmul.f32 %v7445_v16, %v1757_v0  ;;  %v1742_v12 = vsel %vm1732_vm10, %v1725_v61, %v1639_v31  ;;  %v9800_v62 = vld [vmem:[#allocation199_spill] sm:$0xff] }
 0xa73   :  { %4952 = vpow2.f32 %v3354_v29  ;;  %v4939_v9 = vpop.eup %4938  ;;  %v3514_v21 = vadd.f32 %v3506_v56, %v3442_v8  ;;  %v3515_v2 = vadd.f32 %v3507_v25, %v3443_v37  ;;  %v3364_v32 = vmul.f32 1.442695, %v3272_v17 }
 0xa74   :  { %v4941_v58 = vpop.eup %4940  ;;  %v3195_v6 = vsel %vm1732_vm10, %v3179_v42, %v9799_v40  ;;  %v3366_v63 = vmul.f32 1.442695, %v3273_v39  ;;  %v3520_v23 = vmul.f32 %v4939_v9, %v3512_v4  ;;  %v3368_v24 = vmul.f32 1.442695, %v3274_v44 }
 0xa75   :  { %v1687_v48 = vpop.permute.xlu1 %1686  ;;  %v4943_v0 = vpop.eup %4942  ;;  %v3211_v11 = vsel %vm1749_vm11, %v3195_v6, %v9800_v62  ;;  %v3448_v8 = vmul.f32 %v8555_v18, %v1977_v38  ;;  %v3521_v37 = vmul.f32 %v4941_v58, %v3513_v3  ;;  %v3370_v17 = vmul.f32 1.442695, %v3275_v36  ;;  %v9802_v62 = vld [vmem:[#allocation180_spill] sm:$0xff] }
 0xa76   :  { %v1759_v49 = vsel %vm1749_vm11, %v1742_v12, %v1687_v48  ;;  %v4945_v31 = vpop.eup %4944  ;;  %v3522_v25 = vmul.f32 %v4943_v0, %v3514_v21  ;;  %4954 = vpow2.f32 %v3364_v32  ;;  %v3449_v61 = vmul.f32 %v8559_v50, %v1977_v38  ;;  %v9801_v0 = vld [vmem:[#allocation257_spill] sm:$0xff] }
 0xa77   :  { %v3280_v5 = vmul.f32 %v7827_v52, %v1759_v49  ;;  %v3281_v43 = vmul.f32 %v7832_v13, %v1759_v49  ;;  %v3282_v29 = vmul.f32 %v7842_v54, %v1759_v49  ;;  %v3283_v42 = vmul.f32 %v7445_v16, %v1759_v49 }
 0xa78   :  { %v3523_v39 = vmul.f32 %v4945_v31, %v3515_v2  ;;  %v3450_v4 = vmul.f32 %v8573_v53, %v1977_v38  ;;  %4956 = vpow2.f32 %v3366_v63  ;;  %v3451_v48 = vmul.f32 %v8601_v51, %v1977_v38 }
 0xa79   :  { %v8749_v56 = vpop.permute.xlu1 %1820  ;;  %v3380_v57 = vmul.f32 1.442695, %v3280_v5  ;;  %v3382_v44 = vmul.f32 1.442695, %v3281_v43  ;;  %4958 = vpow2.f32 %v3368_v24  ;;  %v3528_v18 = vadd.f32 %v3520_v23, %v3448_v8 }
 0xa7a   :  { %v4947_v12 = vpop.eup %4946  ;;  %v3384_v3 = vmul.f32 1.442695, %v3282_v29  ;;  %4960 = vpow2.f32 %v3370_v17  ;;  %v3529_v9 = vadd.f32 %v3521_v37, %v3449_v61  ;;  %v3288_v21 = vmul.f32 %v7827_v52, %v8693_v60  ;;  %v9804_v17 = vld [vmem:[#allocation184_spill] sm:$0xff] }
 0xa7b   :  { %v4949_v36 = vpop.eup %4948  ;;  %v3386_v2 = vmul.f32 1.442695, %v3283_v42  ;;  %v3530_v49 = vadd.f32 %v3522_v25, %v3450_v4  ;;  %v3531_v53 = vadd.f32 %v3523_v39, %v3451_v48  ;;  %v3289_v58 = vmul.f32 %v7832_v13, %v8693_v60  ;;  %v9806_v48 = vld [vmem:[#allocation173_spill] sm:$0xff] }
 0xa7c   :  { %v4951_v50 = vpop.eup %4950  ;;  %4962 = vpow2.f32 %v3380_v57  ;;  %v3456_v38 = vmul.f32 %v8683_v19, %v8588_v55  ;;  %v3457_v40 = vmul.f32 %v8689_v14, %v8588_v55  ;;  %v3290_v6 = vmul.f32 %v7842_v54, %v8693_v60 }
 0xa7d   :  { %v8756_v32 = vpop.permute.xlu1 %1868  ;;  %v4953_v51 = vpop.eup %4952  ;;  %4964 = vpow2.f32 %v3382_v44  ;;  %v3458_v63 = vmul.f32 %v8703_v22, %v8588_v55  ;;  %v3459_v5 = vmul.f32 %v3211_v11, %v8588_v55  ;;  %v3291_v43 = vmul.f32 %v7445_v16, %v8693_v60  ;;  %v9803_v22 = vld [vmem:[#allocation261_spill] sm:$0xff]  ;;  %v9805_v60 = vld [vmem:[#allocation319_spill] sm:$0xff] }
 0xa7e   :  { %4966 = vpow2.f32 %v3384_v3  ;;  %v3039_v19 = vsel %vm436_vm1, %v9802_v62, %v9801_v0  ;;  %v3536_v23 = vmul.f32 %v4947_v12, %v3528_v18  ;;  %v3396_v24 = vmul.f32 1.442695, %v3288_v21  ;;  %v9807_v3 = vld [vmem:[#allocation177_spill] sm:$0xff]  ;;  %v9813_v62 = vld [vmem:[#allocation179_spill] sm:$0xff] }
 0xa7f   :  { %4968 = vpow2.f32 %v3386_v2  ;;  %v3537_v29 = vmul.f32 %v4949_v36, %v3529_v9  ;;  %v3538_v31 = vmul.f32 %v4951_v50, %v3530_v49  ;;  %v3539_v8 = vmul.f32 %v4953_v51, %v3531_v53  ;;  %v9808_v2 = vld [vmem:[#allocation122_spill] sm:$0xff] }
 0xa80   :  { %v3398_v37 = vmul.f32 1.442695, %v3289_v58  ;;  %v3087_v55 = vsel %vm436_vm1, %v9804_v17, %v9803_v22  ;;  %v1949_v11 = vsel %vm436_vm1, %v9805_v60, %v8516_v10  ;;  %v3544_v42 = vadd.f32 %v3536_v23, %v3456_v38  ;;  %v4955_v39 = vpop.eup %4954  ;;  %v9809_v49 = vld [vmem:[#allocation182_spill] sm:$0xff]  ;;  %v9816_v22 = vld [vmem:[#allocation265_spill] sm:$0xff] }
 0xa81   :  { %v8774_v14 = vpop.permute.xlu1 %1916  ;;  %v3400_v25 = vmul.f32 1.442695, %v3290_v6  ;;  %v3545_v57 = vadd.f32 %v3537_v29, %v3457_v40  ;;  %v3546_v61 = vadd.f32 %v3538_v31, %v3458_v63  ;;  %v3547_v4 = vadd.f32 %v3539_v8, %v3459_v5  ;;  %v9810_v51 = vld [vmem:[#allocation186_spill] sm:$0xff] }
 0xa82   :  { %v3402_v44 = vmul.f32 1.442695, %v3291_v43  ;;  %v4957_v12 = vpop.eup %4956  ;;  %v3117_v18 = vsel %vm1749_vm11, %v8661_v47, %v9806_v48  ;;  %v3149_v36 = vsel %vm1732_vm10, %v8669_v7, %v9807_v3  ;;  %v1965_v9 = vsel %vm1732_vm10, %v1949_v11, %v8522_v30  ;;  %v9811_v38 = vld [vmem:[#allocation262_spill] sm:$0xff] }
 0xa83   :  { %4970 = vpow2.f32 %v3396_v24  ;;  %v4959_v21 = vpop.eup %4958  ;;  %v3197_v50 = vsel %vm1732_vm10, %v8679_v27, %v9808_v2  ;;  %v3055_v53 = vsel %vm1732_vm10, %v3039_v19, %v9809_v49  ;;  %v1981_v47 = vsel %vm1749_vm11, %v1965_v9, %v8525_v15  ;;  %v9812_v30 = vld [vmem:[#allocation190_spill] sm:$0xff]  ;;  %v9814_v19 = vld [vmem:[#allocation124_spill] sm:$0xff]  ;;  %v9815_v24 = vld [vmem:[#allocation259_spill] sm:$0xff] }
 0xa84   :  { %4972 = vpow2.f32 %v3398_v37  ;;  %v4961_v58 = vpop.eup %4960  ;;  %v3103_v7 = vsel %vm1732_vm10, %v3087_v55, %v9810_v51  ;;  %v3135_v40 = vsel %vm436_vm1, %v9812_v30, %v9811_v38  ;;  %v3552_v6 = vmul.f32 %v4955_v39, %v3544_v42  ;;  %v9817_v17 = vld [vmem:[#allocation194_spill] sm:$0xff]  ;;  %v9818_v39 = vld [vmem:[#allocation188_spill] sm:$0xff]  ;;  %v9822_v2 = vld [vmem:[#allocation267_spill] sm:$0xff] }
 0xa85   :  { %v1817_v10 = vpop.permute.xlu1 %1816  ;;  %4974 = vpow2.f32 %v3400_v25  ;;  %v3553_v5 = vmul.f32 %v4957_v12, %v3545_v57  ;;  %v3554_v27 = vmul.f32 %v4959_v21, %v3546_v61  ;;  %v3555_v43 = vmul.f32 %v4961_v58, %v3547_v4  ;;  %v9819_v61 = vld [vmem:[#allocation192_spill] sm:$0xff] }
 0xa86   :  { %v4963_v63 = vpop.eup %4962  ;;  %4976 = vpow2.f32 %v3402_v44  ;;  %v3165_v15 = vsel %vm1749_vm11, %v3149_v36, %v9813_v62  ;;  %v3213_v23 = vsel %vm1749_vm11, %v3197_v50, %v9814_v19  ;;  %v3071_v29 = vsel %vm1749_vm11, %v3055_v53, %v9815_v24  ;;  %v9820_v44 = vld [vmem:[#allocation266_spill] sm:$0xff] }
 0xa87   :  { %v4965_v0 = vpop.eup %4964  ;;  %v3464_v31 = vmul.f32 %v8657_v45, %v1981_v47  ;;  %v3183_v55 = vsel %vm436_vm1, %v9817_v17, %v9816_v22  ;;  %v3465_v60 = vmul.f32 %v3117_v18, %v1981_v47  ;;  %v3466_v11 = vmul.f32 %v3165_v15, %v1981_v47  ;;  %v9821_v18 = vld [vmem:[#allocation263_spill] sm:$0xff] }
 0xa88   :  { %v4967_v37 = vpop.eup %4966  ;;  %v3467_v42 = vmul.f32 %v3213_v23, %v1981_v47  ;;  %v3119_v57 = vsel %vm1749_vm11, %v3103_v7, %v9818_v39  ;;  %v3151_v4 = vsel %vm1732_vm10, %v3135_v40, %v9819_v61  ;;  %v3199_v12 = vsel %vm1732_vm10, %v3183_v55, %v9820_v44 }
 0xa89   :  { %v1865_v8 = vpop.permute.xlu1 %1864  ;;  %v4969_v25 = vpop.eup %4968  ;;  %v3560_v45 = vadd.f32 %v3552_v6, %v3464_v31  ;;  %v1951_v48 = vsel %vm436_vm1, %v7864_v35, %v1817_v10  ;;  %v3561_v3 = vadd.f32 %v3553_v5, %v3465_v60  ;;  %v3562_v36 = vadd.f32 %v3554_v27, %v3466_v11 }
 0xa8a   :  { %v3563_v9 = vadd.f32 %v3555_v43, %v3467_v42  ;;  %v3167_v21 = vsel %vm1749_vm11, %v3151_v4, %v9821_v18  ;;  %v3215_v50 = vsel %vm1749_vm11, %v3199_v12, %v9822_v2  ;;  %v1967_v49 = vsel %vm1732_vm10, %v1951_v48, %v1865_v8  ;;  %v9824_v18 = vld [vmem:[#allocation166_spill] sm:$0xff] }
 0xa8b   :  { %v3568_v53 = vmul.f32 %v4963_v63, %v3560_v45  ;;  %v3569_v58 = vmul.f32 %v4965_v0, %v3561_v3  ;;  %v3570_v51 = vmul.f32 %v4967_v37, %v3562_v36  ;;  %v1953_v2 = vsel %vm436_vm1, %v7860_v46, %v8749_v56  ;;  %v9827_v46 = vld [vmem:[#allocation242_spill] sm:$0xff] }
 0xa8c   :  { %v3571_v7 = vmul.f32 %v4969_v25, %v3563_v9  ;;  %v9823_v9 = vld [vmem:[#allocation238_spill] sm:$0xff] }
 0xa8d   :  { %v1913_v47 = vpop.permute.xlu1 %1912  ;;  %v4971_v30 = vpop.eup %4970  ;;  %v9828_v56 = vld [vmem:[#allocation170_spill] sm:$0xff] }
 0xa8e   :  { %v1983_v38 = vsel %vm1749_vm11, %v1967_v49, %v1913_v47  ;;  %v4973_v5 = vpop.eup %4972 }
 0xa8f   :  { %v3472_v35 = vmul.f32 %v3071_v29, %v1983_v38  ;;  %v3473_v10 = vmul.f32 %v3119_v57, %v1983_v38  ;;  %v3474_v40 = vmul.f32 %v3167_v21, %v1983_v38  ;;  %v3475_v6 = vmul.f32 %v3215_v50, %v1983_v38  ;;  %v4975_v27 = vpop.eup %4974  ;;  %v9829_v38 = vld [vmem:[#allocation323_spill] sm:$0xff] }
 0xa90   :  { %v4977_v24 = vpop.eup %4976  ;;  %v3041_v21 = vsel %vm436_vm1, %v9824_v18, %v9823_v9  ;;  %v1969_v50 = vsel %vm1732_vm10, %v1953_v2, %v8756_v32  ;;  %v3089_v32 = vsel %vm436_vm1, %v9828_v56, %v9827_v46  ;;  %v9841_v18 = vld [vmem:[#allocation302_spill] sm:$0xff] }
 0xa91   :  { %v3576_v43 = vadd.f32 %v3568_v53, %v3472_v35  ;;  %v3577_v62 = vadd.f32 %v3569_v58, %v3473_v10  ;;  %v3578_v15 = vadd.f32 %v3570_v51, %v3474_v40  ;;  %v3579_v19 = vadd.f32 %v3571_v7, %v3475_v6  ;;  %v1603_v23 = vpop.permute.xlu1 %1602  ;;  %v9825_v53 = vld [vmem:[#allocation168_spill] sm:$0xff]  ;;  %v9832_v40 = vld [vmem:[#allocation249_spill] sm:$0xff] }
 0xa92   :  { %v1731_v39 = vsel %vm436_vm1, %v9675_v26, %v1603_v23  ;;  %v3057_v47 = vsel %vm1732_vm10, %v3041_v21, %v9825_v53  ;;  %v9826_v51 = vld [vmem:[#allocation240_spill] sm:$0xff]  ;;  %v9842_v21 = vld [vmem:[#allocation301_spill] sm:$0xff] }
 0xa93   :  { %v3584_v63 = vmul.f32 %v4971_v30, %v3576_v43  ;;  %v8826_v31 = vmul.f32 %v4973_v5, %v3577_v62  ;;  %v8828_v0 = vmul.f32 %v4975_v27, %v3578_v15  ;;  %v8830_v8 = vmul.f32 %v4977_v24, %v3579_v19  ;;  %v9830_v30 = vld [vmem:[#allocation245_spill] sm:$0xff]  ;;  %v9833_v62 = vld [vmem:[#allocation172_spill] sm:$0xff]  ;;  %v9834_v19 = vld [vmem:[#allocation247_spill] sm:$0xff] }
 0xa94   :  { %v3073_v7 = vsel %vm1749_vm11, %v3057_v47, %v9826_v51  ;;  %v3105_v15 = vsel %vm1732_vm10, %v3089_v32, %v9833_v62  ;;  %v3757_v2 = vsel %vm436_vm1, %v9842_v21, %v9841_v18  ;;  %v9843_v47 = vld [vmem:[#allocation298_spill] sm:$0xff]  ;;  %v9844_v51 = vld [vmem:[#allocation304_spill] sm:$0xff]  ;;  %v9860_v18 = vld [vmem:[#allocation57_spill] sm:$0xff] }
 0xa95   :  { %v1651_v37 = vpop.permute.xlu1 %1650 }
 0xa96   :  { %v1748_v61 = vsel %vm1732_vm10, %v1731_v39, %v1651_v37 }
 0xa99   :  { %v1699_v29 = vpop.permute.xlu1 %1698 }
 0xa9a   :  { %v8844_v4 = vsel %vm1749_vm11, %v1748_v61, %v1699_v29 }
 0xa9b   :  { %v3304_v12 = vmul.f32 %v7827_v52, %v8844_v4  ;;  %v3305_v49 = vmul.f32 %v7832_v13, %v8844_v4 }
 0xa9d   :  { %v1599_v22 = vpop.permute.xlu1 %1598  ;;  %v3428_v3 = vmul.f32 1.442695, %v3304_v12  ;;  %v3430_v5 = vmul.f32 1.442695, %v3305_v49 }
 0xa9e   :  { %v1729_v55 = vsel %vm436_vm1, %v9685_v59, %v1599_v22  ;;  %v9835_v22 = vld [vmem:[#allocation296_spill] sm:$0xff] }
 0xaa1   :  { %v1647_v17 = vpop.permute.xlu1 %1646 }
 0xaa2   :  { %v1746_v11 = vsel %vm1732_vm10, %v1729_v55, %v1647_v17  ;;  %v9836_v17 = vld [vmem:[#allocation225_spill] sm:$0xff] }
 0xaa3   :  { %v3045_v55 = vsel %vm436_vm1, %v9836_v17, %v9835_v22  ;;  %v9852_v22 = vld [vmem:[#allocation248_spill] sm:$0xff] }
 0xaa5   :  { %v1695_v60 = vpop.permute.xlu1 %1694 }
 0xaa6   :  { %v8836_v42 = vsel %vm1749_vm11, %v1746_v11, %v1695_v60  ;;  %v9837_v60 = vld [vmem:[#allocation326_spill] sm:$0xff] }
 0xaa7   :  { %v3296_v57 = vmul.f32 %v7827_v52, %v8836_v42  ;;  %v3297_v45 = vmul.f32 %v7832_v13, %v8836_v42  ;;  %v8860_v52 = vsel %vm1749_vm11, %v1969_v50, %v8774_v14  ;;  %v3043_v14 = vsel %vm436_vm1, %v9830_v30, %v9829_v38  ;;  %v9831_v13 = vld [vmem:[#allocation328_spill] sm:$0xff] }
 0xaa8   :  { %v3480_v35 = vmul.f32 %v3073_v7, %v8860_v52  ;;  %v3091_v6 = vsel %vm436_vm1, %v9832_v40, %v9831_v13  ;;  %v3298_v27 = vmul.f32 %v7842_v54, %v8836_v42  ;;  %v3059_v23 = vsel %vm1732_vm10, %v3043_v14, %v9834_v19  ;;  %v9845_v7 = vld [vmem:[#allocation253_spill] sm:$0xff]  ;;  %v9849_v19 = vld [vmem:[#allocation38_spill] sm:$0xff] }
 0xaa9   :  { %v1829_v25 = vpop.permute.xlu1 %1828  ;;  %v3412_v59 = vmul.f32 1.442695, %v3296_v57  ;;  %v3414_v26 = vmul.f32 1.442695, %v3297_v45  ;;  %v3075_v11 = vsel %vm1749_vm11, %v3059_v23, %v9837_v60  ;;  %v9838_v57 = vld [vmem:[#allocation251_spill] sm:$0xff]  ;;  %v9839_v45 = vld [vmem:[#allocation174_spill] sm:$0xff]  ;;  %v3306_v14 = vmul.f32 %v7842_v54, %v8844_v4 }
 0xaaa   :  { %v3592_v37 = vadd.f32 %v3584_v63, %v3480_v35  ;;  %v3107_v61 = vsel %vm1732_vm10, %v3091_v6, %v9838_v57  ;;  %v9846_v13 = vld [vmem:[#allocation233_spill] sm:$0xff]  ;;  %v4198_v23 = vmul.f32 -1.442695, %v9849_v19  ;;  %v9851_v54 = vld [vmem:[#allocation244_spill] sm:$0xff] }
 0xaab   :  { %4978 = vpow2.f32 %v3412_v59  ;;  %v3123_v46 = vsel %vm1749_vm11, %v3107_v61, %v9845_v7  ;;  %v9855_v57 = vld [vmem:[#allocation305_spill] sm:$0xff] }
 0xaac   :  { %4980 = vpow2.f32 %v3428_v3  ;;  %v3121_v3 = vsel %vm1749_vm11, %v3105_v15, %v9839_v45  ;;  %v3432_v15 = vmul.f32 1.442695, %v3306_v14  ;;  %v9857_v45 = vld [vmem:[#allocation306_spill] sm:$0xff] }
 0xaad   :  { %v1877_v44 = vpop.permute.xlu1 %1876  ;;  %4982 = vpow2.f32 %v3414_v26  ;;  %v3416_v26 = vmul.f32 1.442695, %v3298_v27  ;;  %v9848_v27 = vld [vmem:[#allocation229_spill] sm:$0xff] }
 0xaae   :  { %4984 = vpow2.f32 %v3430_v5  ;;  %v9847_v5 = vld [vmem:[#allocation299_spill] sm:$0xff] }
 0xaaf   :  { %4986 = vpow2.f32 %v3416_v26  ;;  %v9858_v26 = vld [vmem:[#allocation49_spill] sm:$0xff] }
 0xab0   :  { %4988 = vpow2.f32 %v3432_v15  ;;  %v9867_v15 = vld [vmem:[#allocation308_spill] sm:$0xff] }
 0xab1   :  { %v1925_v48 = vpop.permute.xlu1 %1924  ;;  %4990 = vpow2.f32 %v4198_v23 }
 0xab5   :  { %v1825_v36 = vpop.permute.xlu1 %1824  ;;  %v4979_v10 = vpop.eup %4978 }
 0xab6   :  { %v1955_v43 = vsel %vm436_vm1, %v8466_v20, %v1825_v36  ;;  %v1957_v20 = vsel %vm436_vm1, %v9704_v34, %v1829_v25  ;;  %v3600_v63 = vmul.f32 %v4979_v10, %v3592_v37  ;;  %v4981_v34 = vpop.eup %4980  ;;  %v9840_v25 = vld [vmem:[#allocation227_spill] sm:$0xff] }
 0xab7   :  { %v1973_v59 = vsel %vm1732_vm10, %v1957_v20, %v1877_v44  ;;  %v3061_v9 = vsel %vm1732_vm10, %v3045_v55, %v9840_v25  ;;  %v3481_v44 = vmul.f32 %v3121_v3, %v8860_v52  ;;  %v4983_v53 = vpop.eup %4982  ;;  %v9853_v55 = vld [vmem:[#allocation231_spill] sm:$0xff] }
 0xab8   :  { %v8904_v36 = vsel %vm1749_vm11, %v1973_v59, %v1925_v48  ;;  %v3759_v48 = vsel %vm1732_vm10, %v3757_v2, %v9844_v51 }
 0xab9   :  { %v1873_v58 = vpop.permute.xlu1 %1872  ;;  %v3593_v32 = vadd.f32 %v8826_v31, %v3481_v44  ;;  %v3761_v40 = vsel %vm1749_vm11, %v3759_v48, %v9846_v13  ;;  %v3307_v13 = vmul.f32 %v7445_v16, %v8844_v4 }
 0xaba   :  { %v1971_v24 = vsel %vm1732_vm10, %v1955_v43, %v1873_v58  ;;  %v3077_v58 = vsel %vm1749_vm11, %v3061_v9, %v9843_v47  ;;  %v3093_v43 = vsel %vm436_vm1, %v9848_v27, %v9847_v5  ;;  %v3299_v9 = vmul.f32 %v7445_v16, %v8836_v42  ;;  %v9865_v5 = vld [vmem:[#allocation39_spill] sm:$0xff]  ;;  %v9870_v16 = vld [vmem:[#allocation176_spill] sm:$0xff] }
 0xabb   :  { %v3496_v56 = vmul.f32 %v3077_v58, %v8904_v36  ;;  %v3601_v35 = vmul.f32 %v4983_v53, %v3593_v32  ;;  %v3109_v60 = vsel %vm1732_vm10, %v3093_v43, %v9853_v55  ;;  %v9861_v53 = vld [vmem:[#allocation55_spill] sm:$0xff]  ;;  %v9862_v58 = vld [vmem:[#allocation237_spill] sm:$0xff]  ;;  %v4199_v27 = vmul.f32 -1.442695, %v9865_v5  ;;  %v9871_v55 = vld [vmem:[#allocation312_spill] sm:$0xff] }
 0xabc   :  { %v3125_v61 = vsel %vm1749_vm11, %v3109_v60, %v9855_v57  ;;  %v4698_v32 = vld [vmem:[%s9113_s17] sm:$0xff]  }
 0xabd   :  { %v1921_v29 = vpop.permute.xlu1 %1920  ;;  %v3497_v44 = vmul.f32 %v3125_v61, %v8904_v36  ;;  %4325 = vmatpush3.bf16.msra.mxu1 %v4698_v32 }
 0xabe   :  { %v8895_v39 = vsel %vm1749_vm11, %v1971_v24, %v1921_v29  ;;  %v9850_v24 = vld [vmem:[#allocation246_spill] sm:$0xff]  ;;  %v4985_v29 = vpop.eup %4984 }
 0xabf   :  { %v3488_v12 = vmul.f32 %v3075_v11, %v8895_v39  ;;  %v3489_v38 = vmul.f32 %v3123_v46, %v8895_v39  ;;  %v3137_v37 = vsel %vm436_vm1, %v9851_v54, %v9850_v24  ;;  %v9854_v11 = vld [vmem:[#allocation250_spill] sm:$0xff]  ;;  %v3418_v46 = vmul.f32 1.442695, %v3299_v9  ;;  %v3730_v54 = vpop.permute.xlu0 %3729 }
 0xac0   :  { %v3153_v17 = vsel %vm1732_vm10, %v3137_v37, %v9852_v22  ;;  %v9868_v37 = vld [vmem:[#allocation311_spill] sm:$0xff] }
 0xac1   :  { %v3608_v50 = vadd.f32 %v3600_v63, %v3488_v12  ;;  %v3609_v62 = vadd.f32 %v3601_v35, %v3489_v38  ;;  %v3169_v20 = vsel %vm1749_vm11, %v3153_v17, %v9854_v11  ;;  %v9856_v12 = vld [vmem:[#allocation235_spill] sm:$0xff]  ;;  %4992 = vpow2.f32 %v3418_v46  ;;  %v9869_v17 = vld [vmem:[#allocation252_spill] sm:$0xff]  ;;  %v9881_v46 = vld [vmem:[#allocation258_spill] sm:$0xff] }
 0xac2   :  { %v8912_v49 = vpop.permute.xlu1 %2963  ;;  %v3763_v3 = vsel %vm436_vm1, %v9857_v45, %v9856_v12  ;;  %v3482_v2 = vmul.f32 %v3169_v20, %v8860_v52  ;;  %v3185_v4 = vsel %vm436_vm1, %v9870_v16, %v9869_v17  ;;  %v3434_v11 = vmul.f32 1.442695, %v3307_v13  ;;  %v9873_v12 = vld [vmem:[#allocation256_spill] sm:$0xff]  ;;  %v9882_v13 = vld [vmem:[#allocation243_spill] sm:$0xff] }
 0xac3   :  { %v3616_v30 = vmul.f32 %v4981_v34, %v3608_v50  ;;  %v3617_v59 = vmul.f32 %v4985_v29, %v3609_v62  ;;  %v9859_v34 = vld [vmem:[#allocation329_spill] sm:$0xff]  ;;  %v4987_v50 = vpop.eup %4986  ;;  %v3765_v51 = vsel %vm1732_vm10, %v3763_v3, %v9862_v58  ;;  %4994 = vpow2.f32 %v4199_v27  ;;  %v9874_v3 = vld [vmem:[#allocation178_spill] sm:$0xff]  ;;  %v9879_v58 = vld [vmem:[#allocation316_spill] sm:$0xff] }
 0xac4   :  { %v3139_v25 = vsel %vm436_vm1, %v9859_v34, %v9858_v26  ;;  %v3594_v42 = vadd.f32 %v8828_v0, %v3482_v2  ;;  %v9864_v0 = vmov 0.0   ;;  %v4989_v43 = vpop.eup %4988  ;;  %v9866_v62 = vld [vmem:[#allocation309_spill] sm:$0xff]  ;;  %v3201_v26 = vsel %vm1732_vm10, %v3185_v4, %v9874_v3  ;;  %v9875_v34 = vld [vmem:[#allocation63_spill] sm:$0xff] }
 0xac5   :  { %v3624_v10 = vadd.f32 %v3616_v30, %v3496_v56  ;;  %v3155_v21 = vsel %vm1732_vm10, %v3139_v25, %v9860_v18  ;;  %v3625_v7 = vadd.f32 %v3617_v59, %v3497_v44  ;;  %v9863_v30 = vld [vmem:[#allocation239_spill] sm:$0xff]  ;;  %4326 = vmatprep.subr.bf16.mxu1 %v9864_v0  ;;  %v3141_v23 = vsel %vm436_vm1, %v9867_v15, %v9866_v62  ;;  %v4991_v24 = vpop.eup %4990  ;;  %v9877_v44 = vld [vmem:[#allocation241_spill] sm:$0xff] }
 0xac6   :  { %v3171_v47 = vsel %vm1749_vm11, %v3155_v21, %v9861_v53  ;;  %v3602_v38 = vmul.f32 %v4987_v50, %v3594_v42  ;;  %v3767_v14 = vsel %vm1749_vm11, %v3765_v51, %v9863_v30  ;;  %v3157_v29 = vsel %vm1732_vm10, %v3141_v23, %v9868_v37  ;;  %v9872_v59 = vld [vmem:[#allocation59_spill] sm:$0xff]  ;;  %v9876_v21 = vld [vmem:[#allocation254_spill] sm:$0xff]  ;;  %v9883_v27 = vld [vmem:[#allocation321_spill] sm:$0xff] }
 0xac7   :  { %v8927_v6 = vpop.permute.xlu1 %3027  ;;  %v8932_v31 = vmul.f32 %v3761_v40, %v3624_v10  ;;  %v3490_v48 = vmul.f32 %v3171_v47, %v8895_v39  ;;  %v8975_v10 = vmul.f32 %v3767_v14, %v3625_v7  ;;  %v3173_v60 = vsel %vm1749_vm11, %v3157_v29, %v9871_v55  ;;  %v9878_v50 = vld [vmem:[#allocation314_spill] sm:$0xff]  ;;  %v3742_v47 = vpop.permute.xlu0 %3741 }
 0xac8   :  { %v3498_v20 = vmul.f32 %v3173_v60, %v8904_v36  ;;  %v3915_v61 = vadd.f32 1.0, %v4991_v24  ;;  %v3187_v45 = vsel %vm436_vm1, %v9873_v12, %v9872_v59  ;;  %v3217_v2 = vsel %vm1749_vm11, %v3201_v26, %v9876_v21  ;;  %v4699_v15 = vld [vmem:[%s9113_s17 + $0x8] sm:$0xff]  }
 0xac9   :  { %3792 = vrot.lane.b32.xlu1 %v8932_v31, %s5430_s13  ;;  %v3610_v35 = vadd.f32 %v3602_v38, %v3490_v48  ;;  %v3203_v25 = vsel %vm1732_vm10, %v3187_v45, %v9875_v34  ;;  %v3769_v53 = vsel %vm436_vm1, %v9878_v50, %v9877_v44  ;;  %4996 = vpow2.f32 %v3434_v11  ;;  %4327 = vmatpush3.bf16.msra.mxu1 %v4699_v15 }
 0xaca   :  { %v3771_v51 = vsel %vm1732_vm10, %v3769_v53, %v9879_v58  ;;  %v3483_v42 = vmul.f32 %v3217_v2, %v8860_v52  ;;  %4998 = vrcp.f32 %v3915_v61  ;;  %4332 = vmatprep.subr.bf16.mxu1 %v9864_v0 }
 0xacb   :  { %v3618_v22 = vmul.f32 %v4989_v43, %v3610_v35  ;;  %v4993_v48 = vpop.eup %4992  ;;  %v3189_v43 = vsel %vm436_vm1, %v9883_v27, %v9882_v13 }
 0xacc   :  { %v3726_v63 = vpop.permute.xlu1 %3725  ;;  %v3595_v30 = vadd.f32 %v8830_v8, %v3483_v42  ;;  %v3205_v8 = vsel %vm1732_vm10, %v3189_v43, %v8912_v49 }
 0xacd   :  { %3800 = vrot.lane.b32.xlu1 %v8932_v31, %s9223_s29  ;;  %v3626_v18 = vadd.f32 %v3618_v22, %v3498_v20 }
 0xace   :  { %v3603_v23 = vmul.f32 %v4993_v48, %v3595_v30 }
 0xad1   :  { %v3734_v56 = vpop.permute.xlu1 %3733  ;;  %3808 = vrot.lane.b32.xlu1 %v8932_v31, %s5431_s12 }
 0xad2   :  { %v3774_v9 = vsel %vm436_vm1, %v3726_v63, %v3734_v56  ;;  %v9880_v63 = vld [vmem:[#allocation318_spill] sm:$0xff]  ;;  %v3219_v56 = vsel %vm1749_vm11, %v3203_v25, %v9881_v46 }
 0xad3   :  { %v3773_v7 = vsel %vm1749_vm11, %v3771_v51, %v9880_v63  ;;  %v3776_v32 = vsel %vm1732_vm10, %v3774_v9, %v3742_v47  ;;  %v3491_v14 = vmul.f32 %v3219_v56, %v8895_v39  ;;  %v3221_v39 = vsel %vm1749_vm11, %v3205_v8, %v8927_v6  ;;  %v3754_v6 = vpop.permute.xlu0 %3753 }
 0xad4   :  { %v9022_v35 = vmul.f32 %v3773_v7, %v3626_v18  ;;  %v3499_v29 = vmul.f32 %v3221_v39, %v8904_v36 }
 0xad5   :  { %v3738_v40 = vpop.permute.xlu1 %3737  ;;  %3820 = vrot.lane.b32.xlu1 %v8975_v10, %s5430_s13  ;;  %v3611_v24 = vadd.f32 %v3603_v23, %v3491_v14 }
 0xad6   :  { %v3775_v37 = vsel %vm436_vm1, %v3730_v54, %v3738_v40 }
 0xad7   :  { %v3799_v20 = vpop.permute.xlu0 %3798 }
 0xad9   :  { %3828 = vrot.lane.b32.xlu1 %v8975_v10, %s9223_s29 }
 0xada   :  { %v3746_v57 = vpop.permute.xlu1 %3745 }
 0xadb   :  { %v3777_v49 = vsel %vm1732_vm10, %v3775_v37, %v3746_v57  ;;  %v3807_v57 = vpop.permute.xlu0 %3806 }
 0xadc   :  { %v3779_v55 = vsel %vm1749_vm11, %v3777_v49, %v3754_v6 }
 0xadd   :  { %3836 = vrot.lane.b32.xlu1 %v8975_v10, %s5431_s12 }
 0xadf   :  { %v3750_v38 = vpop.permute.xlu1 %3749  ;;  %v3819_v12 = vpop.permute.xlu0 %3818 }
 0xae0   :  { %v3778_v52 = vsel %vm1749_vm11, %v3776_v32, %v3750_v38 }
 0xae1   :  { %v9028_v62 = vmul.f32 %v3778_v52, %v8446_v41  ;;  %3848 = vrot.lane.b32.xlu1 %v9022_v35, %s5430_s13  ;;  %v4995_v41 = vpop.eup %4994 }
 0xae2   :  { %v4997_v22 = vpop.eup %4996  ;;  %v3916_v17 = vadd.f32 1.0, %v4995_v41 }
 0xae3   :  { %3874 = vrot.lane.b32.xlu0 %v9028_v62, %s5430_s13  ;;  %v3619_v16 = vmul.f32 %v4997_v22, %v3611_v24  ;;  %v4999_v4 = vpop.eup %4998  ;;  %v3791_v61 = vpop.permute.xlu1 %3790 }
 0xae4   :  { %5000 = vrcp.f32 %v3916_v17  ;;  %v3921_v40 = vmul.f32 %v4999_v4, %v9849_v19  ;;  %v3796_v59 = vadd.f32 %v3791_v61, %v8429_v28  ;;  %v3827_v45 = vpop.permute.xlu0 %3826  ;;  %v9884_v17 = vld [vmem:[#allocation44_spill] sm:$0xff] }
 0xae5   :  { %3856 = vrot.lane.b32.xlu1 %v9022_v35, %s9223_s29  ;;  %v3627_v60 = vadd.f32 %v3619_v16, %v3499_v29  ;;  %v4197_v29 = vld [vmem:[#allocation23] ss:$0 sm:$0xff] }
 0xae6   :  { %v3804_v19 = vadd.f32 %v3799_v20, %v3796_v59  ;;  %v3905_v6 = vmul.f32 %v4197_v29, %v9884_v17  ;;  %v4700_v59 = vld [vmem:[#allocation25] sm:$0xff]  }
 0xae7   :  { %3882 = vrot.lane.b32.xlu0 %v9028_v62, %s9223_s29  ;;  %v3787_v36 = vmul.f32 %v3779_v55, %v3627_v60 }
 0xae8   :  { %v3812_v3 = vadd.f32 %v3807_v57, %v3804_v19  ;;  %v3835_v25 = vpop.permute.xlu0 %3834 }
 0xae9   :  { %3864 = vrot.lane.b32.xlu1 %v9022_v35, %s5431_s12 }
 0xaea   :  { %v3814_v34 = vadd.f32 %v3812_v3, %v8468_v33 }
 0xaeb   :  { %3890 = vrot.lane.b32.xlu0 %v9028_v62, %s5431_s12 }
 0xaec   :  { %v3824_v21 = vadd.f32 %v3819_v12, %v3814_v34  ;;  %v3847_v50 = vpop.permute.xlu0 %3846  ;;  %v4701_v12 = vld [vmem:[#allocation25 + $0x8] sm:$0xff]  }
 0xaed   :  { %3876 = vrot.lane.b32.xlu1 %v3787_v36, %s5430_s13 }
 0xaee   :  { %v5001_v54 = vpop.eup %5000  ;;  %v3832_v53 = vadd.f32 %v3827_v45, %v3824_v21 }
 0xaef   :  { %3925 = vrot.lane.b32.xlu0 %v3921_v40, %s5430_s13  ;;  %v3922_v11 = vmul.f32 %v5001_v54, %v9865_v5  ;;  %v9885_v40 = vld [vmem:[#allocation43_spill] sm:$0xff] }
 0xaf0   :  { %v3840_v58 = vadd.f32 %v3835_v25, %v3832_v53  ;;  %v3855_v51 = vpop.permute.xlu0 %3854  ;;  %v3906_v54 = vmul.f32 %v4197_v29, %v9885_v40  ;;  %v9887_v29 = vld [vmem:[#allocation37_spill] sm:$0xff] }
 0xaf1   :  { %3884 = vrot.lane.b32.xlu1 %v3787_v36, %s9223_s29 }
 0xaf2   :  { %v3842_v33 = vadd.f32 %v3840_v58, %v8503_v1 }
 0xaf4   :  { %v3863_v56 = vpop.permute.xlu0 %3862 }
 0xaf5   :  { %3892 = vrot.lane.b32.xlu1 %v3787_v36, %s5431_s12 }
 0xaf9   :  { %3927 = vrot.lane.b32.xlu1 %v3922_v11, %s5430_s13 }
 0xb3b   :  { %v3793_v26 = vpop.permute.xlu1 %3792 }
 0xb3c   :  { %v3797_v18 = vadd.f32 %v3793_v26, %v8932_v31  ;;  %v3852_v31 = vadd.f32 %v3847_v50, %v3842_v33 }
 0xb3e   :  { %v3860_v14 = vadd.f32 %v3855_v51, %v3852_v31 }
 0xb3f   :  { %v3801_v9 = vpop.permute.xlu1 %3800 }
 0xb40   :  { %v3805_v5 = vadd.f32 %v3801_v9, %v3797_v18  ;;  %v3868_v27 = vadd.f32 %v3863_v56, %v3860_v14 }
 0xb42   :  { %v3870_v8 = vadd.f32 %v3868_v27, %v9028_v62 }
 0xb43   :  { %v3809_v2 = vpop.permute.xlu1 %3808 }
 0xb44   :  { %v3813_v44 = vadd.f32 %v3809_v2, %v3805_v5 }
 0xb46   :  { %v3815_v28 = vadd.f32 %v3813_v44, %v8975_v10 }
 0xb47   :  { %v3821_v47 = vpop.permute.xlu1 %3820 }
 0xb48   :  { %v3825_v48 = vadd.f32 %v3821_v47, %v3815_v28 }
 0xb4b   :  { %v3829_v42 = vpop.permute.xlu1 %3828 }
 0xb4c   :  { %v3833_v63 = vadd.f32 %v3829_v42, %v3825_v48 }
 0xb4f   :  { %v3837_v7 = vpop.permute.xlu1 %3836 }
 0xb50   :  { %v3841_v46 = vadd.f32 %v3837_v7, %v3833_v63  ;;  %v4203_v7 = vld [vmem:[%s9115_s19] ss:$0 sm:$0xff]  ;;  %s5438_s19 = smov [#allocation26]  }
 0xb51   :  { %s4111_s3 = sshll.u32 %s5438_s19, 4  ;;  %s4112_s3 = int_to_ptr.vmem [resolvable:$true] %s4111_s3 }
 0xb52   :  { %v3843_v38 = vadd.f32 %v3841_v46, %v9022_v35  ;;  %s5345_s27 = scalar_lea.vmem %s4112_s3, 256  ;;  %p5350_p9 = scmp.lt.s32.totalorder %s4112_s3, %s4112_s3 }
 0xb53   :  { %v3849_v32 = vpop.permute.xlu1 %3848  ;;  %p5346_p8 = scmp.ne.s32.totalorder %s4112_s3, %s5345_s27  ;;  %p5351_p10 = scmp.lt.s32.totalorder %s5345_s27, %s5345_s27 }
 0xb54   :  { %v3853_v13 = vadd.f32 %v3849_v32, %v3843_v38 }
 0xb55   :  { %v3875_v30 = vpop.permute.xlu0 %3874  ;;  %p5352_p11 = por %p5351_p10, %p5350_p9 }
 0xb56   :  { %v3880_v1 = vadd.f32 %v3875_v30, %v3870_v8 }
 0xb57   :  { %v3857_v52 = vpop.permute.xlu1 %3856  ;;  %p5353_p12 = pnand %p5352_p11, %p5346_p8 }
 0xb58   :  { %v3861_v10 = vadd.f32 %v3857_v52, %v3853_v13 }
 0xb59   :  { %v3883_v43 = vpop.permute.xlu0 %3882 }
 0xb5a   :  { %v3888_v37 = vadd.f32 %v3883_v43, %v3880_v1 }
 0xb5b   :  { %v3865_v15 = vpop.permute.xlu1 %3864 }
 0xb5c   :  { %v3869_v23 = vadd.f32 %v3865_v15, %v3861_v10 }
 0xb5d   :  { %v3891_v24 = vpop.permute.xlu0 %3890 }
 0xb5e   :  { %v3871_v41 = vadd.f32 %v3869_v23, %v3787_v36  ;;  %v3896_v22 = vadd.f32 %v3891_v24, %v3888_v37 }
 0xb5f   :  { %v3877_v39 = vpop.permute.xlu1 %3876 }
 0xb60   :  { %v3881_v35 = vadd.f32 %v3877_v39, %v3871_v41  ;;  %v3907_v55 = vadd.f32 %v3905_v6, %v3896_v22  ;;  %v9886_v41 = vld [vmem:[#allocation36_spill] sm:$0xff] }
 0xb61   :  { %v3926_v11 = vpop.permute.xlu0 %3925 }
 0xb62   :  { %v3931_v57 = vmul.f32 %v3926_v11, %v3907_v55 }
 0xb63   :  { %v3885_v49 = vpop.permute.xlu1 %3884 }
 0xb64   :  { %v3889_v16 = vadd.f32 %v3885_v49, %v3881_v35 }
 0xb67   :  { %v3893_v4 = vpop.permute.xlu1 %3892 }
 0xb68   :  { %v3897_v60 = vadd.f32 %v3893_v4, %v3889_v16 }
 0xb6a   :  { %v3908_v20 = vadd.f32 %v3906_v54, %v3897_v60 }
 0xb6b   :  { %v3928_v62 = vpop.permute.xlu1 %3927 }
 0xb6c   :  { %v3932_v61 = vmul.f32 %v3928_v62, %v3908_v20 }
 0xb6e   :  { %v3933_v36 = vpack.c.bf16 %v3932_v61, %v3931_v57 }
 0xb70   :  { %4329 = vmatmul.mubr.msk.bf16.vlgmr.msra.gmra.mrb[24].mxu1 %vm436_vm1, %v3933_v36 }
 0xb71   :  { %4336 = vmatprep.mubr.msk.bf16.mxu1 %vm5403_vm2, %v9864_v0  ;;  %4333 = vmatpush3.bf16.msra.mxu1 %v4700_v59 }
 0xb72   :  { %4334 = vmatprep.subr.bf16.mxu1 %v9864_v0 }
 0xb75   :  { %4335 = vmatpush3.bf16.msra.mxu1 %v4701_v12 }
 0xc43   :  { %v3987_v19 = vpop.f32.mrb[24].mxu1 }
 0xc44   :  { %v3996_v45 = vmul.f32 0.044715, %v3987_v19  ;;  %v4330_v3 = vpop.f32.mrb[25].mxu1  ;;  %v3994_v58 = vmul.f32 0.5, %v3987_v19 }
 0xc45   :  { %v3990_v26 = vpop.f32.mrb[26].mxu1 }
 0xc46   :  { %v3998_v34 = vmul.f32 %v3996_v45, %v3987_v19  ;;  %v3997_v25 = vmul.f32 0.044715, %v3990_v26  ;;  %v4331_v9 = vpop.f32.mrb[27].mxu1  ;;  %v3995_v51 = vmul.f32 0.5, %v3990_v26 }
 0xc48   :  { %v4000_v18 = vmul.f32 %v3998_v34, %v3987_v19  ;;  %v3999_v21 = vmul.f32 %v3997_v25, %v3990_v26 }
 0xc4a   :  { %v4002_v5 = vadd.f32 %v4000_v18, %v3987_v19  ;;  %v4001_v2 = vmul.f32 %v3999_v21, %v3990_v26 }
 0xc4c   :  { %v4004_v44 = vmul.f32 0.7978846, %v4002_v5  ;;  %v4003_v50 = vadd.f32 %v4001_v2, %v3990_v26 }
 0xc4e   :  { %5002 = vtanh.f32 %v4004_v44  ;;  %v4005_v53 = vmul.f32 0.7978846, %v4003_v50 }
 0xc50   :  { %5004 = vtanh.f32 %v4005_v53 }
 0xc58   :  { %v5003_v47 = vpop.eup %5002 }
 0xc59   :  { %v4008_v28 = vadd.f32 1.0, %v5003_v47 }
 0xc5a   :  { %v5005_v0 = vpop.eup %5004 }
 0xc5b   :  { %v4009_v42 = vadd.f32 1.0, %v5005_v0  ;;  %v4010_v48 = vmul.f32 %v4008_v28, %v3994_v58 }
 0xc5d   :  { %v4011_v63 = vmul.f32 %v4009_v42, %v3995_v51 }
 0xc5f   :  { %v4012_v33 = vpack.c.bf16 %v4011_v63, %v4010_v48 }
 0xc61   :  { %4337 = vmatmul.mubr.msk.bf16.vlgmr.msra.gmra.mrb[28].mxu1 %vm436_vm1, %v4012_v33 }
 0xd34   :  { %v4073_v46 = vpop.f32.mrb[28].mxu1 }
 0xd35   :  { %v4074_v56 = vadd.f32 %v4203_v7, %v4073_v46  ;;  %v4338_v31 = vpop.f32.mrb[29].mxu1 }
 0xd36   :  { %v4076_v32 = vpop.f32.mrb[30].mxu1 }
 0xd37   :  { %v4207_v38 = vmul.f32 -1.442695, %v4074_v56  ;;  %v4077_v30 = vadd.f32 %v4203_v7, %v4076_v32  ;;  %v4339_v14 = vpop.f32.mrb[31].mxu1 }
 0xd39   :  { %5006 = vpow2.f32 %v4207_v38  ;;  %v4208_v52 = vmul.f32 -1.442695, %v4077_v30 }
 0xd3b   :  { %5008 = vpow2.f32 %v4208_v52 }
 0xd43   :  { %v5007_v13 = vpop.eup %5006 }
 0xd44   :  { %v4086_v27 = vadd.f32 1.0, %v5007_v13 }
 0xd45   :  { %v5009_v10 = vpop.eup %5008 }
 0xd46   :  { %5010 = vrcp.f32 %v4086_v27  ;;  %v4087_v43 = vadd.f32 1.0, %v5009_v10 }
 0xd48   :  { %5012 = vrcp.f32 %v4087_v43 }
 0xd50   :  { %v5011_v15 = vpop.eup %5010 }
 0xd51   :  { %4094 = vrot.lane.b32.xlu0 %v5011_v15, %s5430_s13 }
 0xd52   :  { %v5013_v23 = vpop.eup %5012 }
 0xd53   :  { %4096 = vrot.lane.b32.xlu1 %v5013_v23, %s5430_s13 }
 0xdc3   :  { %v4095_v8 = vpop.permute.xlu0 %4094 }
 0xdc4   :  { %v4100_v39 = vmul.f32 %v4095_v8, %v4074_v56 }
 0xdc5   :  { %v4097_v1 = vpop.permute.xlu1 %4096 }
 0xdc6   :  { %v4102_v24 = vadd.f32 %v4100_v39, %v9886_v41  ;;  %v4101_v37 = vmul.f32 %v4097_v1, %v4077_v30 }
 0xdc8   :  { %4104 = vst.msk [vmem:[#allocation26] sm:$0xff] %vm436_vm1, %v4102_v24  ;;  %v4103_v49 = vadd.f32 %v4101_v37, %v9887_v29 }
 0xdca   :  { %4105 = vst.msk [vmem:[#allocation26 + $0x8] sm:$0xff] %vm436_vm1, %v4103_v49 }
 0xdcb   :  { %5356 = shalt.err (!%p5353_p12)
}
 0xdcc   :  { %s5357_s11 = scalar_lea.hbm %s9116_s20, 256 }
 0xdcd   :  { %p5358_p13 = scmp.ne.s32.totalorder %s9116_s20, %s5357_s11  ;;  %p5361_p0 = scmp.lt.u32.totalorder %s5357_s11, %s9116_s20 }
 0xdcf   :  { %p5363_p1 = pnand %p5361_p0, %p5358_p13 }
 0xdd1   :  { %5366 = shalt.err (!%p5363_p1)
}
 0xdd2   :  { %s5439_s18 = smov 128   ;;  %s5440_s16 = smov 8  }
 0xdd3   :  { %4117 = dma.vmem_to_hbm [thread:$0]  %s4112_s3, 256, %s9116_s20, [#allocation4], %s5439_s18, %s5439_s18, %s5440_s16  }
 0xdd4   :  { %5383 = dma.done.wait [#allocation4], 256  }
 0xdd5   :  { %5384 = vsyncadd [#allocation4], 4294967040 }
 0xdd6   :  { %4121 = vsyncpa [#allocation3], 1 }
 0xdd7   :  { %4122 = vsyncpa [#allocation6], 1 }
 0xdd8   :  { %4123 = vsyncpa [#allocation9], 1 }
 0xdd9   :  { %4124 = vsyncpa [#allocation12], 1 }
 0xdda   :  { %4125 = vsyncpa [#allocation15], 1 }
 0xddb   :  { %4126 = vsyncpa [#allocation18], 1 }
 0xddc   :  { %4127 = vsyncpa [#allocation21], 1 }
 0xddd   :  { %4128 = vsyncpa [#allocation24], 1 }
 0xdde   :  { %4129 = vsyncpa [#allocation4], 1 }

</bundles_post_ra>
